<compile_context>
chip_gen: v6e
topology: v6e:2x2x1
jax: 0.10.0
libtpu: 0.0.40
codegen_flags: <defaults>
</compile_context>

<pallas_src>
import functools
import math

import jax
import jax.numpy as jnp
from jax.experimental import pallas as pl
from jax.experimental.pallas import tpu as pltpu

_EPS_SINKHORN = 0.1
_N_SINKHORN_ITERS = 50
_W1, _W2, _W3 = 0.4, 0.4, 0.2  # TimeAwareCost(0.4, 0.4, 0.2)


def _flatten_seq_to_lanes(a, S):
    """(B, S, D) -> (B, S*D) using S static slices + lane concat (layout-safe)."""
    return jnp.concatenate([a[:, s, :] for s in range(S)], axis=1)


# ----------------------------- fused per-modality kernel -----------------------------

def _fused_kernel(params_ref, pred_ref, targ_ref, x_ref, z_ref, out_ref, *,
                  epsilon, n_iters):
    f32 = jnp.float32
    B, S, Din = x_ref.shape
    Dl = z_ref.shape[-1]

    beta = params_ref[0]
    gamma = params_ref[1]
    weight = params_ref[2]

    # ------------- MSE (pred: nan_to_num + clamp; target: nan_to_num only, as reference) -------------
    p = jnp.nan_to_num(pred_ref[...].astype(f32), nan=0.0, posinf=1.0, neginf=-1.0)
    p = jnp.clip(p, -100.0, 100.0)
    t = jnp.nan_to_num(targ_ref[...].astype(f32), nan=0.0, posinf=1.0, neginf=-1.0)
    d = p - t
    mse = jnp.mean(d * d)

    # ------------- F.normalize(X, dim=-1) / F.normalize(Z, dim=-1) -------------
    # Cast to f32 immediately (f32 compute even if storage ever becomes bf16).
    x_raw = x_ref[...].astype(f32)                                          # (B, S, Din)
    z_raw = z_ref[...].astype(f32)                                          # (B, S, Dl)
    x = x_raw * jax.lax.rsqrt(
        jnp.maximum(jnp.sum(x_raw * x_raw, axis=-1, keepdims=True), 1e-24))
    z = z_raw * jax.lax.rsqrt(
        jnp.maximum(jnp.sum(z_raw * z_raw, axis=-1, keepdims=True), 1e-24))

    # ------------- sparsity regularizer -------------
    # TODO(synk): dynamic_sparsity_regularizer is undefined in the reference code;
    # use the mean L1 magnitude of the normalized latent as a deterministic stand-in.
    sparse_raw = jnp.mean(jnp.abs(z))

    # ------------- pairwise soft-DTW distances: one MXU Gram, no O(B^2 S^2 D) broadcast -------------
    # soft_dtw re-normalizes its inputs (matches the reference double normalization).
    xn = x * pl.reciprocal(
        jnp.sqrt(jnp.sum(x * x, axis=-1, keepdims=True)) + 1e-8, approx=True)
    # S-major flattening: row (s*B + i) holds xn[i, s, :].
    xflat = jnp.concatenate([xn[:, s, :] for s in range(S)], axis=0)        # (S*B, Din)
    gram = jnp.dot(xflat, xflat.T, preferred_element_type=f32)              # MXU (S*B, S*B)
    nsq = jnp.sum(xflat * xflat, axis=-1, keepdims=True)                    # (S*B, 1)
    d2 = jnp.maximum(nsq + nsq.T - 2.0 * gram, 0.0)
    dall = jnp.sqrt(d2)                                                     # D[(s,i),(t,j)]

    # Dense (B,B) blocks for the DP (static slices of the single Gram result).
    # TODO(synk): for large S replace the S^2 block slices with one (S,S,B,B)
    # transpose/einshape + anti-diagonal DP.
    blk = [[dall[si * B:(si + 1) * B, ti * B:(ti + 1) * B]
            for ti in range(S)] for si in range(S)]
    dmax = blk[0][0]
    for si in range(S):
        for ti in range(S):
            if si or ti:
                dmax = jnp.maximum(dmax, blk[si][ti])                       # per-pair max (B,B)
    inv_dmax = pl.reciprocal(dmax + 1e-8, approx=True)

    # DTW dynamic program over (si, ti); every cell is a dense (B,B) tile.
    R = [[None] * S for _ in range(S)]
    for si in range(S):
        for ti in range(S):
            c = blk[si][ti] * inv_dmax
            if si == 0 and ti == 0:
                R[si][ti] = c
            elif si == 0:
                R[si][ti] = c + R[si][ti - 1]
            elif ti == 0:
                R[si][ti] = c + R[si - 1][ti]
            else:
                R[si][ti] = c + jnp.minimum(
                    jnp.minimum(R[si - 1][ti], R[si][ti - 1]), R[si - 1][ti - 1])
    d_time = jnp.abs(R[S - 1][S - 1])                                       # (B, B)

    # ------------- d_latent via Gram: ||z_i - z_j||_F / S -------------
    zf = _flatten_seq_to_lanes(z, S)                                        # (B, S*Dl)
    gz = jnp.dot(zf, zf.T, preferred_element_type=f32)
    nz = jnp.sum(zf * zf, axis=-1, keepdims=True)
    dz2 = jnp.maximum(nz + nz.T - 2.0 * gz, 0.0)                            # (B, B)
    d_lat = jnp.sqrt(dz2) * (1.0 / S)

    # ------------- ACF (lags 1..5), batched over B -------------
    zc = z - jnp.mean(z, axis=1, keepdims=True)                             # (B, S, Dl)
    # TODO(synk): the reference ACF normalization has no epsilon; a constant latent
    # feature yields inf/NaN exactly like the PyTorch code.
    # TODO(synk): swap the 5 small unaligned sublane slices for pltpu.roll(zc, S-lag,
    # axis=1) + mask once sublane-rotate lowering is verified for this layout.
    acf_rows = [jnp.sum(zc[:, :S - lag, :] * zc[:, lag:, :], axis=1, keepdims=True)
                for lag in range(1, 6)]                                     # 5 x (B, 1, Dl)
    acf = jnp.concatenate(acf_rows, axis=1)                                 # (B, 5, Dl)
    acf = acf * pl.reciprocal(jnp.max(jnp.abs(acf), axis=1, keepdims=True), approx=True)
    da = acf[:, None, :, :] - acf[None, :, :, :]                            # (B, B, 5, Dl)
    d_acf = jnp.sum(jnp.sum(jnp.abs(da), axis=-1), axis=-1)                 # (B, B)

    # ------------- is_same_sample guard (zero diagonal + identical pairs) -------------
    xf = _flatten_seq_to_lanes(x, S)                                        # (B, S*Din)
    gx = jnp.dot(xf, xf.T, preferred_element_type=f32)
    nx = jnp.sum(xf * xf, axis=-1, keepdims=True)
    dx2 = jnp.maximum(nx + nx.T - 2.0 * gx, 0.0)                            # (B, B)
    row = jax.lax.broadcasted_iota(jnp.int32, (B, B), 0)
    col = jax.lax.broadcasted_iota(jnp.int32, (B, B), 1)
    same = jnp.logical_or(row == col,
                          jnp.logical_and(dx2 <= 1e-12, dz2 <= 1e-12))

    C = jnp.where(same, 0.0, _W1 * d_time + _W2 * d_lat + _W3 * d_acf)      # (B, B)

    # ------------- Sinkhorn, log domain (same nonstandard scaling as the reference) -------------
    inv_eps = 1.0 / epsilon
    logK = C * (-inv_eps)
    log_inv_b = math.log(1.0 / B)

    def body(_, carry):
        u, v = carry                                                        # (B,1), (1,B)
        a = logK + v
        am = jnp.max(a, axis=1, keepdims=True)
        lse_r = am + jnp.log(jnp.sum(jnp.exp(a - am), axis=1, keepdims=True))
        u = epsilon * (log_inv_b - lse_r)
        b2 = logK + u
        bm = jnp.max(b2, axis=0, keepdims=True)
        lse_c = bm + jnp.log(jnp.sum(jnp.exp(b2 - bm), axis=0, keepdims=True))
        v = epsilon * (log_inv_b - lse_c)
        return (u, v)

    u0 = jnp.zeros((B, 1), f32)
    v0 = jnp.zeros((1, B), f32)
    u, v = jax.lax.fori_loop(0, n_iters, body, (u0, v0), unroll=True)
    P = jnp.exp((u + v - C) * inv_eps)
    w_raw = jnp.sum(P * C)

    # ------------- combine (clamp / tanh / modality weight from SMEM) -------------
    w_loss = jnp.clip(w_raw, 0.0, 100.0)
    sparse_loss = jnp.clip(sparse_raw, 0.0, 100.0)
    modality_loss = mse + beta * jnp.tanh(w_loss) + gamma * jnp.tanh(sparse_loss)
    weighted = weight * modality_loss

    # Single lane-dense output vector: [mse, wasserstein, sparsity, weighted, 0, ...].
    lane = jax.lax.broadcasted_iota(jnp.int32, (1, 128), 1)
    out = jnp.where(lane == 0, mse, 0.0)
    out = jnp.where(lane == 1, w_loss, out)
    out = jnp.where(lane == 2, sparse_loss, out)
    out = jnp.where(lane == 3, weighted, out)
    out_ref[...] = out.astype(f32)


def _fused_modality_call(params, pred, target, x, z, *,
                         epsilon=_EPS_SINKHORN, n_iters=_N_SINKHORN_ITERS):
    B, S, Din = x.shape
    Dl = z.shape[-1]
    n_rows, n_cols = pred.shape
    kernel = functools.partial(_fused_kernel, epsilon=float(epsilon),
                               n_iters=int(n_iters))
    return pl.pallas_call(
        kernel,
        out_shape=jax.ShapeDtypeStruct((1, 128), jnp.float32),
        grid=(1,),
        in_specs=[
            # [beta, gamma, weight, pad] as runtime SMEM scalars -> one compiled
            # kernel shared by all modalities with the same tensor shapes.
            pl.BlockSpec(memory_space=pltpu.MemorySpace.SMEM),
            pl.BlockSpec((n_rows, n_cols), lambda i: (0, 0)),
            pl.BlockSpec((n_rows, n_cols), lambda i: (0, 0)),
            pl.BlockSpec((B, S, Din), lambda i: (0, 0, 0)),
            pl.BlockSpec((B, S, Dl), lambda i: (0, 0, 0)),
        ],
        out_specs=pl.BlockSpec((1, 128), lambda i: (0, 0)),
        compiler_params=pltpu.CompilerParams(
            dimension_semantics=("arbitrary",),
            vmem_limit_bytes=32 * 1024 * 1024),
    )(params, pred, target, x, z)


@jax.jit
def _modality_forward(params, pred, target, x, z):
    out = _fused_modality_call(params, pred, target, x, z)
    mse = out[0, 0]
    w_loss = out[0, 1]
    sparse_loss = out[0, 2]
    weighted = out[0, 3]
    ok = jnp.logical_not(jnp.logical_or(jnp.isnan(weighted), jnp.isinf(weighted)))
    contrib = jnp.where(ok, weighted, jnp.float32(0.0))
    return mse, w_loss, sparse_loss, weighted, contrib


# ----------------------------- full loss (glue in plain JAX) -----------------------------

def wasserstein_ib_loss(scores, y_true, X, Z, mask=None, beta=0.1, gamma=0.01,
                        modality_weights=None):
    if not isinstance(scores, dict) or len(scores) == 0:
        comps = {k: 0.0 for k in
                 ['visual_mse', 'visual_wasserstein', 'visual_sparsity', 'visual_total']}
        return jnp.float32(0.0), comps

    if modality_weights is None:
        # TODO(synk): self.modality_weights is never initialized in the reference
        # module; deterministically default every modality weight to 1.0.
        modality_weights = {m: 1.0 for m in scores}

    total = jnp.float32(0.0)
    comps = {}
    for modality in scores:
        pred = scores[modality][mask] if mask is not None else scores[modality]
        target = y_true[mask] if mask is not None else y_true
        pred = jnp.asarray(pred)
        target = jnp.asarray(target)
        if pred.ndim == 1:
            pred = pred[None, :]
            target = target[None, :]

        params = jnp.array([float(beta), float(gamma),
                            float(modality_weights[modality]), 0.0], jnp.float32)

        mse, w_loss, sparse_loss, weighted, contrib = _modality_forward(
            params, pred, target, X[modality], Z[modality])

        total = total + contrib
        # Keep components as device scalars (no per-item host syncs in the hot path).
        comps[f'{modality}_mse'] = mse
        comps[f'{modality}_wasserstein'] = w_loss
        comps[f'{modality}_sparsity'] = sparse_loss
        comps[f'{modality}_total'] = weighted
    return total, comps


# ----------------------------- demo -----------------------------

if __name__ == "__main__":
    key = jax.random.PRNGKey(0)
    kx, kz, ks, ky = jax.random.split(key, 4)

    B, S, Din, Dl, T = 4, 8, 16, 8, 8
    X = {"visual": jax.random.normal(kx, (B, S, Din), jnp.float32)}
    Z = {"visual": jax.random.normal(kz, (B, S, Dl), jnp.float32)}
    scores = {"visual": jax.random.normal(ks, (B, T), jnp.float32)}
    y_true = jax.random.normal(ky, (B, T), jnp.float32)

    total, comps = wasserstein_ib_loss(scores, y_true, X, Z, mask=None)
    total = jax.block_until_ready(total)
    _ = jax.device_get(comps)  # single host sync for all logging values
    print("KERNEL_OK")
</pallas_src>

<mosaic_0001>
module attributes {stable_mosaic.version = 11 : i64} {
  func.func @_fused_kernel(%arg0: i32, %arg1: memref<4xf32, #tpu.memory_space<smem>>, %arg2: memref<4x8xf32, #tpu.memory_space<vmem>>, %arg3: memref<4x8xf32, #tpu.memory_space<vmem>>, %arg4: memref<4x8x16xf32, #tpu.memory_space<vmem>>, %arg5: memref<4x8x8xf32, #tpu.memory_space<vmem>>, %arg6: memref<1x128xf32, #tpu.memory_space<vmem>>) attributes {dimension_semantics = [#tpu.dimension_semantics<arbitrary>], iteration_bounds = array<i64: 1>, scalar_prefetch = 0 : i64, scratch_operands = 0 : i64, tpu.core_type = #tpu.core_type<tc>, window_params = [{transform_indices = @transform_0, window_bounds = array<i64: 4>}, {pipeline_mode = #tpu.pipeline_mode<synchronous>, transform_indices = @transform_1, window_bounds = array<i64: 4, 8>}, {pipeline_mode = #tpu.pipeline_mode<synchronous>, transform_indices = @transform_2, window_bounds = array<i64: 4, 8>}, {pipeline_mode = #tpu.pipeline_mode<synchronous>, transform_indices = @transform_3, window_bounds = array<i64: 4, 8, 16>}, {pipeline_mode = #tpu.pipeline_mode<synchronous>, transform_indices = @transform_4, window_bounds = array<i64: 4, 8, 8>}, {pipeline_mode = #tpu.pipeline_mode<synchronous>, transform_indices = @transform_5, window_bounds = array<i64: 1, 128>}]} {
    %c0 = arith.constant 0 : index
    %0 = memref.load %arg1[%c0] : memref<4xf32, #tpu.memory_space<smem>>
    %c1 = arith.constant 1 : index
    %1 = memref.load %arg1[%c1] : memref<4xf32, #tpu.memory_space<smem>>
    %c2 = arith.constant 2 : index
    %2 = memref.load %arg1[%c2] : memref<4xf32, #tpu.memory_space<smem>>
    %c0_0 = arith.constant 0 : index
    %c0_1 = arith.constant 0 : index
    %3 = vector.load %arg2[%c0_0, %c0_1] : memref<4x8xf32, #tpu.memory_space<vmem>>, vector<4x8xf32>
    %cst = arith.constant 0.000000e+00 : f32
    %cst_2 = arith.constant -1.000000e+00 : f32
    %cst_3 = arith.constant 1.000000e+00 : f32
    %4 = arith.cmpf one, %3, %3 : vector<4x8xf32>
    %5 = vector.broadcast %cst : f32 to vector<4x8xf32>
    %6 = arith.select %4, %5, %3 : vector<4x8xi1>, vector<4x8xf32>
    %cst_4 = arith.constant 0x7F800000 : f32
    %7 = vector.broadcast %cst_4 : f32 to vector<4x8xf32>
    %8 = arith.cmpf oeq, %6, %7 : vector<4x8xf32>
    %9 = vector.broadcast %cst_3 : f32 to vector<4x8xf32>
    %10 = arith.select %8, %9, %6 : vector<4x8xi1>, vector<4x8xf32>
    %cst_5 = arith.constant 0xFF800000 : f32
    %11 = vector.broadcast %cst_5 : f32 to vector<4x8xf32>
    %12 = arith.cmpf oeq, %10, %11 : vector<4x8xf32>
    %13 = vector.broadcast %cst_2 : f32 to vector<4x8xf32>
    %14 = arith.select %12, %13, %10 : vector<4x8xi1>, vector<4x8xf32>
    %cst_6 = arith.constant -1.000000e+02 : f32
    %cst_7 = arith.constant 1.000000e+02 : f32
    %15 = vector.broadcast %cst_6 : f32 to vector<4x8xf32>
    %16 = arith.maximumf %15, %14 : vector<4x8xf32>
    %17 = vector.broadcast %cst_7 : f32 to vector<4x8xf32>
    %18 = arith.minimumf %17, %16 : vector<4x8xf32>
    %c0_8 = arith.constant 0 : index
    %c0_9 = arith.constant 0 : index
    %19 = vector.load %arg3[%c0_8, %c0_9] : memref<4x8xf32, #tpu.memory_space<vmem>>, vector<4x8xf32>
    %cst_10 = arith.constant 0.000000e+00 : f32
    %cst_11 = arith.constant -1.000000e+00 : f32
    %cst_12 = arith.constant 1.000000e+00 : f32
    %20 = arith.cmpf one, %19, %19 : vector<4x8xf32>
    %21 = vector.broadcast %cst_10 : f32 to vector<4x8xf32>
    %22 = arith.select %20, %21, %19 : vector<4x8xi1>, vector<4x8xf32>
    %cst_13 = arith.constant 0x7F800000 : f32
    %23 = vector.broadcast %cst_13 : f32 to vector<4x8xf32>
    %24 = arith.cmpf oeq, %22, %23 : vector<4x8xf32>
    %25 = vector.broadcast %cst_12 : f32 to vector<4x8xf32>
    %26 = arith.select %24, %25, %22 : vector<4x8xi1>, vector<4x8xf32>
    %cst_14 = arith.constant 0xFF800000 : f32
    %27 = vector.broadcast %cst_14 : f32 to vector<4x8xf32>
    %28 = arith.cmpf oeq, %26, %27 : vector<4x8xf32>
    %29 = vector.broadcast %cst_11 : f32 to vector<4x8xf32>
    %30 = arith.select %28, %29, %26 : vector<4x8xi1>, vector<4x8xf32>
    %31 = arith.subf %18, %30 : vector<4x8xf32>
    %32 = arith.mulf %31, %31 : vector<4x8xf32>
    %33 = vector.shape_cast %32 : vector<4x8xf32> to vector<1x4x8xf32>
    %cst_15 = arith.constant dense<0.000000e+00> : vector<1xf32>
    %34 = vector.multi_reduction <add>, %33, %cst_15 [1, 2] : vector<1x4x8xf32> to vector<1xf32>
    %35 = vector.shape_cast %34 : vector<1xf32> to vector<1x1x1xf32>
    %36 = vector.extract %35[0, 0, 0] : f32 from vector<1x1x1xf32>
    %cst_16 = arith.constant 3.200000e+01 : f32
    %37 = arith.divf %36, %cst_16 : f32
    %c0_17 = arith.constant 0 : index
    %c0_18 = arith.constant 0 : index
    %c0_19 = arith.constant 0 : index
    %38 = vector.load %arg4[%c0_17, %c0_18, %c0_19] : memref<4x8x16xf32, #tpu.memory_space<vmem>>, vector<4x8x16xf32>
    %c0_20 = arith.constant 0 : index
    %c0_21 = arith.constant 0 : index
    %c0_22 = arith.constant 0 : index
    %39 = vector.load %arg5[%c0_20, %c0_21, %c0_22] : memref<4x8x8xf32, #tpu.memory_space<vmem>>, vector<4x8x8xf32>
    %40 = arith.mulf %38, %38 : vector<4x8x16xf32>
    %cst_23 = arith.constant dense<0.000000e+00> : vector<4x8xf32>
    %41 = vector.multi_reduction <add>, %40, %cst_23 [2] : vector<4x8x16xf32> to vector<4x8xf32>
    %42 = vector.shape_cast %41 : vector<4x8xf32> to vector<4x8x1xf32>
    %cst_24 = arith.constant 1.000000e-24 : f32
    %43 = vector.broadcast %cst_24 : f32 to vector<4x8x1xf32>
    %44 = arith.maximumf %42, %43 : vector<4x8x1xf32>
    %45 = math.rsqrt %44 : vector<4x8x1xf32>
    %46 = vector.broadcast %45 : vector<4x8x1xf32> to vector<4x8x16xf32>
    %47 = arith.mulf %38, %46 : vector<4x8x16xf32>
    %48 = arith.mulf %39, %39 : vector<4x8x8xf32>
    %cst_25 = arith.constant dense<0.000000e+00> : vector<4x8xf32>
    %49 = vector.multi_reduction <add>, %48, %cst_25 [2] : vector<4x8x8xf32> to vector<4x8xf32>
    %50 = vector.shape_cast %49 : vector<4x8xf32> to vector<4x8x1xf32>
    %cst_26 = arith.constant 1.000000e-24 : f32
    %51 = vector.broadcast %cst_26 : f32 to vector<4x8x1xf32>
    %52 = arith.maximumf %50, %51 : vector<4x8x1xf32>
    %53 = math.rsqrt %52 : vector<4x8x1xf32>
    %54 = vector.broadcast %53 : vector<4x8x1xf32> to vector<4x8x8xf32>
    %55 = arith.mulf %39, %54 : vector<4x8x8xf32>
    %56 = math.absf %55 : vector<4x8x8xf32>
    %57 = vector.shape_cast %56 : vector<4x8x8xf32> to vector<1x4x8x8xf32>
    %cst_27 = arith.constant dense<0.000000e+00> : vector<1xf32>
    %58 = vector.multi_reduction <add>, %57, %cst_27 [1, 2, 3] : vector<1x4x8x8xf32> to vector<1xf32>
    %59 = vector.shape_cast %58 : vector<1xf32> to vector<1x1x1x1xf32>
    %60 = vector.extract %59[0, 0, 0, 0] : f32 from vector<1x1x1x1xf32>
    %cst_28 = arith.constant 2.560000e+02 : f32
    %61 = arith.divf %60, %cst_28 : f32
    %62 = arith.mulf %47, %47 : vector<4x8x16xf32>
    %cst_29 = arith.constant dense<0.000000e+00> : vector<4x8xf32>
    %63 = vector.multi_reduction <add>, %62, %cst_29 [2] : vector<4x8x16xf32> to vector<4x8xf32>
    %64 = vector.shape_cast %63 : vector<4x8xf32> to vector<4x8x1xf32>
    %65 = math.sqrt %64 : vector<4x8x1xf32>
    %cst_30 = arith.constant 9.99999993E-9 : f32
    %66 = vector.broadcast %cst_30 : f32 to vector<4x8x1xf32>
    %67 = arith.addf %65, %66 : vector<4x8x1xf32>
    %68 = tpu.reciprocal %67 {approx = true} : vector<4x8x1xf32> -> vector<4x8x1xf32>
    %69 = vector.broadcast %68 : vector<4x8x1xf32> to vector<4x8x16xf32>
    %70 = arith.mulf %47, %69 : vector<4x8x16xf32>
    %71 = vector.extract_strided_slice %70 {offsets = [0, 0, 0], sizes = [4, 1, 16], strides = [1, 1, 1]} : vector<4x8x16xf32> to vector<4x1x16xf32>
    %72 = vector.shape_cast %71 : vector<4x1x16xf32> to vector<4x16xf32>
    %73 = vector.extract_strided_slice %70 {offsets = [0, 1, 0], sizes = [4, 1, 16], strides = [1, 1, 1]} : vector<4x8x16xf32> to vector<4x1x16xf32>
    %74 = vector.shape_cast %73 : vector<4x1x16xf32> to vector<4x16xf32>
    %75 = vector.extract_strided_slice %70 {offsets = [0, 2, 0], sizes = [4, 1, 16], strides = [1, 1, 1]} : vector<4x8x16xf32> to vector<4x1x16xf32>
    %76 = vector.shape_cast %75 : vector<4x1x16xf32> to vector<4x16xf32>
    %77 = vector.extract_strided_slice %70 {offsets = [0, 3, 0], sizes = [4, 1, 16], strides = [1, 1, 1]} : vector<4x8x16xf32> to vector<4x1x16xf32>
    %78 = vector.shape_cast %77 : vector<4x1x16xf32> to vector<4x16xf32>
    %79 = vector.extract_strided_slice %70 {offsets = [0, 4, 0], sizes = [4, 1, 16], strides = [1, 1, 1]} : vector<4x8x16xf32> to vector<4x1x16xf32>
    %80 = vector.shape_cast %79 : vector<4x1x16xf32> to vector<4x16xf32>
    %81 = vector.extract_strided_slice %70 {offsets = [0, 5, 0], sizes = [4, 1, 16], strides = [1, 1, 1]} : vector<4x8x16xf32> to vector<4x1x16xf32>
    %82 = vector.shape_cast %81 : vector<4x1x16xf32> to vector<4x16xf32>
    %83 = vector.extract_strided_slice %70 {offsets = [0, 6, 0], sizes = [4, 1, 16], strides = [1, 1, 1]} : vector<4x8x16xf32> to vector<4x1x16xf32>
    %84 = vector.shape_cast %83 : vector<4x1x16xf32> to vector<4x16xf32>
    %85 = vector.extract_strided_slice %70 {offsets = [0, 7, 0], sizes = [4, 1, 16], strides = [1, 1, 1]} : vector<4x8x16xf32> to vector<4x1x16xf32>
    %86 = vector.shape_cast %85 : vector<4x1x16xf32> to vector<4x16xf32>
    %87 = tpu.concatenate %72, %74, %76, %78, %80, %82, %84, %86 in 0 : vector<4x16xf32>, vector<4x16xf32>, vector<4x16xf32>, vector<4x16xf32>, vector<4x16xf32>, vector<4x16xf32>, vector<4x16xf32>, vector<4x16xf32> -> vector<32x16xf32>
    %88 = tpu.transpose %87, [1, 0] : vector<32x16xf32> -> vector<16x32xf32>
    %cst_31 = arith.constant dense<0.000000e+00> : vector<32x32xf32>
    %89 = tpu.matmul %87, %88, %cst_31 {dimension_numbers = #tpu.dot_dimension_numbers<[1], [0], [0], [1], [0, 0, 1, 1], [], []>} : vector<32x16xf32>, vector<16x32xf32>, vector<32x32xf32> -> vector<32x32xf32>
    %90 = arith.mulf %87, %87 : vector<32x16xf32>
    %cst_32 = arith.constant dense<0.000000e+00> : vector<32xf32>
    %91 = vector.multi_reduction <add>, %90, %cst_32 [1] : vector<32x16xf32> to vector<32xf32>
    %92 = vector.shape_cast %91 : vector<32xf32> to vector<32x1xf32>
    %93 = tpu.transpose %92, [1, 0] : vector<32x1xf32> -> vector<1x32xf32>
    %94 = vector.broadcast %92 : vector<32x1xf32> to vector<32x32xf32>
    %95 = vector.broadcast %93 : vector<1x32xf32> to vector<32x32xf32>
    %96 = arith.addf %94, %95 : vector<32x32xf32>
    %cst_33 = arith.constant 2.000000e+00 : f32
    %97 = vector.broadcast %cst_33 : f32 to vector<32x32xf32>
    %98 = arith.mulf %97, %89 : vector<32x32xf32>
    %99 = arith.subf %96, %98 : vector<32x32xf32>
    %cst_34 = arith.constant 0.000000e+00 : f32
    %100 = vector.broadcast %cst_34 : f32 to vector<32x32xf32>
    %101 = arith.maximumf %99, %100 : vector<32x32xf32>
    %102 = math.sqrt %101 : vector<32x32xf32>
    %103 = vector.extract_strided_slice %102 {offsets = [0, 0], sizes = [4, 4], strides = [1, 1]} : vector<32x32xf32> to vector<4x4xf32>
    %104 = vector.extract_strided_slice %102 {offsets = [0, 4], sizes = [4, 4], strides = [1, 1]} : vector<32x32xf32> to vector<4x4xf32>
    %105 = vector.extract_strided_slice %102 {offsets = [0, 8], sizes = [4, 4], strides = [1, 1]} : vector<32x32xf32> to vector<4x4xf32>
    %106 = vector.extract_strided_slice %102 {offsets = [0, 12], sizes = [4, 4], strides = [1, 1]} : vector<32x32xf32> to vector<4x4xf32>
    %107 = vector.extract_strided_slice %102 {offsets = [0, 16], sizes = [4, 4], strides = [1, 1]} : vector<32x32xf32> to vector<4x4xf32>
    %108 = vector.extract_strided_slice %102 {offsets = [0, 20], sizes = [4, 4], strides = [1, 1]} : vector<32x32xf32> to vector<4x4xf32>
    %109 = vector.extract_strided_slice %102 {offsets = [0, 24], sizes = [4, 4], strides = [1, 1]} : vector<32x32xf32> to vector<4x4xf32>
    %110 = vector.extract_strided_slice %102 {offsets = [0, 28], sizes = [4, 4], strides = [1, 1]} : vector<32x32xf32> to vector<4x4xf32>
    %111 = vector.extract_strided_slice %102 {offsets = [4, 0], sizes = [4, 4], strides = [1, 1]} : vector<32x32xf32> to vector<4x4xf32>
    %112 = vector.extract_strided_slice %102 {offsets = [4, 4], sizes = [4, 4], strides = [1, 1]} : vector<32x32xf32> to vector<4x4xf32>
    %113 = vector.extract_strided_slice %102 {offsets = [4, 8], sizes = [4, 4], strides = [1, 1]} : vector<32x32xf32> to vector<4x4xf32>
    %114 = vector.extract_strided_slice %102 {offsets = [4, 12], sizes = [4, 4], strides = [1, 1]} : vector<32x32xf32> to vector<4x4xf32>
    %115 = vector.extract_strided_slice %102 {offsets = [4, 16], sizes = [4, 4], strides = [1, 1]} : vector<32x32xf32> to vector<4x4xf32>
    %116 = vector.extract_strided_slice %102 {offsets = [4, 20], sizes = [4, 4], strides = [1, 1]} : vector<32x32xf32> to vector<4x4xf32>
    %117 = vector.extract_strided_slice %102 {offsets = [4, 24], sizes = [4, 4], strides = [1, 1]} : vector<32x32xf32> to vector<4x4xf32>
    %118 = vector.extract_strided_slice %102 {offsets = [4, 28], sizes = [4, 4], strides = [1, 1]} : vector<32x32xf32> to vector<4x4xf32>
    %119 = vector.extract_strided_slice %102 {offsets = [8, 0], sizes = [4, 4], strides = [1, 1]} : vector<32x32xf32> to vector<4x4xf32>
    %120 = vector.extract_strided_slice %102 {offsets = [8, 4], sizes = [4, 4], strides = [1, 1]} : vector<32x32xf32> to vector<4x4xf32>
    %121 = vector.extract_strided_slice %102 {offsets = [8, 8], sizes = [4, 4], strides = [1, 1]} : vector<32x32xf32> to vector<4x4xf32>
    %122 = vector.extract_strided_slice %102 {offsets = [8, 12], sizes = [4, 4], strides = [1, 1]} : vector<32x32xf32> to vector<4x4xf32>
    %123 = vector.extract_strided_slice %102 {offsets = [8, 16], sizes = [4, 4], strides = [1, 1]} : vector<32x32xf32> to vector<4x4xf32>
    %124 = vector.extract_strided_slice %102 {offsets = [8, 20], sizes = [4, 4], strides = [1, 1]} : vector<32x32xf32> to vector<4x4xf32>
    %125 = vector.extract_strided_slice %102 {offsets = [8, 24], sizes = [4, 4], strides = [1, 1]} : vector<32x32xf32> to vector<4x4xf32>
    %126 = vector.extract_strided_slice %102 {offsets = [8, 28], sizes = [4, 4], strides = [1, 1]} : vector<32x32xf32> to vector<4x4xf32>
    %127 = vector.extract_strided_slice %102 {offsets = [12, 0], sizes = [4, 4], strides = [1, 1]} : vector<32x32xf32> to vector<4x4xf32>
    %128 = vector.extract_strided_slice %102 {offsets = [12, 4], sizes = [4, 4], strides = [1, 1]} : vector<32x32xf32> to vector<4x4xf32>
    %129 = vector.extract_strided_slice %102 {offsets = [12, 8], sizes = [4, 4], strides = [1, 1]} : vector<32x32xf32> to vector<4x4xf32>
    %130 = vector.extract_strided_slice %102 {offsets = [12, 12], sizes = [4, 4], strides = [1, 1]} : vector<32x32xf32> to vector<4x4xf32>
    %131 = vector.extract_strided_slice %102 {offsets = [12, 16], sizes = [4, 4], strides = [1, 1]} : vector<32x32xf32> to vector<4x4xf32>
    %132 = vector.extract_strided_slice %102 {offsets = [12, 20], sizes = [4, 4], strides = [1, 1]} : vector<32x32xf32> to vector<4x4xf32>
    %133 = vector.extract_strided_slice %102 {offsets = [12, 24], sizes = [4, 4], strides = [1, 1]} : vector<32x32xf32> to vector<4x4xf32>
    %134 = vector.extract_strided_slice %102 {offsets = [12, 28], sizes = [4, 4], strides = [1, 1]} : vector<32x32xf32> to vector<4x4xf32>
    %135 = vector.extract_strided_slice %102 {offsets = [16, 0], sizes = [4, 4], strides = [1, 1]} : vector<32x32xf32> to vector<4x4xf32>
    %136 = vector.extract_strided_slice %102 {offsets = [16, 4], sizes = [4, 4], strides = [1, 1]} : vector<32x32xf32> to vector<4x4xf32>
    %137 = vector.extract_strided_slice %102 {offsets = [16, 8], sizes = [4, 4], strides = [1, 1]} : vector<32x32xf32> to vector<4x4xf32>
    %138 = vector.extract_strided_slice %102 {offsets = [16, 12], sizes = [4, 4], strides = [1, 1]} : vector<32x32xf32> to vector<4x4xf32>
    %139 = vector.extract_strided_slice %102 {offsets = [16, 16], sizes = [4, 4], strides = [1, 1]} : vector<32x32xf32> to vector<4x4xf32>
    %140 = vector.extract_strided_slice %102 {offsets = [16, 20], sizes = [4, 4], strides = [1, 1]} : vector<32x32xf32> to vector<4x4xf32>
    %141 = vector.extract_strided_slice %102 {offsets = [16, 24], sizes = [4, 4], strides = [1, 1]} : vector<32x32xf32> to vector<4x4xf32>
    %142 = vector.extract_strided_slice %102 {offsets = [16, 28], sizes = [4, 4], strides = [1, 1]} : vector<32x32xf32> to vector<4x4xf32>
    %143 = vector.extract_strided_slice %102 {offsets = [20, 0], sizes = [4, 4], strides = [1, 1]} : vector<32x32xf32> to vector<4x4xf32>
    %144 = vector.extract_strided_slice %102 {offsets = [20, 4], sizes = [4, 4], strides = [1, 1]} : vector<32x32xf32> to vector<4x4xf32>
    %145 = vector.extract_strided_slice %102 {offsets = [20, 8], sizes = [4, 4], strides = [1, 1]} : vector<32x32xf32> to vector<4x4xf32>
    %146 = vector.extract_strided_slice %102 {offsets = [20, 12], sizes = [4, 4], strides = [1, 1]} : vector<32x32xf32> to vector<4x4xf32>
    %147 = vector.extract_strided_slice %102 {offsets = [20, 16], sizes = [4, 4], strides = [1, 1]} : vector<32x32xf32> to vector<4x4xf32>
    %148 = vector.extract_strided_slice %102 {offsets = [20, 20], sizes = [4, 4], strides = [1, 1]} : vector<32x32xf32> to vector<4x4xf32>
    %149 = vector.extract_strided_slice %102 {offsets = [20, 24], sizes = [4, 4], strides = [1, 1]} : vector<32x32xf32> to vector<4x4xf32>
    %150 = vector.extract_strided_slice %102 {offsets = [20, 28], sizes = [4, 4], strides = [1, 1]} : vector<32x32xf32> to vector<4x4xf32>
    %151 = vector.extract_strided_slice %102 {offsets = [24, 0], sizes = [4, 4], strides = [1, 1]} : vector<32x32xf32> to vector<4x4xf32>
    %152 = vector.extract_strided_slice %102 {offsets = [24, 4], sizes = [4, 4], strides = [1, 1]} : vector<32x32xf32> to vector<4x4xf32>
    %153 = vector.extract_strided_slice %102 {offsets = [24, 8], sizes = [4, 4], strides = [1, 1]} : vector<32x32xf32> to vector<4x4xf32>
    %154 = vector.extract_strided_slice %102 {offsets = [24, 12], sizes = [4, 4], strides = [1, 1]} : vector<32x32xf32> to vector<4x4xf32>
    %155 = vector.extract_strided_slice %102 {offsets = [24, 16], sizes = [4, 4], strides = [1, 1]} : vector<32x32xf32> to vector<4x4xf32>
    %156 = vector.extract_strided_slice %102 {offsets = [24, 20], sizes = [4, 4], strides = [1, 1]} : vector<32x32xf32> to vector<4x4xf32>
    %157 = vector.extract_strided_slice %102 {offsets = [24, 24], sizes = [4, 4], strides = [1, 1]} : vector<32x32xf32> to vector<4x4xf32>
    %158 = vector.extract_strided_slice %102 {offsets = [24, 28], sizes = [4, 4], strides = [1, 1]} : vector<32x32xf32> to vector<4x4xf32>
    %159 = vector.extract_strided_slice %102 {offsets = [28, 0], sizes = [4, 4], strides = [1, 1]} : vector<32x32xf32> to vector<4x4xf32>
    %160 = vector.extract_strided_slice %102 {offsets = [28, 4], sizes = [4, 4], strides = [1, 1]} : vector<32x32xf32> to vector<4x4xf32>
    %161 = vector.extract_strided_slice %102 {offsets = [28, 8], sizes = [4, 4], strides = [1, 1]} : vector<32x32xf32> to vector<4x4xf32>
    %162 = vector.extract_strided_slice %102 {offsets = [28, 12], sizes = [4, 4], strides = [1, 1]} : vector<32x32xf32> to vector<4x4xf32>
    %163 = vector.extract_strided_slice %102 {offsets = [28, 16], sizes = [4, 4], strides = [1, 1]} : vector<32x32xf32> to vector<4x4xf32>
    %164 = vector.extract_strided_slice %102 {offsets = [28, 20], sizes = [4, 4], strides = [1, 1]} : vector<32x32xf32> to vector<4x4xf32>
    %165 = vector.extract_strided_slice %102 {offsets = [28, 24], sizes = [4, 4], strides = [1, 1]} : vector<32x32xf32> to vector<4x4xf32>
    %166 = vector.extract_strided_slice %102 {offsets = [28, 28], sizes = [4, 4], strides = [1, 1]} : vector<32x32xf32> to vector<4x4xf32>
    %167 = arith.maximumf %103, %104 : vector<4x4xf32>
    %168 = arith.maximumf %167, %105 : vector<4x4xf32>
    %169 = arith.maximumf %168, %106 : vector<4x4xf32>
    %170 = arith.maximumf %169, %107 : vector<4x4xf32>
    %171 = arith.maximumf %170, %108 : vector<4x4xf32>
    %172 = arith.maximumf %171, %109 : vector<4x4xf32>
    %173 = arith.maximumf %172, %110 : vector<4x4xf32>
    %174 = arith.maximumf %173, %111 : vector<4x4xf32>
    %175 = arith.maximumf %174, %112 : vector<4x4xf32>
    %176 = arith.maximumf %175, %113 : vector<4x4xf32>
    %177 = arith.maximumf %176, %114 : vector<4x4xf32>
    %178 = arith.maximumf %177, %115 : vector<4x4xf32>
    %179 = arith.maximumf %178, %116 : vector<4x4xf32>
    %180 = arith.maximumf %179, %117 : vector<4x4xf32>
    %181 = arith.maximumf %180, %118 : vector<4x4xf32>
    %182 = arith.maximumf %181, %119 : vector<4x4xf32>
    %183 = arith.maximumf %182, %120 : vector<4x4xf32>
    %184 = arith.maximumf %183, %121 : vector<4x4xf32>
    %185 = arith.maximumf %184, %122 : vector<4x4xf32>
    %186 = arith.maximumf %185, %123 : vector<4x4xf32>
    %187 = arith.maximumf %186, %124 : vector<4x4xf32>
    %188 = arith.maximumf %187, %125 : vector<4x4xf32>
    %189 = arith.maximumf %188, %126 : vector<4x4xf32>
    %190 = arith.maximumf %189, %127 : vector<4x4xf32>
    %191 = arith.maximumf %190, %128 : vector<4x4xf32>
    %192 = arith.maximumf %191, %129 : vector<4x4xf32>
    %193 = arith.maximumf %192, %130 : vector<4x4xf32>
    %194 = arith.maximumf %193, %131 : vector<4x4xf32>
    %195 = arith.maximumf %194, %132 : vector<4x4xf32>
    %196 = arith.maximumf %195, %133 : vector<4x4xf32>
    %197 = arith.maximumf %196, %134 : vector<4x4xf32>
    %198 = arith.maximumf %197, %135 : vector<4x4xf32>
    %199 = arith.maximumf %198, %136 : vector<4x4xf32>
    %200 = arith.maximumf %199, %137 : vector<4x4xf32>
    %201 = arith.maximumf %200, %138 : vector<4x4xf32>
    %202 = arith.maximumf %201, %139 : vector<4x4xf32>
    %203 = arith.maximumf %202, %140 : vector<4x4xf32>
    %204 = arith.maximumf %203, %141 : vector<4x4xf32>
    %205 = arith.maximumf %204, %142 : vector<4x4xf32>
    %206 = arith.maximumf %205, %143 : vector<4x4xf32>
    %207 = arith.maximumf %206, %144 : vector<4x4xf32>
    %208 = arith.maximumf %207, %145 : vector<4x4xf32>
    %209 = arith.maximumf %208, %146 : vector<4x4xf32>
    %210 = arith.maximumf %209, %147 : vector<4x4xf32>
    %211 = arith.maximumf %210, %148 : vector<4x4xf32>
    %212 = arith.maximumf %211, %149 : vector<4x4xf32>
    %213 = arith.maximumf %212, %150 : vector<4x4xf32>
    %214 = arith.maximumf %213, %151 : vector<4x4xf32>
    %215 = arith.maximumf %214, %152 : vector<4x4xf32>
    %216 = arith.maximumf %215, %153 : vector<4x4xf32>
    %217 = arith.maximumf %216, %154 : vector<4x4xf32>
    %218 = arith.maximumf %217, %155 : vector<4x4xf32>
    %219 = arith.maximumf %218, %156 : vector<4x4xf32>
    %220 = arith.maximumf %219, %157 : vector<4x4xf32>
    %221 = arith.maximumf %220, %158 : vector<4x4xf32>
    %222 = arith.maximumf %221, %159 : vector<4x4xf32>
    %223 = arith.maximumf %222, %160 : vector<4x4xf32>
    %224 = arith.maximumf %223, %161 : vector<4x4xf32>
    %225 = arith.maximumf %224, %162 : vector<4x4xf32>
    %226 = arith.maximumf %225, %163 : vector<4x4xf32>
    %227 = arith.maximumf %226, %164 : vector<4x4xf32>
    %228 = arith.maximumf %227, %165 : vector<4x4xf32>
    %229 = arith.maximumf %228, %166 : vector<4x4xf32>
    %cst_35 = arith.constant 9.99999993E-9 : f32
    %230 = vector.broadcast %cst_35 : f32 to vector<4x4xf32>
    %231 = arith.addf %229, %230 : vector<4x4xf32>
    %232 = tpu.reciprocal %231 {approx = true} : vector<4x4xf32> -> vector<4x4xf32>
    %233 = arith.mulf %103, %232 : vector<4x4xf32>
    %234 = arith.mulf %104, %232 : vector<4x4xf32>
    %235 = arith.addf %234, %233 : vector<4x4xf32>
    %236 = arith.mulf %105, %232 : vector<4x4xf32>
    %237 = arith.addf %236, %235 : vector<4x4xf32>
    %238 = arith.mulf %106, %232 : vector<4x4xf32>
    %239 = arith.addf %238, %237 : vector<4x4xf32>
    %240 = arith.mulf %107, %232 : vector<4x4xf32>
    %241 = arith.addf %240, %239 : vector<4x4xf32>
    %242 = arith.mulf %108, %232 : vector<4x4xf32>
    %243 = arith.addf %242, %241 : vector<4x4xf32>
    %244 = arith.mulf %109, %232 : vector<4x4xf32>
    %245 = arith.addf %244, %243 : vector<4x4xf32>
    %246 = arith.mulf %110, %232 : vector<4x4xf32>
    %247 = arith.addf %246, %245 : vector<4x4xf32>
    %248 = arith.mulf %111, %232 : vector<4x4xf32>
    %249 = arith.addf %248, %233 : vector<4x4xf32>
    %250 = arith.mulf %112, %232 : vector<4x4xf32>
    %251 = arith.minimumf %235, %249 : vector<4x4xf32>
    %252 = arith.minimumf %251, %233 : vector<4x4xf32>
    %253 = arith.addf %250, %252 : vector<4x4xf32>
    %254 = arith.mulf %113, %232 : vector<4x4xf32>
    %255 = arith.minimumf %237, %253 : vector<4x4xf32>
    %256 = arith.minimumf %255, %235 : vector<4x4xf32>
    %257 = arith.addf %254, %256 : vector<4x4xf32>
    %258 = arith.mulf %114, %232 : vector<4x4xf32>
    %259 = arith.minimumf %239, %257 : vector<4x4xf32>
    %260 = arith.minimumf %259, %237 : vector<4x4xf32>
    %261 = arith.addf %258, %260 : vector<4x4xf32>
    %262 = arith.mulf %115, %232 : vector<4x4xf32>
    %263 = arith.minimumf %241, %261 : vector<4x4xf32>
    %264 = arith.minimumf %263, %239 : vector<4x4xf32>
    %265 = arith.addf %262, %264 : vector<4x4xf32>
    %266 = arith.mulf %116, %232 : vector<4x4xf32>
    %267 = arith.minimumf %243, %265 : vector<4x4xf32>
    %268 = arith.minimumf %267, %241 : vector<4x4xf32>
    %269 = arith.addf %266, %268 : vector<4x4xf32>
    %270 = arith.mulf %117, %232 : vector<4x4xf32>
    %271 = arith.minimumf %245, %269 : vector<4x4xf32>
    %272 = arith.minimumf %271, %243 : vector<4x4xf32>
    %273 = arith.addf %270, %272 : vector<4x4xf32>
    %274 = arith.mulf %118, %232 : vector<4x4xf32>
    %275 = arith.minimumf %247, %273 : vector<4x4xf32>
    %276 = arith.minimumf %275, %245 : vector<4x4xf32>
    %277 = arith.addf %274, %276 : vector<4x4xf32>
    %278 = arith.mulf %119, %232 : vector<4x4xf32>
    %279 = arith.addf %278, %249 : vector<4x4xf32>
    %280 = arith.mulf %120, %232 : vector<4x4xf32>
    %281 = arith.minimumf %253, %279 : vector<4x4xf32>
    %282 = arith.minimumf %281, %249 : vector<4x4xf32>
    %283 = arith.addf %280, %282 : vector<4x4xf32>
    %284 = arith.mulf %121, %232 : vector<4x4xf32>
    %285 = arith.minimumf %257, %283 : vector<4x4xf32>
    %286 = arith.minimumf %285, %253 : vector<4x4xf32>
    %287 = arith.addf %284, %286 : vector<4x4xf32>
    %288 = arith.mulf %122, %232 : vector<4x4xf32>
    %289 = arith.minimumf %261, %287 : vector<4x4xf32>
    %290 = arith.minimumf %289, %257 : vector<4x4xf32>
    %291 = arith.addf %288, %290 : vector<4x4xf32>
    %292 = arith.mulf %123, %232 : vector<4x4xf32>
    %293 = arith.minimumf %265, %291 : vector<4x4xf32>
    %294 = arith.minimumf %293, %261 : vector<4x4xf32>
    %295 = arith.addf %292, %294 : vector<4x4xf32>
    %296 = arith.mulf %124, %232 : vector<4x4xf32>
    %297 = arith.minimumf %269, %295 : vector<4x4xf32>
    %298 = arith.minimumf %297, %265 : vector<4x4xf32>
    %299 = arith.addf %296, %298 : vector<4x4xf32>
    %300 = arith.mulf %125, %232 : vector<4x4xf32>
    %301 = arith.minimumf %273, %299 : vector<4x4xf32>
    %302 = arith.minimumf %301, %269 : vector<4x4xf32>
    %303 = arith.addf %300, %302 : vector<4x4xf32>
    %304 = arith.mulf %126, %232 : vector<4x4xf32>
    %305 = arith.minimumf %277, %303 : vector<4x4xf32>
    %306 = arith.minimumf %305, %273 : vector<4x4xf32>
    %307 = arith.addf %304, %306 : vector<4x4xf32>
    %308 = arith.mulf %127, %232 : vector<4x4xf32>
    %309 = arith.addf %308, %279 : vector<4x4xf32>
    %310 = arith.mulf %128, %232 : vector<4x4xf32>
    %311 = arith.minimumf %283, %309 : vector<4x4xf32>
    %312 = arith.minimumf %311, %279 : vector<4x4xf32>
    %313 = arith.addf %310, %312 : vector<4x4xf32>
    %314 = arith.mulf %129, %232 : vector<4x4xf32>
    %315 = arith.minimumf %287, %313 : vector<4x4xf32>
    %316 = arith.minimumf %315, %283 : vector<4x4xf32>
    %317 = arith.addf %314, %316 : vector<4x4xf32>
    %318 = arith.mulf %130, %232 : vector<4x4xf32>
    %319 = arith.minimumf %291, %317 : vector<4x4xf32>
    %320 = arith.minimumf %319, %287 : vector<4x4xf32>
    %321 = arith.addf %318, %320 : vector<4x4xf32>
    %322 = arith.mulf %131, %232 : vector<4x4xf32>
    %323 = arith.minimumf %295, %321 : vector<4x4xf32>
    %324 = arith.minimumf %323, %291 : vector<4x4xf32>
    %325 = arith.addf %322, %324 : vector<4x4xf32>
    %326 = arith.mulf %132, %232 : vector<4x4xf32>
    %327 = arith.minimumf %299, %325 : vector<4x4xf32>
    %328 = arith.minimumf %327, %295 : vector<4x4xf32>
    %329 = arith.addf %326, %328 : vector<4x4xf32>
    %330 = arith.mulf %133, %232 : vector<4x4xf32>
    %331 = arith.minimumf %303, %329 : vector<4x4xf32>
    %332 = arith.minimumf %331, %299 : vector<4x4xf32>
    %333 = arith.addf %330, %332 : vector<4x4xf32>
    %334 = arith.mulf %134, %232 : vector<4x4xf32>
    %335 = arith.minimumf %307, %333 : vector<4x4xf32>
    %336 = arith.minimumf %335, %303 : vector<4x4xf32>
    %337 = arith.addf %334, %336 : vector<4x4xf32>
    %338 = arith.mulf %135, %232 : vector<4x4xf32>
    %339 = arith.addf %338, %309 : vector<4x4xf32>
    %340 = arith.mulf %136, %232 : vector<4x4xf32>
    %341 = arith.minimumf %313, %339 : vector<4x4xf32>
    %342 = arith.minimumf %341, %309 : vector<4x4xf32>
    %343 = arith.addf %340, %342 : vector<4x4xf32>
    %344 = arith.mulf %137, %232 : vector<4x4xf32>
    %345 = arith.minimumf %317, %343 : vector<4x4xf32>
    %346 = arith.minimumf %345, %313 : vector<4x4xf32>
    %347 = arith.addf %344, %346 : vector<4x4xf32>
    %348 = arith.mulf %138, %232 : vector<4x4xf32>
    %349 = arith.minimumf %321, %347 : vector<4x4xf32>
    %350 = arith.minimumf %349, %317 : vector<4x4xf32>
    %351 = arith.addf %348, %350 : vector<4x4xf32>
    %352 = arith.mulf %139, %232 : vector<4x4xf32>
    %353 = arith.minimumf %325, %351 : vector<4x4xf32>
    %354 = arith.minimumf %353, %321 : vector<4x4xf32>
    %355 = arith.addf %352, %354 : vector<4x4xf32>
    %356 = arith.mulf %140, %232 : vector<4x4xf32>
    %357 = arith.minimumf %329, %355 : vector<4x4xf32>
    %358 = arith.minimumf %357, %325 : vector<4x4xf32>
    %359 = arith.addf %356, %358 : vector<4x4xf32>
    %360 = arith.mulf %141, %232 : vector<4x4xf32>
    %361 = arith.minimumf %333, %359 : vector<4x4xf32>
    %362 = arith.minimumf %361, %329 : vector<4x4xf32>
    %363 = arith.addf %360, %362 : vector<4x4xf32>
    %364 = arith.mulf %142, %232 : vector<4x4xf32>
    %365 = arith.minimumf %337, %363 : vector<4x4xf32>
    %366 = arith.minimumf %365, %333 : vector<4x4xf32>
    %367 = arith.addf %364, %366 : vector<4x4xf32>
    %368 = arith.mulf %143, %232 : vector<4x4xf32>
    %369 = arith.addf %368, %339 : vector<4x4xf32>
    %370 = arith.mulf %144, %232 : vector<4x4xf32>
    %371 = arith.minimumf %343, %369 : vector<4x4xf32>
    %372 = arith.minimumf %371, %339 : vector<4x4xf32>
    %373 = arith.addf %370, %372 : vector<4x4xf32>
    %374 = arith.mulf %145, %232 : vector<4x4xf32>
    %375 = arith.minimumf %347, %373 : vector<4x4xf32>
    %376 = arith.minimumf %375, %343 : vector<4x4xf32>
    %377 = arith.addf %374, %376 : vector<4x4xf32>
    %378 = arith.mulf %146, %232 : vector<4x4xf32>
    %379 = arith.minimumf %351, %377 : vector<4x4xf32>
    %380 = arith.minimumf %379, %347 : vector<4x4xf32>
    %381 = arith.addf %378, %380 : vector<4x4xf32>
    %382 = arith.mulf %147, %232 : vector<4x4xf32>
    %383 = arith.minimumf %355, %381 : vector<4x4xf32>
    %384 = arith.minimumf %383, %351 : vector<4x4xf32>
    %385 = arith.addf %382, %384 : vector<4x4xf32>
    %386 = arith.mulf %148, %232 : vector<4x4xf32>
    %387 = arith.minimumf %359, %385 : vector<4x4xf32>
    %388 = arith.minimumf %387, %355 : vector<4x4xf32>
    %389 = arith.addf %386, %388 : vector<4x4xf32>
    %390 = arith.mulf %149, %232 : vector<4x4xf32>
    %391 = arith.minimumf %363, %389 : vector<4x4xf32>
    %392 = arith.minimumf %391, %359 : vector<4x4xf32>
    %393 = arith.addf %390, %392 : vector<4x4xf32>
    %394 = arith.mulf %150, %232 : vector<4x4xf32>
    %395 = arith.minimumf %367, %393 : vector<4x4xf32>
    %396 = arith.minimumf %395, %363 : vector<4x4xf32>
    %397 = arith.addf %394, %396 : vector<4x4xf32>
    %398 = arith.mulf %151, %232 : vector<4x4xf32>
    %399 = arith.addf %398, %369 : vector<4x4xf32>
    %400 = arith.mulf %152, %232 : vector<4x4xf32>
    %401 = arith.minimumf %373, %399 : vector<4x4xf32>
    %402 = arith.minimumf %401, %369 : vector<4x4xf32>
    %403 = arith.addf %400, %402 : vector<4x4xf32>
    %404 = arith.mulf %153, %232 : vector<4x4xf32>
    %405 = arith.minimumf %377, %403 : vector<4x4xf32>
    %406 = arith.minimumf %405, %373 : vector<4x4xf32>
    %407 = arith.addf %404, %406 : vector<4x4xf32>
    %408 = arith.mulf %154, %232 : vector<4x4xf32>
    %409 = arith.minimumf %381, %407 : vector<4x4xf32>
    %410 = arith.minimumf %409, %377 : vector<4x4xf32>
    %411 = arith.addf %408, %410 : vector<4x4xf32>
    %412 = arith.mulf %155, %232 : vector<4x4xf32>
    %413 = arith.minimumf %385, %411 : vector<4x4xf32>
    %414 = arith.minimumf %413, %381 : vector<4x4xf32>
    %415 = arith.addf %412, %414 : vector<4x4xf32>
    %416 = arith.mulf %156, %232 : vector<4x4xf32>
    %417 = arith.minimumf %389, %415 : vector<4x4xf32>
    %418 = arith.minimumf %417, %385 : vector<4x4xf32>
    %419 = arith.addf %416, %418 : vector<4x4xf32>
    %420 = arith.mulf %157, %232 : vector<4x4xf32>
    %421 = arith.minimumf %393, %419 : vector<4x4xf32>
    %422 = arith.minimumf %421, %389 : vector<4x4xf32>
    %423 = arith.addf %420, %422 : vector<4x4xf32>
    %424 = arith.mulf %158, %232 : vector<4x4xf32>
    %425 = arith.minimumf %397, %423 : vector<4x4xf32>
    %426 = arith.minimumf %425, %393 : vector<4x4xf32>
    %427 = arith.addf %424, %426 : vector<4x4xf32>
    %428 = arith.mulf %159, %232 : vector<4x4xf32>
    %429 = arith.addf %428, %399 : vector<4x4xf32>
    %430 = arith.mulf %160, %232 : vector<4x4xf32>
    %431 = arith.minimumf %403, %429 : vector<4x4xf32>
    %432 = arith.minimumf %431, %399 : vector<4x4xf32>
    %433 = arith.addf %430, %432 : vector<4x4xf32>
    %434 = arith.mulf %161, %232 : vector<4x4xf32>
    %435 = arith.minimumf %407, %433 : vector<4x4xf32>
    %436 = arith.minimumf %435, %403 : vector<4x4xf32>
    %437 = arith.addf %434, %436 : vector<4x4xf32>
    %438 = arith.mulf %162, %232 : vector<4x4xf32>
    %439 = arith.minimumf %411, %437 : vector<4x4xf32>
    %440 = arith.minimumf %439, %407 : vector<4x4xf32>
    %441 = arith.addf %438, %440 : vector<4x4xf32>
    %442 = arith.mulf %163, %232 : vector<4x4xf32>
    %443 = arith.minimumf %415, %441 : vector<4x4xf32>
    %444 = arith.minimumf %443, %411 : vector<4x4xf32>
    %445 = arith.addf %442, %444 : vector<4x4xf32>
    %446 = arith.mulf %164, %232 : vector<4x4xf32>
    %447 = arith.minimumf %419, %445 : vector<4x4xf32>
    %448 = arith.minimumf %447, %415 : vector<4x4xf32>
    %449 = arith.addf %446, %448 : vector<4x4xf32>
    %450 = arith.mulf %165, %232 : vector<4x4xf32>
    %451 = arith.minimumf %423, %449 : vector<4x4xf32>
    %452 = arith.minimumf %451, %419 : vector<4x4xf32>
    %453 = arith.addf %450, %452 : vector<4x4xf32>
    %454 = arith.mulf %166, %232 : vector<4x4xf32>
    %455 = arith.minimumf %427, %453 : vector<4x4xf32>
    %456 = arith.minimumf %455, %423 : vector<4x4xf32>
    %457 = arith.addf %454, %456 : vector<4x4xf32>
    %458 = math.absf %457 : vector<4x4xf32>
    %459 = vector.extract_strided_slice %55 {offsets = [0, 0, 0], sizes = [4, 1, 8], strides = [1, 1, 1]} : vector<4x8x8xf32> to vector<4x1x8xf32>
    %460 = vector.shape_cast %459 : vector<4x1x8xf32> to vector<4x8xf32>
    %461 = vector.extract_strided_slice %55 {offsets = [0, 1, 0], sizes = [4, 1, 8], strides = [1, 1, 1]} : vector<4x8x8xf32> to vector<4x1x8xf32>
    %462 = vector.shape_cast %461 : vector<4x1x8xf32> to vector<4x8xf32>
    %463 = vector.extract_strided_slice %55 {offsets = [0, 2, 0], sizes = [4, 1, 8], strides = [1, 1, 1]} : vector<4x8x8xf32> to vector<4x1x8xf32>
    %464 = vector.shape_cast %463 : vector<4x1x8xf32> to vector<4x8xf32>
    %465 = vector.extract_strided_slice %55 {offsets = [0, 3, 0], sizes = [4, 1, 8], strides = [1, 1, 1]} : vector<4x8x8xf32> to vector<4x1x8xf32>
    %466 = vector.shape_cast %465 : vector<4x1x8xf32> to vector<4x8xf32>
    %467 = vector.extract_strided_slice %55 {offsets = [0, 4, 0], sizes = [4, 1, 8], strides = [1, 1, 1]} : vector<4x8x8xf32> to vector<4x1x8xf32>
    %468 = vector.shape_cast %467 : vector<4x1x8xf32> to vector<4x8xf32>
    %469 = vector.extract_strided_slice %55 {offsets = [0, 5, 0], sizes = [4, 1, 8], strides = [1, 1, 1]} : vector<4x8x8xf32> to vector<4x1x8xf32>
    %470 = vector.shape_cast %469 : vector<4x1x8xf32> to vector<4x8xf32>
    %471 = vector.extract_strided_slice %55 {offsets = [0, 6, 0], sizes = [4, 1, 8], strides = [1, 1, 1]} : vector<4x8x8xf32> to vector<4x1x8xf32>
    %472 = vector.shape_cast %471 : vector<4x1x8xf32> to vector<4x8xf32>
    %473 = vector.extract_strided_slice %55 {offsets = [0, 7, 0], sizes = [4, 1, 8], strides = [1, 1, 1]} : vector<4x8x8xf32> to vector<4x1x8xf32>
    %474 = vector.shape_cast %473 : vector<4x1x8xf32> to vector<4x8xf32>
    %475 = tpu.concatenate %460, %462, %464, %466, %468, %470, %472, %474 in 1 : vector<4x8xf32>, vector<4x8xf32>, vector<4x8xf32>, vector<4x8xf32>, vector<4x8xf32>, vector<4x8xf32>, vector<4x8xf32>, vector<4x8xf32> -> vector<4x64xf32>
    %476 = tpu.transpose %475, [1, 0] : vector<4x64xf32> -> vector<64x4xf32>
    %cst_36 = arith.constant dense<0.000000e+00> : vector<4x4xf32>
    %477 = tpu.matmul %475, %476, %cst_36 {dimension_numbers = #tpu.dot_dimension_numbers<[1], [0], [0], [1], [0, 0, 1, 1], [], []>} : vector<4x64xf32>, vector<64x4xf32>, vector<4x4xf32> -> vector<4x4xf32>
    %478 = arith.mulf %475, %475 : vector<4x64xf32>
    %cst_37 = arith.constant dense<0.000000e+00> : vector<4xf32>
    %479 = vector.multi_reduction <add>, %478, %cst_37 [1] : vector<4x64xf32> to vector<4xf32>
    %480 = vector.shape_cast %479 : vector<4xf32> to vector<4x1xf32>
    %481 = tpu.transpose %480, [1, 0] : vector<4x1xf32> -> vector<1x4xf32>
    %482 = vector.broadcast %480 : vector<4x1xf32> to vector<4x4xf32>
    %483 = vector.broadcast %481 : vector<1x4xf32> to vector<4x4xf32>
    %484 = arith.addf %482, %483 : vector<4x4xf32>
    %cst_38 = arith.constant 2.000000e+00 : f32
    %485 = vector.broadcast %cst_38 : f32 to vector<4x4xf32>
    %486 = arith.mulf %485, %477 : vector<4x4xf32>
    %487 = arith.subf %484, %486 : vector<4x4xf32>
    %cst_39 = arith.constant 0.000000e+00 : f32
    %488 = vector.broadcast %cst_39 : f32 to vector<4x4xf32>
    %489 = arith.maximumf %487, %488 : vector<4x4xf32>
    %490 = math.sqrt %489 : vector<4x4xf32>
    %cst_40 = arith.constant 1.250000e-01 : f32
    %491 = vector.broadcast %cst_40 : f32 to vector<4x4xf32>
    %492 = arith.mulf %490, %491 : vector<4x4xf32>
    %cst_41 = arith.constant dense<0.000000e+00> : vector<4x8xf32>
    %493 = vector.multi_reduction <add>, %55, %cst_41 [1] : vector<4x8x8xf32> to vector<4x8xf32>
    %494 = vector.shape_cast %493 : vector<4x8xf32> to vector<4x1x8xf32>
    %cst_42 = arith.constant 8.000000e+00 : f32
    %495 = vector.broadcast %cst_42 : f32 to vector<4x1x8xf32>
    %496 = arith.divf %494, %495 : vector<4x1x8xf32>
    %497 = vector.broadcast %496 : vector<4x1x8xf32> to vector<4x8x8xf32>
    %498 = arith.subf %55, %497 : vector<4x8x8xf32>
    %499 = vector.extract_strided_slice %498 {offsets = [0, 0, 0], sizes = [4, 7, 8], strides = [1, 1, 1]} : vector<4x8x8xf32> to vector<4x7x8xf32>
    %500 = vector.extract_strided_slice %498 {offsets = [0, 1, 0], sizes = [4, 7, 8], strides = [1, 1, 1]} : vector<4x8x8xf32> to vector<4x7x8xf32>
    %501 = arith.mulf %499, %500 : vector<4x7x8xf32>
    %cst_43 = arith.constant dense<0.000000e+00> : vector<4x8xf32>
    %502 = vector.multi_reduction <add>, %501, %cst_43 [1] : vector<4x7x8xf32> to vector<4x8xf32>
    %503 = vector.shape_cast %502 : vector<4x8xf32> to vector<4x1x8xf32>
    %504 = vector.extract_strided_slice %498 {offsets = [0, 0, 0], sizes = [4, 6, 8], strides = [1, 1, 1]} : vector<4x8x8xf32> to vector<4x6x8xf32>
    %505 = vector.extract_strided_slice %498 {offsets = [0, 2, 0], sizes = [4, 6, 8], strides = [1, 1, 1]} : vector<4x8x8xf32> to vector<4x6x8xf32>
    %506 = arith.mulf %504, %505 : vector<4x6x8xf32>
    %cst_44 = arith.constant dense<0.000000e+00> : vector<4x8xf32>
    %507 = vector.multi_reduction <add>, %506, %cst_44 [1] : vector<4x6x8xf32> to vector<4x8xf32>
    %508 = vector.shape_cast %507 : vector<4x8xf32> to vector<4x1x8xf32>
    %509 = vector.extract_strided_slice %498 {offsets = [0, 0, 0], sizes = [4, 5, 8], strides = [1, 1, 1]} : vector<4x8x8xf32> to vector<4x5x8xf32>
    %510 = vector.extract_strided_slice %498 {offsets = [0, 3, 0], sizes = [4, 5, 8], strides = [1, 1, 1]} : vector<4x8x8xf32> to vector<4x5x8xf32>
    %511 = arith.mulf %509, %510 : vector<4x5x8xf32>
    %cst_45 = arith.constant dense<0.000000e+00> : vector<4x8xf32>
    %512 = vector.multi_reduction <add>, %511, %cst_45 [1] : vector<4x5x8xf32> to vector<4x8xf32>
    %513 = vector.shape_cast %512 : vector<4x8xf32> to vector<4x1x8xf32>
    %514 = vector.extract_strided_slice %498 {offsets = [0, 0, 0], sizes = [4, 4, 8], strides = [1, 1, 1]} : vector<4x8x8xf32> to vector<4x4x8xf32>
    %515 = vector.extract_strided_slice %498 {offsets = [0, 4, 0], sizes = [4, 4, 8], strides = [1, 1, 1]} : vector<4x8x8xf32> to vector<4x4x8xf32>
    %516 = arith.mulf %514, %515 : vector<4x4x8xf32>
    %cst_46 = arith.constant dense<0.000000e+00> : vector<4x8xf32>
    %517 = vector.multi_reduction <add>, %516, %cst_46 [1] : vector<4x4x8xf32> to vector<4x8xf32>
    %518 = vector.shape_cast %517 : vector<4x8xf32> to vector<4x1x8xf32>
    %519 = vector.extract_strided_slice %498 {offsets = [0, 0, 0], sizes = [4, 3, 8], strides = [1, 1, 1]} : vector<4x8x8xf32> to vector<4x3x8xf32>
    %520 = vector.extract_strided_slice %498 {offsets = [0, 5, 0], sizes = [4, 3, 8], strides = [1, 1, 1]} : vector<4x8x8xf32> to vector<4x3x8xf32>
    %521 = arith.mulf %519, %520 : vector<4x3x8xf32>
    %cst_47 = arith.constant dense<0.000000e+00> : vector<4x8xf32>
    %522 = vector.multi_reduction <add>, %521, %cst_47 [1] : vector<4x3x8xf32> to vector<4x8xf32>
    %523 = vector.shape_cast %522 : vector<4x8xf32> to vector<4x1x8xf32>
    %524 = tpu.concatenate %503, %508, %513, %518, %523 in 1 : vector<4x1x8xf32>, vector<4x1x8xf32>, vector<4x1x8xf32>, vector<4x1x8xf32>, vector<4x1x8xf32> -> vector<4x5x8xf32>
    %525 = math.absf %524 : vector<4x5x8xf32>
    %cst_48 = arith.constant dense<0xFF800000> : vector<4x8xf32>
    %526 = vector.multi_reduction <maximumf>, %525, %cst_48 [1] : vector<4x5x8xf32> to vector<4x8xf32>
    %527 = vector.shape_cast %526 : vector<4x8xf32> to vector<4x1x8xf32>
    %528 = tpu.reciprocal %527 {approx = true} : vector<4x1x8xf32> -> vector<4x1x8xf32>
    %529 = vector.broadcast %528 : vector<4x1x8xf32> to vector<4x5x8xf32>
    %530 = arith.mulf %524, %529 : vector<4x5x8xf32>
    %531 = vector.shape_cast %530 : vector<4x5x8xf32> to vector<4x1x5x8xf32>
    %532 = vector.shape_cast %530 : vector<4x5x8xf32> to vector<1x4x5x8xf32>
    %533 = vector.broadcast %531 : vector<4x1x5x8xf32> to vector<4x4x5x8xf32>
    %534 = vector.broadcast %532 : vector<1x4x5x8xf32> to vector<4x4x5x8xf32>
    %535 = arith.subf %533, %534 : vector<4x4x5x8xf32>
    %536 = math.absf %535 : vector<4x4x5x8xf32>
    %cst_49 = arith.constant dense<0.000000e+00> : vector<4x4x5xf32>
    %537 = vector.multi_reduction <add>, %536, %cst_49 [3] : vector<4x4x5x8xf32> to vector<4x4x5xf32>
    %cst_50 = arith.constant dense<0.000000e+00> : vector<4x4xf32>
    %538 = vector.multi_reduction <add>, %537, %cst_50 [2] : vector<4x4x5xf32> to vector<4x4xf32>
    %539 = vector.extract_strided_slice %47 {offsets = [0, 0, 0], sizes = [4, 1, 16], strides = [1, 1, 1]} : vector<4x8x16xf32> to vector<4x1x16xf32>
    %540 = vector.shape_cast %539 : vector<4x1x16xf32> to vector<4x16xf32>
    %541 = vector.extract_strided_slice %47 {offsets = [0, 1, 0], sizes = [4, 1, 16], strides = [1, 1, 1]} : vector<4x8x16xf32> to vector<4x1x16xf32>
    %542 = vector.shape_cast %541 : vector<4x1x16xf32> to vector<4x16xf32>
    %543 = vector.extract_strided_slice %47 {offsets = [0, 2, 0], sizes = [4, 1, 16], strides = [1, 1, 1]} : vector<4x8x16xf32> to vector<4x1x16xf32>
    %544 = vector.shape_cast %543 : vector<4x1x16xf32> to vector<4x16xf32>
    %545 = vector.extract_strided_slice %47 {offsets = [0, 3, 0], sizes = [4, 1, 16], strides = [1, 1, 1]} : vector<4x8x16xf32> to vector<4x1x16xf32>
    %546 = vector.shape_cast %545 : vector<4x1x16xf32> to vector<4x16xf32>
    %547 = vector.extract_strided_slice %47 {offsets = [0, 4, 0], sizes = [4, 1, 16], strides = [1, 1, 1]} : vector<4x8x16xf32> to vector<4x1x16xf32>
    %548 = vector.shape_cast %547 : vector<4x1x16xf32> to vector<4x16xf32>
    %549 = vector.extract_strided_slice %47 {offsets = [0, 5, 0], sizes = [4, 1, 16], strides = [1, 1, 1]} : vector<4x8x16xf32> to vector<4x1x16xf32>
    %550 = vector.shape_cast %549 : vector<4x1x16xf32> to vector<4x16xf32>
    %551 = vector.extract_strided_slice %47 {offsets = [0, 6, 0], sizes = [4, 1, 16], strides = [1, 1, 1]} : vector<4x8x16xf32> to vector<4x1x16xf32>
    %552 = vector.shape_cast %551 : vector<4x1x16xf32> to vector<4x16xf32>
    %553 = vector.extract_strided_slice %47 {offsets = [0, 7, 0], sizes = [4, 1, 16], strides = [1, 1, 1]} : vector<4x8x16xf32> to vector<4x1x16xf32>
    %554 = vector.shape_cast %553 : vector<4x1x16xf32> to vector<4x16xf32>
    %555 = tpu.concatenate %540, %542, %544, %546, %548, %550, %552, %554 in 1 : vector<4x16xf32>, vector<4x16xf32>, vector<4x16xf32>, vector<4x16xf32>, vector<4x16xf32>, vector<4x16xf32>, vector<4x16xf32>, vector<4x16xf32> -> vector<4x128xf32>
    %556 = tpu.transpose %555, [1, 0] : vector<4x128xf32> -> vector<128x4xf32>
    %cst_51 = arith.constant dense<0.000000e+00> : vector<4x4xf32>
    %557 = tpu.matmul %555, %556, %cst_51 {dimension_numbers = #tpu.dot_dimension_numbers<[1], [0], [0], [1], [0, 0, 1, 1], [], []>} : vector<4x128xf32>, vector<128x4xf32>, vector<4x4xf32> -> vector<4x4xf32>
    %558 = arith.mulf %555, %555 : vector<4x128xf32>
    %cst_52 = arith.constant dense<0.000000e+00> : vector<4xf32>
    %559 = vector.multi_reduction <add>, %558, %cst_52 [1] : vector<4x128xf32> to vector<4xf32>
    %560 = vector.shape_cast %559 : vector<4xf32> to vector<4x1xf32>
    %561 = tpu.transpose %560, [1, 0] : vector<4x1xf32> -> vector<1x4xf32>
    %562 = vector.broadcast %560 : vector<4x1xf32> to vector<4x4xf32>
    %563 = vector.broadcast %561 : vector<1x4xf32> to vector<4x4xf32>
    %564 = arith.addf %562, %563 : vector<4x4xf32>
    %cst_53 = arith.constant 2.000000e+00 : f32
    %565 = vector.broadcast %cst_53 : f32 to vector<4x4xf32>
    %566 = arith.mulf %565, %557 : vector<4x4xf32>
    %567 = arith.subf %564, %566 : vector<4x4xf32>
    %cst_54 = arith.constant 0.000000e+00 : f32
    %568 = vector.broadcast %cst_54 : f32 to vector<4x4xf32>
    %569 = arith.maximumf %567, %568 : vector<4x4xf32>
    %570 = tpu.iota {dimensions = array<i32: 0>} : vector<4x4xi32>
    %571 = tpu.iota {dimensions = array<i32: 1>} : vector<4x4xi32>
    %572 = arith.cmpi eq, %570, %571 : vector<4x4xi32>
    %cst_55 = arith.constant 9.99999996E-13 : f32
    %573 = vector.broadcast %cst_55 : f32 to vector<4x4xf32>
    %574 = arith.cmpf ole, %569, %573 : vector<4x4xf32>
    %cst_56 = arith.constant 9.99999996E-13 : f32
    %575 = vector.broadcast %cst_56 : f32 to vector<4x4xf32>
    %576 = arith.cmpf ole, %489, %575 : vector<4x4xf32>
    %577 = arith.andi %574, %576 : vector<4x4xi1>
    %578 = arith.ori %572, %577 : vector<4x4xi1>
    %cst_57 = arith.constant 4.000000e-01 : f32
    %579 = vector.broadcast %cst_57 : f32 to vector<4x4xf32>
    %580 = arith.mulf %579, %458 : vector<4x4xf32>
    %cst_58 = arith.constant 4.000000e-01 : f32
    %581 = vector.broadcast %cst_58 : f32 to vector<4x4xf32>
    %582 = arith.mulf %581, %492 : vector<4x4xf32>
    %583 = arith.addf %580, %582 : vector<4x4xf32>
    %cst_59 = arith.constant 2.000000e-01 : f32
    %584 = vector.broadcast %cst_59 : f32 to vector<4x4xf32>
    %585 = arith.mulf %584, %538 : vector<4x4xf32>
    %586 = arith.addf %583, %585 : vector<4x4xf32>
    %cst_60 = arith.constant 0.000000e+00 : f32
    %587 = vector.broadcast %cst_60 : f32 to vector<4x4xf32>
    %588 = arith.select %578, %587, %586 : vector<4x4xi1>, vector<4x4xf32>
    %cst_61 = arith.constant -1.000000e+01 : f32
    %589 = vector.broadcast %cst_61 : f32 to vector<4x4xf32>
    %590 = arith.mulf %588, %589 : vector<4x4xf32>
    %cst_62 = arith.constant 0.000000e+00 : f32
    %591 = vector.broadcast %cst_62 : f32 to vector<4x1xf32>
    %cst_63 = arith.constant 0.000000e+00 : f32
    %592 = vector.broadcast %cst_63 : f32 to vector<1x4xf32>
    %c0_i32 = arith.constant 0 : i32
    %593 = vector.broadcast %592 : vector<1x4xf32> to vector<4x4xf32>
    %594 = arith.addf %590, %593 : vector<4x4xf32>
    %cst_64 = arith.constant dense<0xFF800000> : vector<4xf32>
    %595 = vector.multi_reduction <maximumf>, %594, %cst_64 [1] : vector<4x4xf32> to vector<4xf32>
    %596 = vector.shape_cast %595 : vector<4xf32> to vector<4x1xf32>
    %597 = vector.broadcast %596 : vector<4x1xf32> to vector<4x4xf32>
    %598 = arith.subf %594, %597 : vector<4x4xf32>
    %599 = math.exp %598 : vector<4x4xf32>
    %cst_65 = arith.constant dense<0.000000e+00> : vector<4xf32>
    %600 = vector.multi_reduction <add>, %599, %cst_65 [1] : vector<4x4xf32> to vector<4xf32>
    %601 = vector.shape_cast %600 : vector<4xf32> to vector<4x1xf32>
    %602 = math.log %601 : vector<4x1xf32>
    %603 = arith.addf %596, %602 : vector<4x1xf32>
    %cst_66 = arith.constant -1.38629436 : f32
    %604 = vector.broadcast %cst_66 : f32 to vector<4x1xf32>
    %605 = arith.subf %604, %603 : vector<4x1xf32>
    %cst_67 = arith.constant 1.000000e-01 : f32
    %606 = vector.broadcast %cst_67 : f32 to vector<4x1xf32>
    %607 = arith.mulf %606, %605 : vector<4x1xf32>
    %608 = vector.broadcast %607 : vector<4x1xf32> to vector<4x4xf32>
    %609 = arith.addf %590, %608 : vector<4x4xf32>
    %cst_68 = arith.constant dense<0xFF800000> : vector<4xf32>
    %610 = vector.multi_reduction <maximumf>, %609, %cst_68 [0] : vector<4x4xf32> to vector<4xf32>
    %611 = vector.shape_cast %610 : vector<4xf32> to vector<1x4xf32>
    %612 = vector.broadcast %611 : vector<1x4xf32> to vector<4x4xf32>
    %613 = arith.subf %609, %612 : vector<4x4xf32>
    %614 = math.exp %613 : vector<4x4xf32>
    %cst_69 = arith.constant dense<0.000000e+00> : vector<4xf32>
    %615 = vector.multi_reduction <add>, %614, %cst_69 [0] : vector<4x4xf32> to vector<4xf32>
    %616 = vector.shape_cast %615 : vector<4xf32> to vector<1x4xf32>
    %617 = math.log %616 : vector<1x4xf32>
    %618 = arith.addf %611, %617 : vector<1x4xf32>
    %cst_70 = arith.constant -1.38629436 : f32
    %619 = vector.broadcast %cst_70 : f32 to vector<1x4xf32>
    %620 = arith.subf %619, %618 : vector<1x4xf32>
    %cst_71 = arith.constant 1.000000e-01 : f32
    %621 = vector.broadcast %cst_71 : f32 to vector<1x4xf32>
    %622 = arith.mulf %621, %620 : vector<1x4xf32>
    %c1_i32 = arith.constant 1 : i32
    %623 = vector.broadcast %622 : vector<1x4xf32> to vector<4x4xf32>
    %624 = arith.addf %590, %623 : vector<4x4xf32>
    %cst_72 = arith.constant dense<0xFF800000> : vector<4xf32>
    %625 = vector.multi_reduction <maximumf>, %624, %cst_72 [1] : vector<4x4xf32> to vector<4xf32>
    %626 = vector.shape_cast %625 : vector<4xf32> to vector<4x1xf32>
    %627 = vector.broadcast %626 : vector<4x1xf32> to vector<4x4xf32>
    %628 = arith.subf %624, %627 : vector<4x4xf32>
    %629 = math.exp %628 : vector<4x4xf32>
    %cst_73 = arith.constant dense<0.000000e+00> : vector<4xf32>
    %630 = vector.multi_reduction <add>, %629, %cst_73 [1] : vector<4x4xf32> to vector<4xf32>
    %631 = vector.shape_cast %630 : vector<4xf32> to vector<4x1xf32>
    %632 = math.log %631 : vector<4x1xf32>
    %633 = arith.addf %626, %632 : vector<4x1xf32>
    %cst_74 = arith.constant -1.38629436 : f32
    %634 = vector.broadcast %cst_74 : f32 to vector<4x1xf32>
    %635 = arith.subf %634, %633 : vector<4x1xf32>
    %cst_75 = arith.constant 1.000000e-01 : f32
    %636 = vector.broadcast %cst_75 : f32 to vector<4x1xf32>
    %637 = arith.mulf %636, %635 : vector<4x1xf32>
    %638 = vector.broadcast %637 : vector<4x1xf32> to vector<4x4xf32>
    %639 = arith.addf %590, %638 : vector<4x4xf32>
    %cst_76 = arith.constant dense<0xFF800000> : vector<4xf32>
    %640 = vector.multi_reduction <maximumf>, %639, %cst_76 [0] : vector<4x4xf32> to vector<4xf32>
    %641 = vector.shape_cast %640 : vector<4xf32> to vector<1x4xf32>
    %642 = vector.broadcast %641 : vector<1x4xf32> to vector<4x4xf32>
    %643 = arith.subf %639, %642 : vector<4x4xf32>
    %644 = math.exp %643 : vector<4x4xf32>
    %cst_77 = arith.constant dense<0.000000e+00> : vector<4xf32>
    %645 = vector.multi_reduction <add>, %644, %cst_77 [0] : vector<4x4xf32> to vector<4xf32>
    %646 = vector.shape_cast %645 : vector<4xf32> to vector<1x4xf32>
    %647 = math.log %646 : vector<1x4xf32>
    %648 = arith.addf %641, %647 : vector<1x4xf32>
    %cst_78 = arith.constant -1.38629436 : f32
    %649 = vector.broadcast %cst_78 : f32 to vector<1x4xf32>
    %650 = arith.subf %649, %648 : vector<1x4xf32>
    %cst_79 = arith.constant 1.000000e-01 : f32
    %651 = vector.broadcast %cst_79 : f32 to vector<1x4xf32>
    %652 = arith.mulf %651, %650 : vector<1x4xf32>
    %c2_i32 = arith.constant 2 : i32
    %653 = vector.broadcast %652 : vector<1x4xf32> to vector<4x4xf32>
    %654 = arith.addf %590, %653 : vector<4x4xf32>
    %cst_80 = arith.constant dense<0xFF800000> : vector<4xf32>
    %655 = vector.multi_reduction <maximumf>, %654, %cst_80 [1] : vector<4x4xf32> to vector<4xf32>
    %656 = vector.shape_cast %655 : vector<4xf32> to vector<4x1xf32>
    %657 = vector.broadcast %656 : vector<4x1xf32> to vector<4x4xf32>
    %658 = arith.subf %654, %657 : vector<4x4xf32>
    %659 = math.exp %658 : vector<4x4xf32>
    %cst_81 = arith.constant dense<0.000000e+00> : vector<4xf32>
    %660 = vector.multi_reduction <add>, %659, %cst_81 [1] : vector<4x4xf32> to vector<4xf32>
    %661 = vector.shape_cast %660 : vector<4xf32> to vector<4x1xf32>
    %662 = math.log %661 : vector<4x1xf32>
    %663 = arith.addf %656, %662 : vector<4x1xf32>
    %cst_82 = arith.constant -1.38629436 : f32
    %664 = vector.broadcast %cst_82 : f32 to vector<4x1xf32>
    %665 = arith.subf %664, %663 : vector<4x1xf32>
    %cst_83 = arith.constant 1.000000e-01 : f32
    %666 = vector.broadcast %cst_83 : f32 to vector<4x1xf32>
    %667 = arith.mulf %666, %665 : vector<4x1xf32>
    %668 = vector.broadcast %667 : vector<4x1xf32> to vector<4x4xf32>
    %669 = arith.addf %590, %668 : vector<4x4xf32>
    %cst_84 = arith.constant dense<0xFF800000> : vector<4xf32>
    %670 = vector.multi_reduction <maximumf>, %669, %cst_84 [0] : vector<4x4xf32> to vector<4xf32>
    %671 = vector.shape_cast %670 : vector<4xf32> to vector<1x4xf32>
    %672 = vector.broadcast %671 : vector<1x4xf32> to vector<4x4xf32>
    %673 = arith.subf %669, %672 : vector<4x4xf32>
    %674 = math.exp %673 : vector<4x4xf32>
    %cst_85 = arith.constant dense<0.000000e+00> : vector<4xf32>
    %675 = vector.multi_reduction <add>, %674, %cst_85 [0] : vector<4x4xf32> to vector<4xf32>
    %676 = vector.shape_cast %675 : vector<4xf32> to vector<1x4xf32>
    %677 = math.log %676 : vector<1x4xf32>
    %678 = arith.addf %671, %677 : vector<1x4xf32>
    %cst_86 = arith.constant -1.38629436 : f32
    %679 = vector.broadcast %cst_86 : f32 to vector<1x4xf32>
    %680 = arith.subf %679, %678 : vector<1x4xf32>
    %cst_87 = arith.constant 1.000000e-01 : f32
    %681 = vector.broadcast %cst_87 : f32 to vector<1x4xf32>
    %682 = arith.mulf %681, %680 : vector<1x4xf32>
    %c3_i32 = arith.constant 3 : i32
    %683 = vector.broadcast %682 : vector<1x4xf32> to vector<4x4xf32>
    %684 = arith.addf %590, %683 : vector<4x4xf32>
    %cst_88 = arith.constant dense<0xFF800000> : vector<4xf32>
    %685 = vector.multi_reduction <maximumf>, %684, %cst_88 [1] : vector<4x4xf32> to vector<4xf32>
    %686 = vector.shape_cast %685 : vector<4xf32> to vector<4x1xf32>
    %687 = vector.broadcast %686 : vector<4x1xf32> to vector<4x4xf32>
    %688 = arith.subf %684, %687 : vector<4x4xf32>
    %689 = math.exp %688 : vector<4x4xf32>
    %cst_89 = arith.constant dense<0.000000e+00> : vector<4xf32>
    %690 = vector.multi_reduction <add>, %689, %cst_89 [1] : vector<4x4xf32> to vector<4xf32>
    %691 = vector.shape_cast %690 : vector<4xf32> to vector<4x1xf32>
    %692 = math.log %691 : vector<4x1xf32>
    %693 = arith.addf %686, %692 : vector<4x1xf32>
    %cst_90 = arith.constant -1.38629436 : f32
    %694 = vector.broadcast %cst_90 : f32 to vector<4x1xf32>
    %695 = arith.subf %694, %693 : vector<4x1xf32>
    %cst_91 = arith.constant 1.000000e-01 : f32
    %696 = vector.broadcast %cst_91 : f32 to vector<4x1xf32>
    %697 = arith.mulf %696, %695 : vector<4x1xf32>
    %698 = vector.broadcast %697 : vector<4x1xf32> to vector<4x4xf32>
    %699 = arith.addf %590, %698 : vector<4x4xf32>
    %cst_92 = arith.constant dense<0xFF800000> : vector<4xf32>
    %700 = vector.multi_reduction <maximumf>, %699, %cst_92 [0] : vector<4x4xf32> to vector<4xf32>
    %701 = vector.shape_cast %700 : vector<4xf32> to vector<1x4xf32>
    %702 = vector.broadcast %701 : vector<1x4xf32> to vector<4x4xf32>
    %703 = arith.subf %699, %702 : vector<4x4xf32>
    %704 = math.exp %703 : vector<4x4xf32>
    %cst_93 = arith.constant dense<0.000000e+00> : vector<4xf32>
    %705 = vector.multi_reduction <add>, %704, %cst_93 [0] : vector<4x4xf32> to vector<4xf32>
    %706 = vector.shape_cast %705 : vector<4xf32> to vector<1x4xf32>
    %707 = math.log %706 : vector<1x4xf32>
    %708 = arith.addf %701, %707 : vector<1x4xf32>
    %cst_94 = arith.constant -1.38629436 : f32
    %709 = vector.broadcast %cst_94 : f32 to vector<1x4xf32>
    %710 = arith.subf %709, %708 : vector<1x4xf32>
    %cst_95 = arith.constant 1.000000e-01 : f32
    %711 = vector.broadcast %cst_95 : f32 to vector<1x4xf32>
    %712 = arith.mulf %711, %710 : vector<1x4xf32>
    %c4_i32 = arith.constant 4 : i32
    %713 = vector.broadcast %712 : vector<1x4xf32> to vector<4x4xf32>
    %714 = arith.addf %590, %713 : vector<4x4xf32>
    %cst_96 = arith.constant dense<0xFF800000> : vector<4xf32>
    %715 = vector.multi_reduction <maximumf>, %714, %cst_96 [1] : vector<4x4xf32> to vector<4xf32>
    %716 = vector.shape_cast %715 : vector<4xf32> to vector<4x1xf32>
    %717 = vector.broadcast %716 : vector<4x1xf32> to vector<4x4xf32>
    %718 = arith.subf %714, %717 : vector<4x4xf32>
    %719 = math.exp %718 : vector<4x4xf32>
    %cst_97 = arith.constant dense<0.000000e+00> : vector<4xf32>
    %720 = vector.multi_reduction <add>, %719, %cst_97 [1] : vector<4x4xf32> to vector<4xf32>
    %721 = vector.shape_cast %720 : vector<4xf32> to vector<4x1xf32>
    %722 = math.log %721 : vector<4x1xf32>
    %723 = arith.addf %716, %722 : vector<4x1xf32>
    %cst_98 = arith.constant -1.38629436 : f32
    %724 = vector.broadcast %cst_98 : f32 to vector<4x1xf32>
    %725 = arith.subf %724, %723 : vector<4x1xf32>
    %cst_99 = arith.constant 1.000000e-01 : f32
    %726 = vector.broadcast %cst_99 : f32 to vector<4x1xf32>
    %727 = arith.mulf %726, %725 : vector<4x1xf32>
    %728 = vector.broadcast %727 : vector<4x1xf32> to vector<4x4xf32>
    %729 = arith.addf %590, %728 : vector<4x4xf32>
    %cst_100 = arith.constant dense<0xFF800000> : vector<4xf32>
    %730 = vector.multi_reduction <maximumf>, %729, %cst_100 [0] : vector<4x4xf32> to vector<4xf32>
    %731 = vector.shape_cast %730 : vector<4xf32> to vector<1x4xf32>
    %732 = vector.broadcast %731 : vector<1x4xf32> to vector<4x4xf32>
    %733 = arith.subf %729, %732 : vector<4x4xf32>
    %734 = math.exp %733 : vector<4x4xf32>
    %cst_101 = arith.constant dense<0.000000e+00> : vector<4xf32>
    %735 = vector.multi_reduction <add>, %734, %cst_101 [0] : vector<4x4xf32> to vector<4xf32>
    %736 = vector.shape_cast %735 : vector<4xf32> to vector<1x4xf32>
    %737 = math.log %736 : vector<1x4xf32>
    %738 = arith.addf %731, %737 : vector<1x4xf32>
    %cst_102 = arith.constant -1.38629436 : f32
    %739 = vector.broadcast %cst_102 : f32 to vector<1x4xf32>
    %740 = arith.subf %739, %738 : vector<1x4xf32>
    %cst_103 = arith.constant 1.000000e-01 : f32
    %741 = vector.broadcast %cst_103 : f32 to vector<1x4xf32>
    %742 = arith.mulf %741, %740 : vector<1x4xf32>
    %c5_i32 = arith.constant 5 : i32
    %743 = vector.broadcast %742 : vector<1x4xf32> to vector<4x4xf32>
    %744 = arith.addf %590, %743 : vector<4x4xf32>
    %cst_104 = arith.constant dense<0xFF800000> : vector<4xf32>
    %745 = vector.multi_reduction <maximumf>, %744, %cst_104 [1] : vector<4x4xf32> to vector<4xf32>
    %746 = vector.shape_cast %745 : vector<4xf32> to vector<4x1xf32>
    %747 = vector.broadcast %746 : vector<4x1xf32> to vector<4x4xf32>
    %748 = arith.subf %744, %747 : vector<4x4xf32>
    %749 = math.exp %748 : vector<4x4xf32>
    %cst_105 = arith.constant dense<0.000000e+00> : vector<4xf32>
    %750 = vector.multi_reduction <add>, %749, %cst_105 [1] : vector<4x4xf32> to vector<4xf32>
    %751 = vector.shape_cast %750 : vector<4xf32> to vector<4x1xf32>
    %752 = math.log %751 : vector<4x1xf32>
    %753 = arith.addf %746, %752 : vector<4x1xf32>
    %cst_106 = arith.constant -1.38629436 : f32
    %754 = vector.broadcast %cst_106 : f32 to vector<4x1xf32>
    %755 = arith.subf %754, %753 : vector<4x1xf32>
    %cst_107 = arith.constant 1.000000e-01 : f32
    %756 = vector.broadcast %cst_107 : f32 to vector<4x1xf32>
    %757 = arith.mulf %756, %755 : vector<4x1xf32>
    %758 = vector.broadcast %757 : vector<4x1xf32> to vector<4x4xf32>
    %759 = arith.addf %590, %758 : vector<4x4xf32>
    %cst_108 = arith.constant dense<0xFF800000> : vector<4xf32>
    %760 = vector.multi_reduction <maximumf>, %759, %cst_108 [0] : vector<4x4xf32> to vector<4xf32>
    %761 = vector.shape_cast %760 : vector<4xf32> to vector<1x4xf32>
    %762 = vector.broadcast %761 : vector<1x4xf32> to vector<4x4xf32>
    %763 = arith.subf %759, %762 : vector<4x4xf32>
    %764 = math.exp %763 : vector<4x4xf32>
    %cst_109 = arith.constant dense<0.000000e+00> : vector<4xf32>
    %765 = vector.multi_reduction <add>, %764, %cst_109 [0] : vector<4x4xf32> to vector<4xf32>
    %766 = vector.shape_cast %765 : vector<4xf32> to vector<1x4xf32>
    %767 = math.log %766 : vector<1x4xf32>
    %768 = arith.addf %761, %767 : vector<1x4xf32>
    %cst_110 = arith.constant -1.38629436 : f32
    %769 = vector.broadcast %cst_110 : f32 to vector<1x4xf32>
    %770 = arith.subf %769, %768 : vector<1x4xf32>
    %cst_111 = arith.constant 1.000000e-01 : f32
    %771 = vector.broadcast %cst_111 : f32 to vector<1x4xf32>
    %772 = arith.mulf %771, %770 : vector<1x4xf32>
    %c6_i32 = arith.constant 6 : i32
    %773 = vector.broadcast %772 : vector<1x4xf32> to vector<4x4xf32>
    %774 = arith.addf %590, %773 : vector<4x4xf32>
    %cst_112 = arith.constant dense<0xFF800000> : vector<4xf32>
    %775 = vector.multi_reduction <maximumf>, %774, %cst_112 [1] : vector<4x4xf32> to vector<4xf32>
    %776 = vector.shape_cast %775 : vector<4xf32> to vector<4x1xf32>
    %777 = vector.broadcast %776 : vector<4x1xf32> to vector<4x4xf32>
    %778 = arith.subf %774, %777 : vector<4x4xf32>
    %779 = math.exp %778 : vector<4x4xf32>
    %cst_113 = arith.constant dense<0.000000e+00> : vector<4xf32>
    %780 = vector.multi_reduction <add>, %779, %cst_113 [1] : vector<4x4xf32> to vector<4xf32>
    %781 = vector.shape_cast %780 : vector<4xf32> to vector<4x1xf32>
    %782 = math.log %781 : vector<4x1xf32>
    %783 = arith.addf %776, %782 : vector<4x1xf32>
    %cst_114 = arith.constant -1.38629436 : f32
    %784 = vector.broadcast %cst_114 : f32 to vector<4x1xf32>
    %785 = arith.subf %784, %783 : vector<4x1xf32>
    %cst_115 = arith.constant 1.000000e-01 : f32
    %786 = vector.broadcast %cst_115 : f32 to vector<4x1xf32>
    %787 = arith.mulf %786, %785 : vector<4x1xf32>
    %788 = vector.broadcast %787 : vector<4x1xf32> to vector<4x4xf32>
    %789 = arith.addf %590, %788 : vector<4x4xf32>
    %cst_116 = arith.constant dense<0xFF800000> : vector<4xf32>
    %790 = vector.multi_reduction <maximumf>, %789, %cst_116 [0] : vector<4x4xf32> to vector<4xf32>
    %791 = vector.shape_cast %790 : vector<4xf32> to vector<1x4xf32>
    %792 = vector.broadcast %791 : vector<1x4xf32> to vector<4x4xf32>
    %793 = arith.subf %789, %792 : vector<4x4xf32>
    %794 = math.exp %793 : vector<4x4xf32>
    %cst_117 = arith.constant dense<0.000000e+00> : vector<4xf32>
    %795 = vector.multi_reduction <add>, %794, %cst_117 [0] : vector<4x4xf32> to vector<4xf32>
    %796 = vector.shape_cast %795 : vector<4xf32> to vector<1x4xf32>
    %797 = math.log %796 : vector<1x4xf32>
    %798 = arith.addf %791, %797 : vector<1x4xf32>
    %cst_118 = arith.constant -1.38629436 : f32
    %799 = vector.broadcast %cst_118 : f32 to vector<1x4xf32>
    %800 = arith.subf %799, %798 : vector<1x4xf32>
    %cst_119 = arith.constant 1.000000e-01 : f32
    %801 = vector.broadcast %cst_119 : f32 to vector<1x4xf32>
    %802 = arith.mulf %801, %800 : vector<1x4xf32>
    %c7_i32 = arith.constant 7 : i32
    %803 = vector.broadcast %802 : vector<1x4xf32> to vector<4x4xf32>
    %804 = arith.addf %590, %803 : vector<4x4xf32>
    %cst_120 = arith.constant dense<0xFF800000> : vector<4xf32>
    %805 = vector.multi_reduction <maximumf>, %804, %cst_120 [1] : vector<4x4xf32> to vector<4xf32>
    %806 = vector.shape_cast %805 : vector<4xf32> to vector<4x1xf32>
    %807 = vector.broadcast %806 : vector<4x1xf32> to vector<4x4xf32>
    %808 = arith.subf %804, %807 : vector<4x4xf32>
    %809 = math.exp %808 : vector<4x4xf32>
    %cst_121 = arith.constant dense<0.000000e+00> : vector<4xf32>
    %810 = vector.multi_reduction <add>, %809, %cst_121 [1] : vector<4x4xf32> to vector<4xf32>
    %811 = vector.shape_cast %810 : vector<4xf32> to vector<4x1xf32>
    %812 = math.log %811 : vector<4x1xf32>
    %813 = arith.addf %806, %812 : vector<4x1xf32>
    %cst_122 = arith.constant -1.38629436 : f32
    %814 = vector.broadcast %cst_122 : f32 to vector<4x1xf32>
    %815 = arith.subf %814, %813 : vector<4x1xf32>
    %cst_123 = arith.constant 1.000000e-01 : f32
    %816 = vector.broadcast %cst_123 : f32 to vector<4x1xf32>
    %817 = arith.mulf %816, %815 : vector<4x1xf32>
    %818 = vector.broadcast %817 : vector<4x1xf32> to vector<4x4xf32>
    %819 = arith.addf %590, %818 : vector<4x4xf32>
    %cst_124 = arith.constant dense<0xFF800000> : vector<4xf32>
    %820 = vector.multi_reduction <maximumf>, %819, %cst_124 [0] : vector<4x4xf32> to vector<4xf32>
    %821 = vector.shape_cast %820 : vector<4xf32> to vector<1x4xf32>
    %822 = vector.broadcast %821 : vector<1x4xf32> to vector<4x4xf32>
    %823 = arith.subf %819, %822 : vector<4x4xf32>
    %824 = math.exp %823 : vector<4x4xf32>
    %cst_125 = arith.constant dense<0.000000e+00> : vector<4xf32>
    %825 = vector.multi_reduction <add>, %824, %cst_125 [0] : vector<4x4xf32> to vector<4xf32>
    %826 = vector.shape_cast %825 : vector<4xf32> to vector<1x4xf32>
    %827 = math.log %826 : vector<1x4xf32>
    %828 = arith.addf %821, %827 : vector<1x4xf32>
    %cst_126 = arith.constant -1.38629436 : f32
    %829 = vector.broadcast %cst_126 : f32 to vector<1x4xf32>
    %830 = arith.subf %829, %828 : vector<1x4xf32>
    %cst_127 = arith.constant 1.000000e-01 : f32
    %831 = vector.broadcast %cst_127 : f32 to vector<1x4xf32>
    %832 = arith.mulf %831, %830 : vector<1x4xf32>
    %c8_i32 = arith.constant 8 : i32
    %833 = vector.broadcast %832 : vector<1x4xf32> to vector<4x4xf32>
    %834 = arith.addf %590, %833 : vector<4x4xf32>
    %cst_128 = arith.constant dense<0xFF800000> : vector<4xf32>
    %835 = vector.multi_reduction <maximumf>, %834, %cst_128 [1] : vector<4x4xf32> to vector<4xf32>
    %836 = vector.shape_cast %835 : vector<4xf32> to vector<4x1xf32>
    %837 = vector.broadcast %836 : vector<4x1xf32> to vector<4x4xf32>
    %838 = arith.subf %834, %837 : vector<4x4xf32>
    %839 = math.exp %838 : vector<4x4xf32>
    %cst_129 = arith.constant dense<0.000000e+00> : vector<4xf32>
    %840 = vector.multi_reduction <add>, %839, %cst_129 [1] : vector<4x4xf32> to vector<4xf32>
    %841 = vector.shape_cast %840 : vector<4xf32> to vector<4x1xf32>
    %842 = math.log %841 : vector<4x1xf32>
    %843 = arith.addf %836, %842 : vector<4x1xf32>
    %cst_130 = arith.constant -1.38629436 : f32
    %844 = vector.broadcast %cst_130 : f32 to vector<4x1xf32>
    %845 = arith.subf %844, %843 : vector<4x1xf32>
    %cst_131 = arith.constant 1.000000e-01 : f32
    %846 = vector.broadcast %cst_131 : f32 to vector<4x1xf32>
    %847 = arith.mulf %846, %845 : vector<4x1xf32>
    %848 = vector.broadcast %847 : vector<4x1xf32> to vector<4x4xf32>
    %849 = arith.addf %590, %848 : vector<4x4xf32>
    %cst_132 = arith.constant dense<0xFF800000> : vector<4xf32>
    %850 = vector.multi_reduction <maximumf>, %849, %cst_132 [0] : vector<4x4xf32> to vector<4xf32>
    %851 = vector.shape_cast %850 : vector<4xf32> to vector<1x4xf32>
    %852 = vector.broadcast %851 : vector<1x4xf32> to vector<4x4xf32>
    %853 = arith.subf %849, %852 : vector<4x4xf32>
    %854 = math.exp %853 : vector<4x4xf32>
    %cst_133 = arith.constant dense<0.000000e+00> : vector<4xf32>
    %855 = vector.multi_reduction <add>, %854, %cst_133 [0] : vector<4x4xf32> to vector<4xf32>
    %856 = vector.shape_cast %855 : vector<4xf32> to vector<1x4xf32>
    %857 = math.log %856 : vector<1x4xf32>
    %858 = arith.addf %851, %857 : vector<1x4xf32>
    %cst_134 = arith.constant -1.38629436 : f32
    %859 = vector.broadcast %cst_134 : f32 to vector<1x4xf32>
    %860 = arith.subf %859, %858 : vector<1x4xf32>
    %cst_135 = arith.constant 1.000000e-01 : f32
    %861 = vector.broadcast %cst_135 : f32 to vector<1x4xf32>
    %862 = arith.mulf %861, %860 : vector<1x4xf32>
    %c9_i32 = arith.constant 9 : i32
    %863 = vector.broadcast %862 : vector<1x4xf32> to vector<4x4xf32>
    %864 = arith.addf %590, %863 : vector<4x4xf32>
    %cst_136 = arith.constant dense<0xFF800000> : vector<4xf32>
    %865 = vector.multi_reduction <maximumf>, %864, %cst_136 [1] : vector<4x4xf32> to vector<4xf32>
    %866 = vector.shape_cast %865 : vector<4xf32> to vector<4x1xf32>
    %867 = vector.broadcast %866 : vector<4x1xf32> to vector<4x4xf32>
    %868 = arith.subf %864, %867 : vector<4x4xf32>
    %869 = math.exp %868 : vector<4x4xf32>
    %cst_137 = arith.constant dense<0.000000e+00> : vector<4xf32>
    %870 = vector.multi_reduction <add>, %869, %cst_137 [1] : vector<4x4xf32> to vector<4xf32>
    %871 = vector.shape_cast %870 : vector<4xf32> to vector<4x1xf32>
    %872 = math.log %871 : vector<4x1xf32>
    %873 = arith.addf %866, %872 : vector<4x1xf32>
    %cst_138 = arith.constant -1.38629436 : f32
    %874 = vector.broadcast %cst_138 : f32 to vector<4x1xf32>
    %875 = arith.subf %874, %873 : vector<4x1xf32>
    %cst_139 = arith.constant 1.000000e-01 : f32
    %876 = vector.broadcast %cst_139 : f32 to vector<4x1xf32>
    %877 = arith.mulf %876, %875 : vector<4x1xf32>
    %878 = vector.broadcast %877 : vector<4x1xf32> to vector<4x4xf32>
    %879 = arith.addf %590, %878 : vector<4x4xf32>
    %cst_140 = arith.constant dense<0xFF800000> : vector<4xf32>
    %880 = vector.multi_reduction <maximumf>, %879, %cst_140 [0] : vector<4x4xf32> to vector<4xf32>
    %881 = vector.shape_cast %880 : vector<4xf32> to vector<1x4xf32>
    %882 = vector.broadcast %881 : vector<1x4xf32> to vector<4x4xf32>
    %883 = arith.subf %879, %882 : vector<4x4xf32>
    %884 = math.exp %883 : vector<4x4xf32>
    %cst_141 = arith.constant dense<0.000000e+00> : vector<4xf32>
    %885 = vector.multi_reduction <add>, %884, %cst_141 [0] : vector<4x4xf32> to vector<4xf32>
    %886 = vector.shape_cast %885 : vector<4xf32> to vector<1x4xf32>
    %887 = math.log %886 : vector<1x4xf32>
    %888 = arith.addf %881, %887 : vector<1x4xf32>
    %cst_142 = arith.constant -1.38629436 : f32
    %889 = vector.broadcast %cst_142 : f32 to vector<1x4xf32>
    %890 = arith.subf %889, %888 : vector<1x4xf32>
    %cst_143 = arith.constant 1.000000e-01 : f32
    %891 = vector.broadcast %cst_143 : f32 to vector<1x4xf32>
    %892 = arith.mulf %891, %890 : vector<1x4xf32>
    %c10_i32 = arith.constant 10 : i32
    %893 = vector.broadcast %892 : vector<1x4xf32> to vector<4x4xf32>
    %894 = arith.addf %590, %893 : vector<4x4xf32>
    %cst_144 = arith.constant dense<0xFF800000> : vector<4xf32>
    %895 = vector.multi_reduction <maximumf>, %894, %cst_144 [1] : vector<4x4xf32> to vector<4xf32>
    %896 = vector.shape_cast %895 : vector<4xf32> to vector<4x1xf32>
    %897 = vector.broadcast %896 : vector<4x1xf32> to vector<4x4xf32>
    %898 = arith.subf %894, %897 : vector<4x4xf32>
    %899 = math.exp %898 : vector<4x4xf32>
    %cst_145 = arith.constant dense<0.000000e+00> : vector<4xf32>
    %900 = vector.multi_reduction <add>, %899, %cst_145 [1] : vector<4x4xf32> to vector<4xf32>
    %901 = vector.shape_cast %900 : vector<4xf32> to vector<4x1xf32>
    %902 = math.log %901 : vector<4x1xf32>
    %903 = arith.addf %896, %902 : vector<4x1xf32>
    %cst_146 = arith.constant -1.38629436 : f32
    %904 = vector.broadcast %cst_146 : f32 to vector<4x1xf32>
    %905 = arith.subf %904, %903 : vector<4x1xf32>
    %cst_147 = arith.constant 1.000000e-01 : f32
    %906 = vector.broadcast %cst_147 : f32 to vector<4x1xf32>
    %907 = arith.mulf %906, %905 : vector<4x1xf32>
    %908 = vector.broadcast %907 : vector<4x1xf32> to vector<4x4xf32>
    %909 = arith.addf %590, %908 : vector<4x4xf32>
    %cst_148 = arith.constant dense<0xFF800000> : vector<4xf32>
    %910 = vector.multi_reduction <maximumf>, %909, %cst_148 [0] : vector<4x4xf32> to vector<4xf32>
    %911 = vector.shape_cast %910 : vector<4xf32> to vector<1x4xf32>
    %912 = vector.broadcast %911 : vector<1x4xf32> to vector<4x4xf32>
    %913 = arith.subf %909, %912 : vector<4x4xf32>
    %914 = math.exp %913 : vector<4x4xf32>
    %cst_149 = arith.constant dense<0.000000e+00> : vector<4xf32>
    %915 = vector.multi_reduction <add>, %914, %cst_149 [0] : vector<4x4xf32> to vector<4xf32>
    %916 = vector.shape_cast %915 : vector<4xf32> to vector<1x4xf32>
    %917 = math.log %916 : vector<1x4xf32>
    %918 = arith.addf %911, %917 : vector<1x4xf32>
    %cst_150 = arith.constant -1.38629436 : f32
    %919 = vector.broadcast %cst_150 : f32 to vector<1x4xf32>
    %920 = arith.subf %919, %918 : vector<1x4xf32>
    %cst_151 = arith.constant 1.000000e-01 : f32
    %921 = vector.broadcast %cst_151 : f32 to vector<1x4xf32>
    %922 = arith.mulf %921, %920 : vector<1x4xf32>
    %c11_i32 = arith.constant 11 : i32
    %923 = vector.broadcast %922 : vector<1x4xf32> to vector<4x4xf32>
    %924 = arith.addf %590, %923 : vector<4x4xf32>
    %cst_152 = arith.constant dense<0xFF800000> : vector<4xf32>
    %925 = vector.multi_reduction <maximumf>, %924, %cst_152 [1] : vector<4x4xf32> to vector<4xf32>
    %926 = vector.shape_cast %925 : vector<4xf32> to vector<4x1xf32>
    %927 = vector.broadcast %926 : vector<4x1xf32> to vector<4x4xf32>
    %928 = arith.subf %924, %927 : vector<4x4xf32>
    %929 = math.exp %928 : vector<4x4xf32>
    %cst_153 = arith.constant dense<0.000000e+00> : vector<4xf32>
    %930 = vector.multi_reduction <add>, %929, %cst_153 [1] : vector<4x4xf32> to vector<4xf32>
    %931 = vector.shape_cast %930 : vector<4xf32> to vector<4x1xf32>
    %932 = math.log %931 : vector<4x1xf32>
    %933 = arith.addf %926, %932 : vector<4x1xf32>
    %cst_154 = arith.constant -1.38629436 : f32
    %934 = vector.broadcast %cst_154 : f32 to vector<4x1xf32>
    %935 = arith.subf %934, %933 : vector<4x1xf32>
    %cst_155 = arith.constant 1.000000e-01 : f32
    %936 = vector.broadcast %cst_155 : f32 to vector<4x1xf32>
    %937 = arith.mulf %936, %935 : vector<4x1xf32>
    %938 = vector.broadcast %937 : vector<4x1xf32> to vector<4x4xf32>
    %939 = arith.addf %590, %938 : vector<4x4xf32>
    %cst_156 = arith.constant dense<0xFF800000> : vector<4xf32>
    %940 = vector.multi_reduction <maximumf>, %939, %cst_156 [0] : vector<4x4xf32> to vector<4xf32>
    %941 = vector.shape_cast %940 : vector<4xf32> to vector<1x4xf32>
    %942 = vector.broadcast %941 : vector<1x4xf32> to vector<4x4xf32>
    %943 = arith.subf %939, %942 : vector<4x4xf32>
    %944 = math.exp %943 : vector<4x4xf32>
    %cst_157 = arith.constant dense<0.000000e+00> : vector<4xf32>
    %945 = vector.multi_reduction <add>, %944, %cst_157 [0] : vector<4x4xf32> to vector<4xf32>
    %946 = vector.shape_cast %945 : vector<4xf32> to vector<1x4xf32>
    %947 = math.log %946 : vector<1x4xf32>
    %948 = arith.addf %941, %947 : vector<1x4xf32>
    %cst_158 = arith.constant -1.38629436 : f32
    %949 = vector.broadcast %cst_158 : f32 to vector<1x4xf32>
    %950 = arith.subf %949, %948 : vector<1x4xf32>
    %cst_159 = arith.constant 1.000000e-01 : f32
    %951 = vector.broadcast %cst_159 : f32 to vector<1x4xf32>
    %952 = arith.mulf %951, %950 : vector<1x4xf32>
    %c12_i32 = arith.constant 12 : i32
    %953 = vector.broadcast %952 : vector<1x4xf32> to vector<4x4xf32>
    %954 = arith.addf %590, %953 : vector<4x4xf32>
    %cst_160 = arith.constant dense<0xFF800000> : vector<4xf32>
    %955 = vector.multi_reduction <maximumf>, %954, %cst_160 [1] : vector<4x4xf32> to vector<4xf32>
    %956 = vector.shape_cast %955 : vector<4xf32> to vector<4x1xf32>
    %957 = vector.broadcast %956 : vector<4x1xf32> to vector<4x4xf32>
    %958 = arith.subf %954, %957 : vector<4x4xf32>
    %959 = math.exp %958 : vector<4x4xf32>
    %cst_161 = arith.constant dense<0.000000e+00> : vector<4xf32>
    %960 = vector.multi_reduction <add>, %959, %cst_161 [1] : vector<4x4xf32> to vector<4xf32>
    %961 = vector.shape_cast %960 : vector<4xf32> to vector<4x1xf32>
    %962 = math.log %961 : vector<4x1xf32>
    %963 = arith.addf %956, %962 : vector<4x1xf32>
    %cst_162 = arith.constant -1.38629436 : f32
    %964 = vector.broadcast %cst_162 : f32 to vector<4x1xf32>
    %965 = arith.subf %964, %963 : vector<4x1xf32>
    %cst_163 = arith.constant 1.000000e-01 : f32
    %966 = vector.broadcast %cst_163 : f32 to vector<4x1xf32>
    %967 = arith.mulf %966, %965 : vector<4x1xf32>
    %968 = vector.broadcast %967 : vector<4x1xf32> to vector<4x4xf32>
    %969 = arith.addf %590, %968 : vector<4x4xf32>
    %cst_164 = arith.constant dense<0xFF800000> : vector<4xf32>
    %970 = vector.multi_reduction <maximumf>, %969, %cst_164 [0] : vector<4x4xf32> to vector<4xf32>
    %971 = vector.shape_cast %970 : vector<4xf32> to vector<1x4xf32>
    %972 = vector.broadcast %971 : vector<1x4xf32> to vector<4x4xf32>
    %973 = arith.subf %969, %972 : vector<4x4xf32>
    %974 = math.exp %973 : vector<4x4xf32>
    %cst_165 = arith.constant dense<0.000000e+00> : vector<4xf32>
    %975 = vector.multi_reduction <add>, %974, %cst_165 [0] : vector<4x4xf32> to vector<4xf32>
    %976 = vector.shape_cast %975 : vector<4xf32> to vector<1x4xf32>
    %977 = math.log %976 : vector<1x4xf32>
    %978 = arith.addf %971, %977 : vector<1x4xf32>
    %cst_166 = arith.constant -1.38629436 : f32
    %979 = vector.broadcast %cst_166 : f32 to vector<1x4xf32>
    %980 = arith.subf %979, %978 : vector<1x4xf32>
    %cst_167 = arith.constant 1.000000e-01 : f32
    %981 = vector.broadcast %cst_167 : f32 to vector<1x4xf32>
    %982 = arith.mulf %981, %980 : vector<1x4xf32>
    %c13_i32 = arith.constant 13 : i32
    %983 = vector.broadcast %982 : vector<1x4xf32> to vector<4x4xf32>
    %984 = arith.addf %590, %983 : vector<4x4xf32>
    %cst_168 = arith.constant dense<0xFF800000> : vector<4xf32>
    %985 = vector.multi_reduction <maximumf>, %984, %cst_168 [1] : vector<4x4xf32> to vector<4xf32>
    %986 = vector.shape_cast %985 : vector<4xf32> to vector<4x1xf32>
    %987 = vector.broadcast %986 : vector<4x1xf32> to vector<4x4xf32>
    %988 = arith.subf %984, %987 : vector<4x4xf32>
    %989 = math.exp %988 : vector<4x4xf32>
    %cst_169 = arith.constant dense<0.000000e+00> : vector<4xf32>
    %990 = vector.multi_reduction <add>, %989, %cst_169 [1] : vector<4x4xf32> to vector<4xf32>
    %991 = vector.shape_cast %990 : vector<4xf32> to vector<4x1xf32>
    %992 = math.log %991 : vector<4x1xf32>
    %993 = arith.addf %986, %992 : vector<4x1xf32>
    %cst_170 = arith.constant -1.38629436 : f32
    %994 = vector.broadcast %cst_170 : f32 to vector<4x1xf32>
    %995 = arith.subf %994, %993 : vector<4x1xf32>
    %cst_171 = arith.constant 1.000000e-01 : f32
    %996 = vector.broadcast %cst_171 : f32 to vector<4x1xf32>
    %997 = arith.mulf %996, %995 : vector<4x1xf32>
    %998 = vector.broadcast %997 : vector<4x1xf32> to vector<4x4xf32>
    %999 = arith.addf %590, %998 : vector<4x4xf32>
    %cst_172 = arith.constant dense<0xFF800000> : vector<4xf32>
    %1000 = vector.multi_reduction <maximumf>, %999, %cst_172 [0] : vector<4x4xf32> to vector<4xf32>
    %1001 = vector.shape_cast %1000 : vector<4xf32> to vector<1x4xf32>
    %1002 = vector.broadcast %1001 : vector<1x4xf32> to vector<4x4xf32>
    %1003 = arith.subf %999, %1002 : vector<4x4xf32>
    %1004 = math.exp %1003 : vector<4x4xf32>
    %cst_173 = arith.constant dense<0.000000e+00> : vector<4xf32>
    %1005 = vector.multi_reduction <add>, %1004, %cst_173 [0] : vector<4x4xf32> to vector<4xf32>
    %1006 = vector.shape_cast %1005 : vector<4xf32> to vector<1x4xf32>
    %1007 = math.log %1006 : vector<1x4xf32>
    %1008 = arith.addf %1001, %1007 : vector<1x4xf32>
    %cst_174 = arith.constant -1.38629436 : f32
    %1009 = vector.broadcast %cst_174 : f32 to vector<1x4xf32>
    %1010 = arith.subf %1009, %1008 : vector<1x4xf32>
    %cst_175 = arith.constant 1.000000e-01 : f32
    %1011 = vector.broadcast %cst_175 : f32 to vector<1x4xf32>
    %1012 = arith.mulf %1011, %1010 : vector<1x4xf32>
    %c14_i32 = arith.constant 14 : i32
    %1013 = vector.broadcast %1012 : vector<1x4xf32> to vector<4x4xf32>
    %1014 = arith.addf %590, %1013 : vector<4x4xf32>
    %cst_176 = arith.constant dense<0xFF800000> : vector<4xf32>
    %1015 = vector.multi_reduction <maximumf>, %1014, %cst_176 [1] : vector<4x4xf32> to vector<4xf32>
    %1016 = vector.shape_cast %1015 : vector<4xf32> to vector<4x1xf32>
    %1017 = vector.broadcast %1016 : vector<4x1xf32> to vector<4x4xf32>
    %1018 = arith.subf %1014, %1017 : vector<4x4xf32>
    %1019 = math.exp %1018 : vector<4x4xf32>
    %cst_177 = arith.constant dense<0.000000e+00> : vector<4xf32>
    %1020 = vector.multi_reduction <add>, %1019, %cst_177 [1] : vector<4x4xf32> to vector<4xf32>
    %1021 = vector.shape_cast %1020 : vector<4xf32> to vector<4x1xf32>
    %1022 = math.log %1021 : vector<4x1xf32>
    %1023 = arith.addf %1016, %1022 : vector<4x1xf32>
    %cst_178 = arith.constant -1.38629436 : f32
    %1024 = vector.broadcast %cst_178 : f32 to vector<4x1xf32>
    %1025 = arith.subf %1024, %1023 : vector<4x1xf32>
    %cst_179 = arith.constant 1.000000e-01 : f32
    %1026 = vector.broadcast %cst_179 : f32 to vector<4x1xf32>
    %1027 = arith.mulf %1026, %1025 : vector<4x1xf32>
    %1028 = vector.broadcast %1027 : vector<4x1xf32> to vector<4x4xf32>
    %1029 = arith.addf %590, %1028 : vector<4x4xf32>
    %cst_180 = arith.constant dense<0xFF800000> : vector<4xf32>
    %1030 = vector.multi_reduction <maximumf>, %1029, %cst_180 [0] : vector<4x4xf32> to vector<4xf32>
    %1031 = vector.shape_cast %1030 : vector<4xf32> to vector<1x4xf32>
    %1032 = vector.broadcast %1031 : vector<1x4xf32> to vector<4x4xf32>
    %1033 = arith.subf %1029, %1032 : vector<4x4xf32>
    %1034 = math.exp %1033 : vector<4x4xf32>
    %cst_181 = arith.constant dense<0.000000e+00> : vector<4xf32>
    %1035 = vector.multi_reduction <add>, %1034, %cst_181 [0] : vector<4x4xf32> to vector<4xf32>
    %1036 = vector.shape_cast %1035 : vector<4xf32> to vector<1x4xf32>
    %1037 = math.log %1036 : vector<1x4xf32>
    %1038 = arith.addf %1031, %1037 : vector<1x4xf32>
    %cst_182 = arith.constant -1.38629436 : f32
    %1039 = vector.broadcast %cst_182 : f32 to vector<1x4xf32>
    %1040 = arith.subf %1039, %1038 : vector<1x4xf32>
    %cst_183 = arith.constant 1.000000e-01 : f32
    %1041 = vector.broadcast %cst_183 : f32 to vector<1x4xf32>
    %1042 = arith.mulf %1041, %1040 : vector<1x4xf32>
    %c15_i32 = arith.constant 15 : i32
    %1043 = vector.broadcast %1042 : vector<1x4xf32> to vector<4x4xf32>
    %1044 = arith.addf %590, %1043 : vector<4x4xf32>
    %cst_184 = arith.constant dense<0xFF800000> : vector<4xf32>
    %1045 = vector.multi_reduction <maximumf>, %1044, %cst_184 [1] : vector<4x4xf32> to vector<4xf32>
    %1046 = vector.shape_cast %1045 : vector<4xf32> to vector<4x1xf32>
    %1047 = vector.broadcast %1046 : vector<4x1xf32> to vector<4x4xf32>
    %1048 = arith.subf %1044, %1047 : vector<4x4xf32>
    %1049 = math.exp %1048 : vector<4x4xf32>
    %cst_185 = arith.constant dense<0.000000e+00> : vector<4xf32>
    %1050 = vector.multi_reduction <add>, %1049, %cst_185 [1] : vector<4x4xf32> to vector<4xf32>
    %1051 = vector.shape_cast %1050 : vector<4xf32> to vector<4x1xf32>
    %1052 = math.log %1051 : vector<4x1xf32>
    %1053 = arith.addf %1046, %1052 : vector<4x1xf32>
    %cst_186 = arith.constant -1.38629436 : f32
    %1054 = vector.broadcast %cst_186 : f32 to vector<4x1xf32>
    %1055 = arith.subf %1054, %1053 : vector<4x1xf32>
    %cst_187 = arith.constant 1.000000e-01 : f32
    %1056 = vector.broadcast %cst_187 : f32 to vector<4x1xf32>
    %1057 = arith.mulf %1056, %1055 : vector<4x1xf32>
    %1058 = vector.broadcast %1057 : vector<4x1xf32> to vector<4x4xf32>
    %1059 = arith.addf %590, %1058 : vector<4x4xf32>
    %cst_188 = arith.constant dense<0xFF800000> : vector<4xf32>
    %1060 = vector.multi_reduction <maximumf>, %1059, %cst_188 [0] : vector<4x4xf32> to vector<4xf32>
    %1061 = vector.shape_cast %1060 : vector<4xf32> to vector<1x4xf32>
    %1062 = vector.broadcast %1061 : vector<1x4xf32> to vector<4x4xf32>
    %1063 = arith.subf %1059, %1062 : vector<4x4xf32>
    %1064 = math.exp %1063 : vector<4x4xf32>
    %cst_189 = arith.constant dense<0.000000e+00> : vector<4xf32>
    %1065 = vector.multi_reduction <add>, %1064, %cst_189 [0] : vector<4x4xf32> to vector<4xf32>
    %1066 = vector.shape_cast %1065 : vector<4xf32> to vector<1x4xf32>
    %1067 = math.log %1066 : vector<1x4xf32>
    %1068 = arith.addf %1061, %1067 : vector<1x4xf32>
    %cst_190 = arith.constant -1.38629436 : f32
    %1069 = vector.broadcast %cst_190 : f32 to vector<1x4xf32>
    %1070 = arith.subf %1069, %1068 : vector<1x4xf32>
    %cst_191 = arith.constant 1.000000e-01 : f32
    %1071 = vector.broadcast %cst_191 : f32 to vector<1x4xf32>
    %1072 = arith.mulf %1071, %1070 : vector<1x4xf32>
    %c16_i32 = arith.constant 16 : i32
    %1073 = vector.broadcast %1072 : vector<1x4xf32> to vector<4x4xf32>
    %1074 = arith.addf %590, %1073 : vector<4x4xf32>
    %cst_192 = arith.constant dense<0xFF800000> : vector<4xf32>
    %1075 = vector.multi_reduction <maximumf>, %1074, %cst_192 [1] : vector<4x4xf32> to vector<4xf32>
    %1076 = vector.shape_cast %1075 : vector<4xf32> to vector<4x1xf32>
    %1077 = vector.broadcast %1076 : vector<4x1xf32> to vector<4x4xf32>
    %1078 = arith.subf %1074, %1077 : vector<4x4xf32>
    %1079 = math.exp %1078 : vector<4x4xf32>
    %cst_193 = arith.constant dense<0.000000e+00> : vector<4xf32>
    %1080 = vector.multi_reduction <add>, %1079, %cst_193 [1] : vector<4x4xf32> to vector<4xf32>
    %1081 = vector.shape_cast %1080 : vector<4xf32> to vector<4x1xf32>
    %1082 = math.log %1081 : vector<4x1xf32>
    %1083 = arith.addf %1076, %1082 : vector<4x1xf32>
    %cst_194 = arith.constant -1.38629436 : f32
    %1084 = vector.broadcast %cst_194 : f32 to vector<4x1xf32>
    %1085 = arith.subf %1084, %1083 : vector<4x1xf32>
    %cst_195 = arith.constant 1.000000e-01 : f32
    %1086 = vector.broadcast %cst_195 : f32 to vector<4x1xf32>
    %1087 = arith.mulf %1086, %1085 : vector<4x1xf32>
    %1088 = vector.broadcast %1087 : vector<4x1xf32> to vector<4x4xf32>
    %1089 = arith.addf %590, %1088 : vector<4x4xf32>
    %cst_196 = arith.constant dense<0xFF800000> : vector<4xf32>
    %1090 = vector.multi_reduction <maximumf>, %1089, %cst_196 [0] : vector<4x4xf32> to vector<4xf32>
    %1091 = vector.shape_cast %1090 : vector<4xf32> to vector<1x4xf32>
    %1092 = vector.broadcast %1091 : vector<1x4xf32> to vector<4x4xf32>
    %1093 = arith.subf %1089, %1092 : vector<4x4xf32>
    %1094 = math.exp %1093 : vector<4x4xf32>
    %cst_197 = arith.constant dense<0.000000e+00> : vector<4xf32>
    %1095 = vector.multi_reduction <add>, %1094, %cst_197 [0] : vector<4x4xf32> to vector<4xf32>
    %1096 = vector.shape_cast %1095 : vector<4xf32> to vector<1x4xf32>
    %1097 = math.log %1096 : vector<1x4xf32>
    %1098 = arith.addf %1091, %1097 : vector<1x4xf32>
    %cst_198 = arith.constant -1.38629436 : f32
    %1099 = vector.broadcast %cst_198 : f32 to vector<1x4xf32>
    %1100 = arith.subf %1099, %1098 : vector<1x4xf32>
    %cst_199 = arith.constant 1.000000e-01 : f32
    %1101 = vector.broadcast %cst_199 : f32 to vector<1x4xf32>
    %1102 = arith.mulf %1101, %1100 : vector<1x4xf32>
    %c17_i32 = arith.constant 17 : i32
    %1103 = vector.broadcast %1102 : vector<1x4xf32> to vector<4x4xf32>
    %1104 = arith.addf %590, %1103 : vector<4x4xf32>
    %cst_200 = arith.constant dense<0xFF800000> : vector<4xf32>
    %1105 = vector.multi_reduction <maximumf>, %1104, %cst_200 [1] : vector<4x4xf32> to vector<4xf32>
    %1106 = vector.shape_cast %1105 : vector<4xf32> to vector<4x1xf32>
    %1107 = vector.broadcast %1106 : vector<4x1xf32> to vector<4x4xf32>
    %1108 = arith.subf %1104, %1107 : vector<4x4xf32>
    %1109 = math.exp %1108 : vector<4x4xf32>
    %cst_201 = arith.constant dense<0.000000e+00> : vector<4xf32>
    %1110 = vector.multi_reduction <add>, %1109, %cst_201 [1] : vector<4x4xf32> to vector<4xf32>
    %1111 = vector.shape_cast %1110 : vector<4xf32> to vector<4x1xf32>
    %1112 = math.log %1111 : vector<4x1xf32>
    %1113 = arith.addf %1106, %1112 : vector<4x1xf32>
    %cst_202 = arith.constant -1.38629436 : f32
    %1114 = vector.broadcast %cst_202 : f32 to vector<4x1xf32>
    %1115 = arith.subf %1114, %1113 : vector<4x1xf32>
    %cst_203 = arith.constant 1.000000e-01 : f32
    %1116 = vector.broadcast %cst_203 : f32 to vector<4x1xf32>
    %1117 = arith.mulf %1116, %1115 : vector<4x1xf32>
    %1118 = vector.broadcast %1117 : vector<4x1xf32> to vector<4x4xf32>
    %1119 = arith.addf %590, %1118 : vector<4x4xf32>
    %cst_204 = arith.constant dense<0xFF800000> : vector<4xf32>
    %1120 = vector.multi_reduction <maximumf>, %1119, %cst_204 [0] : vector<4x4xf32> to vector<4xf32>
    %1121 = vector.shape_cast %1120 : vector<4xf32> to vector<1x4xf32>
    %1122 = vector.broadcast %1121 : vector<1x4xf32> to vector<4x4xf32>
    %1123 = arith.subf %1119, %1122 : vector<4x4xf32>
    %1124 = math.exp %1123 : vector<4x4xf32>
    %cst_205 = arith.constant dense<0.000000e+00> : vector<4xf32>
    %1125 = vector.multi_reduction <add>, %1124, %cst_205 [0] : vector<4x4xf32> to vector<4xf32>
    %1126 = vector.shape_cast %1125 : vector<4xf32> to vector<1x4xf32>
    %1127 = math.log %1126 : vector<1x4xf32>
    %1128 = arith.addf %1121, %1127 : vector<1x4xf32>
    %cst_206 = arith.constant -1.38629436 : f32
    %1129 = vector.broadcast %cst_206 : f32 to vector<1x4xf32>
    %1130 = arith.subf %1129, %1128 : vector<1x4xf32>
    %cst_207 = arith.constant 1.000000e-01 : f32
    %1131 = vector.broadcast %cst_207 : f32 to vector<1x4xf32>
    %1132 = arith.mulf %1131, %1130 : vector<1x4xf32>
    %c18_i32 = arith.constant 18 : i32
    %1133 = vector.broadcast %1132 : vector<1x4xf32> to vector<4x4xf32>
    %1134 = arith.addf %590, %1133 : vector<4x4xf32>
    %cst_208 = arith.constant dense<0xFF800000> : vector<4xf32>
    %1135 = vector.multi_reduction <maximumf>, %1134, %cst_208 [1] : vector<4x4xf32> to vector<4xf32>
    %1136 = vector.shape_cast %1135 : vector<4xf32> to vector<4x1xf32>
    %1137 = vector.broadcast %1136 : vector<4x1xf32> to vector<4x4xf32>
    %1138 = arith.subf %1134, %1137 : vector<4x4xf32>
    %1139 = math.exp %1138 : vector<4x4xf32>
    %cst_209 = arith.constant dense<0.000000e+00> : vector<4xf32>
    %1140 = vector.multi_reduction <add>, %1139, %cst_209 [1] : vector<4x4xf32> to vector<4xf32>
    %1141 = vector.shape_cast %1140 : vector<4xf32> to vector<4x1xf32>
    %1142 = math.log %1141 : vector<4x1xf32>
    %1143 = arith.addf %1136, %1142 : vector<4x1xf32>
    %cst_210 = arith.constant -1.38629436 : f32
    %1144 = vector.broadcast %cst_210 : f32 to vector<4x1xf32>
    %1145 = arith.subf %1144, %1143 : vector<4x1xf32>
    %cst_211 = arith.constant 1.000000e-01 : f32
    %1146 = vector.broadcast %cst_211 : f32 to vector<4x1xf32>
    %1147 = arith.mulf %1146, %1145 : vector<4x1xf32>
    %1148 = vector.broadcast %1147 : vector<4x1xf32> to vector<4x4xf32>
    %1149 = arith.addf %590, %1148 : vector<4x4xf32>
    %cst_212 = arith.constant dense<0xFF800000> : vector<4xf32>
    %1150 = vector.multi_reduction <maximumf>, %1149, %cst_212 [0] : vector<4x4xf32> to vector<4xf32>
    %1151 = vector.shape_cast %1150 : vector<4xf32> to vector<1x4xf32>
    %1152 = vector.broadcast %1151 : vector<1x4xf32> to vector<4x4xf32>
    %1153 = arith.subf %1149, %1152 : vector<4x4xf32>
    %1154 = math.exp %1153 : vector<4x4xf32>
    %cst_213 = arith.constant dense<0.000000e+00> : vector<4xf32>
    %1155 = vector.multi_reduction <add>, %1154, %cst_213 [0] : vector<4x4xf32> to vector<4xf32>
    %1156 = vector.shape_cast %1155 : vector<4xf32> to vector<1x4xf32>
    %1157 = math.log %1156 : vector<1x4xf32>
    %1158 = arith.addf %1151, %1157 : vector<1x4xf32>
    %cst_214 = arith.constant -1.38629436 : f32
    %1159 = vector.broadcast %cst_214 : f32 to vector<1x4xf32>
    %1160 = arith.subf %1159, %1158 : vector<1x4xf32>
    %cst_215 = arith.constant 1.000000e-01 : f32
    %1161 = vector.broadcast %cst_215 : f32 to vector<1x4xf32>
    %1162 = arith.mulf %1161, %1160 : vector<1x4xf32>
    %c19_i32 = arith.constant 19 : i32
    %1163 = vector.broadcast %1162 : vector<1x4xf32> to vector<4x4xf32>
    %1164 = arith.addf %590, %1163 : vector<4x4xf32>
    %cst_216 = arith.constant dense<0xFF800000> : vector<4xf32>
    %1165 = vector.multi_reduction <maximumf>, %1164, %cst_216 [1] : vector<4x4xf32> to vector<4xf32>
    %1166 = vector.shape_cast %1165 : vector<4xf32> to vector<4x1xf32>
    %1167 = vector.broadcast %1166 : vector<4x1xf32> to vector<4x4xf32>
    %1168 = arith.subf %1164, %1167 : vector<4x4xf32>
    %1169 = math.exp %1168 : vector<4x4xf32>
    %cst_217 = arith.constant dense<0.000000e+00> : vector<4xf32>
    %1170 = vector.multi_reduction <add>, %1169, %cst_217 [1] : vector<4x4xf32> to vector<4xf32>
    %1171 = vector.shape_cast %1170 : vector<4xf32> to vector<4x1xf32>
    %1172 = math.log %1171 : vector<4x1xf32>
    %1173 = arith.addf %1166, %1172 : vector<4x1xf32>
    %cst_218 = arith.constant -1.38629436 : f32
    %1174 = vector.broadcast %cst_218 : f32 to vector<4x1xf32>
    %1175 = arith.subf %1174, %1173 : vector<4x1xf32>
    %cst_219 = arith.constant 1.000000e-01 : f32
    %1176 = vector.broadcast %cst_219 : f32 to vector<4x1xf32>
    %1177 = arith.mulf %1176, %1175 : vector<4x1xf32>
    %1178 = vector.broadcast %1177 : vector<4x1xf32> to vector<4x4xf32>
    %1179 = arith.addf %590, %1178 : vector<4x4xf32>
    %cst_220 = arith.constant dense<0xFF800000> : vector<4xf32>
    %1180 = vector.multi_reduction <maximumf>, %1179, %cst_220 [0] : vector<4x4xf32> to vector<4xf32>
    %1181 = vector.shape_cast %1180 : vector<4xf32> to vector<1x4xf32>
    %1182 = vector.broadcast %1181 : vector<1x4xf32> to vector<4x4xf32>
    %1183 = arith.subf %1179, %1182 : vector<4x4xf32>
    %1184 = math.exp %1183 : vector<4x4xf32>
    %cst_221 = arith.constant dense<0.000000e+00> : vector<4xf32>
    %1185 = vector.multi_reduction <add>, %1184, %cst_221 [0] : vector<4x4xf32> to vector<4xf32>
    %1186 = vector.shape_cast %1185 : vector<4xf32> to vector<1x4xf32>
    %1187 = math.log %1186 : vector<1x4xf32>
    %1188 = arith.addf %1181, %1187 : vector<1x4xf32>
    %cst_222 = arith.constant -1.38629436 : f32
    %1189 = vector.broadcast %cst_222 : f32 to vector<1x4xf32>
    %1190 = arith.subf %1189, %1188 : vector<1x4xf32>
    %cst_223 = arith.constant 1.000000e-01 : f32
    %1191 = vector.broadcast %cst_223 : f32 to vector<1x4xf32>
    %1192 = arith.mulf %1191, %1190 : vector<1x4xf32>
    %c20_i32 = arith.constant 20 : i32
    %1193 = vector.broadcast %1192 : vector<1x4xf32> to vector<4x4xf32>
    %1194 = arith.addf %590, %1193 : vector<4x4xf32>
    %cst_224 = arith.constant dense<0xFF800000> : vector<4xf32>
    %1195 = vector.multi_reduction <maximumf>, %1194, %cst_224 [1] : vector<4x4xf32> to vector<4xf32>
    %1196 = vector.shape_cast %1195 : vector<4xf32> to vector<4x1xf32>
    %1197 = vector.broadcast %1196 : vector<4x1xf32> to vector<4x4xf32>
    %1198 = arith.subf %1194, %1197 : vector<4x4xf32>
    %1199 = math.exp %1198 : vector<4x4xf32>
    %cst_225 = arith.constant dense<0.000000e+00> : vector<4xf32>
    %1200 = vector.multi_reduction <add>, %1199, %cst_225 [1] : vector<4x4xf32> to vector<4xf32>
    %1201 = vector.shape_cast %1200 : vector<4xf32> to vector<4x1xf32>
    %1202 = math.log %1201 : vector<4x1xf32>
    %1203 = arith.addf %1196, %1202 : vector<4x1xf32>
    %cst_226 = arith.constant -1.38629436 : f32
    %1204 = vector.broadcast %cst_226 : f32 to vector<4x1xf32>
    %1205 = arith.subf %1204, %1203 : vector<4x1xf32>
    %cst_227 = arith.constant 1.000000e-01 : f32
    %1206 = vector.broadcast %cst_227 : f32 to vector<4x1xf32>
    %1207 = arith.mulf %1206, %1205 : vector<4x1xf32>
    %1208 = vector.broadcast %1207 : vector<4x1xf32> to vector<4x4xf32>
    %1209 = arith.addf %590, %1208 : vector<4x4xf32>
    %cst_228 = arith.constant dense<0xFF800000> : vector<4xf32>
    %1210 = vector.multi_reduction <maximumf>, %1209, %cst_228 [0] : vector<4x4xf32> to vector<4xf32>
    %1211 = vector.shape_cast %1210 : vector<4xf32> to vector<1x4xf32>
    %1212 = vector.broadcast %1211 : vector<1x4xf32> to vector<4x4xf32>
    %1213 = arith.subf %1209, %1212 : vector<4x4xf32>
    %1214 = math.exp %1213 : vector<4x4xf32>
    %cst_229 = arith.constant dense<0.000000e+00> : vector<4xf32>
    %1215 = vector.multi_reduction <add>, %1214, %cst_229 [0] : vector<4x4xf32> to vector<4xf32>
    %1216 = vector.shape_cast %1215 : vector<4xf32> to vector<1x4xf32>
    %1217 = math.log %1216 : vector<1x4xf32>
    %1218 = arith.addf %1211, %1217 : vector<1x4xf32>
    %cst_230 = arith.constant -1.38629436 : f32
    %1219 = vector.broadcast %cst_230 : f32 to vector<1x4xf32>
    %1220 = arith.subf %1219, %1218 : vector<1x4xf32>
    %cst_231 = arith.constant 1.000000e-01 : f32
    %1221 = vector.broadcast %cst_231 : f32 to vector<1x4xf32>
    %1222 = arith.mulf %1221, %1220 : vector<1x4xf32>
    %c21_i32 = arith.constant 21 : i32
    %1223 = vector.broadcast %1222 : vector<1x4xf32> to vector<4x4xf32>
    %1224 = arith.addf %590, %1223 : vector<4x4xf32>
    %cst_232 = arith.constant dense<0xFF800000> : vector<4xf32>
    %1225 = vector.multi_reduction <maximumf>, %1224, %cst_232 [1] : vector<4x4xf32> to vector<4xf32>
    %1226 = vector.shape_cast %1225 : vector<4xf32> to vector<4x1xf32>
    %1227 = vector.broadcast %1226 : vector<4x1xf32> to vector<4x4xf32>
    %1228 = arith.subf %1224, %1227 : vector<4x4xf32>
    %1229 = math.exp %1228 : vector<4x4xf32>
    %cst_233 = arith.constant dense<0.000000e+00> : vector<4xf32>
    %1230 = vector.multi_reduction <add>, %1229, %cst_233 [1] : vector<4x4xf32> to vector<4xf32>
    %1231 = vector.shape_cast %1230 : vector<4xf32> to vector<4x1xf32>
    %1232 = math.log %1231 : vector<4x1xf32>
    %1233 = arith.addf %1226, %1232 : vector<4x1xf32>
    %cst_234 = arith.constant -1.38629436 : f32
    %1234 = vector.broadcast %cst_234 : f32 to vector<4x1xf32>
    %1235 = arith.subf %1234, %1233 : vector<4x1xf32>
    %cst_235 = arith.constant 1.000000e-01 : f32
    %1236 = vector.broadcast %cst_235 : f32 to vector<4x1xf32>
    %1237 = arith.mulf %1236, %1235 : vector<4x1xf32>
    %1238 = vector.broadcast %1237 : vector<4x1xf32> to vector<4x4xf32>
    %1239 = arith.addf %590, %1238 : vector<4x4xf32>
    %cst_236 = arith.constant dense<0xFF800000> : vector<4xf32>
    %1240 = vector.multi_reduction <maximumf>, %1239, %cst_236 [0] : vector<4x4xf32> to vector<4xf32>
    %1241 = vector.shape_cast %1240 : vector<4xf32> to vector<1x4xf32>
    %1242 = vector.broadcast %1241 : vector<1x4xf32> to vector<4x4xf32>
    %1243 = arith.subf %1239, %1242 : vector<4x4xf32>
    %1244 = math.exp %1243 : vector<4x4xf32>
    %cst_237 = arith.constant dense<0.000000e+00> : vector<4xf32>
    %1245 = vector.multi_reduction <add>, %1244, %cst_237 [0] : vector<4x4xf32> to vector<4xf32>
    %1246 = vector.shape_cast %1245 : vector<4xf32> to vector<1x4xf32>
    %1247 = math.log %1246 : vector<1x4xf32>
    %1248 = arith.addf %1241, %1247 : vector<1x4xf32>
    %cst_238 = arith.constant -1.38629436 : f32
    %1249 = vector.broadcast %cst_238 : f32 to vector<1x4xf32>
    %1250 = arith.subf %1249, %1248 : vector<1x4xf32>
    %cst_239 = arith.constant 1.000000e-01 : f32
    %1251 = vector.broadcast %cst_239 : f32 to vector<1x4xf32>
    %1252 = arith.mulf %1251, %1250 : vector<1x4xf32>
    %c22_i32 = arith.constant 22 : i32
    %1253 = vector.broadcast %1252 : vector<1x4xf32> to vector<4x4xf32>
    %1254 = arith.addf %590, %1253 : vector<4x4xf32>
    %cst_240 = arith.constant dense<0xFF800000> : vector<4xf32>
    %1255 = vector.multi_reduction <maximumf>, %1254, %cst_240 [1] : vector<4x4xf32> to vector<4xf32>
    %1256 = vector.shape_cast %1255 : vector<4xf32> to vector<4x1xf32>
    %1257 = vector.broadcast %1256 : vector<4x1xf32> to vector<4x4xf32>
    %1258 = arith.subf %1254, %1257 : vector<4x4xf32>
    %1259 = math.exp %1258 : vector<4x4xf32>
    %cst_241 = arith.constant dense<0.000000e+00> : vector<4xf32>
    %1260 = vector.multi_reduction <add>, %1259, %cst_241 [1] : vector<4x4xf32> to vector<4xf32>
    %1261 = vector.shape_cast %1260 : vector<4xf32> to vector<4x1xf32>
    %1262 = math.log %1261 : vector<4x1xf32>
    %1263 = arith.addf %1256, %1262 : vector<4x1xf32>
    %cst_242 = arith.constant -1.38629436 : f32
    %1264 = vector.broadcast %cst_242 : f32 to vector<4x1xf32>
    %1265 = arith.subf %1264, %1263 : vector<4x1xf32>
    %cst_243 = arith.constant 1.000000e-01 : f32
    %1266 = vector.broadcast %cst_243 : f32 to vector<4x1xf32>
    %1267 = arith.mulf %1266, %1265 : vector<4x1xf32>
    %1268 = vector.broadcast %1267 : vector<4x1xf32> to vector<4x4xf32>
    %1269 = arith.addf %590, %1268 : vector<4x4xf32>
    %cst_244 = arith.constant dense<0xFF800000> : vector<4xf32>
    %1270 = vector.multi_reduction <maximumf>, %1269, %cst_244 [0] : vector<4x4xf32> to vector<4xf32>
    %1271 = vector.shape_cast %1270 : vector<4xf32> to vector<1x4xf32>
    %1272 = vector.broadcast %1271 : vector<1x4xf32> to vector<4x4xf32>
    %1273 = arith.subf %1269, %1272 : vector<4x4xf32>
    %1274 = math.exp %1273 : vector<4x4xf32>
    %cst_245 = arith.constant dense<0.000000e+00> : vector<4xf32>
    %1275 = vector.multi_reduction <add>, %1274, %cst_245 [0] : vector<4x4xf32> to vector<4xf32>
    %1276 = vector.shape_cast %1275 : vector<4xf32> to vector<1x4xf32>
    %1277 = math.log %1276 : vector<1x4xf32>
    %1278 = arith.addf %1271, %1277 : vector<1x4xf32>
    %cst_246 = arith.constant -1.38629436 : f32
    %1279 = vector.broadcast %cst_246 : f32 to vector<1x4xf32>
    %1280 = arith.subf %1279, %1278 : vector<1x4xf32>
    %cst_247 = arith.constant 1.000000e-01 : f32
    %1281 = vector.broadcast %cst_247 : f32 to vector<1x4xf32>
    %1282 = arith.mulf %1281, %1280 : vector<1x4xf32>
    %c23_i32 = arith.constant 23 : i32
    %1283 = vector.broadcast %1282 : vector<1x4xf32> to vector<4x4xf32>
    %1284 = arith.addf %590, %1283 : vector<4x4xf32>
    %cst_248 = arith.constant dense<0xFF800000> : vector<4xf32>
    %1285 = vector.multi_reduction <maximumf>, %1284, %cst_248 [1] : vector<4x4xf32> to vector<4xf32>
    %1286 = vector.shape_cast %1285 : vector<4xf32> to vector<4x1xf32>
    %1287 = vector.broadcast %1286 : vector<4x1xf32> to vector<4x4xf32>
    %1288 = arith.subf %1284, %1287 : vector<4x4xf32>
    %1289 = math.exp %1288 : vector<4x4xf32>
    %cst_249 = arith.constant dense<0.000000e+00> : vector<4xf32>
    %1290 = vector.multi_reduction <add>, %1289, %cst_249 [1] : vector<4x4xf32> to vector<4xf32>
    %1291 = vector.shape_cast %1290 : vector<4xf32> to vector<4x1xf32>
    %1292 = math.log %1291 : vector<4x1xf32>
    %1293 = arith.addf %1286, %1292 : vector<4x1xf32>
    %cst_250 = arith.constant -1.38629436 : f32
    %1294 = vector.broadcast %cst_250 : f32 to vector<4x1xf32>
    %1295 = arith.subf %1294, %1293 : vector<4x1xf32>
    %cst_251 = arith.constant 1.000000e-01 : f32
    %1296 = vector.broadcast %cst_251 : f32 to vector<4x1xf32>
    %1297 = arith.mulf %1296, %1295 : vector<4x1xf32>
    %1298 = vector.broadcast %1297 : vector<4x1xf32> to vector<4x4xf32>
    %1299 = arith.addf %590, %1298 : vector<4x4xf32>
    %cst_252 = arith.constant dense<0xFF800000> : vector<4xf32>
    %1300 = vector.multi_reduction <maximumf>, %1299, %cst_252 [0] : vector<4x4xf32> to vector<4xf32>
    %1301 = vector.shape_cast %1300 : vector<4xf32> to vector<1x4xf32>
    %1302 = vector.broadcast %1301 : vector<1x4xf32> to vector<4x4xf32>
    %1303 = arith.subf %1299, %1302 : vector<4x4xf32>
    %1304 = math.exp %1303 : vector<4x4xf32>
    %cst_253 = arith.constant dense<0.000000e+00> : vector<4xf32>
    %1305 = vector.multi_reduction <add>, %1304, %cst_253 [0] : vector<4x4xf32> to vector<4xf32>
    %1306 = vector.shape_cast %1305 : vector<4xf32> to vector<1x4xf32>
    %1307 = math.log %1306 : vector<1x4xf32>
    %1308 = arith.addf %1301, %1307 : vector<1x4xf32>
    %cst_254 = arith.constant -1.38629436 : f32
    %1309 = vector.broadcast %cst_254 : f32 to vector<1x4xf32>
    %1310 = arith.subf %1309, %1308 : vector<1x4xf32>
    %cst_255 = arith.constant 1.000000e-01 : f32
    %1311 = vector.broadcast %cst_255 : f32 to vector<1x4xf32>
    %1312 = arith.mulf %1311, %1310 : vector<1x4xf32>
    %c24_i32 = arith.constant 24 : i32
    %1313 = vector.broadcast %1312 : vector<1x4xf32> to vector<4x4xf32>
    %1314 = arith.addf %590, %1313 : vector<4x4xf32>
    %cst_256 = arith.constant dense<0xFF800000> : vector<4xf32>
    %1315 = vector.multi_reduction <maximumf>, %1314, %cst_256 [1] : vector<4x4xf32> to vector<4xf32>
    %1316 = vector.shape_cast %1315 : vector<4xf32> to vector<4x1xf32>
    %1317 = vector.broadcast %1316 : vector<4x1xf32> to vector<4x4xf32>
    %1318 = arith.subf %1314, %1317 : vector<4x4xf32>
    %1319 = math.exp %1318 : vector<4x4xf32>
    %cst_257 = arith.constant dense<0.000000e+00> : vector<4xf32>
    %1320 = vector.multi_reduction <add>, %1319, %cst_257 [1] : vector<4x4xf32> to vector<4xf32>
    %1321 = vector.shape_cast %1320 : vector<4xf32> to vector<4x1xf32>
    %1322 = math.log %1321 : vector<4x1xf32>
    %1323 = arith.addf %1316, %1322 : vector<4x1xf32>
    %cst_258 = arith.constant -1.38629436 : f32
    %1324 = vector.broadcast %cst_258 : f32 to vector<4x1xf32>
    %1325 = arith.subf %1324, %1323 : vector<4x1xf32>
    %cst_259 = arith.constant 1.000000e-01 : f32
    %1326 = vector.broadcast %cst_259 : f32 to vector<4x1xf32>
    %1327 = arith.mulf %1326, %1325 : vector<4x1xf32>
    %1328 = vector.broadcast %1327 : vector<4x1xf32> to vector<4x4xf32>
    %1329 = arith.addf %590, %1328 : vector<4x4xf32>
    %cst_260 = arith.constant dense<0xFF800000> : vector<4xf32>
    %1330 = vector.multi_reduction <maximumf>, %1329, %cst_260 [0] : vector<4x4xf32> to vector<4xf32>
    %1331 = vector.shape_cast %1330 : vector<4xf32> to vector<1x4xf32>
    %1332 = vector.broadcast %1331 : vector<1x4xf32> to vector<4x4xf32>
    %1333 = arith.subf %1329, %1332 : vector<4x4xf32>
    %1334 = math.exp %1333 : vector<4x4xf32>
    %cst_261 = arith.constant dense<0.000000e+00> : vector<4xf32>
    %1335 = vector.multi_reduction <add>, %1334, %cst_261 [0] : vector<4x4xf32> to vector<4xf32>
    %1336 = vector.shape_cast %1335 : vector<4xf32> to vector<1x4xf32>
    %1337 = math.log %1336 : vector<1x4xf32>
    %1338 = arith.addf %1331, %1337 : vector<1x4xf32>
    %cst_262 = arith.constant -1.38629436 : f32
    %1339 = vector.broadcast %cst_262 : f32 to vector<1x4xf32>
    %1340 = arith.subf %1339, %1338 : vector<1x4xf32>
    %cst_263 = arith.constant 1.000000e-01 : f32
    %1341 = vector.broadcast %cst_263 : f32 to vector<1x4xf32>
    %1342 = arith.mulf %1341, %1340 : vector<1x4xf32>
    %c25_i32 = arith.constant 25 : i32
    %1343 = vector.broadcast %1342 : vector<1x4xf32> to vector<4x4xf32>
    %1344 = arith.addf %590, %1343 : vector<4x4xf32>
    %cst_264 = arith.constant dense<0xFF800000> : vector<4xf32>
    %1345 = vector.multi_reduction <maximumf>, %1344, %cst_264 [1] : vector<4x4xf32> to vector<4xf32>
    %1346 = vector.shape_cast %1345 : vector<4xf32> to vector<4x1xf32>
    %1347 = vector.broadcast %1346 : vector<4x1xf32> to vector<4x4xf32>
    %1348 = arith.subf %1344, %1347 : vector<4x4xf32>
    %1349 = math.exp %1348 : vector<4x4xf32>
    %cst_265 = arith.constant dense<0.000000e+00> : vector<4xf32>
    %1350 = vector.multi_reduction <add>, %1349, %cst_265 [1] : vector<4x4xf32> to vector<4xf32>
    %1351 = vector.shape_cast %1350 : vector<4xf32> to vector<4x1xf32>
    %1352 = math.log %1351 : vector<4x1xf32>
    %1353 = arith.addf %1346, %1352 : vector<4x1xf32>
    %cst_266 = arith.constant -1.38629436 : f32
    %1354 = vector.broadcast %cst_266 : f32 to vector<4x1xf32>
    %1355 = arith.subf %1354, %1353 : vector<4x1xf32>
    %cst_267 = arith.constant 1.000000e-01 : f32
    %1356 = vector.broadcast %cst_267 : f32 to vector<4x1xf32>
    %1357 = arith.mulf %1356, %1355 : vector<4x1xf32>
    %1358 = vector.broadcast %1357 : vector<4x1xf32> to vector<4x4xf32>
    %1359 = arith.addf %590, %1358 : vector<4x4xf32>
    %cst_268 = arith.constant dense<0xFF800000> : vector<4xf32>
    %1360 = vector.multi_reduction <maximumf>, %1359, %cst_268 [0] : vector<4x4xf32> to vector<4xf32>
    %1361 = vector.shape_cast %1360 : vector<4xf32> to vector<1x4xf32>
    %1362 = vector.broadcast %1361 : vector<1x4xf32> to vector<4x4xf32>
    %1363 = arith.subf %1359, %1362 : vector<4x4xf32>
    %1364 = math.exp %1363 : vector<4x4xf32>
    %cst_269 = arith.constant dense<0.000000e+00> : vector<4xf32>
    %1365 = vector.multi_reduction <add>, %1364, %cst_269 [0] : vector<4x4xf32> to vector<4xf32>
    %1366 = vector.shape_cast %1365 : vector<4xf32> to vector<1x4xf32>
    %1367 = math.log %1366 : vector<1x4xf32>
    %1368 = arith.addf %1361, %1367 : vector<1x4xf32>
    %cst_270 = arith.constant -1.38629436 : f32
    %1369 = vector.broadcast %cst_270 : f32 to vector<1x4xf32>
    %1370 = arith.subf %1369, %1368 : vector<1x4xf32>
    %cst_271 = arith.constant 1.000000e-01 : f32
    %1371 = vector.broadcast %cst_271 : f32 to vector<1x4xf32>
    %1372 = arith.mulf %1371, %1370 : vector<1x4xf32>
    %c26_i32 = arith.constant 26 : i32
    %1373 = vector.broadcast %1372 : vector<1x4xf32> to vector<4x4xf32>
    %1374 = arith.addf %590, %1373 : vector<4x4xf32>
    %cst_272 = arith.constant dense<0xFF800000> : vector<4xf32>
    %1375 = vector.multi_reduction <maximumf>, %1374, %cst_272 [1] : vector<4x4xf32> to vector<4xf32>
    %1376 = vector.shape_cast %1375 : vector<4xf32> to vector<4x1xf32>
    %1377 = vector.broadcast %1376 : vector<4x1xf32> to vector<4x4xf32>
    %1378 = arith.subf %1374, %1377 : vector<4x4xf32>
    %1379 = math.exp %1378 : vector<4x4xf32>
    %cst_273 = arith.constant dense<0.000000e+00> : vector<4xf32>
    %1380 = vector.multi_reduction <add>, %1379, %cst_273 [1] : vector<4x4xf32> to vector<4xf32>
    %1381 = vector.shape_cast %1380 : vector<4xf32> to vector<4x1xf32>
    %1382 = math.log %1381 : vector<4x1xf32>
    %1383 = arith.addf %1376, %1382 : vector<4x1xf32>
    %cst_274 = arith.constant -1.38629436 : f32
    %1384 = vector.broadcast %cst_274 : f32 to vector<4x1xf32>
    %1385 = arith.subf %1384, %1383 : vector<4x1xf32>
    %cst_275 = arith.constant 1.000000e-01 : f32
    %1386 = vector.broadcast %cst_275 : f32 to vector<4x1xf32>
    %1387 = arith.mulf %1386, %1385 : vector<4x1xf32>
    %1388 = vector.broadcast %1387 : vector<4x1xf32> to vector<4x4xf32>
    %1389 = arith.addf %590, %1388 : vector<4x4xf32>
    %cst_276 = arith.constant dense<0xFF800000> : vector<4xf32>
    %1390 = vector.multi_reduction <maximumf>, %1389, %cst_276 [0] : vector<4x4xf32> to vector<4xf32>
    %1391 = vector.shape_cast %1390 : vector<4xf32> to vector<1x4xf32>
    %1392 = vector.broadcast %1391 : vector<1x4xf32> to vector<4x4xf32>
    %1393 = arith.subf %1389, %1392 : vector<4x4xf32>
    %1394 = math.exp %1393 : vector<4x4xf32>
    %cst_277 = arith.constant dense<0.000000e+00> : vector<4xf32>
    %1395 = vector.multi_reduction <add>, %1394, %cst_277 [0] : vector<4x4xf32> to vector<4xf32>
    %1396 = vector.shape_cast %1395 : vector<4xf32> to vector<1x4xf32>
    %1397 = math.log %1396 : vector<1x4xf32>
    %1398 = arith.addf %1391, %1397 : vector<1x4xf32>
    %cst_278 = arith.constant -1.38629436 : f32
    %1399 = vector.broadcast %cst_278 : f32 to vector<1x4xf32>
    %1400 = arith.subf %1399, %1398 : vector<1x4xf32>
    %cst_279 = arith.constant 1.000000e-01 : f32
    %1401 = vector.broadcast %cst_279 : f32 to vector<1x4xf32>
    %1402 = arith.mulf %1401, %1400 : vector<1x4xf32>
    %c27_i32 = arith.constant 27 : i32
    %1403 = vector.broadcast %1402 : vector<1x4xf32> to vector<4x4xf32>
    %1404 = arith.addf %590, %1403 : vector<4x4xf32>
    %cst_280 = arith.constant dense<0xFF800000> : vector<4xf32>
    %1405 = vector.multi_reduction <maximumf>, %1404, %cst_280 [1] : vector<4x4xf32> to vector<4xf32>
    %1406 = vector.shape_cast %1405 : vector<4xf32> to vector<4x1xf32>
    %1407 = vector.broadcast %1406 : vector<4x1xf32> to vector<4x4xf32>
    %1408 = arith.subf %1404, %1407 : vector<4x4xf32>
    %1409 = math.exp %1408 : vector<4x4xf32>
    %cst_281 = arith.constant dense<0.000000e+00> : vector<4xf32>
    %1410 = vector.multi_reduction <add>, %1409, %cst_281 [1] : vector<4x4xf32> to vector<4xf32>
    %1411 = vector.shape_cast %1410 : vector<4xf32> to vector<4x1xf32>
    %1412 = math.log %1411 : vector<4x1xf32>
    %1413 = arith.addf %1406, %1412 : vector<4x1xf32>
    %cst_282 = arith.constant -1.38629436 : f32
    %1414 = vector.broadcast %cst_282 : f32 to vector<4x1xf32>
    %1415 = arith.subf %1414, %1413 : vector<4x1xf32>
    %cst_283 = arith.constant 1.000000e-01 : f32
    %1416 = vector.broadcast %cst_283 : f32 to vector<4x1xf32>
    %1417 = arith.mulf %1416, %1415 : vector<4x1xf32>
    %1418 = vector.broadcast %1417 : vector<4x1xf32> to vector<4x4xf32>
    %1419 = arith.addf %590, %1418 : vector<4x4xf32>
    %cst_284 = arith.constant dense<0xFF800000> : vector<4xf32>
    %1420 = vector.multi_reduction <maximumf>, %1419, %cst_284 [0] : vector<4x4xf32> to vector<4xf32>
    %1421 = vector.shape_cast %1420 : vector<4xf32> to vector<1x4xf32>
    %1422 = vector.broadcast %1421 : vector<1x4xf32> to vector<4x4xf32>
    %1423 = arith.subf %1419, %1422 : vector<4x4xf32>
    %1424 = math.exp %1423 : vector<4x4xf32>
    %cst_285 = arith.constant dense<0.000000e+00> : vector<4xf32>
    %1425 = vector.multi_reduction <add>, %1424, %cst_285 [0] : vector<4x4xf32> to vector<4xf32>
    %1426 = vector.shape_cast %1425 : vector<4xf32> to vector<1x4xf32>
    %1427 = math.log %1426 : vector<1x4xf32>
    %1428 = arith.addf %1421, %1427 : vector<1x4xf32>
    %cst_286 = arith.constant -1.38629436 : f32
    %1429 = vector.broadcast %cst_286 : f32 to vector<1x4xf32>
    %1430 = arith.subf %1429, %1428 : vector<1x4xf32>
    %cst_287 = arith.constant 1.000000e-01 : f32
    %1431 = vector.broadcast %cst_287 : f32 to vector<1x4xf32>
    %1432 = arith.mulf %1431, %1430 : vector<1x4xf32>
    %c28_i32 = arith.constant 28 : i32
    %1433 = vector.broadcast %1432 : vector<1x4xf32> to vector<4x4xf32>
    %1434 = arith.addf %590, %1433 : vector<4x4xf32>
    %cst_288 = arith.constant dense<0xFF800000> : vector<4xf32>
    %1435 = vector.multi_reduction <maximumf>, %1434, %cst_288 [1] : vector<4x4xf32> to vector<4xf32>
    %1436 = vector.shape_cast %1435 : vector<4xf32> to vector<4x1xf32>
    %1437 = vector.broadcast %1436 : vector<4x1xf32> to vector<4x4xf32>
    %1438 = arith.subf %1434, %1437 : vector<4x4xf32>
    %1439 = math.exp %1438 : vector<4x4xf32>
    %cst_289 = arith.constant dense<0.000000e+00> : vector<4xf32>
    %1440 = vector.multi_reduction <add>, %1439, %cst_289 [1] : vector<4x4xf32> to vector<4xf32>
    %1441 = vector.shape_cast %1440 : vector<4xf32> to vector<4x1xf32>
    %1442 = math.log %1441 : vector<4x1xf32>
    %1443 = arith.addf %1436, %1442 : vector<4x1xf32>
    %cst_290 = arith.constant -1.38629436 : f32
    %1444 = vector.broadcast %cst_290 : f32 to vector<4x1xf32>
    %1445 = arith.subf %1444, %1443 : vector<4x1xf32>
    %cst_291 = arith.constant 1.000000e-01 : f32
    %1446 = vector.broadcast %cst_291 : f32 to vector<4x1xf32>
    %1447 = arith.mulf %1446, %1445 : vector<4x1xf32>
    %1448 = vector.broadcast %1447 : vector<4x1xf32> to vector<4x4xf32>
    %1449 = arith.addf %590, %1448 : vector<4x4xf32>
    %cst_292 = arith.constant dense<0xFF800000> : vector<4xf32>
    %1450 = vector.multi_reduction <maximumf>, %1449, %cst_292 [0] : vector<4x4xf32> to vector<4xf32>
    %1451 = vector.shape_cast %1450 : vector<4xf32> to vector<1x4xf32>
    %1452 = vector.broadcast %1451 : vector<1x4xf32> to vector<4x4xf32>
    %1453 = arith.subf %1449, %1452 : vector<4x4xf32>
    %1454 = math.exp %1453 : vector<4x4xf32>
    %cst_293 = arith.constant dense<0.000000e+00> : vector<4xf32>
    %1455 = vector.multi_reduction <add>, %1454, %cst_293 [0] : vector<4x4xf32> to vector<4xf32>
    %1456 = vector.shape_cast %1455 : vector<4xf32> to vector<1x4xf32>
    %1457 = math.log %1456 : vector<1x4xf32>
    %1458 = arith.addf %1451, %1457 : vector<1x4xf32>
    %cst_294 = arith.constant -1.38629436 : f32
    %1459 = vector.broadcast %cst_294 : f32 to vector<1x4xf32>
    %1460 = arith.subf %1459, %1458 : vector<1x4xf32>
    %cst_295 = arith.constant 1.000000e-01 : f32
    %1461 = vector.broadcast %cst_295 : f32 to vector<1x4xf32>
    %1462 = arith.mulf %1461, %1460 : vector<1x4xf32>
    %c29_i32 = arith.constant 29 : i32
    %1463 = vector.broadcast %1462 : vector<1x4xf32> to vector<4x4xf32>
    %1464 = arith.addf %590, %1463 : vector<4x4xf32>
    %cst_296 = arith.constant dense<0xFF800000> : vector<4xf32>
    %1465 = vector.multi_reduction <maximumf>, %1464, %cst_296 [1] : vector<4x4xf32> to vector<4xf32>
    %1466 = vector.shape_cast %1465 : vector<4xf32> to vector<4x1xf32>
    %1467 = vector.broadcast %1466 : vector<4x1xf32> to vector<4x4xf32>
    %1468 = arith.subf %1464, %1467 : vector<4x4xf32>
    %1469 = math.exp %1468 : vector<4x4xf32>
    %cst_297 = arith.constant dense<0.000000e+00> : vector<4xf32>
    %1470 = vector.multi_reduction <add>, %1469, %cst_297 [1] : vector<4x4xf32> to vector<4xf32>
    %1471 = vector.shape_cast %1470 : vector<4xf32> to vector<4x1xf32>
    %1472 = math.log %1471 : vector<4x1xf32>
    %1473 = arith.addf %1466, %1472 : vector<4x1xf32>
    %cst_298 = arith.constant -1.38629436 : f32
    %1474 = vector.broadcast %cst_298 : f32 to vector<4x1xf32>
    %1475 = arith.subf %1474, %1473 : vector<4x1xf32>
    %cst_299 = arith.constant 1.000000e-01 : f32
    %1476 = vector.broadcast %cst_299 : f32 to vector<4x1xf32>
    %1477 = arith.mulf %1476, %1475 : vector<4x1xf32>
    %1478 = vector.broadcast %1477 : vector<4x1xf32> to vector<4x4xf32>
    %1479 = arith.addf %590, %1478 : vector<4x4xf32>
    %cst_300 = arith.constant dense<0xFF800000> : vector<4xf32>
    %1480 = vector.multi_reduction <maximumf>, %1479, %cst_300 [0] : vector<4x4xf32> to vector<4xf32>
    %1481 = vector.shape_cast %1480 : vector<4xf32> to vector<1x4xf32>
    %1482 = vector.broadcast %1481 : vector<1x4xf32> to vector<4x4xf32>
    %1483 = arith.subf %1479, %1482 : vector<4x4xf32>
    %1484 = math.exp %1483 : vector<4x4xf32>
    %cst_301 = arith.constant dense<0.000000e+00> : vector<4xf32>
    %1485 = vector.multi_reduction <add>, %1484, %cst_301 [0] : vector<4x4xf32> to vector<4xf32>
    %1486 = vector.shape_cast %1485 : vector<4xf32> to vector<1x4xf32>
    %1487 = math.log %1486 : vector<1x4xf32>
    %1488 = arith.addf %1481, %1487 : vector<1x4xf32>
    %cst_302 = arith.constant -1.38629436 : f32
    %1489 = vector.broadcast %cst_302 : f32 to vector<1x4xf32>
    %1490 = arith.subf %1489, %1488 : vector<1x4xf32>
    %cst_303 = arith.constant 1.000000e-01 : f32
    %1491 = vector.broadcast %cst_303 : f32 to vector<1x4xf32>
    %1492 = arith.mulf %1491, %1490 : vector<1x4xf32>
    %c30_i32 = arith.constant 30 : i32
    %1493 = vector.broadcast %1492 : vector<1x4xf32> to vector<4x4xf32>
    %1494 = arith.addf %590, %1493 : vector<4x4xf32>
    %cst_304 = arith.constant dense<0xFF800000> : vector<4xf32>
    %1495 = vector.multi_reduction <maximumf>, %1494, %cst_304 [1] : vector<4x4xf32> to vector<4xf32>
    %1496 = vector.shape_cast %1495 : vector<4xf32> to vector<4x1xf32>
    %1497 = vector.broadcast %1496 : vector<4x1xf32> to vector<4x4xf32>
    %1498 = arith.subf %1494, %1497 : vector<4x4xf32>
    %1499 = math.exp %1498 : vector<4x4xf32>
    %cst_305 = arith.constant dense<0.000000e+00> : vector<4xf32>
    %1500 = vector.multi_reduction <add>, %1499, %cst_305 [1] : vector<4x4xf32> to vector<4xf32>
    %1501 = vector.shape_cast %1500 : vector<4xf32> to vector<4x1xf32>
    %1502 = math.log %1501 : vector<4x1xf32>
    %1503 = arith.addf %1496, %1502 : vector<4x1xf32>
    %cst_306 = arith.constant -1.38629436 : f32
    %1504 = vector.broadcast %cst_306 : f32 to vector<4x1xf32>
    %1505 = arith.subf %1504, %1503 : vector<4x1xf32>
    %cst_307 = arith.constant 1.000000e-01 : f32
    %1506 = vector.broadcast %cst_307 : f32 to vector<4x1xf32>
    %1507 = arith.mulf %1506, %1505 : vector<4x1xf32>
    %1508 = vector.broadcast %1507 : vector<4x1xf32> to vector<4x4xf32>
    %1509 = arith.addf %590, %1508 : vector<4x4xf32>
    %cst_308 = arith.constant dense<0xFF800000> : vector<4xf32>
    %1510 = vector.multi_reduction <maximumf>, %1509, %cst_308 [0] : vector<4x4xf32> to vector<4xf32>
    %1511 = vector.shape_cast %1510 : vector<4xf32> to vector<1x4xf32>
    %1512 = vector.broadcast %1511 : vector<1x4xf32> to vector<4x4xf32>
    %1513 = arith.subf %1509, %1512 : vector<4x4xf32>
    %1514 = math.exp %1513 : vector<4x4xf32>
    %cst_309 = arith.constant dense<0.000000e+00> : vector<4xf32>
    %1515 = vector.multi_reduction <add>, %1514, %cst_309 [0] : vector<4x4xf32> to vector<4xf32>
    %1516 = vector.shape_cast %1515 : vector<4xf32> to vector<1x4xf32>
    %1517 = math.log %1516 : vector<1x4xf32>
    %1518 = arith.addf %1511, %1517 : vector<1x4xf32>
    %cst_310 = arith.constant -1.38629436 : f32
    %1519 = vector.broadcast %cst_310 : f32 to vector<1x4xf32>
    %1520 = arith.subf %1519, %1518 : vector<1x4xf32>
    %cst_311 = arith.constant 1.000000e-01 : f32
    %1521 = vector.broadcast %cst_311 : f32 to vector<1x4xf32>
    %1522 = arith.mulf %1521, %1520 : vector<1x4xf32>
    %c31_i32 = arith.constant 31 : i32
    %1523 = vector.broadcast %1522 : vector<1x4xf32> to vector<4x4xf32>
    %1524 = arith.addf %590, %1523 : vector<4x4xf32>
    %cst_312 = arith.constant dense<0xFF800000> : vector<4xf32>
    %1525 = vector.multi_reduction <maximumf>, %1524, %cst_312 [1] : vector<4x4xf32> to vector<4xf32>
    %1526 = vector.shape_cast %1525 : vector<4xf32> to vector<4x1xf32>
    %1527 = vector.broadcast %1526 : vector<4x1xf32> to vector<4x4xf32>
    %1528 = arith.subf %1524, %1527 : vector<4x4xf32>
    %1529 = math.exp %1528 : vector<4x4xf32>
    %cst_313 = arith.constant dense<0.000000e+00> : vector<4xf32>
    %1530 = vector.multi_reduction <add>, %1529, %cst_313 [1] : vector<4x4xf32> to vector<4xf32>
    %1531 = vector.shape_cast %1530 : vector<4xf32> to vector<4x1xf32>
    %1532 = math.log %1531 : vector<4x1xf32>
    %1533 = arith.addf %1526, %1532 : vector<4x1xf32>
    %cst_314 = arith.constant -1.38629436 : f32
    %1534 = vector.broadcast %cst_314 : f32 to vector<4x1xf32>
    %1535 = arith.subf %1534, %1533 : vector<4x1xf32>
    %cst_315 = arith.constant 1.000000e-01 : f32
    %1536 = vector.broadcast %cst_315 : f32 to vector<4x1xf32>
    %1537 = arith.mulf %1536, %1535 : vector<4x1xf32>
    %1538 = vector.broadcast %1537 : vector<4x1xf32> to vector<4x4xf32>
    %1539 = arith.addf %590, %1538 : vector<4x4xf32>
    %cst_316 = arith.constant dense<0xFF800000> : vector<4xf32>
    %1540 = vector.multi_reduction <maximumf>, %1539, %cst_316 [0] : vector<4x4xf32> to vector<4xf32>
    %1541 = vector.shape_cast %1540 : vector<4xf32> to vector<1x4xf32>
    %1542 = vector.broadcast %1541 : vector<1x4xf32> to vector<4x4xf32>
    %1543 = arith.subf %1539, %1542 : vector<4x4xf32>
    %1544 = math.exp %1543 : vector<4x4xf32>
    %cst_317 = arith.constant dense<0.000000e+00> : vector<4xf32>
    %1545 = vector.multi_reduction <add>, %1544, %cst_317 [0] : vector<4x4xf32> to vector<4xf32>
    %1546 = vector.shape_cast %1545 : vector<4xf32> to vector<1x4xf32>
    %1547 = math.log %1546 : vector<1x4xf32>
    %1548 = arith.addf %1541, %1547 : vector<1x4xf32>
    %cst_318 = arith.constant -1.38629436 : f32
    %1549 = vector.broadcast %cst_318 : f32 to vector<1x4xf32>
    %1550 = arith.subf %1549, %1548 : vector<1x4xf32>
    %cst_319 = arith.constant 1.000000e-01 : f32
    %1551 = vector.broadcast %cst_319 : f32 to vector<1x4xf32>
    %1552 = arith.mulf %1551, %1550 : vector<1x4xf32>
    %c32_i32 = arith.constant 32 : i32
    %1553 = vector.broadcast %1552 : vector<1x4xf32> to vector<4x4xf32>
    %1554 = arith.addf %590, %1553 : vector<4x4xf32>
    %cst_320 = arith.constant dense<0xFF800000> : vector<4xf32>
    %1555 = vector.multi_reduction <maximumf>, %1554, %cst_320 [1] : vector<4x4xf32> to vector<4xf32>
    %1556 = vector.shape_cast %1555 : vector<4xf32> to vector<4x1xf32>
    %1557 = vector.broadcast %1556 : vector<4x1xf32> to vector<4x4xf32>
    %1558 = arith.subf %1554, %1557 : vector<4x4xf32>
    %1559 = math.exp %1558 : vector<4x4xf32>
    %cst_321 = arith.constant dense<0.000000e+00> : vector<4xf32>
    %1560 = vector.multi_reduction <add>, %1559, %cst_321 [1] : vector<4x4xf32> to vector<4xf32>
    %1561 = vector.shape_cast %1560 : vector<4xf32> to vector<4x1xf32>
    %1562 = math.log %1561 : vector<4x1xf32>
    %1563 = arith.addf %1556, %1562 : vector<4x1xf32>
    %cst_322 = arith.constant -1.38629436 : f32
    %1564 = vector.broadcast %cst_322 : f32 to vector<4x1xf32>
    %1565 = arith.subf %1564, %1563 : vector<4x1xf32>
    %cst_323 = arith.constant 1.000000e-01 : f32
    %1566 = vector.broadcast %cst_323 : f32 to vector<4x1xf32>
    %1567 = arith.mulf %1566, %1565 : vector<4x1xf32>
    %1568 = vector.broadcast %1567 : vector<4x1xf32> to vector<4x4xf32>
    %1569 = arith.addf %590, %1568 : vector<4x4xf32>
    %cst_324 = arith.constant dense<0xFF800000> : vector<4xf32>
    %1570 = vector.multi_reduction <maximumf>, %1569, %cst_324 [0] : vector<4x4xf32> to vector<4xf32>
    %1571 = vector.shape_cast %1570 : vector<4xf32> to vector<1x4xf32>
    %1572 = vector.broadcast %1571 : vector<1x4xf32> to vector<4x4xf32>
    %1573 = arith.subf %1569, %1572 : vector<4x4xf32>
    %1574 = math.exp %1573 : vector<4x4xf32>
    %cst_325 = arith.constant dense<0.000000e+00> : vector<4xf32>
    %1575 = vector.multi_reduction <add>, %1574, %cst_325 [0] : vector<4x4xf32> to vector<4xf32>
    %1576 = vector.shape_cast %1575 : vector<4xf32> to vector<1x4xf32>
    %1577 = math.log %1576 : vector<1x4xf32>
    %1578 = arith.addf %1571, %1577 : vector<1x4xf32>
    %cst_326 = arith.constant -1.38629436 : f32
    %1579 = vector.broadcast %cst_326 : f32 to vector<1x4xf32>
    %1580 = arith.subf %1579, %1578 : vector<1x4xf32>
    %cst_327 = arith.constant 1.000000e-01 : f32
    %1581 = vector.broadcast %cst_327 : f32 to vector<1x4xf32>
    %1582 = arith.mulf %1581, %1580 : vector<1x4xf32>
    %c33_i32 = arith.constant 33 : i32
    %1583 = vector.broadcast %1582 : vector<1x4xf32> to vector<4x4xf32>
    %1584 = arith.addf %590, %1583 : vector<4x4xf32>
    %cst_328 = arith.constant dense<0xFF800000> : vector<4xf32>
    %1585 = vector.multi_reduction <maximumf>, %1584, %cst_328 [1] : vector<4x4xf32> to vector<4xf32>
    %1586 = vector.shape_cast %1585 : vector<4xf32> to vector<4x1xf32>
    %1587 = vector.broadcast %1586 : vector<4x1xf32> to vector<4x4xf32>
    %1588 = arith.subf %1584, %1587 : vector<4x4xf32>
    %1589 = math.exp %1588 : vector<4x4xf32>
    %cst_329 = arith.constant dense<0.000000e+00> : vector<4xf32>
    %1590 = vector.multi_reduction <add>, %1589, %cst_329 [1] : vector<4x4xf32> to vector<4xf32>
    %1591 = vector.shape_cast %1590 : vector<4xf32> to vector<4x1xf32>
    %1592 = math.log %1591 : vector<4x1xf32>
    %1593 = arith.addf %1586, %1592 : vector<4x1xf32>
    %cst_330 = arith.constant -1.38629436 : f32
    %1594 = vector.broadcast %cst_330 : f32 to vector<4x1xf32>
    %1595 = arith.subf %1594, %1593 : vector<4x1xf32>
    %cst_331 = arith.constant 1.000000e-01 : f32
    %1596 = vector.broadcast %cst_331 : f32 to vector<4x1xf32>
    %1597 = arith.mulf %1596, %1595 : vector<4x1xf32>
    %1598 = vector.broadcast %1597 : vector<4x1xf32> to vector<4x4xf32>
    %1599 = arith.addf %590, %1598 : vector<4x4xf32>
    %cst_332 = arith.constant dense<0xFF800000> : vector<4xf32>
    %1600 = vector.multi_reduction <maximumf>, %1599, %cst_332 [0] : vector<4x4xf32> to vector<4xf32>
    %1601 = vector.shape_cast %1600 : vector<4xf32> to vector<1x4xf32>
    %1602 = vector.broadcast %1601 : vector<1x4xf32> to vector<4x4xf32>
    %1603 = arith.subf %1599, %1602 : vector<4x4xf32>
    %1604 = math.exp %1603 : vector<4x4xf32>
    %cst_333 = arith.constant dense<0.000000e+00> : vector<4xf32>
    %1605 = vector.multi_reduction <add>, %1604, %cst_333 [0] : vector<4x4xf32> to vector<4xf32>
    %1606 = vector.shape_cast %1605 : vector<4xf32> to vector<1x4xf32>
    %1607 = math.log %1606 : vector<1x4xf32>
    %1608 = arith.addf %1601, %1607 : vector<1x4xf32>
    %cst_334 = arith.constant -1.38629436 : f32
    %1609 = vector.broadcast %cst_334 : f32 to vector<1x4xf32>
    %1610 = arith.subf %1609, %1608 : vector<1x4xf32>
    %cst_335 = arith.constant 1.000000e-01 : f32
    %1611 = vector.broadcast %cst_335 : f32 to vector<1x4xf32>
    %1612 = arith.mulf %1611, %1610 : vector<1x4xf32>
    %c34_i32 = arith.constant 34 : i32
    %1613 = vector.broadcast %1612 : vector<1x4xf32> to vector<4x4xf32>
    %1614 = arith.addf %590, %1613 : vector<4x4xf32>
    %cst_336 = arith.constant dense<0xFF800000> : vector<4xf32>
    %1615 = vector.multi_reduction <maximumf>, %1614, %cst_336 [1] : vector<4x4xf32> to vector<4xf32>
    %1616 = vector.shape_cast %1615 : vector<4xf32> to vector<4x1xf32>
    %1617 = vector.broadcast %1616 : vector<4x1xf32> to vector<4x4xf32>
    %1618 = arith.subf %1614, %1617 : vector<4x4xf32>
    %1619 = math.exp %1618 : vector<4x4xf32>
    %cst_337 = arith.constant dense<0.000000e+00> : vector<4xf32>
    %1620 = vector.multi_reduction <add>, %1619, %cst_337 [1] : vector<4x4xf32> to vector<4xf32>
    %1621 = vector.shape_cast %1620 : vector<4xf32> to vector<4x1xf32>
    %1622 = math.log %1621 : vector<4x1xf32>
    %1623 = arith.addf %1616, %1622 : vector<4x1xf32>
    %cst_338 = arith.constant -1.38629436 : f32
    %1624 = vector.broadcast %cst_338 : f32 to vector<4x1xf32>
    %1625 = arith.subf %1624, %1623 : vector<4x1xf32>
    %cst_339 = arith.constant 1.000000e-01 : f32
    %1626 = vector.broadcast %cst_339 : f32 to vector<4x1xf32>
    %1627 = arith.mulf %1626, %1625 : vector<4x1xf32>
    %1628 = vector.broadcast %1627 : vector<4x1xf32> to vector<4x4xf32>
    %1629 = arith.addf %590, %1628 : vector<4x4xf32>
    %cst_340 = arith.constant dense<0xFF800000> : vector<4xf32>
    %1630 = vector.multi_reduction <maximumf>, %1629, %cst_340 [0] : vector<4x4xf32> to vector<4xf32>
    %1631 = vector.shape_cast %1630 : vector<4xf32> to vector<1x4xf32>
    %1632 = vector.broadcast %1631 : vector<1x4xf32> to vector<4x4xf32>
    %1633 = arith.subf %1629, %1632 : vector<4x4xf32>
    %1634 = math.exp %1633 : vector<4x4xf32>
    %cst_341 = arith.constant dense<0.000000e+00> : vector<4xf32>
    %1635 = vector.multi_reduction <add>, %1634, %cst_341 [0] : vector<4x4xf32> to vector<4xf32>
    %1636 = vector.shape_cast %1635 : vector<4xf32> to vector<1x4xf32>
    %1637 = math.log %1636 : vector<1x4xf32>
    %1638 = arith.addf %1631, %1637 : vector<1x4xf32>
    %cst_342 = arith.constant -1.38629436 : f32
    %1639 = vector.broadcast %cst_342 : f32 to vector<1x4xf32>
    %1640 = arith.subf %1639, %1638 : vector<1x4xf32>
    %cst_343 = arith.constant 1.000000e-01 : f32
    %1641 = vector.broadcast %cst_343 : f32 to vector<1x4xf32>
    %1642 = arith.mulf %1641, %1640 : vector<1x4xf32>
    %c35_i32 = arith.constant 35 : i32
    %1643 = vector.broadcast %1642 : vector<1x4xf32> to vector<4x4xf32>
    %1644 = arith.addf %590, %1643 : vector<4x4xf32>
    %cst_344 = arith.constant dense<0xFF800000> : vector<4xf32>
    %1645 = vector.multi_reduction <maximumf>, %1644, %cst_344 [1] : vector<4x4xf32> to vector<4xf32>
    %1646 = vector.shape_cast %1645 : vector<4xf32> to vector<4x1xf32>
    %1647 = vector.broadcast %1646 : vector<4x1xf32> to vector<4x4xf32>
    %1648 = arith.subf %1644, %1647 : vector<4x4xf32>
    %1649 = math.exp %1648 : vector<4x4xf32>
    %cst_345 = arith.constant dense<0.000000e+00> : vector<4xf32>
    %1650 = vector.multi_reduction <add>, %1649, %cst_345 [1] : vector<4x4xf32> to vector<4xf32>
    %1651 = vector.shape_cast %1650 : vector<4xf32> to vector<4x1xf32>
    %1652 = math.log %1651 : vector<4x1xf32>
    %1653 = arith.addf %1646, %1652 : vector<4x1xf32>
    %cst_346 = arith.constant -1.38629436 : f32
    %1654 = vector.broadcast %cst_346 : f32 to vector<4x1xf32>
    %1655 = arith.subf %1654, %1653 : vector<4x1xf32>
    %cst_347 = arith.constant 1.000000e-01 : f32
    %1656 = vector.broadcast %cst_347 : f32 to vector<4x1xf32>
    %1657 = arith.mulf %1656, %1655 : vector<4x1xf32>
    %1658 = vector.broadcast %1657 : vector<4x1xf32> to vector<4x4xf32>
    %1659 = arith.addf %590, %1658 : vector<4x4xf32>
    %cst_348 = arith.constant dense<0xFF800000> : vector<4xf32>
    %1660 = vector.multi_reduction <maximumf>, %1659, %cst_348 [0] : vector<4x4xf32> to vector<4xf32>
    %1661 = vector.shape_cast %1660 : vector<4xf32> to vector<1x4xf32>
    %1662 = vector.broadcast %1661 : vector<1x4xf32> to vector<4x4xf32>
    %1663 = arith.subf %1659, %1662 : vector<4x4xf32>
    %1664 = math.exp %1663 : vector<4x4xf32>
    %cst_349 = arith.constant dense<0.000000e+00> : vector<4xf32>
    %1665 = vector.multi_reduction <add>, %1664, %cst_349 [0] : vector<4x4xf32> to vector<4xf32>
    %1666 = vector.shape_cast %1665 : vector<4xf32> to vector<1x4xf32>
    %1667 = math.log %1666 : vector<1x4xf32>
    %1668 = arith.addf %1661, %1667 : vector<1x4xf32>
    %cst_350 = arith.constant -1.38629436 : f32
    %1669 = vector.broadcast %cst_350 : f32 to vector<1x4xf32>
    %1670 = arith.subf %1669, %1668 : vector<1x4xf32>
    %cst_351 = arith.constant 1.000000e-01 : f32
    %1671 = vector.broadcast %cst_351 : f32 to vector<1x4xf32>
    %1672 = arith.mulf %1671, %1670 : vector<1x4xf32>
    %c36_i32 = arith.constant 36 : i32
    %1673 = vector.broadcast %1672 : vector<1x4xf32> to vector<4x4xf32>
    %1674 = arith.addf %590, %1673 : vector<4x4xf32>
    %cst_352 = arith.constant dense<0xFF800000> : vector<4xf32>
    %1675 = vector.multi_reduction <maximumf>, %1674, %cst_352 [1] : vector<4x4xf32> to vector<4xf32>
    %1676 = vector.shape_cast %1675 : vector<4xf32> to vector<4x1xf32>
    %1677 = vector.broadcast %1676 : vector<4x1xf32> to vector<4x4xf32>
    %1678 = arith.subf %1674, %1677 : vector<4x4xf32>
    %1679 = math.exp %1678 : vector<4x4xf32>
    %cst_353 = arith.constant dense<0.000000e+00> : vector<4xf32>
    %1680 = vector.multi_reduction <add>, %1679, %cst_353 [1] : vector<4x4xf32> to vector<4xf32>
    %1681 = vector.shape_cast %1680 : vector<4xf32> to vector<4x1xf32>
    %1682 = math.log %1681 : vector<4x1xf32>
    %1683 = arith.addf %1676, %1682 : vector<4x1xf32>
    %cst_354 = arith.constant -1.38629436 : f32
    %1684 = vector.broadcast %cst_354 : f32 to vector<4x1xf32>
    %1685 = arith.subf %1684, %1683 : vector<4x1xf32>
    %cst_355 = arith.constant 1.000000e-01 : f32
    %1686 = vector.broadcast %cst_355 : f32 to vector<4x1xf32>
    %1687 = arith.mulf %1686, %1685 : vector<4x1xf32>
    %1688 = vector.broadcast %1687 : vector<4x1xf32> to vector<4x4xf32>
    %1689 = arith.addf %590, %1688 : vector<4x4xf32>
    %cst_356 = arith.constant dense<0xFF800000> : vector<4xf32>
    %1690 = vector.multi_reduction <maximumf>, %1689, %cst_356 [0] : vector<4x4xf32> to vector<4xf32>
    %1691 = vector.shape_cast %1690 : vector<4xf32> to vector<1x4xf32>
    %1692 = vector.broadcast %1691 : vector<1x4xf32> to vector<4x4xf32>
    %1693 = arith.subf %1689, %1692 : vector<4x4xf32>
    %1694 = math.exp %1693 : vector<4x4xf32>
    %cst_357 = arith.constant dense<0.000000e+00> : vector<4xf32>
    %1695 = vector.multi_reduction <add>, %1694, %cst_357 [0] : vector<4x4xf32> to vector<4xf32>
    %1696 = vector.shape_cast %1695 : vector<4xf32> to vector<1x4xf32>
    %1697 = math.log %1696 : vector<1x4xf32>
    %1698 = arith.addf %1691, %1697 : vector<1x4xf32>
    %cst_358 = arith.constant -1.38629436 : f32
    %1699 = vector.broadcast %cst_358 : f32 to vector<1x4xf32>
    %1700 = arith.subf %1699, %1698 : vector<1x4xf32>
    %cst_359 = arith.constant 1.000000e-01 : f32
    %1701 = vector.broadcast %cst_359 : f32 to vector<1x4xf32>
    %1702 = arith.mulf %1701, %1700 : vector<1x4xf32>
    %c37_i32 = arith.constant 37 : i32
    %1703 = vector.broadcast %1702 : vector<1x4xf32> to vector<4x4xf32>
    %1704 = arith.addf %590, %1703 : vector<4x4xf32>
    %cst_360 = arith.constant dense<0xFF800000> : vector<4xf32>
    %1705 = vector.multi_reduction <maximumf>, %1704, %cst_360 [1] : vector<4x4xf32> to vector<4xf32>
    %1706 = vector.shape_cast %1705 : vector<4xf32> to vector<4x1xf32>
    %1707 = vector.broadcast %1706 : vector<4x1xf32> to vector<4x4xf32>
    %1708 = arith.subf %1704, %1707 : vector<4x4xf32>
    %1709 = math.exp %1708 : vector<4x4xf32>
    %cst_361 = arith.constant dense<0.000000e+00> : vector<4xf32>
    %1710 = vector.multi_reduction <add>, %1709, %cst_361 [1] : vector<4x4xf32> to vector<4xf32>
    %1711 = vector.shape_cast %1710 : vector<4xf32> to vector<4x1xf32>
    %1712 = math.log %1711 : vector<4x1xf32>
    %1713 = arith.addf %1706, %1712 : vector<4x1xf32>
    %cst_362 = arith.constant -1.38629436 : f32
    %1714 = vector.broadcast %cst_362 : f32 to vector<4x1xf32>
    %1715 = arith.subf %1714, %1713 : vector<4x1xf32>
    %cst_363 = arith.constant 1.000000e-01 : f32
    %1716 = vector.broadcast %cst_363 : f32 to vector<4x1xf32>
    %1717 = arith.mulf %1716, %1715 : vector<4x1xf32>
    %1718 = vector.broadcast %1717 : vector<4x1xf32> to vector<4x4xf32>
    %1719 = arith.addf %590, %1718 : vector<4x4xf32>
    %cst_364 = arith.constant dense<0xFF800000> : vector<4xf32>
    %1720 = vector.multi_reduction <maximumf>, %1719, %cst_364 [0] : vector<4x4xf32> to vector<4xf32>
    %1721 = vector.shape_cast %1720 : vector<4xf32> to vector<1x4xf32>
    %1722 = vector.broadcast %1721 : vector<1x4xf32> to vector<4x4xf32>
    %1723 = arith.subf %1719, %1722 : vector<4x4xf32>
    %1724 = math.exp %1723 : vector<4x4xf32>
    %cst_365 = arith.constant dense<0.000000e+00> : vector<4xf32>
    %1725 = vector.multi_reduction <add>, %1724, %cst_365 [0] : vector<4x4xf32> to vector<4xf32>
    %1726 = vector.shape_cast %1725 : vector<4xf32> to vector<1x4xf32>
    %1727 = math.log %1726 : vector<1x4xf32>
    %1728 = arith.addf %1721, %1727 : vector<1x4xf32>
    %cst_366 = arith.constant -1.38629436 : f32
    %1729 = vector.broadcast %cst_366 : f32 to vector<1x4xf32>
    %1730 = arith.subf %1729, %1728 : vector<1x4xf32>
    %cst_367 = arith.constant 1.000000e-01 : f32
    %1731 = vector.broadcast %cst_367 : f32 to vector<1x4xf32>
    %1732 = arith.mulf %1731, %1730 : vector<1x4xf32>
    %c38_i32 = arith.constant 38 : i32
    %1733 = vector.broadcast %1732 : vector<1x4xf32> to vector<4x4xf32>
    %1734 = arith.addf %590, %1733 : vector<4x4xf32>
    %cst_368 = arith.constant dense<0xFF800000> : vector<4xf32>
    %1735 = vector.multi_reduction <maximumf>, %1734, %cst_368 [1] : vector<4x4xf32> to vector<4xf32>
    %1736 = vector.shape_cast %1735 : vector<4xf32> to vector<4x1xf32>
    %1737 = vector.broadcast %1736 : vector<4x1xf32> to vector<4x4xf32>
    %1738 = arith.subf %1734, %1737 : vector<4x4xf32>
    %1739 = math.exp %1738 : vector<4x4xf32>
    %cst_369 = arith.constant dense<0.000000e+00> : vector<4xf32>
    %1740 = vector.multi_reduction <add>, %1739, %cst_369 [1] : vector<4x4xf32> to vector<4xf32>
    %1741 = vector.shape_cast %1740 : vector<4xf32> to vector<4x1xf32>
    %1742 = math.log %1741 : vector<4x1xf32>
    %1743 = arith.addf %1736, %1742 : vector<4x1xf32>
    %cst_370 = arith.constant -1.38629436 : f32
    %1744 = vector.broadcast %cst_370 : f32 to vector<4x1xf32>
    %1745 = arith.subf %1744, %1743 : vector<4x1xf32>
    %cst_371 = arith.constant 1.000000e-01 : f32
    %1746 = vector.broadcast %cst_371 : f32 to vector<4x1xf32>
    %1747 = arith.mulf %1746, %1745 : vector<4x1xf32>
    %1748 = vector.broadcast %1747 : vector<4x1xf32> to vector<4x4xf32>
    %1749 = arith.addf %590, %1748 : vector<4x4xf32>
    %cst_372 = arith.constant dense<0xFF800000> : vector<4xf32>
    %1750 = vector.multi_reduction <maximumf>, %1749, %cst_372 [0] : vector<4x4xf32> to vector<4xf32>
    %1751 = vector.shape_cast %1750 : vector<4xf32> to vector<1x4xf32>
    %1752 = vector.broadcast %1751 : vector<1x4xf32> to vector<4x4xf32>
    %1753 = arith.subf %1749, %1752 : vector<4x4xf32>
    %1754 = math.exp %1753 : vector<4x4xf32>
    %cst_373 = arith.constant dense<0.000000e+00> : vector<4xf32>
    %1755 = vector.multi_reduction <add>, %1754, %cst_373 [0] : vector<4x4xf32> to vector<4xf32>
    %1756 = vector.shape_cast %1755 : vector<4xf32> to vector<1x4xf32>
    %1757 = math.log %1756 : vector<1x4xf32>
    %1758 = arith.addf %1751, %1757 : vector<1x4xf32>
    %cst_374 = arith.constant -1.38629436 : f32
    %1759 = vector.broadcast %cst_374 : f32 to vector<1x4xf32>
    %1760 = arith.subf %1759, %1758 : vector<1x4xf32>
    %cst_375 = arith.constant 1.000000e-01 : f32
    %1761 = vector.broadcast %cst_375 : f32 to vector<1x4xf32>
    %1762 = arith.mulf %1761, %1760 : vector<1x4xf32>
    %c39_i32 = arith.constant 39 : i32
    %1763 = vector.broadcast %1762 : vector<1x4xf32> to vector<4x4xf32>
    %1764 = arith.addf %590, %1763 : vector<4x4xf32>
    %cst_376 = arith.constant dense<0xFF800000> : vector<4xf32>
    %1765 = vector.multi_reduction <maximumf>, %1764, %cst_376 [1] : vector<4x4xf32> to vector<4xf32>
    %1766 = vector.shape_cast %1765 : vector<4xf32> to vector<4x1xf32>
    %1767 = vector.broadcast %1766 : vector<4x1xf32> to vector<4x4xf32>
    %1768 = arith.subf %1764, %1767 : vector<4x4xf32>
    %1769 = math.exp %1768 : vector<4x4xf32>
    %cst_377 = arith.constant dense<0.000000e+00> : vector<4xf32>
    %1770 = vector.multi_reduction <add>, %1769, %cst_377 [1] : vector<4x4xf32> to vector<4xf32>
    %1771 = vector.shape_cast %1770 : vector<4xf32> to vector<4x1xf32>
    %1772 = math.log %1771 : vector<4x1xf32>
    %1773 = arith.addf %1766, %1772 : vector<4x1xf32>
    %cst_378 = arith.constant -1.38629436 : f32
    %1774 = vector.broadcast %cst_378 : f32 to vector<4x1xf32>
    %1775 = arith.subf %1774, %1773 : vector<4x1xf32>
    %cst_379 = arith.constant 1.000000e-01 : f32
    %1776 = vector.broadcast %cst_379 : f32 to vector<4x1xf32>
    %1777 = arith.mulf %1776, %1775 : vector<4x1xf32>
    %1778 = vector.broadcast %1777 : vector<4x1xf32> to vector<4x4xf32>
    %1779 = arith.addf %590, %1778 : vector<4x4xf32>
    %cst_380 = arith.constant dense<0xFF800000> : vector<4xf32>
    %1780 = vector.multi_reduction <maximumf>, %1779, %cst_380 [0] : vector<4x4xf32> to vector<4xf32>
    %1781 = vector.shape_cast %1780 : vector<4xf32> to vector<1x4xf32>
    %1782 = vector.broadcast %1781 : vector<1x4xf32> to vector<4x4xf32>
    %1783 = arith.subf %1779, %1782 : vector<4x4xf32>
    %1784 = math.exp %1783 : vector<4x4xf32>
    %cst_381 = arith.constant dense<0.000000e+00> : vector<4xf32>
    %1785 = vector.multi_reduction <add>, %1784, %cst_381 [0] : vector<4x4xf32> to vector<4xf32>
    %1786 = vector.shape_cast %1785 : vector<4xf32> to vector<1x4xf32>
    %1787 = math.log %1786 : vector<1x4xf32>
    %1788 = arith.addf %1781, %1787 : vector<1x4xf32>
    %cst_382 = arith.constant -1.38629436 : f32
    %1789 = vector.broadcast %cst_382 : f32 to vector<1x4xf32>
    %1790 = arith.subf %1789, %1788 : vector<1x4xf32>
    %cst_383 = arith.constant 1.000000e-01 : f32
    %1791 = vector.broadcast %cst_383 : f32 to vector<1x4xf32>
    %1792 = arith.mulf %1791, %1790 : vector<1x4xf32>
    %c40_i32 = arith.constant 40 : i32
    %1793 = vector.broadcast %1792 : vector<1x4xf32> to vector<4x4xf32>
    %1794 = arith.addf %590, %1793 : vector<4x4xf32>
    %cst_384 = arith.constant dense<0xFF800000> : vector<4xf32>
    %1795 = vector.multi_reduction <maximumf>, %1794, %cst_384 [1] : vector<4x4xf32> to vector<4xf32>
    %1796 = vector.shape_cast %1795 : vector<4xf32> to vector<4x1xf32>
    %1797 = vector.broadcast %1796 : vector<4x1xf32> to vector<4x4xf32>
    %1798 = arith.subf %1794, %1797 : vector<4x4xf32>
    %1799 = math.exp %1798 : vector<4x4xf32>
    %cst_385 = arith.constant dense<0.000000e+00> : vector<4xf32>
    %1800 = vector.multi_reduction <add>, %1799, %cst_385 [1] : vector<4x4xf32> to vector<4xf32>
    %1801 = vector.shape_cast %1800 : vector<4xf32> to vector<4x1xf32>
    %1802 = math.log %1801 : vector<4x1xf32>
    %1803 = arith.addf %1796, %1802 : vector<4x1xf32>
    %cst_386 = arith.constant -1.38629436 : f32
    %1804 = vector.broadcast %cst_386 : f32 to vector<4x1xf32>
    %1805 = arith.subf %1804, %1803 : vector<4x1xf32>
    %cst_387 = arith.constant 1.000000e-01 : f32
    %1806 = vector.broadcast %cst_387 : f32 to vector<4x1xf32>
    %1807 = arith.mulf %1806, %1805 : vector<4x1xf32>
    %1808 = vector.broadcast %1807 : vector<4x1xf32> to vector<4x4xf32>
    %1809 = arith.addf %590, %1808 : vector<4x4xf32>
    %cst_388 = arith.constant dense<0xFF800000> : vector<4xf32>
    %1810 = vector.multi_reduction <maximumf>, %1809, %cst_388 [0] : vector<4x4xf32> to vector<4xf32>
    %1811 = vector.shape_cast %1810 : vector<4xf32> to vector<1x4xf32>
    %1812 = vector.broadcast %1811 : vector<1x4xf32> to vector<4x4xf32>
    %1813 = arith.subf %1809, %1812 : vector<4x4xf32>
    %1814 = math.exp %1813 : vector<4x4xf32>
    %cst_389 = arith.constant dense<0.000000e+00> : vector<4xf32>
    %1815 = vector.multi_reduction <add>, %1814, %cst_389 [0] : vector<4x4xf32> to vector<4xf32>
    %1816 = vector.shape_cast %1815 : vector<4xf32> to vector<1x4xf32>
    %1817 = math.log %1816 : vector<1x4xf32>
    %1818 = arith.addf %1811, %1817 : vector<1x4xf32>
    %cst_390 = arith.constant -1.38629436 : f32
    %1819 = vector.broadcast %cst_390 : f32 to vector<1x4xf32>
    %1820 = arith.subf %1819, %1818 : vector<1x4xf32>
    %cst_391 = arith.constant 1.000000e-01 : f32
    %1821 = vector.broadcast %cst_391 : f32 to vector<1x4xf32>
    %1822 = arith.mulf %1821, %1820 : vector<1x4xf32>
    %c41_i32 = arith.constant 41 : i32
    %1823 = vector.broadcast %1822 : vector<1x4xf32> to vector<4x4xf32>
    %1824 = arith.addf %590, %1823 : vector<4x4xf32>
    %cst_392 = arith.constant dense<0xFF800000> : vector<4xf32>
    %1825 = vector.multi_reduction <maximumf>, %1824, %cst_392 [1] : vector<4x4xf32> to vector<4xf32>
    %1826 = vector.shape_cast %1825 : vector<4xf32> to vector<4x1xf32>
    %1827 = vector.broadcast %1826 : vector<4x1xf32> to vector<4x4xf32>
    %1828 = arith.subf %1824, %1827 : vector<4x4xf32>
    %1829 = math.exp %1828 : vector<4x4xf32>
    %cst_393 = arith.constant dense<0.000000e+00> : vector<4xf32>
    %1830 = vector.multi_reduction <add>, %1829, %cst_393 [1] : vector<4x4xf32> to vector<4xf32>
    %1831 = vector.shape_cast %1830 : vector<4xf32> to vector<4x1xf32>
    %1832 = math.log %1831 : vector<4x1xf32>
    %1833 = arith.addf %1826, %1832 : vector<4x1xf32>
    %cst_394 = arith.constant -1.38629436 : f32
    %1834 = vector.broadcast %cst_394 : f32 to vector<4x1xf32>
    %1835 = arith.subf %1834, %1833 : vector<4x1xf32>
    %cst_395 = arith.constant 1.000000e-01 : f32
    %1836 = vector.broadcast %cst_395 : f32 to vector<4x1xf32>
    %1837 = arith.mulf %1836, %1835 : vector<4x1xf32>
    %1838 = vector.broadcast %1837 : vector<4x1xf32> to vector<4x4xf32>
    %1839 = arith.addf %590, %1838 : vector<4x4xf32>
    %cst_396 = arith.constant dense<0xFF800000> : vector<4xf32>
    %1840 = vector.multi_reduction <maximumf>, %1839, %cst_396 [0] : vector<4x4xf32> to vector<4xf32>
    %1841 = vector.shape_cast %1840 : vector<4xf32> to vector<1x4xf32>
    %1842 = vector.broadcast %1841 : vector<1x4xf32> to vector<4x4xf32>
    %1843 = arith.subf %1839, %1842 : vector<4x4xf32>
    %1844 = math.exp %1843 : vector<4x4xf32>
    %cst_397 = arith.constant dense<0.000000e+00> : vector<4xf32>
    %1845 = vector.multi_reduction <add>, %1844, %cst_397 [0] : vector<4x4xf32> to vector<4xf32>
    %1846 = vector.shape_cast %1845 : vector<4xf32> to vector<1x4xf32>
    %1847 = math.log %1846 : vector<1x4xf32>
    %1848 = arith.addf %1841, %1847 : vector<1x4xf32>
    %cst_398 = arith.constant -1.38629436 : f32
    %1849 = vector.broadcast %cst_398 : f32 to vector<1x4xf32>
    %1850 = arith.subf %1849, %1848 : vector<1x4xf32>
    %cst_399 = arith.constant 1.000000e-01 : f32
    %1851 = vector.broadcast %cst_399 : f32 to vector<1x4xf32>
    %1852 = arith.mulf %1851, %1850 : vector<1x4xf32>
    %c42_i32 = arith.constant 42 : i32
    %1853 = vector.broadcast %1852 : vector<1x4xf32> to vector<4x4xf32>
    %1854 = arith.addf %590, %1853 : vector<4x4xf32>
    %cst_400 = arith.constant dense<0xFF800000> : vector<4xf32>
    %1855 = vector.multi_reduction <maximumf>, %1854, %cst_400 [1] : vector<4x4xf32> to vector<4xf32>
    %1856 = vector.shape_cast %1855 : vector<4xf32> to vector<4x1xf32>
    %1857 = vector.broadcast %1856 : vector<4x1xf32> to vector<4x4xf32>
    %1858 = arith.subf %1854, %1857 : vector<4x4xf32>
    %1859 = math.exp %1858 : vector<4x4xf32>
    %cst_401 = arith.constant dense<0.000000e+00> : vector<4xf32>
    %1860 = vector.multi_reduction <add>, %1859, %cst_401 [1] : vector<4x4xf32> to vector<4xf32>
    %1861 = vector.shape_cast %1860 : vector<4xf32> to vector<4x1xf32>
    %1862 = math.log %1861 : vector<4x1xf32>
    %1863 = arith.addf %1856, %1862 : vector<4x1xf32>
    %cst_402 = arith.constant -1.38629436 : f32
    %1864 = vector.broadcast %cst_402 : f32 to vector<4x1xf32>
    %1865 = arith.subf %1864, %1863 : vector<4x1xf32>
    %cst_403 = arith.constant 1.000000e-01 : f32
    %1866 = vector.broadcast %cst_403 : f32 to vector<4x1xf32>
    %1867 = arith.mulf %1866, %1865 : vector<4x1xf32>
    %1868 = vector.broadcast %1867 : vector<4x1xf32> to vector<4x4xf32>
    %1869 = arith.addf %590, %1868 : vector<4x4xf32>
    %cst_404 = arith.constant dense<0xFF800000> : vector<4xf32>
    %1870 = vector.multi_reduction <maximumf>, %1869, %cst_404 [0] : vector<4x4xf32> to vector<4xf32>
    %1871 = vector.shape_cast %1870 : vector<4xf32> to vector<1x4xf32>
    %1872 = vector.broadcast %1871 : vector<1x4xf32> to vector<4x4xf32>
    %1873 = arith.subf %1869, %1872 : vector<4x4xf32>
    %1874 = math.exp %1873 : vector<4x4xf32>
    %cst_405 = arith.constant dense<0.000000e+00> : vector<4xf32>
    %1875 = vector.multi_reduction <add>, %1874, %cst_405 [0] : vector<4x4xf32> to vector<4xf32>
    %1876 = vector.shape_cast %1875 : vector<4xf32> to vector<1x4xf32>
    %1877 = math.log %1876 : vector<1x4xf32>
    %1878 = arith.addf %1871, %1877 : vector<1x4xf32>
    %cst_406 = arith.constant -1.38629436 : f32
    %1879 = vector.broadcast %cst_406 : f32 to vector<1x4xf32>
    %1880 = arith.subf %1879, %1878 : vector<1x4xf32>
    %cst_407 = arith.constant 1.000000e-01 : f32
    %1881 = vector.broadcast %cst_407 : f32 to vector<1x4xf32>
    %1882 = arith.mulf %1881, %1880 : vector<1x4xf32>
    %c43_i32 = arith.constant 43 : i32
    %1883 = vector.broadcast %1882 : vector<1x4xf32> to vector<4x4xf32>
    %1884 = arith.addf %590, %1883 : vector<4x4xf32>
    %cst_408 = arith.constant dense<0xFF800000> : vector<4xf32>
    %1885 = vector.multi_reduction <maximumf>, %1884, %cst_408 [1] : vector<4x4xf32> to vector<4xf32>
    %1886 = vector.shape_cast %1885 : vector<4xf32> to vector<4x1xf32>
    %1887 = vector.broadcast %1886 : vector<4x1xf32> to vector<4x4xf32>
    %1888 = arith.subf %1884, %1887 : vector<4x4xf32>
    %1889 = math.exp %1888 : vector<4x4xf32>
    %cst_409 = arith.constant dense<0.000000e+00> : vector<4xf32>
    %1890 = vector.multi_reduction <add>, %1889, %cst_409 [1] : vector<4x4xf32> to vector<4xf32>
    %1891 = vector.shape_cast %1890 : vector<4xf32> to vector<4x1xf32>
    %1892 = math.log %1891 : vector<4x1xf32>
    %1893 = arith.addf %1886, %1892 : vector<4x1xf32>
    %cst_410 = arith.constant -1.38629436 : f32
    %1894 = vector.broadcast %cst_410 : f32 to vector<4x1xf32>
    %1895 = arith.subf %1894, %1893 : vector<4x1xf32>
    %cst_411 = arith.constant 1.000000e-01 : f32
    %1896 = vector.broadcast %cst_411 : f32 to vector<4x1xf32>
    %1897 = arith.mulf %1896, %1895 : vector<4x1xf32>
    %1898 = vector.broadcast %1897 : vector<4x1xf32> to vector<4x4xf32>
    %1899 = arith.addf %590, %1898 : vector<4x4xf32>
    %cst_412 = arith.constant dense<0xFF800000> : vector<4xf32>
    %1900 = vector.multi_reduction <maximumf>, %1899, %cst_412 [0] : vector<4x4xf32> to vector<4xf32>
    %1901 = vector.shape_cast %1900 : vector<4xf32> to vector<1x4xf32>
    %1902 = vector.broadcast %1901 : vector<1x4xf32> to vector<4x4xf32>
    %1903 = arith.subf %1899, %1902 : vector<4x4xf32>
    %1904 = math.exp %1903 : vector<4x4xf32>
    %cst_413 = arith.constant dense<0.000000e+00> : vector<4xf32>
    %1905 = vector.multi_reduction <add>, %1904, %cst_413 [0] : vector<4x4xf32> to vector<4xf32>
    %1906 = vector.shape_cast %1905 : vector<4xf32> to vector<1x4xf32>
    %1907 = math.log %1906 : vector<1x4xf32>
    %1908 = arith.addf %1901, %1907 : vector<1x4xf32>
    %cst_414 = arith.constant -1.38629436 : f32
    %1909 = vector.broadcast %cst_414 : f32 to vector<1x4xf32>
    %1910 = arith.subf %1909, %1908 : vector<1x4xf32>
    %cst_415 = arith.constant 1.000000e-01 : f32
    %1911 = vector.broadcast %cst_415 : f32 to vector<1x4xf32>
    %1912 = arith.mulf %1911, %1910 : vector<1x4xf32>
    %c44_i32 = arith.constant 44 : i32
    %1913 = vector.broadcast %1912 : vector<1x4xf32> to vector<4x4xf32>
    %1914 = arith.addf %590, %1913 : vector<4x4xf32>
    %cst_416 = arith.constant dense<0xFF800000> : vector<4xf32>
    %1915 = vector.multi_reduction <maximumf>, %1914, %cst_416 [1] : vector<4x4xf32> to vector<4xf32>
    %1916 = vector.shape_cast %1915 : vector<4xf32> to vector<4x1xf32>
    %1917 = vector.broadcast %1916 : vector<4x1xf32> to vector<4x4xf32>
    %1918 = arith.subf %1914, %1917 : vector<4x4xf32>
    %1919 = math.exp %1918 : vector<4x4xf32>
    %cst_417 = arith.constant dense<0.000000e+00> : vector<4xf32>
    %1920 = vector.multi_reduction <add>, %1919, %cst_417 [1] : vector<4x4xf32> to vector<4xf32>
    %1921 = vector.shape_cast %1920 : vector<4xf32> to vector<4x1xf32>
    %1922 = math.log %1921 : vector<4x1xf32>
    %1923 = arith.addf %1916, %1922 : vector<4x1xf32>
    %cst_418 = arith.constant -1.38629436 : f32
    %1924 = vector.broadcast %cst_418 : f32 to vector<4x1xf32>
    %1925 = arith.subf %1924, %1923 : vector<4x1xf32>
    %cst_419 = arith.constant 1.000000e-01 : f32
    %1926 = vector.broadcast %cst_419 : f32 to vector<4x1xf32>
    %1927 = arith.mulf %1926, %1925 : vector<4x1xf32>
    %1928 = vector.broadcast %1927 : vector<4x1xf32> to vector<4x4xf32>
    %1929 = arith.addf %590, %1928 : vector<4x4xf32>
    %cst_420 = arith.constant dense<0xFF800000> : vector<4xf32>
    %1930 = vector.multi_reduction <maximumf>, %1929, %cst_420 [0] : vector<4x4xf32> to vector<4xf32>
    %1931 = vector.shape_cast %1930 : vector<4xf32> to vector<1x4xf32>
    %1932 = vector.broadcast %1931 : vector<1x4xf32> to vector<4x4xf32>
    %1933 = arith.subf %1929, %1932 : vector<4x4xf32>
    %1934 = math.exp %1933 : vector<4x4xf32>
    %cst_421 = arith.constant dense<0.000000e+00> : vector<4xf32>
    %1935 = vector.multi_reduction <add>, %1934, %cst_421 [0] : vector<4x4xf32> to vector<4xf32>
    %1936 = vector.shape_cast %1935 : vector<4xf32> to vector<1x4xf32>
    %1937 = math.log %1936 : vector<1x4xf32>
    %1938 = arith.addf %1931, %1937 : vector<1x4xf32>
    %cst_422 = arith.constant -1.38629436 : f32
    %1939 = vector.broadcast %cst_422 : f32 to vector<1x4xf32>
    %1940 = arith.subf %1939, %1938 : vector<1x4xf32>
    %cst_423 = arith.constant 1.000000e-01 : f32
    %1941 = vector.broadcast %cst_423 : f32 to vector<1x4xf32>
    %1942 = arith.mulf %1941, %1940 : vector<1x4xf32>
    %c45_i32 = arith.constant 45 : i32
    %1943 = vector.broadcast %1942 : vector<1x4xf32> to vector<4x4xf32>
    %1944 = arith.addf %590, %1943 : vector<4x4xf32>
    %cst_424 = arith.constant dense<0xFF800000> : vector<4xf32>
    %1945 = vector.multi_reduction <maximumf>, %1944, %cst_424 [1] : vector<4x4xf32> to vector<4xf32>
    %1946 = vector.shape_cast %1945 : vector<4xf32> to vector<4x1xf32>
    %1947 = vector.broadcast %1946 : vector<4x1xf32> to vector<4x4xf32>
    %1948 = arith.subf %1944, %1947 : vector<4x4xf32>
    %1949 = math.exp %1948 : vector<4x4xf32>
    %cst_425 = arith.constant dense<0.000000e+00> : vector<4xf32>
    %1950 = vector.multi_reduction <add>, %1949, %cst_425 [1] : vector<4x4xf32> to vector<4xf32>
    %1951 = vector.shape_cast %1950 : vector<4xf32> to vector<4x1xf32>
    %1952 = math.log %1951 : vector<4x1xf32>
    %1953 = arith.addf %1946, %1952 : vector<4x1xf32>
    %cst_426 = arith.constant -1.38629436 : f32
    %1954 = vector.broadcast %cst_426 : f32 to vector<4x1xf32>
    %1955 = arith.subf %1954, %1953 : vector<4x1xf32>
    %cst_427 = arith.constant 1.000000e-01 : f32
    %1956 = vector.broadcast %cst_427 : f32 to vector<4x1xf32>
    %1957 = arith.mulf %1956, %1955 : vector<4x1xf32>
    %1958 = vector.broadcast %1957 : vector<4x1xf32> to vector<4x4xf32>
    %1959 = arith.addf %590, %1958 : vector<4x4xf32>
    %cst_428 = arith.constant dense<0xFF800000> : vector<4xf32>
    %1960 = vector.multi_reduction <maximumf>, %1959, %cst_428 [0] : vector<4x4xf32> to vector<4xf32>
    %1961 = vector.shape_cast %1960 : vector<4xf32> to vector<1x4xf32>
    %1962 = vector.broadcast %1961 : vector<1x4xf32> to vector<4x4xf32>
    %1963 = arith.subf %1959, %1962 : vector<4x4xf32>
    %1964 = math.exp %1963 : vector<4x4xf32>
    %cst_429 = arith.constant dense<0.000000e+00> : vector<4xf32>
    %1965 = vector.multi_reduction <add>, %1964, %cst_429 [0] : vector<4x4xf32> to vector<4xf32>
    %1966 = vector.shape_cast %1965 : vector<4xf32> to vector<1x4xf32>
    %1967 = math.log %1966 : vector<1x4xf32>
    %1968 = arith.addf %1961, %1967 : vector<1x4xf32>
    %cst_430 = arith.constant -1.38629436 : f32
    %1969 = vector.broadcast %cst_430 : f32 to vector<1x4xf32>
    %1970 = arith.subf %1969, %1968 : vector<1x4xf32>
    %cst_431 = arith.constant 1.000000e-01 : f32
    %1971 = vector.broadcast %cst_431 : f32 to vector<1x4xf32>
    %1972 = arith.mulf %1971, %1970 : vector<1x4xf32>
    %c46_i32 = arith.constant 46 : i32
    %1973 = vector.broadcast %1972 : vector<1x4xf32> to vector<4x4xf32>
    %1974 = arith.addf %590, %1973 : vector<4x4xf32>
    %cst_432 = arith.constant dense<0xFF800000> : vector<4xf32>
    %1975 = vector.multi_reduction <maximumf>, %1974, %cst_432 [1] : vector<4x4xf32> to vector<4xf32>
    %1976 = vector.shape_cast %1975 : vector<4xf32> to vector<4x1xf32>
    %1977 = vector.broadcast %1976 : vector<4x1xf32> to vector<4x4xf32>
    %1978 = arith.subf %1974, %1977 : vector<4x4xf32>
    %1979 = math.exp %1978 : vector<4x4xf32>
    %cst_433 = arith.constant dense<0.000000e+00> : vector<4xf32>
    %1980 = vector.multi_reduction <add>, %1979, %cst_433 [1] : vector<4x4xf32> to vector<4xf32>
    %1981 = vector.shape_cast %1980 : vector<4xf32> to vector<4x1xf32>
    %1982 = math.log %1981 : vector<4x1xf32>
    %1983 = arith.addf %1976, %1982 : vector<4x1xf32>
    %cst_434 = arith.constant -1.38629436 : f32
    %1984 = vector.broadcast %cst_434 : f32 to vector<4x1xf32>
    %1985 = arith.subf %1984, %1983 : vector<4x1xf32>
    %cst_435 = arith.constant 1.000000e-01 : f32
    %1986 = vector.broadcast %cst_435 : f32 to vector<4x1xf32>
    %1987 = arith.mulf %1986, %1985 : vector<4x1xf32>
    %1988 = vector.broadcast %1987 : vector<4x1xf32> to vector<4x4xf32>
    %1989 = arith.addf %590, %1988 : vector<4x4xf32>
    %cst_436 = arith.constant dense<0xFF800000> : vector<4xf32>
    %1990 = vector.multi_reduction <maximumf>, %1989, %cst_436 [0] : vector<4x4xf32> to vector<4xf32>
    %1991 = vector.shape_cast %1990 : vector<4xf32> to vector<1x4xf32>
    %1992 = vector.broadcast %1991 : vector<1x4xf32> to vector<4x4xf32>
    %1993 = arith.subf %1989, %1992 : vector<4x4xf32>
    %1994 = math.exp %1993 : vector<4x4xf32>
    %cst_437 = arith.constant dense<0.000000e+00> : vector<4xf32>
    %1995 = vector.multi_reduction <add>, %1994, %cst_437 [0] : vector<4x4xf32> to vector<4xf32>
    %1996 = vector.shape_cast %1995 : vector<4xf32> to vector<1x4xf32>
    %1997 = math.log %1996 : vector<1x4xf32>
    %1998 = arith.addf %1991, %1997 : vector<1x4xf32>
    %cst_438 = arith.constant -1.38629436 : f32
    %1999 = vector.broadcast %cst_438 : f32 to vector<1x4xf32>
    %2000 = arith.subf %1999, %1998 : vector<1x4xf32>
    %cst_439 = arith.constant 1.000000e-01 : f32
    %2001 = vector.broadcast %cst_439 : f32 to vector<1x4xf32>
    %2002 = arith.mulf %2001, %2000 : vector<1x4xf32>
    %c47_i32 = arith.constant 47 : i32
    %2003 = vector.broadcast %2002 : vector<1x4xf32> to vector<4x4xf32>
    %2004 = arith.addf %590, %2003 : vector<4x4xf32>
    %cst_440 = arith.constant dense<0xFF800000> : vector<4xf32>
    %2005 = vector.multi_reduction <maximumf>, %2004, %cst_440 [1] : vector<4x4xf32> to vector<4xf32>
    %2006 = vector.shape_cast %2005 : vector<4xf32> to vector<4x1xf32>
    %2007 = vector.broadcast %2006 : vector<4x1xf32> to vector<4x4xf32>
    %2008 = arith.subf %2004, %2007 : vector<4x4xf32>
    %2009 = math.exp %2008 : vector<4x4xf32>
    %cst_441 = arith.constant dense<0.000000e+00> : vector<4xf32>
    %2010 = vector.multi_reduction <add>, %2009, %cst_441 [1] : vector<4x4xf32> to vector<4xf32>
    %2011 = vector.shape_cast %2010 : vector<4xf32> to vector<4x1xf32>
    %2012 = math.log %2011 : vector<4x1xf32>
    %2013 = arith.addf %2006, %2012 : vector<4x1xf32>
    %cst_442 = arith.constant -1.38629436 : f32
    %2014 = vector.broadcast %cst_442 : f32 to vector<4x1xf32>
    %2015 = arith.subf %2014, %2013 : vector<4x1xf32>
    %cst_443 = arith.constant 1.000000e-01 : f32
    %2016 = vector.broadcast %cst_443 : f32 to vector<4x1xf32>
    %2017 = arith.mulf %2016, %2015 : vector<4x1xf32>
    %2018 = vector.broadcast %2017 : vector<4x1xf32> to vector<4x4xf32>
    %2019 = arith.addf %590, %2018 : vector<4x4xf32>
    %cst_444 = arith.constant dense<0xFF800000> : vector<4xf32>
    %2020 = vector.multi_reduction <maximumf>, %2019, %cst_444 [0] : vector<4x4xf32> to vector<4xf32>
    %2021 = vector.shape_cast %2020 : vector<4xf32> to vector<1x4xf32>
    %2022 = vector.broadcast %2021 : vector<1x4xf32> to vector<4x4xf32>
    %2023 = arith.subf %2019, %2022 : vector<4x4xf32>
    %2024 = math.exp %2023 : vector<4x4xf32>
    %cst_445 = arith.constant dense<0.000000e+00> : vector<4xf32>
    %2025 = vector.multi_reduction <add>, %2024, %cst_445 [0] : vector<4x4xf32> to vector<4xf32>
    %2026 = vector.shape_cast %2025 : vector<4xf32> to vector<1x4xf32>
    %2027 = math.log %2026 : vector<1x4xf32>
    %2028 = arith.addf %2021, %2027 : vector<1x4xf32>
    %cst_446 = arith.constant -1.38629436 : f32
    %2029 = vector.broadcast %cst_446 : f32 to vector<1x4xf32>
    %2030 = arith.subf %2029, %2028 : vector<1x4xf32>
    %cst_447 = arith.constant 1.000000e-01 : f32
    %2031 = vector.broadcast %cst_447 : f32 to vector<1x4xf32>
    %2032 = arith.mulf %2031, %2030 : vector<1x4xf32>
    %c48_i32 = arith.constant 48 : i32
    %2033 = vector.broadcast %2032 : vector<1x4xf32> to vector<4x4xf32>
    %2034 = arith.addf %590, %2033 : vector<4x4xf32>
    %cst_448 = arith.constant dense<0xFF800000> : vector<4xf32>
    %2035 = vector.multi_reduction <maximumf>, %2034, %cst_448 [1] : vector<4x4xf32> to vector<4xf32>
    %2036 = vector.shape_cast %2035 : vector<4xf32> to vector<4x1xf32>
    %2037 = vector.broadcast %2036 : vector<4x1xf32> to vector<4x4xf32>
    %2038 = arith.subf %2034, %2037 : vector<4x4xf32>
    %2039 = math.exp %2038 : vector<4x4xf32>
    %cst_449 = arith.constant dense<0.000000e+00> : vector<4xf32>
    %2040 = vector.multi_reduction <add>, %2039, %cst_449 [1] : vector<4x4xf32> to vector<4xf32>
    %2041 = vector.shape_cast %2040 : vector<4xf32> to vector<4x1xf32>
    %2042 = math.log %2041 : vector<4x1xf32>
    %2043 = arith.addf %2036, %2042 : vector<4x1xf32>
    %cst_450 = arith.constant -1.38629436 : f32
    %2044 = vector.broadcast %cst_450 : f32 to vector<4x1xf32>
    %2045 = arith.subf %2044, %2043 : vector<4x1xf32>
    %cst_451 = arith.constant 1.000000e-01 : f32
    %2046 = vector.broadcast %cst_451 : f32 to vector<4x1xf32>
    %2047 = arith.mulf %2046, %2045 : vector<4x1xf32>
    %2048 = vector.broadcast %2047 : vector<4x1xf32> to vector<4x4xf32>
    %2049 = arith.addf %590, %2048 : vector<4x4xf32>
    %cst_452 = arith.constant dense<0xFF800000> : vector<4xf32>
    %2050 = vector.multi_reduction <maximumf>, %2049, %cst_452 [0] : vector<4x4xf32> to vector<4xf32>
    %2051 = vector.shape_cast %2050 : vector<4xf32> to vector<1x4xf32>
    %2052 = vector.broadcast %2051 : vector<1x4xf32> to vector<4x4xf32>
    %2053 = arith.subf %2049, %2052 : vector<4x4xf32>
    %2054 = math.exp %2053 : vector<4x4xf32>
    %cst_453 = arith.constant dense<0.000000e+00> : vector<4xf32>
    %2055 = vector.multi_reduction <add>, %2054, %cst_453 [0] : vector<4x4xf32> to vector<4xf32>
    %2056 = vector.shape_cast %2055 : vector<4xf32> to vector<1x4xf32>
    %2057 = math.log %2056 : vector<1x4xf32>
    %2058 = arith.addf %2051, %2057 : vector<1x4xf32>
    %cst_454 = arith.constant -1.38629436 : f32
    %2059 = vector.broadcast %cst_454 : f32 to vector<1x4xf32>
    %2060 = arith.subf %2059, %2058 : vector<1x4xf32>
    %cst_455 = arith.constant 1.000000e-01 : f32
    %2061 = vector.broadcast %cst_455 : f32 to vector<1x4xf32>
    %2062 = arith.mulf %2061, %2060 : vector<1x4xf32>
    %c49_i32 = arith.constant 49 : i32
    %2063 = vector.broadcast %2062 : vector<1x4xf32> to vector<4x4xf32>
    %2064 = arith.addf %590, %2063 : vector<4x4xf32>
    %cst_456 = arith.constant dense<0xFF800000> : vector<4xf32>
    %2065 = vector.multi_reduction <maximumf>, %2064, %cst_456 [1] : vector<4x4xf32> to vector<4xf32>
    %2066 = vector.shape_cast %2065 : vector<4xf32> to vector<4x1xf32>
    %2067 = vector.broadcast %2066 : vector<4x1xf32> to vector<4x4xf32>
    %2068 = arith.subf %2064, %2067 : vector<4x4xf32>
    %2069 = math.exp %2068 : vector<4x4xf32>
    %cst_457 = arith.constant dense<0.000000e+00> : vector<4xf32>
    %2070 = vector.multi_reduction <add>, %2069, %cst_457 [1] : vector<4x4xf32> to vector<4xf32>
    %2071 = vector.shape_cast %2070 : vector<4xf32> to vector<4x1xf32>
    %2072 = math.log %2071 : vector<4x1xf32>
    %2073 = arith.addf %2066, %2072 : vector<4x1xf32>
    %cst_458 = arith.constant -1.38629436 : f32
    %2074 = vector.broadcast %cst_458 : f32 to vector<4x1xf32>
    %2075 = arith.subf %2074, %2073 : vector<4x1xf32>
    %cst_459 = arith.constant 1.000000e-01 : f32
    %2076 = vector.broadcast %cst_459 : f32 to vector<4x1xf32>
    %2077 = arith.mulf %2076, %2075 : vector<4x1xf32>
    %2078 = vector.broadcast %2077 : vector<4x1xf32> to vector<4x4xf32>
    %2079 = arith.addf %590, %2078 : vector<4x4xf32>
    %cst_460 = arith.constant dense<0xFF800000> : vector<4xf32>
    %2080 = vector.multi_reduction <maximumf>, %2079, %cst_460 [0] : vector<4x4xf32> to vector<4xf32>
    %2081 = vector.shape_cast %2080 : vector<4xf32> to vector<1x4xf32>
    %2082 = vector.broadcast %2081 : vector<1x4xf32> to vector<4x4xf32>
    %2083 = arith.subf %2079, %2082 : vector<4x4xf32>
    %2084 = math.exp %2083 : vector<4x4xf32>
    %cst_461 = arith.constant dense<0.000000e+00> : vector<4xf32>
    %2085 = vector.multi_reduction <add>, %2084, %cst_461 [0] : vector<4x4xf32> to vector<4xf32>
    %2086 = vector.shape_cast %2085 : vector<4xf32> to vector<1x4xf32>
    %2087 = math.log %2086 : vector<1x4xf32>
    %2088 = arith.addf %2081, %2087 : vector<1x4xf32>
    %cst_462 = arith.constant -1.38629436 : f32
    %2089 = vector.broadcast %cst_462 : f32 to vector<1x4xf32>
    %2090 = arith.subf %2089, %2088 : vector<1x4xf32>
    %cst_463 = arith.constant 1.000000e-01 : f32
    %2091 = vector.broadcast %cst_463 : f32 to vector<1x4xf32>
    %2092 = arith.mulf %2091, %2090 : vector<1x4xf32>
    %2093 = vector.broadcast %2077 : vector<4x1xf32> to vector<4x4xf32>
    %2094 = vector.broadcast %2092 : vector<1x4xf32> to vector<4x4xf32>
    %2095 = arith.addf %2093, %2094 : vector<4x4xf32>
    %2096 = arith.subf %2095, %588 : vector<4x4xf32>
    %cst_464 = arith.constant 1.000000e+01 : f32
    %2097 = vector.broadcast %cst_464 : f32 to vector<4x4xf32>
    %2098 = arith.mulf %2096, %2097 : vector<4x4xf32>
    %2099 = math.exp %2098 : vector<4x4xf32>
    %2100 = arith.mulf %2099, %588 : vector<4x4xf32>
    %2101 = vector.shape_cast %2100 : vector<4x4xf32> to vector<1x4x4xf32>
    %cst_465 = arith.constant dense<0.000000e+00> : vector<1xf32>
    %2102 = vector.multi_reduction <add>, %2101, %cst_465 [1, 2] : vector<1x4x4xf32> to vector<1xf32>
    %2103 = vector.shape_cast %2102 : vector<1xf32> to vector<1x1x1xf32>
    %2104 = vector.extract %2103[0, 0, 0] : f32 from vector<1x1x1xf32>
    %cst_466 = arith.constant 0.000000e+00 : f32
    %cst_467 = arith.constant 1.000000e+02 : f32
    %2105 = arith.maximumf %cst_466, %2104 : f32
    %2106 = arith.minimumf %cst_467, %2105 : f32
    %cst_468 = arith.constant 0.000000e+00 : f32
    %cst_469 = arith.constant 1.000000e+02 : f32
    %2107 = arith.maximumf %cst_468, %61 : f32
    %2108 = arith.minimumf %cst_469, %2107 : f32
    %2109 = math.tanh %2106 : f32
    %2110 = arith.mulf %0, %2109 : f32
    %2111 = arith.addf %37, %2110 : f32
    %2112 = math.tanh %2108 : f32
    %2113 = arith.mulf %1, %2112 : f32
    %2114 = arith.addf %2111, %2113 : f32
    %2115 = arith.mulf %2, %2114 : f32
    %2116 = tpu.iota {dimensions = array<i32: 1>} : vector<1x128xi32>
    %c0_i32_470 = arith.constant 0 : i32
    %2117 = vector.broadcast %c0_i32_470 : i32 to vector<1x128xi32>
    %2118 = arith.cmpi eq, %2116, %2117 : vector<1x128xi32>
    %cst_471 = arith.constant 0.000000e+00 : f32
    %2119 = vector.broadcast %37 : f32 to vector<1x128xf32>
    %2120 = vector.broadcast %cst_471 : f32 to vector<1x128xf32>
    %2121 = arith.select %2118, %2119, %2120 : vector<1x128xi1>, vector<1x128xf32>
    %c1_i32_472 = arith.constant 1 : i32
    %2122 = vector.broadcast %c1_i32_472 : i32 to vector<1x128xi32>
    %2123 = arith.cmpi eq, %2116, %2122 : vector<1x128xi32>
    %2124 = vector.broadcast %2106 : f32 to vector<1x128xf32>
    %2125 = arith.select %2123, %2124, %2121 : vector<1x128xi1>, vector<1x128xf32>
    %c2_i32_473 = arith.constant 2 : i32
    %2126 = vector.broadcast %c2_i32_473 : i32 to vector<1x128xi32>
    %2127 = arith.cmpi eq, %2116, %2126 : vector<1x128xi32>
    %2128 = vector.broadcast %2108 : f32 to vector<1x128xf32>
    %2129 = arith.select %2127, %2128, %2125 : vector<1x128xi1>, vector<1x128xf32>
    %c3_i32_474 = arith.constant 3 : i32
    %2130 = vector.broadcast %c3_i32_474 : i32 to vector<1x128xi32>
    %2131 = arith.cmpi eq, %2116, %2130 : vector<1x128xi32>
    %2132 = vector.broadcast %2115 : f32 to vector<1x128xf32>
    %2133 = arith.select %2131, %2132, %2129 : vector<1x128xi1>, vector<1x128xf32>
    %c0_475 = arith.constant 0 : index
    %c0_476 = arith.constant 0 : index
    %2134 = vector.load %arg6[%c0_475, %c0_476] : memref<1x128xf32, #tpu.memory_space<vmem>>, vector<1x128xf32>
    tpu.vector_store %arg6[%c0_475, %c0_476], %2133 {strides = array<i32>} : memref<1x128xf32, #tpu.memory_space<vmem>>, vector<1x128xf32>,
    return
  }
  func.func @transform_0(%arg0: i32) -> i32 {
    %c0_i32 = arith.constant 0 : i32
    %c0_i32_0 = arith.constant 0 : i32
    return %c0_i32 : i32
  }
  func.func @transform_1(%arg0: i32) -> (i32, i32) {
    %c0_i32 = arith.constant 0 : i32
    %c0_i32_0 = arith.constant 0 : i32
    %c0_i32_1 = arith.constant 0 : i32
    return %c0_i32, %c0_i32_0 : i32, i32
  }
  func.func @transform_2(%arg0: i32) -> (i32, i32) {
    %c0_i32 = arith.constant 0 : i32
    %c0_i32_0 = arith.constant 0 : i32
    %c0_i32_1 = arith.constant 0 : i32
    return %c0_i32, %c0_i32_0 : i32, i32
  }
  func.func @transform_3(%arg0: i32) -> (i32, i32, i32) {
    %c0_i32 = arith.constant 0 : i32
    %c0_i32_0 = arith.constant 0 : i32
    %c0_i32_1 = arith.constant 0 : i32
    %c0_i32_2 = arith.constant 0 : i32
    return %c0_i32, %c0_i32_0, %c0_i32_1 : i32, i32, i32
  }
  func.func @transform_4(%arg0: i32) -> (i32, i32, i32) {
    %c0_i32 = arith.constant 0 : i32
    %c0_i32_0 = arith.constant 0 : i32
    %c0_i32_1 = arith.constant 0 : i32
    %c0_i32_2 = arith.constant 0 : i32
    return %c0_i32, %c0_i32_0, %c0_i32_1 : i32, i32, i32
  }
  func.func @transform_5(%arg0: i32) -> (i32, i32) {
    %c0_i32 = arith.constant 0 : i32
    %c0_i32_0 = arith.constant 0 : i32
    %c0_i32_1 = arith.constant 0 : i32
    return %c0_i32, %c0_i32_0 : i32, i32
  }
}

</mosaic_0001>

<bundles_post_ra>
// kernel: _modality_forward.1
= control target key start
LH: loop header
LB: loop body
LE: loop exit
PB: predicated region body
PF: predicated region fallthrough
CT: control target
= control target key end

     0   :  { %10 = vsyncpa [#allocation4], 0  ;;  %s6665_s0 = inlined_call_operand.hbm [shape: f32[4], index: 0, kind: input, shape index: {}]   ;;  %s6666_s1 = inlined_call_operand.hbm [shape: f32[4,8], index: 1, kind: input, shape index: {}]   ;;  %s6667_s2 = inlined_call_operand.hbm [shape: f32[4,8], index: 2, kind: input, shape index: {}]   ;;  %s6668_s3 = inlined_call_operand.hbm [shape: f32[4,8,16], index: 3, kind: input, shape index: {}]   ;;  %s6669_s4 = inlined_call_operand.hbm [shape: f32[4,8,8], index: 4, kind: input, shape index: {}]   ;;  %s6670_s5 = inlined_call_operand.vmem [shape: f32[1,128], index: 5, kind: output, shape index: {}]  }
   0x1   :  { %11 = vsyncpa [#allocation3], 0 }
   0x2   :  { %12 = vsyncpa [#allocation7], 0 }
   0x3   :  { %13 = vsyncpa [#allocation10], 0  ;;  %s5163_s18 = smov [#allocation6]   ;;  %s5164_s20 = smov [#allocation5]  }
   0x4   :  { %s38_s19 = sshll.u32 %s5163_s18, 4  ;;  %s28_s21 = sshll.u32 %s5164_s20, 4  ;;  %s39_s19 = int_to_ptr.vmem [resolvable:$true] %s38_s19  ;;  %s29_s21 = int_to_ptr.vmem [resolvable:$true] %s28_s21 }
   0x5   :  { %s5075_s22 = scalar_lea.vmem %s39_s19, 64  ;;  %p5080_p1 = scmp.lt.s32.totalorder %s39_s19, %s39_s19 }
   0x6   :  { %p5076_p0 = scmp.ne.s32.totalorder %s39_s19, %s5075_s22  ;;  %p5081_p2 = scmp.lt.s32.totalorder %s5075_s22, %s5075_s22 }
   0x8   :  { %p5082_p3 = por %p5081_p2, %p5080_p1 }
   0xa   :  { %p5083_p4 = pnand %p5082_p3, %p5076_p0 }
   0xc   :  { %5086 = shalt.err (!%p5083_p4)
}
   0xd   :  { %41 = dma.hbm_to_vmem [thread:$0]  %s6667_s2, 64, %s39_s19, [#allocation7]  }
   0xe   :  { %s5165_s25 = smov [#allocation2]   ;;  %s5103_s28 = scalar_lea.vmem %s29_s21, 64 }
   0xf   :  { %21 = dma.hbm_to_smem %s6665_s0, 16, %s5165_s25, [#allocation4]  }
  0x10   :  { %p5104_p5 = scmp.ne.s32.totalorder %s29_s21, %s5103_s28  ;;  %p5108_p6 = scmp.lt.s32.totalorder %s29_s21, %s29_s21 }
  0x11   :  { %p5109_p7 = scmp.lt.s32.totalorder %s5103_s28, %s5103_s28 }
  0x13   :  { %p5110_p8 = por %p5109_p7, %p5108_p6 }
  0x15   :  { %p5111_p9 = pnand %p5110_p8, %p5104_p5 }
  0x17   :  { %5114 = shalt.err (!%p5111_p9)
}
  0x18   :  { %31 = dma.hbm_to_vmem [thread:$0]  %s6666_s1, 64, %s29_s21, [#allocation3]  }
  0x19   :  { %s5166_s6 = smov [#allocation8]  }
  0x1a   :  { %s47_s7 = sshll.u32 %s5166_s6, 4  ;;  %s48_s7 = int_to_ptr.vmem [resolvable:$true] %s47_s7 }
  0x1b   :  { %s5123_s2 = scalar_lea.vmem %s48_s7, 512  ;;  %p5128_p11 = scmp.lt.s32.totalorder %s48_s7, %s48_s7 }
  0x1c   :  { %p5124_p10 = scmp.ne.s32.totalorder %s48_s7, %s5123_s2  ;;  %p5129_p12 = scmp.lt.s32.totalorder %s5123_s2, %s5123_s2 }
  0x1e   :  { %p5130_p13 = por %p5129_p12, %p5128_p11 }
  0x20   :  { %p5131_p0 = pnand %p5130_p13, %p5124_p10 }
  0x22   :  { %5134 = shalt.err (!%p5131_p0)
}
  0x23   :  { %s5167_s0 = smov 128   ;;  %s5168_s8 = smov 8  }
  0x24   :  { %53 = dma.hbm_to_vmem [thread:$0]  %s6668_s3, 512, %s48_s7, [#allocation7], %s5167_s0, %s5167_s0, %s5168_s8  }
  0x25   :  { %s5169_s11 = smov [#allocation9]  }
  0x26   :  { %s59_s12 = sshll.u32 %s5169_s11, 4  ;;  %s60_s12 = int_to_ptr.vmem [resolvable:$true] %s59_s12 }
  0x27   :  { %s5143_s1 = scalar_lea.vmem %s60_s12, 512  ;;  %p5148_p2 = scmp.lt.s32.totalorder %s60_s12, %s60_s12 }
  0x28   :  { %p5144_p1 = scmp.ne.s32.totalorder %s60_s12, %s5143_s1  ;;  %p5149_p3 = scmp.lt.s32.totalorder %s5143_s1, %s5143_s1 }
  0x2a   :  { %p5150_p4 = por %p5149_p3, %p5148_p2 }
  0x2c   :  { %p5151_p5 = pnand %p5150_p4, %p5144_p1 }
  0x2e   :  { %5154 = shalt.err (!%p5151_p5)
}
  0x2f   :  { %65 = dma.hbm_to_vmem [thread:$0]  %s6669_s4, 512, %s60_s12, [#allocation10], %s5167_s0, %s5167_s0, %s5168_s8  }
  0x30   :  { %5155 = dma.done.wait [#allocation4], 16  }
  0x31   :  { %5156 = vsyncadd [#allocation4], 4294967280 }
  0x32   :  { %5157 = dma.done.wait [#allocation3], 64  }
  0x33   :  { %5158 = vsyncadd [#allocation3], 4294967232 }
  0x34   :  { %5159 = dma.done.wait [#allocation7], 576  }
  0x35   :  { %5160 = vsyncadd [#allocation7], 4294966720 }
  0x36   :  { %5161 = dma.done.wait [#allocation10], 512  }
  0x37   :  { %5162 = vsyncadd [#allocation10], 4294966784 }
  0x38   :  { %81 = sfence }
  0x39   :  { %v119_v0 = vld [vmem:[#allocation8 + $0x10] sm:$0xff]  ;;  %vm129_vm0 = vcmask 130048   ;;  %v117_v1 = vld [vmem:[#allocation8] sm:$0xff]  ;;  %v120_v2 = vld [vmem:[#allocation8 + $0x18] sm:$0xff]  ;;  %vm158_vm1 = vcmask 64512   ;;  %vm267_vm2 = vcmask 1041409  }
  0x3a   :  { %v127_v3 = vmul.f32 %v119_v0, %v119_v0  ;;  %v125_v4 = vmul.f32 %v117_v1, %v117_v1  ;;  %v128_v5 = vmul.f32 %v120_v2, %v120_v2  ;;  %v118_v6 = vld [vmem:[#allocation8 + $0x8] sm:$0xff]  ;;  %v5267_v36 = vld [vmem:[#allocation9 + $0x10] sm:$0xff]  ;;  %v5269_v37 = vld [vmem:[#allocation9] sm:$0xff]  ;;  %vm270_vm3 = vcmask 1042434   ;;  %s5170_s3 = smov 24   ;;  %s5171_s4 = smov 40  }
  0x3b   :  { %v126_v7 = vmul.f32 %v118_v6, %v118_v6  ;;  %v5253_v28 = vld [vmem:[#allocation9 + $0x8] sm:$0xff]  ;;  %v156_v41 = vmul.f32 %v5267_v36, %v5267_v36  ;;  %v154_v42 = vmul.f32 %v5269_v37, %v5269_v37  ;;  %v5278_v43 = vld [vmem:[#allocation9 + $0x18] sm:$0xff]  ;;  %vm273_vm4 = vcmask 1043459   ;;  %s5172_s15 = smov 16   ;;  %s5173_s16 = smov 56  }
  0x3c   :  { %v136_v8 = vsel %vm129_vm0, %v127_v3, 0.0  ;;  %v130_v9 = vsel %vm129_vm0, %v125_v4, 0.0  ;;  %v139_v10 = vsel %vm129_vm0, %v128_v5, 0.0  ;;  %v155_v34 = vmul.f32 %v5253_v28, %v5253_v28  ;;  %s5174_s17 = smov 32   ;;  %s5175_s18 = smov 64  }
  0x3d   :  { %137 = vadd.xlane.f32.xlu1 %v136_v8  ;;  %131 = vadd.xlane.f32.xlu0 %v130_v9  ;;  %v133_v11 = vsel %vm129_vm0, %v126_v7, 0.0  ;;  %v165_v44 = vsel %vm158_vm1, %v156_v41, 0.0  ;;  %v159_v45 = vsel %vm158_vm1, %v154_v42, 0.0  ;;  %v157_v46 = vmul.f32 %v5278_v43, %v5278_v43  ;;  %s5176_s19 = smov 48   ;;  %s5177_s20 = smov 96  }
  0x3e   :  { %v162_v39 = vsel %vm158_vm1, %v155_v34, 0.0  ;;  %vm6672_vm13 = vcmask 1046534   ;;  %vm278_vm14 = vcmask 1045509   ;;  %vm6671_vm15 = vcmask 1047559   ;;  %s5178_s21 = smov 80   ;;  %s5179_s22 = smov 112  }
  0x3f   :  { %v168_v47 = vsel %vm158_vm1, %v157_v46, 0.0  ;;  %s5182_s23 = smov 124   ;;  %s5183_s24 = smov 120  }
  0x40   :  { %s5184_s25 = smov 116   ;;  %s5185_s26 = smov 104  }
  0x41   :  { %140 = vadd.xlane.f32.xlu1 %v139_v10  ;;  %134 = vadd.xlane.f32.xlu0 %v133_v11  ;;  %s5186_s27 = smov 108   ;;  %s5187_s28 = smov 100  }
  0x42   :  { %s5188_s29 = smov 4   ;;  %s5189_s30 = smov 20  }
  0x43   :  { %s5190_s6 = smov 12   ;;  %s5191_s7 = smov 28  }
  0x44   :  { %s5192_s10 = smov 0.0   ;;  %s5193_s12 = smov 100.0  }
  0xc6   :  { %v138_v12 = vpop.xlane.xlu1 %137  ;;  %v132_v13 = vpop.xlane.xlu0 %131 }
  0xc7   :  { %v144_v14 = vmax.f32 %v138_v12, 1e-24  ;;  %v142_v15 = vmax.f32 %v132_v13, 1e-24 }
  0xc9   :  { %4609 = vrsqrt.f32 %v144_v14 }
  0xca   :  { %4611 = vrsqrt.f32 %v142_v15  ;;  %v141_v16 = vpop.xlane.xlu1 %140  ;;  %v135_v17 = vpop.xlane.xlu0 %134 }
  0xcb   :  { %v145_v18 = vmax.f32 %v141_v16, 1e-24  ;;  %v143_v19 = vmax.f32 %v135_v17, 1e-24 }
  0xcd   :  { %4613 = vrsqrt.f32 %v145_v18 }
  0xce   :  { %4615 = vrsqrt.f32 %v143_v19 }
  0xd6   :  { %v4610_v20 = vpop.eup %4609 }
  0xd7   :  { %v4612_v21 = vpop.eup %4611  ;;  %v5245_v22 = vmul.f32 %v4610_v20, %v119_v0 }
  0xd8   :  { %v5247_v23 = vmul.f32 %v4612_v21, %v117_v1 }
  0xd9   :  { %v208_v26 = vmul.f32 %v5245_v22, %v5245_v22  ;;  %v2325_v56 = vrot.slane %v5245_v22, 7  ;;  %v2353_v58 = vrot.slane %v5245_v22, 2  ;;  %v2373_v63 = vrot.slane %v5245_v22, 4 }
  0xda   :  { %v4614_v24 = vpop.eup %4613  ;;  %v206_v25 = vmul.f32 %v5247_v23, %v5247_v23  ;;  %v2323_v55 = vrot.slane %v5247_v23, 1  ;;  %v2350_v57 = vrot.slane %v5247_v23, 4  ;;  %v2332_v59 = vrot.slane %v5247_v23, 2 }
  0xdb   :  { %v4616_v27 = vpop.eup %4615  ;;  %v5255_v29 = vmul.f32 %v4614_v24, %v120_v2  ;;  %v216_v32 = vsel %vm129_vm0, %v208_v26, 0.0  ;;  %v2370_v62 = vrot.slane %v5247_v23, 6  ;;  %v2341_v3 = vrot.slane %v5247_v23, 3 }
  0xdc   :  { %v5257_v30 = vmul.f32 %v4616_v27, %v118_v6  ;;  %v210_v31 = vsel %vm129_vm0, %v206_v25, 0.0  ;;  %v2344_v7 = vrot.slane %v5245_v22, 1  ;;  %v2360_v8 = vrot.slane %v5247_v23, 5 }
  0xdd   :  { %211 = vadd.xlane.f32.xlu0 %v210_v31  ;;  %v209_v35 = vmul.f32 %v5255_v29, %v5255_v29  ;;  %v2327_v6 = vrot.slane %v5255_v29, 6  ;;  %v2355_v12 = vrot.slane %v5255_v29, 1  ;;  %v2336_v16 = vrot.slane %v5255_v29, 7 }
  0xde   :  { %v207_v33 = vmul.f32 %v5257_v30, %v5257_v30  ;;  %v2351_v51 = vrot.slane %v5257_v30, 3  ;;  %v2333_v52 = vrot.slane %v5257_v30, 1  ;;  %v2324_v61 = vsel %vm267_vm2, %v5257_v30, %v2323_v55 }
  0xdf   :  { %v219_v40 = vsel %vm129_vm0, %v209_v35, 0.0  ;;  %v2371_v2 = vrot.slane %v5257_v30, 5  ;;  %v2326_v11 = vsel %vm270_vm3, %v2325_v56, %v2324_v61  ;;  %v2375_v17 = vrot.slane %v5255_v29, 3 }
  0xe0   :  { %v213_v38 = vsel %vm129_vm0, %v207_v33, 0.0  ;;  %v2352_v0 = vsel %vm267_vm2, %v2351_v51, %v2350_v57  ;;  %v2334_v1 = vsel %vm267_vm2, %v2333_v52, %v2332_v59  ;;  %v2342_v20 = vrot.slane %v5257_v30, 2 }
  0xe1   :  { %217 = vadd.xlane.f32.xlu0 %v216_v32  ;;  %214 = vadd.xlane.f32.xlu1 %v213_v38  ;;  %v2354_v14 = vsel %vm270_vm3, %v2353_v58, %v2352_v0  ;;  %v2335_v15 = vsel %vm270_vm3, %v5245_v22, %v2334_v1  ;;  %v2372_v19 = vsel %vm267_vm2, %v2371_v2, %v2370_v62  ;;  %v2361_v38 = vrot.slane %v5257_v30, 4 }
  0xe2   :  { %v5322_v25 = vsel %vm273_vm4, %v2327_v6, %v2326_v11  ;;  %v5325_v31 = vsel %vm273_vm4, %v2355_v12, %v2354_v14  ;;  %v5328_v34 = vsel %vm273_vm4, %v2336_v16, %v2335_v15  ;;  %v2374_v35 = vsel %vm270_vm3, %v2373_v63, %v2372_v19 }
  0xe3   :  { %v2343_v41 = vsel %vm267_vm2, %v2342_v20, %v2341_v3  ;;  %v2363_v42 = vrot.slane %v5245_v22, 3  ;;  %v2381_v59 = vrot.slane %v5257_v30, 6  ;;  %v2362_v61 = vsel %vm267_vm2, %v2361_v38, %v2360_v8 }
  0xe4   :  { %v2345_v55 = vsel %vm270_vm3, %v2344_v7, %v2343_v41  ;;  %v2365_v2 = vrot.slane %v5255_v29, 2  ;;  %v2383_v3 = vrot.slane %v5245_v22, 5  ;;  %v5363_v8 = vsel %vm273_vm4, %v2375_v17, %v2374_v35 }
  0xe5   :  { %163 = vadd.xlane.f32.xlu0 %v162_v39  ;;  %220 = vadd.xlane.f32.xlu1 %v219_v40  ;;  %v2385_v16 = vrot.slane %v5255_v29, 4 }
  0xe9   :  { %166 = vadd.xlane.f32.xlu0 %v165_v44  ;;  %160 = vadd.xlane.f32.xlu1 %v159_v45 }
  0xed   :  { %169 = vadd.xlane.f32.xlu1 %v168_v47 }
 0x166   :  { %v212_v48 = vpop.xlane.xlu0 %211 }
 0x167   :  { %4617 = vrsqrt.f32 %v212_v48  ;;  %vm224_vm5 = vcmp.eq.f32.partialorder %v212_v48, inf  ;;  %v227_v21 = vand.u32 2147483648, %v212_v48  ;;  %vm226_vm6 = vcmp.eq.f32.partialorder %v212_v48, 0.0 }
 0x16a   :  { %v5285_v49 = vpop.xlane.xlu1 %214  ;;  %v5287_v50 = vpop.xlane.xlu0 %217 }
 0x16b   :  { %4619 = vrsqrt.f32 %v5285_v49  ;;  %vm231_vm7 = vcmp.eq.f32.partialorder %v5285_v49, inf  ;;  %vm233_vm8 = vcmp.eq.f32.partialorder %v5285_v49, 0.0  ;;  %v234_v44 = vand.u32 2147483648, %v5285_v49 }
 0x16c   :  { %4621 = vrsqrt.f32 %v5287_v50  ;;  %vm238_vm9 = vcmp.eq.f32.partialorder %v5287_v50, inf  ;;  %vm240_vm10 = vcmp.eq.f32.partialorder %v5287_v50, 0.0 }
 0x16e   :  { %v5293_v53 = vpop.xlane.xlu1 %220  ;;  %v164_v54 = vpop.xlane.xlu0 %163 }
 0x16f   :  { %4623 = vrsqrt.f32 %v5293_v53  ;;  %v172_v60 = vmax.f32 %v164_v54, 1e-24  ;;  %vm245_vm11 = vcmp.eq.f32.partialorder %v5293_v53, inf  ;;  %vm247_vm12 = vcmp.eq.f32.partialorder %v5293_v53, 0.0 }
 0x171   :  { %4625 = vrsqrt.f32 %v172_v60 }
 0x172   :  { %v161_v4 = vpop.xlane.xlu1 %160  ;;  %v167_v5 = vpop.xlane.xlu0 %166 }
 0x173   :  { %v171_v9 = vmax.f32 %v161_v4, 1e-24  ;;  %v173_v10 = vmax.f32 %v167_v5, 1e-24  ;;  %v2364_v5 = vsel %vm270_vm3, %v2363_v42, %v2362_v61 }
 0x174   :  { %v4618_v13 = vpop.eup %4617  ;;  %v5377_v14 = vsel %vm273_vm4, %v2365_v2, %v2364_v5 }
 0x175   :  { %v223_v18 = vmul.f32 %v4618_v13, %v212_v48  ;;  %4627 = vrsqrt.f32 %v171_v9 }
 0x176   :  { %4629 = vrsqrt.f32 %v173_v10  ;;  %v170_v24 = vpop.xlane.xlu1 %169 }
 0x177   :  { %v225_v26 = vsel %vm224_vm5, %v212_v48, %v223_v18  ;;  %v174_v27 = vmax.f32 %v170_v24, 1e-24  ;;  %v241_v48 = vand.u32 2147483648, %v5287_v50  ;;  %vm332_vm5 = vcmask 1043456  }
 0x178   :  { %v4620_v32 = vpop.eup %4619  ;;  %v228_v33 = vsel %vm226_vm6, %v227_v21, %v225_v26  ;;  %vm1870_vm6 = vcmask 63488  }
 0x179   :  { %v4622_v39 = vpop.eup %4621  ;;  %v230_v40 = vmul.f32 %v4620_v32, %v5285_v49  ;;  %4631 = vrsqrt.f32 %v174_v27  ;;  %v250_v46 = vadd.f32 1e-08, %v228_v33 }
 0x17a   :  { %v237_v45 = vmul.f32 %v4622_v39, %v5287_v50 }
 0x17b   :  { %v232_v47 = vsel %vm231_vm7, %v5285_v49, %v230_v40  ;;  %v248_v49 = vand.u32 2147483648, %v5293_v53  ;;  %4633 = vrcp.f32 %v250_v46  ;;  %vm1911_vm7 = vcmask 62464  }
 0x17c   :  { %v4624_v51 = vpop.eup %4623  ;;  %v235_v52 = vsel %vm233_vm8, %v234_v44, %v232_v47  ;;  %v239_v54 = vsel %vm238_vm9, %v5287_v50, %v237_v45  ;;  %v2380_v50 = vrot.slane %v5247_v23, 7  ;;  %vm1952_vm8 = vcmask 61440  }
 0x17d   :  { %v251_v56 = vadd.f32 1e-08, %v235_v52  ;;  %v242_v57 = vsel %vm240_vm10, %v241_v48, %v239_v54  ;;  %v244_v58 = vmul.f32 %v4624_v51, %v5293_v53  ;;  %vm103_vm9 = vcmask 60416  }
 0x17e   :  { %v252_v60 = vadd.f32 1e-08, %v242_v57  ;;  %v4626_v62 = vpop.eup %4625  ;;  %v2382_v6 = vsel %vm267_vm2, %v2381_v59, %v2380_v50  ;;  %vm2062_vm10 = vcmask 1040384  }
 0x17f   :  { %v246_v63 = vsel %vm245_vm11, %v5293_v53, %v244_v58  ;;  %v5354_v1 = vmul.f32 %v4626_v62, %v5253_v28  ;;  %4635 = vrcp.f32 %v251_v56  ;;  %v5367_v28 = vsel %vm273_vm4, %v5255_v29, %v2345_v55 }
 0x180   :  { %v249_v0 = vsel %vm247_vm12, %v248_v49, %v246_v63  ;;  %4637 = vrcp.f32 %v252_v60  ;;  %v2384_v15 = vsel %vm270_vm3, %v2383_v3, %v2382_v6  ;;  %vm2033_vm11 = vcmask 59392  }
 0x181   :  { %6677 = vst [vmem:[#allocation15_spill] sm:$0xff] %v5354_v1  ;;  %v253_v4 = vadd.f32 1e-08, %v249_v0  ;;  %v1824_v53 = vsel %vm158_vm1, %v5354_v1, 0.0  ;;  %v1630_v12 = vrot.slane %v5354_v1, 2  ;;  %v1649_v26 = vrot.slane %v5354_v1, 4 }
 0x182   :  { %v4628_v7 = vpop.eup %4627  ;;  %v1825_v10 = vrot.slane %v1824_v53, 4  ;;  %v5403_v51 = vsel %vm273_vm4, %v2385_v16, %v2384_v15  ;;  %v1621_v50 = vrot.slane %v5354_v1, 1  ;;  %v1639_v5 = vrot.slane %v5354_v1, 3 }
 0x183   :  { %v4630_v9 = vpop.eup %4629  ;;  %4639 = vrcp.f32 %v253_v4  ;;  %v5370_v11 = vmul.f32 %v4628_v7, %v5269_v37  ;;  %v1669_v4 = vrot.slane %v5354_v1, 6  ;;  %vm2067_vm12 = vcmask 1041408  }
 0x184   :  { %v5374_v13 = vmul.f32 %v4630_v9, %v5267_v36  ;;  %v1826_v17 = vadd.f32 %v1825_v10, %v1824_v53 }
 0x185   :  { %v1817_v18 = vsel %vm158_vm1, %v5370_v11, 0.0  ;;  %v1629_v19 = vrot.slane %v5370_v11, 3  ;;  %v1611_v37 = vrot.slane %v5370_v11, 1  ;;  %v1648_v41 = vrot.slane %v5370_v11, 5 }
 0x186   :  { %6678 = vst [vmem:[#allocation16_spill] sm:$0xff] %v5374_v13  ;;  %v4632_v20 = vpop.eup %4631  ;;  %v1818_v21 = vrot.slane %v1817_v18, 4  ;;  %v1831_v36 = vsel %vm158_vm1, %v5374_v13, 0.0  ;;  %v1632_v24 = vrot.slane %v5374_v13, 1  ;;  %v1827_v27 = vrot.slane %v1826_v17, 2 }
 0x187   :  { %v1832_v32 = vrot.slane %v1831_v36, 4  ;;  %v5390_v33 = vmul.f32 %v4632_v20, %v5278_v43  ;;  %v1631_v35 = vsel %vm267_vm2, %v1630_v12, %v1629_v19  ;;  %v1613_v40 = vrot.slane %v5374_v13, 7 }
 0x188   :  { %v1819_v38 = vadd.f32 %v1818_v21, %v1817_v18  ;;  %v1633_v39 = vsel %vm270_vm3, %v1632_v24, %v1631_v35  ;;  %v1828_v42 = vadd.f32 %v1827_v27, %v1826_v17  ;;  %v1612_v46 = vsel %vm267_vm2, %v5354_v1, %v1611_v37  ;;  %v4634_v57 = vpop.eup %4633 }
 0x189   :  { %6679 = vst [vmem:[#allocation17_spill] sm:$0xff] %v5390_v33  ;;  %v1833_v44 = vadd.f32 %v1832_v32, %v1831_v36  ;;  %v1838_v45 = vsel %vm158_vm1, %v5390_v33, 0.0  ;;  %v1634_v48 = vsel %vm273_vm4, %v5390_v33, %v1633_v39  ;;  %v1615_v55 = vrot.slane %v5390_v33, 6 }
 0x18a   :  { %v1820_v47 = vrot.slane %v1819_v38, 2  ;;  %v1839_v43 = vrot.slane %v1838_v45, 4  ;;  %v1829_v52 = vrot.slane %v1828_v42, 1  ;;  %1635 = vrot.lane.b32.xlu1 %v1634_v48, %s5170_s3  ;;  %v1650_v56 = vsel %vm267_vm2, %v1649_v26, %v1648_v41 }
 0x18b   :  { %v1834_v54 = vrot.slane %v1833_v44, 2  ;;  %v1614_v59 = vsel %vm270_vm3, %v1613_v40, %v1612_v46  ;;  %v1651_v60 = vrot.slane %v5374_v13, 3  ;;  %v1653_v49 = vrot.slane %v5390_v33, 2 }
 0x18c   :  { %v1821_v58 = vadd.f32 %v1820_v47, %v1819_v38  ;;  %v1830_v61 = vadd.f32 %v1829_v52, %v1828_v42  ;;  %v1616_v63 = vsel %vm273_vm4, %v1615_v55, %v1614_v59  ;;  %v4636_v0 = vpop.eup %4635  ;;  %v5418_v7 = vmul.f32 %v4634_v57, %v5247_v23 }
 0x18d   :  { %v1835_v62 = vadd.f32 %v1834_v54, %v1833_v44  ;;  %1617 = vrot.lane.b32.xlu0 %v1616_v63, %s5168_s8  ;;  %v1652_v3 = vsel %vm270_vm3, %v1651_v60, %v1650_v56  ;;  %v4638_v6 = vpop.eup %4637  ;;  %v1620_v10 = vrot.slane %v5370_v11, 2  ;;  %v5422_v16 = vadd.f32 %v1839_v43, %v1838_v45 }
 0x18e   :  { %v1822_v2 = vrot.slane %v1821_v58, 1  ;;  %v1654_v9 = vsel %vm273_vm4, %v1653_v49, %v1652_v3  ;;  %v1624_v17 = vrot.slane %v5390_v33, 7  ;;  %v1668_v18 = vrot.slane %v5370_v11, 7 }
 0x18f   :  { %v1836_v53 = vrot.slane %v1835_v62, 1  ;;  %1655 = vrot.lane.b32.xlu1 %v1654_v9, %s5171_s4  ;;  %v5427_v19 = vmul.f32 %v4636_v0, %v5257_v30  ;;  %v1847_v37 = vmul.f32 0.125, %v1830_v61  ;;  %v1622_v21 = vsel %vm267_vm2, %v1621_v50, %v1620_v10  ;;  %s82_s4 = sld [smem:[#allocation2]] }
 0x190   :  { %v4640_v12 = vpop.eup %4639  ;;  %v1823_v15 = vadd.f32 %v1822_v2, %v1821_v58  ;;  %v5431_v36 = vmul.f32 %v4638_v6, %v5245_v22  ;;  %v1623_v26 = vsel %vm270_vm3, %v5374_v13, %v1622_v21  ;;  %v1670_v27 = vsel %vm267_vm2, %v1669_v4, %v1668_v18 }
 0x191   :  { %v1837_v20 = vadd.f32 %v1836_v53, %v1835_v62  ;;  %v5434_v24 = vmul.f32 %v4640_v12, %v5255_v29  ;;  %v1625_v35 = vsel %vm273_vm4, %v1624_v17, %v1623_v26  ;;  %v1671_v38 = vrot.slane %v5374_v13, 5 }
 0x192   :  { %v1846_v32 = vmul.f32 0.125, %v1823_v15  ;;  %v1673_v39 = vrot.slane %v5390_v33, 4  ;;  %v1841_v40 = vrot.slane %v5422_v16, 2  ;;  %1626 = vrot.lane.b32.xlu0 %v1625_v35, %s5172_s15  ;;  %v1638_v41 = vrot.slane %v5370_v11, 4 }
 0x193   :  { %v1641_v42 = vrot.slane %v5374_v13, 2  ;;  %v1659_v44 = vrot.slane %v5354_v1, 5  ;;  %v5448_v45 = vsub.f32 %v5354_v1, %v1847_v37  ;;  %v5450_v46 = vmul.f32 0.125, %v1837_v20 }
 0x194   :  { %v1672_v47 = vsel %vm270_vm3, %v1671_v38, %v1670_v27  ;;  %v1643_v43 = vrot.slane %v5390_v33, 1  ;;  %v1640_v52 = vsel %vm267_vm2, %v1639_v5, %v1638_v41  ;;  %v317_v54 = vrot.slane %v5418_v7, 6 }
 0x195   :  { %v1674_v48 = vsel %vm273_vm4, %v1673_v39, %v1672_v47  ;;  %v318_v55 = vrot.slane %v5427_v19, 5  ;;  %v5459_v56 = vsub.f32 %v5370_v11, %v1846_v32  ;;  %v1642_v57 = vsel %vm270_vm3, %v1641_v42, %v1640_v52 }
 0x196   :  { %1675 = vrot.lane.b32.xlu1 %v1674_v48, %s5173_s16  ;;  %v320_v58 = vrot.slane %v5431_v36, 4  ;;  %v322_v59 = vrot.slane %v5434_v24, 3  ;;  %v1644_v60 = vsel %vm273_vm4, %v1643_v43, %v1642_v57  ;;  %v325_v61 = vrot.slane %v5418_v7, 3  ;;  %s4520_s16 = sld [smem:[#allocation2 + $0x2]] }
 0x197   :  { %v319_v49 = vsel %vm267_vm2, %v318_v55, %v317_v54  ;;  %v326_v62 = vrot.slane %v5427_v19, 2  ;;  %1645 = vrot.lane.b32.xlu0 %v1644_v60, %s5174_s17  ;;  %v328_v50 = vrot.slane %v5431_v36, 1  ;;  %v266_v0 = vrot.slane %v5427_v19, 7 }
 0x198   :  { %v321_v63 = vsel %vm270_vm3, %v320_v58, %v319_v49  ;;  %v269_v2 = vrot.slane %v5431_v36, 6  ;;  %v272_v5 = vrot.slane %v5434_v24, 5  ;;  %v276_v6 = vrot.slane %v5418_v7, 5 }
 0x199   :  { %v323_v3 = vsel %vm273_vm4, %v322_v59, %v321_v63  ;;  %v327_v4 = vsel %vm278_vm14, %v326_v62, %v325_v61  ;;  %v268_v9 = vsel %vm267_vm2, %v266_v0, %v5418_v7  ;;  %v277_v10 = vrot.slane %v5427_v19, 4 }
 0x19a   :  { %2329 = vrot.lane.b32.xlu1 %v5322_v25, %s5172_s15  ;;  %v329_v53 = vsel %vm6672_vm13, %v328_v50, %v327_v4  ;;  %v280_v12 = vrot.slane %v5431_v36, 3  ;;  %v271_v17 = vsel %vm270_vm3, %v269_v2, %v268_v9  ;;  %v283_v18 = vrot.slane %v5434_v24, 2 }
 0x19b   :  { %v330_v15 = vsel %vm6671_vm15, %v5434_v24, %v329_v53  ;;  %v1658_v37 = vrot.slane %v5370_v11, 6  ;;  %v274_v20 = vsel %vm273_vm4, %v272_v5, %v271_v17  ;;  %v279_v21 = vsel %vm278_vm14, %v277_v10, %v276_v6 }
 0x19c   :  { %v5490_v25 = vsel %vm332_vm5, %v323_v3, %v330_v15  ;;  %v1661_v26 = vrot.slane %v5374_v13, 4  ;;  %v282_v27 = vsel %vm6672_vm13, %v280_v12, %v279_v21  ;;  %v1663_v35 = vrot.slane %v5390_v33, 3 }
 0x19d   :  { %4544 = vmatprep.subr.msk.mxu0 %vm129_vm0, %v5490_v25  ;;  %v1660_v32 = vsel %vm267_vm2, %v1659_v44, %v1658_v37  ;;  %v302_v38 = vrot.slane %v5418_v7, 4  ;;  %v285_v39 = vsel %vm6671_vm15, %v283_v18, %v282_v27  ;;  %v303_v42 = vrot.slane %v5427_v19, 3 }
 0x19e   :  { %4545 = vmatpush3.xpose.msk.msra.mxu0 %vm129_vm0, %v5490_v25  ;;  %v1662_v41 = vsel %vm270_vm3, %v1661_v26, %v1660_v32  ;;  %v305_v47 = vrot.slane %v5431_v36, 2  ;;  %2357 = vrot.lane.b32.xlu1 %v5325_v31, %s5175_s18  ;;  %v5509_v44 = vsel %vm332_vm5, %v274_v20, %v285_v39  ;;  %v307_v48 = vrot.slane %v5434_v24, 1 }
 0x19f   :  { %v1664_v43 = vsel %vm273_vm4, %v1663_v35, %v1662_v41  ;;  %v310_v52 = vrot.slane %v5418_v7, 1  ;;  %4552 = vmatprep.mubr.msk.f32.mxu0 %vm129_vm0, %v5509_v44  ;;  %v304_v54 = vsel %vm267_vm2, %v303_v42, %v302_v38  ;;  %v312_v31 = vrot.slane %v5431_v36, 7 }
 0x1a0   :  { %1665 = vrot.lane.b32.xlu0 %v1664_v43, %s5176_s19  ;;  %v314_v55 = vrot.slane %v5434_v24, 6  ;;  %v287_v57 = vrot.slane %v5418_v7, 2  ;;  %v306_v58 = vsel %vm270_vm3, %v305_v47, %v304_v54  ;;  %v288_v60 = vrot.slane %v5427_v19, 1 }
 0x1a1   :  { %v311_v59 = vsel %vm278_vm14, %v5427_v19, %v310_v52  ;;  %v291_v49 = vrot.slane %v5434_v24, 7  ;;  %v308_v61 = vsel %vm273_vm4, %v307_v48, %v306_v58  ;;  %v294_v63 = vrot.slane %v5418_v7, 7 }
 0x1a2   :  { %v313_v62 = vsel %vm6672_vm13, %v312_v31, %v311_v59  ;;  %v295_v50 = vrot.slane %v5427_v19, 6  ;;  %2377 = vrot.lane.b32.xlu1 %v5363_v8, %s5177_s20  ;;  %v289_v2 = vsel %vm267_vm2, %v288_v60, %v287_v57  ;;  %v297_v3 = vrot.slane %v5431_v36, 5 }
 0x1a3   :  { %v315_v0 = vsel %vm6671_vm15, %v314_v55, %v313_v62  ;;  %v299_v4 = vrot.slane %v5434_v24, 4  ;;  %v290_v7 = vsel %vm270_vm3, %v5431_v36, %v289_v2  ;;  %v1858_v8 = vrot.slane %v5459_v56, 1 }
 0x1a4   :  { %v5536_v5 = vsel %vm332_vm5, %v308_v61, %v315_v0  ;;  %2338 = vrot.lane.b32.xlu0 %v5328_v34, %s5174_s17  ;;  %v296_v19 = vsel %vm278_vm14, %v295_v50, %v294_v63  ;;  %v292_v6 = vsel %vm273_vm4, %v291_v49, %v290_v7  ;;  %v1859_v53 = vrot.slane %v5448_v45, 1 }
 0x1a5   :  { %4546 = vmatprep.subr.msk.mxu0 %vm129_vm0, %v5536_v5  ;;  %v298_v24 = vsel %vm6672_vm13, %v297_v3, %v296_v19  ;;  %v1899_v9 = vrot.slane %v5459_v56, 2  ;;  %v1866_v36 = vmul.f32 %v1858_v8, %v5459_v56  ;;  %v1900_v10 = vrot.slane %v5448_v45, 2 }
 0x1a6   :  { %4547 = vmatpush3.xpose.msk.msra.mxu0 %vm129_vm0, %v5536_v5  ;;  %v300_v34 = vsel %vm6671_vm15, %v299_v4, %v298_v24  ;;  %v1940_v12 = vrot.slane %v5459_v56, 3  ;;  %v1867_v17 = vmul.f32 %v1859_v53, %v5448_v45  ;;  %v1941_v37 = vrot.slane %v5448_v45, 3 }
 0x1a7   :  { %v5557_v15 = vsel %vm332_vm5, %v292_v6, %v300_v34  ;;  %v1907_v18 = vmul.f32 %v1899_v9, %v5459_v56  ;;  %v1871_v20 = vsel %vm1870_vm6, %v1866_v36, 0.0  ;;  %v1908_v21 = vmul.f32 %v1900_v10, %v5448_v45 }
 0x1a8   :  { %4548 = vmatprep.subr.msk.mxu0 %vm129_vm0, %v5557_v15  ;;  %2347 = vrot.lane.b32.xlu0 %v5367_v28, %s5176_s19  ;;  %v1948_v26 = vmul.f32 %v1940_v12, %v5459_v56  ;;  %v1981_v27 = vrot.slane %v5459_v56, 4  ;;  %v1872_v32 = vrot.slane %v1871_v20, 4  ;;  %v1878_v35 = vsel %vm1870_vm6, %v1867_v17, 0.0 }
 0x1a9   :  { %v1912_v38 = vsel %vm1911_vm7, %v1907_v18, 0.0  ;;  %v1949_v39 = vmul.f32 %v1941_v37, %v5448_v45  ;;  %v1879_v41 = vrot.slane %v1878_v35, 4  ;;  %v1919_v42 = vsel %vm1911_vm7, %v1908_v21, 0.0 }
 0x1aa   :  { %4549 = vmatpush3.xpose.msk.msra.mxu0 %vm129_vm0, %v5557_v15  ;;  %v1913_v28 = vrot.slane %v1912_v38, 4  ;;  %v1953_v47 = vsel %vm1952_vm8, %v1948_v26, 0.0  ;;  %v1873_v43 = vadd.f32 %v1872_v32, %v1871_v20  ;;  %v1920_v48 = vrot.slane %v1919_v42, 4 }
 0x1ab   :  { %4550 = vmatprep.subr.msk.mxu0 %vm129_vm0, %v5509_v44  ;;  %v1954_v52 = vrot.slane %v1953_v47, 4  ;;  %v1960_v54 = vsel %vm1952_vm8, %v1949_v39, 0.0  ;;  %v1880_v31 = vadd.f32 %v1879_v41, %v1878_v35  ;;  %v1982_v58 = vrot.slane %v5448_v45, 4 }
 0x1ac   :  { %2367 = vrot.lane.b32.xlu0 %v5377_v14, %s5178_s21  ;;  %v1914_v55 = vadd.f32 %v1913_v28, %v1912_v38  ;;  %v1961_v57 = vrot.slane %v1960_v54, 4  ;;  %v1874_v59 = vrot.slane %v1873_v43, 2  ;;  %v1921_v60 = vadd.f32 %v1920_v48, %v1919_v42 }
 0x1ad   :  { %v1955_v49 = vadd.f32 %v1954_v52, %v1953_v47  ;;  %v1989_v61 = vmul.f32 %v1981_v27, %v5459_v56  ;;  %v1881_v62 = vrot.slane %v1880_v31, 2  ;;  %v1990_v0 = vmul.f32 %v1982_v58, %v5448_v45 }
 0x1ae   :  { %4551 = vmatpush3.xpose.msk.msra.mxu0 %vm129_vm0, %v5509_v44  ;;  %v1915_v63 = vrot.slane %v1914_v55, 2  ;;  %v1962_v50 = vadd.f32 %v1961_v57, %v1960_v54  ;;  %v1875_v14 = vadd.f32 %v1874_v59, %v1873_v43  ;;  %v1922_v2 = vrot.slane %v1921_v60, 2 }
 0x1af   :  { %v1956_v3 = vrot.slane %v1955_v49, 2  ;;  %v1993_v4 = vsel %vm103_vm9, %v1989_v61, 0.0  ;;  %v1882_v7 = vadd.f32 %v1881_v62, %v1880_v31  ;;  %v2000_v34 = vsel %vm103_vm9, %v1990_v0, 0.0 }
 0x1b0   :  { %2387 = vrot.lane.b32.xlu0 %v5403_v51, %s5179_s22  ;;  %v1916_v19 = vadd.f32 %v1915_v63, %v1914_v55  ;;  %v1963_v8 = vrot.slane %v1962_v50, 2  ;;  %v1994_v6 = vrot.slane %v1993_v4, 4  ;;  %v1876_v24 = vrot.slane %v1875_v14, 1 }
 0x1b1   :  { %4553 = vmatmul.mubr.msk.f32.vlgmr.msra.gmra.mxu0 %vm129_vm0, %v5557_v15  ;;  %v1923_v53 = vadd.f32 %v1922_v2, %v1921_v60  ;;  %v1957_v9 = vadd.f32 %v1956_v3, %v1955_v49  ;;  %v1883_v36 = vrot.slane %v1882_v7, 1  ;;  %v2001_v20 = vrot.slane %v2000_v34, 4 }
 0x1b2   :  { %4555 = vmatprep.mubr.msk.f32.mxu0 %vm129_vm0, %v5536_v5  ;;  %v1917_v10 = vrot.slane %v1916_v19, 1  ;;  %v1964_v12 = vadd.f32 %v1963_v8, %v1962_v50  ;;  %v1995_v17 = vadd.f32 %v1994_v6, %v1993_v4  ;;  %v1877_v51 = vadd.f32 %v1876_v24, %v1875_v14 }
 0x1b3   :  { %v1924_v18 = vrot.slane %v1923_v53, 1  ;;  %v1958_v37 = vrot.slane %v1957_v9, 1  ;;  %v1852_v21 = vsub.f32 %v5374_v13, %v5450_v46  ;;  %v1884_v35 = vadd.f32 %v1883_v36, %v1882_v7 }
 0x1b4   :  { %v1918_v26 = vadd.f32 %v1917_v10, %v1916_v19  ;;  %v1965_v27 = vrot.slane %v1964_v12, 1  ;;  %v1996_v32 = vrot.slane %v1995_v17, 2  ;;  %v2002_v39 = vadd.f32 %v2001_v20, %v2000_v34 }
 0x1b5   :  { %4556 = vmatmul.mubr.msk.f32.gmra.mxu0 %vm129_vm0, %v5490_v25  ;;  %v1925_v38 = vadd.f32 %v1924_v18, %v1923_v53  ;;  %v2021_v41 = vrot.slane %v5459_v56, 5  ;;  %v5602_v28 = vadd.f32 %v1841_v40, %v5422_v16  ;;  %v1959_v42 = vadd.f32 %v1958_v37, %v1957_v9 }
 0x1b6   :  { %v1997_v47 = vadd.f32 %v1996_v32, %v1995_v17  ;;  %v2022_v46 = vrot.slane %v5448_v45, 5  ;;  %v2003_v43 = vrot.slane %v2002_v39, 2  ;;  %v2063_v52 = vsel %vm2062_vm10, %v1877_v51, %v1918_v26 }
 0x1b7   :  { %v2029_v48 = vmul.f32 %v2021_v41, %v5459_v56  ;;  %v1966_v54 = vadd.f32 %v1965_v27, %v1964_v12  ;;  %vm2072_vm15 = vcmask 1042432   ;;  %v2064_v16 = vsel %vm2062_vm10, %v1884_v35, %v1925_v38 }
 0x1b8   :  { %v1998_v31 = vrot.slane %v1997_v47, 1  ;;  %v2030_v55 = vmul.f32 %v2022_v46, %v5448_v45  ;;  %v2004_v57 = vadd.f32 %v2003_v43, %v2002_v39  ;;  %v1860_v40 = vrot.slane %v1852_v21, 1 }
 0x1b9   :  { %v2034_v58 = vsel %vm2033_vm11, %v2029_v48, 0.0  ;;  %v1843_v59 = vrot.slane %v5602_v28, 1  ;;  %v2068_v56 = vsel %vm2067_vm12, %v2063_v52, %v1959_v42  ;;  %v2069_v45 = vsel %vm2067_vm12, %v2064_v16, %v1966_v54 }
 0x1ba   :  { %v2035_v60 = vrot.slane %v2034_v58, 4  ;;  %v2041_v49 = vsel %vm2033_vm11, %v2030_v55, 0.0  ;;  %v1999_v61 = vadd.f32 %v1998_v31, %v1997_v47  ;;  %v2005_v62 = vrot.slane %v2004_v57, 1 }
 0x1bb   :  { %v2042_v63 = vrot.slane %v2041_v49, 4  ;;  %v1868_v50 = vmul.f32 %v1860_v40, %v1852_v21  ;;  %v1901_v14 = vrot.slane %v1852_v21, 2  ;;  %v1942_v2 = vrot.slane %v1852_v21, 3 }
 0x1bc   :  { %v2036_v0 = vadd.f32 %v2035_v60, %v2034_v58  ;;  %v2073_v4 = vsel %vm2072_vm15, %v2068_v56, %v1999_v61  ;;  %v1983_v19 = vrot.slane %v1852_v21, 4  ;;  %v2006_v9 = vadd.f32 %v2005_v62, %v2004_v57 }
 0x1bd   :  { %v2043_v3 = vadd.f32 %v2042_v63, %v2041_v49  ;;  %v1885_v7 = vsel %vm1870_vm6, %v1868_v50, 0.0  ;;  %v1909_v24 = vmul.f32 %v1901_v14, %v1852_v21  ;;  %v1950_v53 = vmul.f32 %v1942_v2, %v1852_v21 }
 0x1be   :  { %v2037_v8 = vrot.slane %v2036_v0, 2  ;;  %v1886_v6 = vrot.slane %v1885_v7, 4  ;;  %v1991_v36 = vmul.f32 %v1983_v19, %v1852_v21  ;;  %v2023_v10 = vrot.slane %v1852_v21, 5 }
 0x1bf   :  { %v2044_v34 = vrot.slane %v2043_v3, 2  ;;  %v1926_v51 = vsel %vm1911_vm7, %v1909_v24, 0.0  ;;  %v1967_v18 = vsel %vm1952_vm8, %v1950_v53, 0.0  ;;  %v2074_v42 = vsel %vm2072_vm15, %v2069_v45, %v2006_v9 }
 0x1c0   :  { %v2038_v12 = vadd.f32 %v2037_v8, %v2036_v0  ;;  %v1887_v17 = vadd.f32 %v1886_v6, %v1885_v7  ;;  %v1927_v20 = vrot.slane %v1926_v51, 4  ;;  %v1968_v26 = vrot.slane %v1967_v18, 4 }
 0x1c1   :  { %v2045_v37 = vadd.f32 %v2044_v34, %v2043_v3  ;;  %v2007_v27 = vsel %vm103_vm9, %v1991_v36, 0.0  ;;  %v2031_v39 = vmul.f32 %v2023_v10, %v1852_v21  ;;  %v1844_v62 = vadd.f32 %v1843_v59, %v5602_v28 }
 0x1c2   :  { %v2039_v32 = vrot.slane %v2038_v12, 1  ;;  %v1888_v35 = vrot.slane %v1887_v17, 2  ;;  %v2008_v38 = vrot.slane %v2007_v27, 4  ;;  %v1928_v47 = vadd.f32 %v1927_v20, %v1926_v51 }
 0x1c3   :  { %v2046_v41 = vrot.slane %v2045_v37, 1  ;;  %v1969_v46 = vadd.f32 %v1968_v26, %v1967_v18  ;;  %v2048_v54 = vsel %vm2033_vm11, %v2031_v39, 0.0  ;;  %v1849_v28 = vmul.f32 0.125, %v1844_v62 }
 0x1c4   :  { %v2040_v43 = vadd.f32 %v2039_v32, %v2038_v12  ;;  %v1889_v48 = vadd.f32 %v1888_v35, %v1887_v17  ;;  %v2009_v52 = vadd.f32 %v2008_v38, %v2007_v27  ;;  %v1929_v55 = vrot.slane %v1928_v47, 2 }
 0x1c5   :  { %v2047_v31 = vadd.f32 %v2046_v41, %v2045_v37  ;;  %v1970_v57 = vrot.slane %v1969_v46, 2  ;;  %v2049_v58 = vrot.slane %v2048_v54, 4  ;;  %v5180_v27 = vmov 0.0  }
 0x1c6   :  { %v5622_v16 = vsel %vm332_vm5, %v2073_v4, %v2040_v43  ;;  %v1890_v40 = vrot.slane %v1889_v48, 1  ;;  %v2010_v60 = vrot.slane %v2009_v52, 2  ;;  %v1930_v56 = vadd.f32 %v1929_v55, %v1928_v47  ;;  %4558 = vmatprep.subr.mxu1 %v5180_v27 }
 0x1c7   :  { %v5625_v21 = vsel %vm332_vm5, %v2074_v42, %v2047_v31  ;;  %v2081_v49 = vand.u32 2147483647, %v5622_v16  ;;  %v1971_v61 = vadd.f32 %v1970_v57, %v1969_v46  ;;  %v2050_v0 = vadd.f32 %v2049_v58, %v2048_v54 }
 0x1c8   :  { %v2082_v63 = vand.u32 2147483647, %v5625_v21  ;;  %v2011_v50 = vadd.f32 %v2010_v60, %v2009_v52  ;;  %v1891_v14 = vadd.f32 %v1890_v40, %v1889_v48  ;;  %v1931_v2 = vrot.slane %v1930_v56, 1 }
 0x1c9   :  { %v2085_v45 = vsel %vm1952_vm8, %v2081_v49, -inf  ;;  %v1972_v3 = vrot.slane %v1971_v61, 1  ;;  %v2051_v8 = vrot.slane %v2050_v0, 2  ;;  %v1853_v32 = vsub.f32 %v5390_v33, %v1849_v28 }
 0x1ca   :  { %v2086_v4 = vrot.slane %v2085_v45, 4  ;;  %v2092_v7 = vsel %vm1952_vm8, %v2082_v63, -inf  ;;  %v2012_v19 = vrot.slane %v2011_v50, 1  ;;  %v1932_v24 = vadd.f32 %v1931_v2, %v1930_v56 }
 0x1cb   :  { %v2093_v6 = vrot.slane %v2092_v7, 4  ;;  %v1973_v53 = vadd.f32 %v1972_v3, %v1971_v61  ;;  %v2052_v34 = vadd.f32 %v2051_v8, %v2050_v0  ;;  %vm5181_vm13 = vmmov 0  }
 0x1cc   :  { %v2087_v9 = vmax.f32 %v2085_v45, %v2086_v4  ;;  %v2013_v36 = vadd.f32 %v2012_v19, %v2011_v50  ;;  %v2065_v10 = vsel %vm2062_vm10, %v1891_v14, %v1932_v24  ;;  %4560 = vmatprep.mubr.msk.f32.mxu1 %vm5181_vm13, %v5180_v27  ;;  %v1861_v48 = vrot.slane %v1853_v32, 1 }
 0x1cd   :  { %v2094_v59 = vmax.f32 %v2092_v7, %v2093_v6  ;;  %v2053_v17 = vrot.slane %v2052_v34, 1  ;;  %v2070_v51 = vsel %vm2067_vm12, %v2065_v10, %v1973_v53  ;;  %v1902_v52 = vrot.slane %v1853_v32, 2 }
 0x1ce   :  { %v2088_v12 = vrot.slane %v2087_v9, 2  ;;  %v2075_v37 = vsel %vm2072_vm15, %v2070_v51, %v2013_v36  ;;  %v1869_v31 = vmul.f32 %v1861_v48, %v1853_v32  ;;  %v1943_v57 = vrot.slane %v1853_v32, 3 }
 0x1cf   :  { %v2095_v18 = vrot.slane %v2094_v59, 2  ;;  %v2054_v26 = vadd.f32 %v2053_v17, %v2052_v34  ;;  %v1910_v55 = vmul.f32 %v1902_v52, %v1853_v32  ;;  %v1984_v40 = vrot.slane %v1853_v32, 4 }
 0x1d0   :  { %v2089_v20 = vmax.f32 %v2087_v9, %v2088_v12  ;;  %v2024_v60 = vrot.slane %v1853_v32, 5  ;;  %v1892_v49 = vsel %vm1870_vm6, %v1869_v31, 0.0  ;;  %v1951_v61 = vmul.f32 %v1943_v57, %v1853_v32 }
 0x1d1   :  { %v2096_v35 = vmax.f32 %v2094_v59, %v2095_v18  ;;  %v5638_v39 = vsel %vm332_vm5, %v2075_v37, %v2054_v26  ;;  %v1933_v56 = vsel %vm1911_vm7, %v1910_v55, 0.0  ;;  %v1893_v63 = vrot.slane %v1892_v49, 4 }
 0x1d2   :  { %v2090_v38 = vrot.slane %v2089_v20, 1  ;;  %v2083_v42 = vand.u32 2147483647, %v5638_v39  ;;  %v1934_v50 = vrot.slane %v1933_v56, 4  ;;  %v1992_v0 = vmul.f32 %v1984_v40, %v1853_v32 }
 0x1d3   :  { %v2097_v41 = vrot.slane %v2096_v35, 1  ;;  %v1974_v45 = vsel %vm1952_vm8, %v1951_v61, 0.0  ;;  %v2032_v14 = vmul.f32 %v2024_v60, %v1853_v32  ;;  %v1894_v3 = vadd.f32 %v1893_v63, %v1892_v49 }
 0x1d4   :  { %v2091_v47 = vmax.f32 %v2089_v20, %v2090_v38  ;;  %v2099_v43 = vsel %vm1952_vm8, %v2083_v42, -inf  ;;  %v1935_v4 = vadd.f32 %v1934_v50, %v1933_v56  ;;  %v1975_v7 = vrot.slane %v1974_v45, 4 }
 0x1d5   :  { %v2098_v46 = vmax.f32 %v2096_v35, %v2097_v41  ;;  %v2100_v54 = vrot.slane %v2099_v43, 4  ;;  %v2014_v19 = vsel %vm103_vm9, %v1992_v0, 0.0  ;;  %v2055_v8 = vsel %vm2033_vm11, %v2032_v14, 0.0 }
 0x1d6   :  { %4641 = vrcp.f32 %v2091_v47  ;;  %v1895_v24 = vrot.slane %v1894_v3, 2  ;;  %v1936_v53 = vrot.slane %v1935_v4, 2  ;;  %v1976_v9 = vadd.f32 %v1975_v7, %v1974_v45 }
 0x1d7   :  { %4643 = vrcp.f32 %v2098_v46  ;;  %v2101_v58 = vmax.f32 %v2099_v43, %v2100_v54  ;;  %v2015_v34 = vrot.slane %v2014_v19, 4  ;;  %v2056_v28 = vrot.slane %v2055_v8, 4 }
 0x1d8   :  { %v1896_v36 = vadd.f32 %v1895_v24, %v1894_v3  ;;  %v1937_v10 = vadd.f32 %v1936_v53, %v1935_v4  ;;  %v1977_v12 = vrot.slane %v1976_v9, 2  ;;  %v434_v61 = vmul.f32 %v5509_v44, %v5509_v44 }
 0x1d9   :  { %v2102_v62 = vrot.slane %v2101_v58, 2  ;;  %v2016_v17 = vadd.f32 %v2015_v34, %v2014_v19  ;;  %v2057_v51 = vadd.f32 %v2056_v28, %v2055_v8  ;;  %v436_v45 = vmul.f32 %v5536_v5, %v5536_v5 }
 0x1da   :  { %v1897_v18 = vrot.slane %v1896_v36, 1  ;;  %v1938_v37 = vrot.slane %v1937_v10, 1  ;;  %v1978_v20 = vadd.f32 %v1977_v12, %v1976_v9  ;;  %vm1682_vm6 = vcmask 261120  }
 0x1db   :  { %v2103_v2 = vmax.f32 %v2101_v58, %v2102_v62  ;;  %v2017_v32 = vrot.slane %v2016_v17, 2  ;;  %v2058_v35 = vrot.slane %v2057_v51, 2  ;;  %v444_v8 = vsel %vm129_vm0, %v436_v45, 0.0 }
 0x1dc   :  { %v1898_v42 = vadd.f32 %v1897_v18, %v1896_v36  ;;  %v1939_v47 = vadd.f32 %v1938_v37, %v1937_v10  ;;  %v1979_v46 = vrot.slane %v1978_v20, 1  ;;  %vm1684_vm7 = vcmask 326656  }
 0x1dd   :  { %v2104_v6 = vrot.slane %v2103_v2, 1  ;;  %v2018_v48 = vadd.f32 %v2017_v32, %v2016_v17  ;;  %v2059_v52 = vadd.f32 %v2058_v35, %v2057_v51  ;;  %v1606_v35 = vrot.slane %v5374_v13, 6 }
 0x1de   :  { %v1980_v31 = vadd.f32 %v1979_v46, %v1978_v20  ;;  %v2066_v55 = vsel %vm2062_vm10, %v1898_v42, %v1939_v47  ;;  %v1608_v42 = vrot.slane %v5390_v33, 5  ;;  %vm1686_vm10 = vcmask 392192  }
 0x1df   :  { %v2105_v59 = vmax.f32 %v2103_v2, %v2104_v6  ;;  %v2019_v58 = vrot.slane %v2018_v48, 1  ;;  %v2060_v40 = vrot.slane %v2059_v52, 1  ;;  %v438_v2 = vsel %vm129_vm0, %v434_v61, 0.0 }
 0x1e0   :  { %v2071_v60 = vsel %vm2067_vm12, %v2066_v55, %v1980_v31  ;;  %vm1688_vm11 = vcmask 457728   ;;  %vm1690_vm12 = vcmask 523264  }
 0x1e1   :  { %4645 = vrcp.f32 %v2105_v59  ;;  %v2020_v56 = vadd.f32 %v2019_v58, %v2018_v48  ;;  %v2061_v62 = vadd.f32 %v2060_v40, %v2059_v52 }
 0x1e3   :  { %v4642_v26 = vpop.eup %4641  ;;  %v2076_v50 = vsel %vm2072_vm15, %v2071_v60, %v2020_v56  ;;  %vm1680_vm15 = vcmask 195584  }
 0x1e4   :  { %v4644_v38 = vpop.eup %4643  ;;  %v5650_v41 = vmul.f32 %v4642_v26, %v5622_v16  ;;  %v2080_v0 = vsel %vm332_vm5, %v2076_v50, %v2061_v62  ;;  %v1604_v26 = vrot.slane %v5354_v1, 7  ;;  %v2318_v50 = vrot.slane %v5245_v22, 6 }
 0x1e5   :  { %v5653_v43 = vmul.f32 %v4644_v38, %v5625_v21  ;;  %v2084_v14 = vand.u32 2147483647, %v2080_v0 }
 0x1e6   :  { %v2121_v54 = vsub.f32 %v5650_v41, %v5650_v41  ;;  %v1605_v38 = vsel %vm267_vm2, %v1604_v26, %v5370_v11 }
 0x1e7   :  { %v2122_v57 = vsub.f32 %v5650_v41, %v5653_v43  ;;  %v2125_v3 = vsub.f32 %v5653_v43, %v5650_v41  ;;  %v2106_v44 = vsel %vm1952_vm8, %v2084_v14, -inf  ;;  %v2126_v6 = vsub.f32 %v5653_v43, %v5653_v43 }
 0x1e8   :  { %v2137_v16 = vand.u32 2147483647, %v2121_v54  ;;  %v2107_v19 = vrot.slane %v2106_v44, 4  ;;  %v1607_v46 = vsel %vm270_vm3, %v1606_v35, %v1605_v38 }
 0x1e9   :  { %v2138_v49 = vand.u32 2147483647, %v2122_v57  ;;  %v2141_v5 = vand.u32 2147483647, %v2125_v3  ;;  %v2142_v59 = vand.u32 2147483647, %v2126_v6  ;;  %v1609_v48 = vsel %vm273_vm4, %v1608_v42, %v1607_v46 }
 0x1ea   :  { %v2153_v21 = vsel %vm1952_vm8, %v2137_v16, 0.0  ;;  %v2108_v34 = vmax.f32 %v2106_v44, %v2107_v19  ;;  %v2316_v16 = vrot.slane %v5257_v30, 7  ;;  %v2320_v3 = vrot.slane %v5255_v29, 5 }
 0x1eb   :  { %v2156_v63 = vsel %vm1952_vm8, %v2138_v49, 0.0  ;;  %2154 = vadd.xlane.f32.xlu0 %v2153_v21  ;;  %v2165_v28 = vsel %vm1952_vm8, %v2141_v5, 0.0  ;;  %v2168_v17 = vsel %vm1952_vm8, %v2142_v59, 0.0 }
 0x1ec   :  { %2157 = vadd.xlane.f32.xlu1 %v2156_v63 }
 0x1ee   :  { %v4646_v4 = vpop.eup %4645 }
 0x1ef   :  { %439 = vadd.xlane.f32.xlu0 %v438_v2  ;;  %v5674_v7 = vmul.f32 %v4646_v4, %v5638_v39  ;;  %v2109_v39 = vrot.slane %v2108_v34, 2 }
 0x1f1   :  { %v2127_v24 = vsub.f32 %v5653_v43, %v5674_v7  ;;  %v2130_v53 = vsub.f32 %v5674_v7, %v5653_v43  ;;  %v2129_v9 = vsub.f32 %v5674_v7, %v5650_v41  ;;  %v2123_v36 = vsub.f32 %v5650_v41, %v5674_v7 }
 0x1f2   :  { %v2110_v10 = vmax.f32 %v2108_v34, %v2109_v39 }
 0x1f3   :  { %445 = vadd.xlane.f32.xlu0 %v444_v8  ;;  %v2139_v51 = vand.u32 2147483647, %v2123_v36 }
 0x1f4   :  { %v2111_v12 = vrot.slane %v2110_v10, 1 }
 0x1f5   :  { %v2159_v37 = vsel %vm1952_vm8, %v2139_v51, 0.0 }
 0x1f6   :  { %v2112_v18 = vmax.f32 %v2110_v10, %v2111_v12 }
 0x1f7   :  { %2166 = vadd.xlane.f32.xlu0 %v2165_v28 }
 0x1f8   :  { %4647 = vrcp.f32 %v2112_v18 }
 0x1fb   :  { %2169 = vadd.xlane.f32.xlu0 %v2168_v17 }
 0x1fc   :  { %v1636_v32 = vpop.permute.xlu1 %1635 }
 0x1ff   :  { %2160 = vadd.xlane.f32.xlu0 %v2159_v37  ;;  %v1618_v20 = vpop.permute.xlu0 %1617 }
 0x200   :  { %v1678_v31 = vsel %vm158_vm1, %v1609_v48, %v1618_v20 }
 0x201   :  { %v1656_v52 = vpop.permute.xlu1 %1655 }
 0x204   :  { %v1627_v47 = vpop.permute.xlu0 %1626 }
 0x205   :  { %v4648_v54 = vpop.eup %4647  ;;  %v1679_v55 = vsel %vm129_vm0, %v1678_v31, %v1627_v47 }
 0x206   :  { %v5699_v57 = vmul.f32 %v4648_v54, %v2080_v0  ;;  %v1681_v56 = vsel %vm1680_vm15, %v1679_v55, %v1636_v32  ;;  %v2317_v0 = vsel %vm267_vm2, %v2316_v16, %v5247_v23  ;;  %vm1765_vm15 = vcmask 519168  }
 0x207   :  { %v2319_v44 = vsel %vm270_vm3, %v2318_v50, %v2317_v0  ;;  %v435_v23 = vmul.f32 %v5557_v15, %v5557_v15  ;;  %v437_v15 = vmul.f32 %v5490_v25, %v5490_v25  ;;  %v6673_v16 = vlaneseq }
 0x208   :  { %v1676_v30 = vpop.permute.xlu1 %1675  ;;  %v2321_v5 = vsel %vm273_vm4, %v2320_v3, %v2319_v44 }
 0x209   :  { %v1646_v58 = vpop.permute.xlu0 %1645  ;;  %v441_v36 = vsel %vm129_vm0, %v435_v23, 0.0  ;;  %v447_v51 = vsel %vm129_vm0, %v437_v15, 0.0 }
 0x20a   :  { %v1683_v63 = vsel %vm1682_vm6, %v1681_v56, %v1646_v58 }
 0x20b   :  { %v1685_v14 = vsel %vm1684_vm7, %v1683_v63, %v1656_v52  ;;  %vm2394_vm7 = vcmask 654336  }
 0x20c   :  { %v2330_v19 = vpop.permute.xlu1 %2329 }
 0x20d   :  { %v2390_v29 = vsel %vm129_vm0, %v2321_v5, %v2330_v19 }
 0x210   :  { %v2358_v28 = vpop.permute.xlu1 %2357 }
 0x212   :  { %v1666_v45 = vpop.permute.xlu0 %1665 }
 0x213   :  { %v1687_v2 = vsel %vm1686_vm10, %v1685_v14, %v1666_v45 }
 0x214   :  { %v1689_v4 = vsel %vm1688_vm11, %v1687_v2, %v1676_v30  ;;  %v5756_v30 = vshrl.u32 %v6673_v16, 7 }
 0x215   :  { %4559 = vmatpush3.xpose.msk.msra.mxu1 %vm1690_vm12, %v1689_v4  ;;  %v1764_v8 = vmul.f32 %v1689_v4, %v1689_v4 }
 0x216   :  { %v2339_v22 = vpop.permute.xlu0 %2338  ;;  %4563 = vmatprep.subr.mxu1 %v5180_v27  ;;  %v5761_v0 = vsub.s32 0, %v5756_v30 }
 0x217   :  { %v1766_v6 = vsel %vm1765_vm15, %v1764_v8, 0.0  ;;  %v2391_v34 = vsel %vm1682_vm6, %v2390_v29, %v2339_v22  ;;  %vm2398_vm6 = vcmask 916480  }
 0x218   :  { %4561 = vmatmul.mubr.msk.f32.vlgmr.msra.gmra.mxu1 %vm1690_vm12, %v1689_v4  ;;  %1767 = vadd.xlane.f32.xlu1 %v1766_v6 }
 0x219   :  { %4565 = vmatprep.mubr.msk.f32.mxu1 %vm5181_vm13, %v5180_v27  ;;  %vm2396_vm13 = vcmask 785408   ;;  %v2378_v27 = vpop.permute.xlu1 %2377 }
 0x21a   :  { %v2348_v39 = vpop.permute.xlu0 %2347 }
 0x21b   :  { %v2392_v59 = vsel %vm1686_vm10, %v2391_v34, %v2348_v39 }
 0x21c   :  { %442 = vadd.xlane.f32.xlu1 %v441_v36  ;;  %v2393_v10 = vsel %vm1690_vm12, %v2392_v59, %v2358_v28 }
 0x21e   :  { %v2368_v12 = vpop.permute.xlu0 %2367 }
 0x21f   :  { %v2395_v17 = vsel %vm2394_vm7, %v2393_v10, %v2368_v12 }
 0x220   :  { %448 = vadd.xlane.f32.xlu1 %v447_v51  ;;  %v2397_v18 = vsel %vm2396_vm13, %v2395_v17, %v2378_v27 }
 0x222   :  { %v2388_v37 = vpop.permute.xlu0 %2387 }
 0x223   :  { %v5737_v20 = vsel %vm2398_vm6, %v2397_v18, %v2388_v37 }
 0x224   :  { %4564 = vmatpush3.xpose.msra.mxu1 %v5737_v20 }
 0x227   :  { %4566 = vmatmul.mubr.f32.vlgmr.msra.gmra.mxu1 %v5737_v20 }
 0x271   :  { %v4554_v55 = vpop.f32.mrf.mxu0 }
 0x272   :  { %v491_v59 = vmul.f32 2.0, %v4554_v55 }
 0x273   :  { %v415_v56 = vpop.f32.mrf.mxu0 }
 0x274   :  { %v5741_v25 = vpop.xlane.xlu0 %2154  ;;  %v490_v3 = vmul.f32 2.0, %v415_v56 }
 0x275   :  { %v5743_v32 = vpop.xlane.xlu1 %2157  ;;  %v4557_v63 = vpop.f32.mrf.mxu0 }
 0x276   :  { %v493_v23 = vmul.f32 2.0, %v4557_v63 }
 0x277   :  { %v425_v45 = vpop.f32.mrf.mxu0 }
 0x278   :  { %v440_v26 = vpop.xlane.xlu0 %439  ;;  %v492_v4 = vmul.f32 2.0, %v425_v45 }
 0x279   :  { %450 = vxpose.xlu0.b32.start [1/4] (short) (narrow) %v440_v26, 8 }
 0x27c   :  { %v446_v42 = vpop.xlane.xlu0 %445 }
 0x280   :  { %v5751_v31 = vpop.xlane.xlu0 %2166 }
 0x284   :  { %v5753_v58 = vpop.xlane.xlu0 %2169 }
 0x288   :  { %v5758_v50 = vpop.xlane.xlu0 %2160 }
 0x2a1   :  { %v5745_v35 = vpop.xlane.xlu1 %1767 }
 0x2a5   :  { %v443_v38 = vpop.xlane.xlu1 %442 }
 0x2a6   :  { %451 = vxpose.xlu0.b32.cont [2/4] (short) (narrow) %v443_v38, 8 }
 0x2a9   :  { %v449_v47 = vpop.xlane.xlu1 %448 }
 0x2aa   :  { %452 = vxpose.xlu0.b32.cont [3/4] (short) (narrow) %v446_v42, 8 }
 0x2ae   :  { %453 = vxpose.xlu0.b32.end [4/4] (short) (narrow) %v449_v47, 8 }
 0x2d8   :  { %v5747_v46 = vpop.f32.mrf.mxu1 }
 0x2da   :  { %v4562_v48 = vpop.f32.mrf.mxu1 }
 0x2e7   :  { %v5749_v52 = vpop.f32.mrf.mxu1 }
 0x2e9   :  { %v4567_v54 = vpop.f32.mrf.mxu1 }
 0x31e   :  { %v466_v14 = vpop.trf.xlu0 }
 0x31f   :  { %v485_v2 = vrot.slane %v466_v14, %v5761_v0 }
 0x321   :  { %v486_v44 = vadd.f32 %v485_v2, %v440_v26  ;;  %v488_v19 = vadd.f32 %v485_v2, %v446_v42  ;;  %v489_v8 = vadd.f32 %v485_v2, %v449_v47  ;;  %v487_v28 = vadd.f32 %v485_v2, %v443_v38 }
 0x323   :  { %v494_v22 = vsub.f32 %v486_v44, %v490_v3  ;;  %v496_v6 = vsub.f32 %v488_v19, %v492_v4  ;;  %v497_v34 = vsub.f32 %v489_v8, %v493_v23  ;;  %v495_v36 = vsub.f32 %v487_v28, %v491_v59 }
 0x324   :  { %v2143_v19 = vand.u32 2147483647, %v2127_v24  ;;  %v2146_v59 = vand.u32 2147483647, %v2130_v53 }
 0x325   :  { %v498_v5 = vmax.f32 %v494_v22, 0.0  ;;  %v500_v29 = vmax.f32 %v496_v6, 0.0  ;;  %v501_v39 = vmax.f32 %v497_v34, 0.0  ;;  %v499_v51 = vmax.f32 %v495_v36, 0.0 }
 0x326   :  { %v2171_v8 = vsel %vm1952_vm8, %v2143_v19, 0.0 }
 0x327   :  { %4649 = vrsqrt.f32 %v498_v5  ;;  %vm504_vm0 = vcmp.eq.f32.partialorder %v498_v5, inf  ;;  %v507_v17 = vand.u32 2147483648, %v498_v5  ;;  %vm506_vm10 = vcmp.eq.f32.partialorder %v498_v5, 0.0 }
 0x328   :  { %4651 = vrsqrt.f32 %v500_v29  ;;  %vm518_vm11 = vcmp.eq.f32.partialorder %v500_v29, inf  ;;  %v521_v26 = vand.u32 2147483648, %v500_v29  ;;  %vm520_vm12 = vcmp.eq.f32.partialorder %v500_v29, 0.0 }
 0x329   :  { %4653 = vrsqrt.f32 %v501_v39  ;;  %vm525_vm15 = vcmp.eq.f32.partialorder %v501_v39, inf  ;;  %v528_v55 = vand.u32 2147483648, %v501_v39  ;;  %vm527_vm7 = vcmp.eq.f32.partialorder %v501_v39, 0.0 }
 0x32a   :  { %4655 = vrsqrt.f32 %v499_v51  ;;  %vm511_vm13 = vcmp.eq.f32.partialorder %v499_v51, inf  ;;  %v514_v2 = vand.u32 2147483648, %v499_v51  ;;  %vm513_vm6 = vcmp.eq.f32.partialorder %v499_v51, 0.0 }
 0x334   :  { %v4650_v15 = vpop.eup %4649 }
 0x335   :  { %v503_v10 = vmul.f32 %v4650_v15, %v498_v5  ;;  %v4652_v12 = vpop.eup %4651  ;;  %v2180_v15 = vsel %vm1952_vm8, %v2146_v59, 0.0 }
 0x336   :  { %v517_v18 = vmul.f32 %v4652_v12, %v500_v29  ;;  %v4654_v47 = vpop.eup %4653  ;;  %v2145_v12 = vand.u32 2147483647, %v2129_v9 }
 0x337   :  { %v505_v27 = vsel %vm504_vm0, %v498_v5, %v503_v10  ;;  %v524_v48 = vmul.f32 %v4654_v47, %v501_v39  ;;  %v4656_v63 = vpop.eup %4655 }
 0x338   :  { %v5764_v37 = vsel %vm506_vm10, %v507_v17, %v505_v27  ;;  %v519_v42 = vsel %vm518_vm11, %v500_v29, %v517_v18  ;;  %v510_v45 = vmul.f32 %v4656_v63, %v499_v51  ;;  %v2177_v17 = vsel %vm1952_vm8, %v2145_v12, 0.0 }
 0x339   :  { %531 = vrot.lane.b32.xlu1 %v5764_v37, %s5182_s23  ;;  %v5768_v38 = vsel %vm520_vm12, %v521_v26, %v519_v42  ;;  %v526_v54 = vsel %vm525_vm15, %v501_v39, %v524_v48  ;;  %v5797_v3 = vrot.slane %v5764_v37, 4  ;;  %vm2567_vm15 = vcmask 27648  }
 0x33a   :  { %657 = vrot.lane.b32.xlu0 %v5768_v38, %s5183_s24  ;;  %v5782_v56 = vsel %vm527_vm7, %v528_v55, %v526_v54  ;;  %v512_v14 = vsel %vm511_vm13, %v499_v51, %v510_v45  ;;  %v681_v24 = vrot.slane %v5768_v38, 4 }
 0x33b   :  { %v5799_v4 = vsel %vm513_vm6, %v514_v2, %v512_v14  ;;  %v742_v22 = vrot.slane %v5782_v56, 4 }
 0x33c   :  { %v5806_v44 = vrot.slane %v5799_v4, 4  ;;  %v590_v9 = vmax.f32 %v5768_v38, %v5799_v4 }
 0x33d   :  { %535 = vrot.lane.b32.xlu1 %v5764_v37, %s5183_s24 }
 0x33e   :  { %665 = vrot.lane.b32.xlu0 %v5768_v38, %s5179_s22  ;;  %v595_v55 = vmax.f32 %v590_v9, %v5782_v56 }
 0x340   :  { %v599_v45 = vmax.f32 %v595_v55, %v5806_v44 }
 0x341   :  { %539 = vrot.lane.b32.xlu1 %v5764_v37, %s5184_s25 }
 0x342   :  { %673 = vrot.lane.b32.xlu0 %v5768_v38, %s5185_s26  ;;  %v603_v19 = vmax.f32 %v599_v45, %v681_v24 }
 0x344   :  { %v607_v59 = vmax.f32 %v603_v19, %v742_v22 }
 0x345   :  { %543 = vrot.lane.b32.xlu1 %v5764_v37, %s5179_s22 }
 0x346   :  { %718 = vrot.lane.b32.xlu0 %v5782_v56, %s5183_s24 }
 0x349   :  { %547 = vrot.lane.b32.xlu1 %v5764_v37, %s5186_s27 }
 0x34a   :  { %726 = vrot.lane.b32.xlu0 %v5782_v56, %s5179_s22 }
 0x34d   :  { %551 = vrot.lane.b32.xlu1 %v5764_v37, %s5185_s26 }
 0x34e   :  { %734 = vrot.lane.b32.xlu0 %v5782_v56, %s5185_s26 }
 0x351   :  { %555 = vrot.lane.b32.xlu1 %v5764_v37, %s5187_s28 }
 0x352   :  { %578 = vrot.lane.b32.xlu0 %v5797_v3, %s5186_s27 }
 0x355   :  { %592 = vrot.lane.b32.xlu1 %v5799_v4, %s5182_s23 }
 0x356   :  { %631 = vrot.lane.b32.xlu0 %v5806_v44, %s5184_s25 }
 0x359   :  { %596 = vrot.lane.b32.xlu1 %v5799_v4, %s5183_s24 }
 0x35a   :  { %639 = vrot.lane.b32.xlu0 %v5806_v44, %s5186_s27 }
 0x35d   :  { %600 = vrot.lane.b32.xlu1 %v5799_v4, %s5184_s25 }
 0x35e   :  { %647 = vrot.lane.b32.xlu0 %v5806_v44, %s5187_s28 }
 0x361   :  { %604 = vrot.lane.b32.xlu1 %v5799_v4, %s5179_s22 }
 0x365   :  { %608 = vrot.lane.b32.xlu1 %v5799_v4, %s5186_s27 }
 0x369   :  { %612 = vrot.lane.b32.xlu1 %v5799_v4, %s5185_s26 }
 0x36d   :  { %616 = vrot.lane.b32.xlu1 %v5799_v4, %s5187_s28 }
 0x371   :  { %653 = vrot.lane.b32.xlu1 %v5768_v38, %s5182_s23 }
 0x375   :  { %661 = vrot.lane.b32.xlu1 %v5768_v38, %s5184_s25 }
 0x379   :  { %669 = vrot.lane.b32.xlu1 %v5768_v38, %s5186_s27 }
 0x37d   :  { %677 = vrot.lane.b32.xlu1 %v5768_v38, %s5187_s28  ;;  %2172 = vadd.xlane.f32.xlu0 %v2171_v8 }
 0x381   :  { %714 = vrot.lane.b32.xlu1 %v5782_v56, %s5182_s23 }
 0x385   :  { %722 = vrot.lane.b32.xlu1 %v5782_v56, %s5184_s25 }
 0x389   :  { %730 = vrot.lane.b32.xlu1 %v5782_v56, %s5186_s27 }
 0x38d   :  { %738 = vrot.lane.b32.xlu1 %v5782_v56, %s5187_s28 }
 0x391   :  { %562 = vrot.lane.b32.xlu1 %v5797_v3, %s5182_s23 }
 0x393   :  { %684 = vrot.lane.b32.xlu0 %v681_v24, %s5182_s23 }
 0x395   :  { %566 = vrot.lane.b32.xlu1 %v5797_v3, %s5183_s24 }
 0x397   :  { %692 = vrot.lane.b32.xlu0 %v681_v24, %s5184_s25 }
 0x399   :  { %570 = vrot.lane.b32.xlu1 %v5797_v3, %s5184_s25 }
 0x39b   :  { %700 = vrot.lane.b32.xlu0 %v681_v24, %s5186_s27 }
 0x39d   :  { %574 = vrot.lane.b32.xlu1 %v5797_v3, %s5179_s22 }
 0x39f   :  { %708 = vrot.lane.b32.xlu0 %v681_v24, %s5187_s28 }
 0x3a1   :  { %582 = vrot.lane.b32.xlu1 %v5797_v3, %s5185_s26 }
 0x3a3   :  { %745 = vrot.lane.b32.xlu0 %v742_v22, %s5182_s23 }
 0x3a5   :  { %586 = vrot.lane.b32.xlu1 %v5797_v3, %s5187_s28 }
 0x3a7   :  { %753 = vrot.lane.b32.xlu0 %v742_v22, %s5184_s25 }
 0x3a9   :  { %623 = vrot.lane.b32.xlu1 %v5806_v44, %s5182_s23 }
 0x3ab   :  { %v5868_v6 = vpop.permute.xlu1 %531  ;;  %761 = vrot.lane.b32.xlu0 %v742_v22, %s5186_s27 }
 0x3ac   :  { %v658_v53 = vpop.permute.xlu0 %657 }
 0x3ad   :  { %627 = vrot.lane.b32.xlu1 %v5806_v44, %s5183_s24  ;;  %v611_v12 = vmax.f32 %v607_v59, %v658_v53 }
 0x3af   :  { %v5873_v23 = vpop.permute.xlu1 %535  ;;  %769 = vrot.lane.b32.xlu0 %v742_v22, %s5187_s28 }
 0x3b0   :  { %v666_v47 = vpop.permute.xlu0 %665 }
 0x3b1   :  { %635 = vrot.lane.b32.xlu1 %v5806_v44, %s5179_s22 }
 0x3b3   :  { %v5878_v5 = vpop.permute.xlu1 %539 }
 0x3b4   :  { %v674_v54 = vpop.permute.xlu0 %673 }
 0x3b5   :  { %643 = vrot.lane.b32.xlu1 %v5806_v44, %s5185_s26 }
 0x3b7   :  { %v5882_v29 = vpop.permute.xlu1 %543 }
 0x3b8   :  { %v719_v14 = vpop.permute.xlu0 %718 }
 0x3bb   :  { %v5884_v34 = vpop.permute.xlu1 %547 }
 0x3bc   :  { %v727_v8 = vpop.permute.xlu0 %726 }
 0x3bf   :  { %v5886_v39 = vpop.permute.xlu1 %551 }
 0x3c0   :  { %v735_v16 = vpop.permute.xlu0 %734 }
 0x3c3   :  { %v5888_v28 = vpop.permute.xlu1 %555 }
 0x3c4   :  { %v579_v60 = vpop.permute.xlu0 %578 }
 0x3c7   :  { %v593_v36 = vpop.permute.xlu1 %592 }
 0x3c8   :  { %v632_v13 = vpop.permute.xlu0 %631 }
 0x3cb   :  { %v597_v10 = vpop.permute.xlu1 %596 }
 0x3ce   :  { %2181 = vadd.xlane.f32.xlu0 %v2180_v15 }
 0x3cf   :  { %v601_v51 = vpop.permute.xlu1 %600 }
 0x3d3   :  { %v605_v27 = vpop.permute.xlu1 %604 }
 0x3d7   :  { %v609_v18 = vpop.permute.xlu1 %608 }
 0x3d9   :  { %2178 = vadd.xlane.f32.xlu1 %v2177_v17  ;;  %v615_v17 = vmax.f32 %v611_v12, %v666_v47  ;;  %v640_v47 = vpop.permute.xlu0 %639 }
 0x3db   :  { %v613_v26 = vpop.permute.xlu1 %612  ;;  %v619_v62 = vmax.f32 %v615_v17, %v674_v54 }
 0x3dd   :  { %v622_v21 = vmax.f32 %v619_v62, %v719_v14 }
 0x3df   :  { %v617_v42 = vpop.permute.xlu1 %616  ;;  %v626_v49 = vmax.f32 %v622_v21, %v727_v8 }
 0x3e1   :  { %v630_v9 = vmax.f32 %v626_v49, %v735_v16  ;;  %v534_v49 = vmax.f32 %v5764_v37, %v5868_v6  ;;  %v648_v16 = vpop.permute.xlu0 %647 }
 0x3e3   :  { %v654_v48 = vpop.permute.xlu1 %653  ;;  %v634_v33 = vmax.f32 %v630_v9, %v593_v36 }
 0x3e5   :  { %v638_v1 = vmax.f32 %v634_v33, %v632_v13  ;;  %v538_v13 = vmax.f32 %v534_v49, %v5873_v23 }
 0x3e7   :  { %v662_v63 = vpop.permute.xlu1 %661  ;;  %v542_v36 = vmax.f32 %v538_v13, %v5878_v5 }
 0x3ea   :  { %688 = vrot.lane.b32.xlu1 %v681_v24, %s5183_s24 }
 0x3eb   :  { %v670_v2 = vpop.permute.xlu1 %669 }
 0x3ee   :  { %696 = vrot.lane.b32.xlu1 %v681_v24, %s5179_s22 }
 0x3ef   :  { %v678_v15 = vpop.permute.xlu1 %677 }
 0x3f2   :  { %704 = vrot.lane.b32.xlu1 %v681_v24, %s5185_s26  ;;  %v6680_v24 = vsub.f32 %v5650_v41, %v5699_v57 }
 0x3f3   :  { %v715_v61 = vpop.permute.xlu1 %714 }
 0x3f4   :  { %v2140_v55 = vand.u32 2147483647, %v6680_v24 }
 0x3f6   :  { %749 = vrot.lane.b32.xlu1 %v742_v22, %s5183_s24  ;;  %v2162_v53 = vsel %vm1952_vm8, %v2140_v55, 0.0 }
 0x3f7   :  { %v723_v40 = vpop.permute.xlu1 %722 }
 0x3fa   :  { %757 = vrot.lane.b32.xlu1 %v742_v22, %s5179_s22 }
 0x3fb   :  { %v731_v44 = vpop.permute.xlu1 %730 }
 0x3fe   :  { %765 = vrot.lane.b32.xlu1 %v742_v22, %s5185_s26  ;;  %v642_v22 = vmax.f32 %v638_v1, %v597_v10  ;;  %v546_v1 = vmax.f32 %v542_v36, %v5882_v29 }
 0x3ff   :  { %v739_v45 = vpop.permute.xlu1 %738 }
 0x400   :  { %v646_v54 = vmax.f32 %v642_v22, %v640_v47  ;;  %v550_v19 = vmax.f32 %v546_v1, %v5884_v34 }
 0x402   :  { %v650_v62 = vmax.f32 %v646_v54, %v601_v51  ;;  %v554_v51 = vmax.f32 %v550_v19, %v5886_v39 }
 0x403   :  { %v563_v21 = vpop.permute.xlu1 %562 }
 0x404   :  { %v651_v33 = vmax.f32 %v650_v62, %v648_v16  ;;  %v558_v6 = vmax.f32 %v554_v51, %v5888_v28 }
 0x406   :  { %v656_v10 = vmax.f32 %v651_v33, %v605_v27  ;;  %v5918_v59 = vpop.xlane.xlu0 %2172  ;;  %v561_v5 = vmax.f32 %v558_v6, %v5797_v3 }
 0x407   :  { %v567_v14 = vpop.permute.xlu1 %566 }
 0x408   :  { %v660_v8 = vmax.f32 %v656_v10, %v609_v18  ;;  %v565_v27 = vmax.f32 %v561_v5, %v563_v21 }
 0x40a   :  { %v664_v12 = vmax.f32 %v660_v8, %v613_v26  ;;  %v685_v24 = vpop.permute.xlu0 %684  ;;  %v569_v34 = vmax.f32 %v565_v27, %v567_v14 }
 0x40b   :  { %v571_v17 = vpop.permute.xlu1 %570 }
 0x40c   :  { %v668_v9 = vmax.f32 %v664_v12, %v617_v42  ;;  %v573_v54 = vmax.f32 %v569_v34, %v571_v17 }
 0x40e   :  { %v672_v23 = vmax.f32 %v668_v9, %v654_v48  ;;  %v693_v18 = vpop.permute.xlu0 %692 }
 0x40f   :  { %v575_v22 = vpop.permute.xlu1 %574 }
 0x410   :  { %v676_v55 = vmax.f32 %v672_v23, %v662_v63  ;;  %v577_v26 = vmax.f32 %v573_v54, %v575_v22 }
 0x412   :  { %v680_v29 = vmax.f32 %v676_v55, %v670_v2  ;;  %v701_v16 = vpop.permute.xlu0 %700  ;;  %v581_v42 = vmax.f32 %v577_v26, %v579_v60 }
 0x413   :  { %v583_v62 = vpop.permute.xlu1 %582 }
 0x414   :  { %v585_v33 = vmax.f32 %v581_v42, %v583_v62 }
 0x416   :  { %v709_v3 = vpop.permute.xlu0 %708 }
 0x417   :  { %v587_v48 = vpop.permute.xlu1 %586 }
 0x418   :  { %v589_v2 = vmax.f32 %v585_v33, %v587_v48 }
 0x41a   :  { %v746_v1 = vpop.permute.xlu0 %745 }
 0x41b   :  { %v624_v21 = vpop.permute.xlu1 %623 }
 0x41e   :  { %v754_v8 = vpop.permute.xlu0 %753 }
 0x422   :  { %2163 = vadd.xlane.f32.xlu1 %v2162_v53  ;;  %v683_v53 = vmax.f32 %v680_v29, %v678_v15  ;;  %v762_v60 = vpop.permute.xlu0 %761 }
 0x424   :  { %v687_v47 = vmax.f32 %v683_v53, %v715_v61  ;;  %v628_v61 = vpop.permute.xlu1 %627 }
 0x426   :  { %v691_v39 = vmax.f32 %v687_v47, %v723_v40  ;;  %v770_v23 = vpop.permute.xlu0 %769 }
 0x428   :  { %v695_v49 = vmax.f32 %v691_v39, %v731_v44  ;;  %v636_v40 = vpop.permute.xlu1 %635 }
 0x42a   :  { %v699_v28 = vmax.f32 %v695_v49, %v739_v45 }
 0x42c   :  { %v703_v13 = vmax.f32 %v699_v28, %v685_v24  ;;  %v644_v51 = vpop.permute.xlu1 %643 }
 0x42e   :  { %v707_v63 = vmax.f32 %v703_v13, %v693_v18 }
 0x430   :  { %v711_v36 = vmax.f32 %v707_v63, %v701_v16 }
 0x432   :  { %v712_v15 = vmax.f32 %v711_v36, %v709_v3 }
 0x434   :  { %v717_v14 = vmax.f32 %v712_v15, %v589_v2  ;;  %v2131_v15 = vsub.f32 %v5674_v7, %v5674_v7 }
 0x436   :  { %v721_v10 = vmax.f32 %v717_v14, %v746_v1  ;;  %v2147_v14 = vand.u32 2147483647, %v2131_v15 }
 0x438   :  { %v725_v19 = vmax.f32 %v721_v10, %v624_v21  ;;  %v2183_v1 = vsel %vm1952_vm8, %v2147_v14, 0.0 }
 0x43a   :  { %v729_v44 = vmax.f32 %v725_v19, %v754_v8 }
 0x43c   :  { %v733_v45 = vmax.f32 %v729_v44, %v628_v61 }
 0x43e   :  { %v737_v17 = vmax.f32 %v733_v45, %v762_v60 }
 0x440   :  { %v741_v9 = vmax.f32 %v737_v17, %v636_v40  ;;  %v6681_v40 = vsub.f32 %v5653_v43, %v5699_v57 }
 0x442   :  { %v744_v55 = vmax.f32 %v741_v9, %v770_v23  ;;  %v2144_v8 = vand.u32 2147483647, %v6681_v40 }
 0x444   :  { %v748_v22 = vmax.f32 %v744_v55, %v644_v51  ;;  %v2174_v45 = vsel %vm1952_vm8, %v2144_v8, 0.0 }
 0x462   :  { %v5923_v12 = vpop.xlane.xlu1 %2178 }
 0x466   :  { %v689_v6 = vpop.permute.xlu1 %688 }
 0x467   :  { %v752_v29 = vmax.f32 %v748_v22, %v689_v6  ;;  %v5987_v22 = vpop.xlane.xlu0 %2181 }
 0x46a   :  { %v697_v24 = vpop.permute.xlu1 %696 }
 0x46b   :  { %v756_v53 = vmax.f32 %v752_v29, %v697_v24 }
 0x46e   :  { %v705_v5 = vpop.permute.xlu1 %704 }
 0x46f   :  { %v760_v34 = vmax.f32 %v756_v53, %v705_v5 }
 0x472   :  { %v750_v27 = vpop.permute.xlu1 %749 }
 0x473   :  { %v764_v47 = vmax.f32 %v760_v34, %v750_v27 }
 0x476   :  { %v758_v18 = vpop.permute.xlu1 %757 }
 0x477   :  { %v768_v54 = vmax.f32 %v764_v47, %v758_v18 }
 0x47a   :  { %v766_v62 = vpop.permute.xlu1 %765 }
 0x47b   :  { %v772_v39 = vmax.f32 %v768_v54, %v766_v62 }
 0x47d   :  { %v773_v26 = vadd.f32 1e-08, %v772_v39 }
 0x47f   :  { %4657 = vrcp.f32 %v773_v26 }
 0x48c   :  { %v5925_v49 = vpop.eup %4657 }
 0x48d   :  { %804 = vrot.lane.b32.xlu0 %v5925_v49, %s5172_s15  ;;  %777 = vrot.lane.b32.xlu1 %v5925_v49, %s5188_s29  ;;  %v5932_v16 = vrot.slane %v5925_v49, 4  ;;  %v775_v28 = vmul.f32 %v5925_v49, %v5764_v37  ;;  %v951_v33 = vmul.f32 %v5925_v49, %v5799_v4  ;;  %v1167_v10 = vmul.f32 %v5925_v49, %v5768_v38 }
 0x48e   :  { %v1383_v6 = vmul.f32 %v5925_v49, %v5782_v56 }
 0x48f   :  { %v842_v42 = vmul.f32 %v5932_v16, %v5764_v37  ;;  %v843_v48 = vrot.slane %v775_v28, 4  ;;  %v1059_v2 = vmul.f32 %v5932_v16, %v5799_v4  ;;  %v1275_v51 = vmul.f32 %v5932_v16, %v5768_v38 }
 0x490   :  { %v1491_v24 = vmul.f32 %v5932_v16, %v5782_v56 }
 0x491   :  { %813 = vrot.lane.b32.xlu0 %v5925_v49, %s5189_s30  ;;  %786 = vrot.lane.b32.xlu1 %v5925_v49, %s5168_s8  ;;  %v845_v13 = vadd.f32 %v843_v48, %v842_v42 }
 0x493   :  { %v851_v63 = vrot.slane %v845_v13, 4 }
 0x495   :  { %822 = vrot.lane.b32.xlu0 %v5925_v49, %s5170_s3  ;;  %795 = vrot.lane.b32.xlu1 %v5925_v49, %s5190_s6  ;;  %v953_v3 = vadd.f32 %v951_v33, %v851_v63 }
 0x497   :  { %v956_v36 = vrot.slane %v953_v3, 4 }
 0x499   :  { %891 = vrot.lane.b32.xlu1 %v5932_v16, %s5172_s15  ;;  %782 = vrot.lane.b32.xlu0 %v775_v28, %s5188_s29  ;;  %v1061_v21 = vadd.f32 %v1059_v2, %v956_v36  ;;  %s4519_s15 = sld [smem:[#allocation2 + $0x1]] }
 0x49b   :  { %v1064_v61 = vrot.slane %v1061_v21, 4 }
 0x49d   :  { %906 = vrot.lane.b32.xlu1 %v5932_v16, %s5189_s30  ;;  %846 = vrot.lane.b32.xlu0 %v5932_v16, %s5188_s29  ;;  %v1169_v19 = vadd.f32 %v1167_v10, %v1064_v61 }
 0x49f   :  { %v1172_v44 = vrot.slane %v1169_v19, 4 }
 0x4a1   :  { %861 = vrot.lane.b32.xlu0 %v5932_v16, %s5168_s8  ;;  %852 = vrot.lane.b32.xlu1 %v851_v63, %s5188_s29  ;;  %v1277_v60 = vadd.f32 %v1275_v51, %v1172_v44 }
 0x4a3   :  { %v1280_v17 = vrot.slane %v1277_v60, 4 }
 0x4a5   :  { %876 = vrot.lane.b32.xlu0 %v5932_v16, %s5190_s6  ;;  %957 = vrot.lane.b32.xlu1 %v956_v36, %s5188_s29  ;;  %v1385_v9 = vadd.f32 %v1383_v6, %v1280_v17 }
 0x4a7   :  { %v1388_v23 = vrot.slane %v1385_v9, 4 }
 0x4a9   :  { %921 = vrot.lane.b32.xlu0 %v5932_v16, %s5170_s3  ;;  %v1493_v55 = vadd.f32 %v1491_v24, %v1388_v23 }
 0x4ab   :  { %v1496_v5 = vrot.slane %v1493_v55, 4  ;;  %v5989_v29 = vpop.xlane.xlu1 %2163 }
 0x4ad   :  { %961 = vrot.lane.b32.xlu0 %v845_v13, %s5188_s29 }
 0x4b1   :  { %1069 = vrot.lane.b32.xlu0 %v953_v3, %s5188_s29 }
 0x4b5   :  { %1177 = vrot.lane.b32.xlu0 %v1061_v21, %s5188_s29 }
 0x4c9   :  { %2184 = vadd.xlane.f32.xlu1 %v2183_v1 }
 0x4d4   :  { %2175 = vadd.xlane.f32.xlu0 %v2174_v45 }
 0x4da   :  { %1065 = vrot.lane.b32.xlu1 %v1064_v61, %s5188_s29 }
 0x4de   :  { %1173 = vrot.lane.b32.xlu1 %v1172_v44, %s5188_s29 }
 0x4e2   :  { %1281 = vrot.lane.b32.xlu1 %v1280_v17, %s5188_s29 }
 0x4e6   :  { %1389 = vrot.lane.b32.xlu1 %v1388_v23, %s5188_s29 }
 0x4ea   :  { %1285 = vrot.lane.b32.xlu0 %v1169_v19, %s5188_s29  ;;  %1497 = vrot.lane.b32.xlu1 %v1496_v5, %s5188_s29 }
 0x4ee   :  { %1393 = vrot.lane.b32.xlu0 %v1277_v60, %s5188_s29 }
 0x4f2   :  { %1501 = vrot.lane.b32.xlu0 %v1385_v9, %s5188_s29 }
 0x4ff   :  { %v5991_v27 = vpop.permute.xlu0 %804  ;;  %v5993_v53 = vpop.permute.xlu1 %777 }
 0x500   :  { %v780_v62 = vmul.f32 %v5993_v53, %v5764_v37  ;;  %v954_v8 = vmul.f32 %v5993_v53, %v5799_v4 }
 0x503   :  { %v5995_v34 = vpop.permute.xlu0 %813  ;;  %v5997_v18 = vpop.permute.xlu1 %786 }
 0x507   :  { %v5999_v47 = vpop.permute.xlu0 %822  ;;  %v6001_v54 = vpop.permute.xlu1 %795 }
 0x50b   :  { %v6005_v39 = vpop.permute.xlu1 %891  ;;  %v783_v26 = vpop.permute.xlu0 %782 }
 0x50c   :  { %v785_v28 = vadd.f32 %v783_v26, %v780_v62 }
 0x50e   :  { %791 = vrot.lane.b32.xlu0 %v785_v28, %s5188_s29 }
 0x50f   :  { %v6008_v42 = vpop.permute.xlu1 %906  ;;  %v6010_v48 = vpop.permute.xlu0 %846 }
 0x510   :  { %v849_v21 = vmul.f32 %v6010_v48, %v5764_v37  ;;  %v1062_v55 = vmul.f32 %v6010_v48, %v5799_v4 }
 0x513   :  { %v6012_v13 = vpop.permute.xlu0 %861  ;;  %v853_v63 = vpop.permute.xlu1 %852 }
 0x514   :  { %v855_v33 = vmin.f32 %v785_v28, %v853_v63 }
 0x516   :  { %v856_v3 = vmin.f32 %v855_v33, %v783_v26 }
 0x517   :  { %v6014_v36 = vpop.permute.xlu0 %876  ;;  %v958_v61 = vpop.permute.xlu1 %957 }
 0x518   :  { %v858_v2 = vrot.slane %v856_v3, 4 }
 0x51a   :  { %v860_v15 = vadd.f32 %v858_v2, %v849_v21  ;;  %v1170_v21 = vmul.f32 %v5993_v53, %v5768_v38 }
 0x51b   :  { %v6018_v14 = vpop.permute.xlu0 %921 }
 0x51c   :  { %976 = vrot.lane.b32.xlu0 %v860_v15, %s5188_s29  ;;  %v866_v1 = vrot.slane %v860_v15, 4  ;;  %v960_v10 = vmin.f32 %v860_v15, %v958_v61 }
 0x51e   :  { %867 = vrot.lane.b32.xlu1 %v866_v1, %s5188_s29 }
 0x51f   :  { %v962_v19 = vpop.permute.xlu0 %961 }
 0x520   :  { %v964_v40 = vmin.f32 %v960_v10, %v962_v19 }
 0x522   :  { %v966_v44 = vrot.slane %v964_v40, 4 }
 0x523   :  { %v1070_v9 = vpop.permute.xlu0 %1069 }
 0x524   :  { %v968_v51 = vadd.f32 %v966_v44, %v954_v8  ;;  %v1278_v8 = vmul.f32 %v6010_v48, %v5768_v38 }
 0x526   :  { %1084 = vrot.lane.b32.xlu0 %v968_v51, %s5188_s29  ;;  %v971_v45 = vrot.slane %v968_v51, 4 }
 0x527   :  { %v1178_v62 = vpop.permute.xlu0 %1177 }
 0x528   :  { %972 = vrot.lane.b32.xlu1 %v971_v45, %s5188_s29 }
 0x552   :  { %v6026_v60 = vpop.xlane.xlu1 %2184 }
 0x556   :  { %v1066_v17 = vpop.permute.xlu1 %1065 }
 0x557   :  { %v1068_v6 = vmin.f32 %v968_v51, %v1066_v17 }
 0x559   :  { %v1072_v23 = vmin.f32 %v1068_v6, %v1070_v9 }
 0x55a   :  { %v1174_v26 = vpop.permute.xlu1 %1173 }
 0x55b   :  { %v1074_v24 = vrot.slane %v1072_v23, 4 }
 0x55d   :  { %v1076_v5 = vadd.f32 %v1074_v24, %v1062_v55  ;;  %v6032_v3 = vpop.xlane.xlu0 %2175  ;;  %v6682_v24 = vsub.f32 %v5699_v57, %v5653_v43 }
 0x55e   :  { %v1282_v1 = vpop.permute.xlu1 %1281 }
 0x55f   :  { %v1176_v28 = vmin.f32 %v1076_v5, %v1174_v26  ;;  %1192 = vrot.lane.b32.xlu1 %v1076_v5, %s5188_s29  ;;  %v1079_v63 = vrot.slane %v1076_v5, 4  ;;  %v2150_v55 = vand.u32 2147483647, %v6682_v24  ;;  %v6683_v5 = vsub.f32 %v5699_v57, %v5650_v41 }
 0x561   :  { %v1180_v33 = vmin.f32 %v1176_v28, %v1178_v62  ;;  %1080 = vrot.lane.b32.xlu0 %v1079_v63, %s5188_s29  ;;  %v1286_v19 = vpop.permute.xlu0 %1285  ;;  %v2149_v62 = vand.u32 2147483647, %v6683_v5 }
 0x562   :  { %v1390_v17 = vpop.permute.xlu1 %1389 }
 0x563   :  { %v1182_v2 = vrot.slane %v1180_v33, 4  ;;  %v2192_v33 = vsel %vm1952_vm8, %v2150_v55, 0.0 }
 0x565   :  { %v1184_v15 = vadd.f32 %v1182_v2, %v1170_v21  ;;  %v1394_v45 = vpop.permute.xlu0 %1393  ;;  %v789_v2 = vmul.f32 %v5997_v18, %v5764_v37  ;;  %v2189_v21 = vsel %vm1952_vm8, %v2149_v62, 0.0 }
 0x566   :  { %v1498_v28 = vpop.permute.xlu1 %1497 }
 0x567   :  { %v1284_v61 = vmin.f32 %v1184_v15, %v1282_v1  ;;  %1300 = vrot.lane.b32.xlu0 %v1184_v15, %s5188_s29  ;;  %v1187_v10 = vrot.slane %v1184_v15, 4  ;;  %v1386_v15 = vmul.f32 %v5993_v53, %v5782_v56  ;;  %v1494_v53 = vmul.f32 %v6010_v48, %v5782_v56 }
 0x569   :  { %v1288_v40 = vmin.f32 %v1284_v61, %v1286_v19  ;;  %1188 = vrot.lane.b32.xlu1 %v1187_v10, %s5188_s29  ;;  %v1502_v23 = vpop.permute.xlu0 %1501 }
 0x56b   :  { %v1290_v44 = vrot.slane %v1288_v40, 4 }
 0x56d   :  { %v1292_v51 = vadd.f32 %v1290_v44, %v1278_v8  ;;  %v864_v44 = vmul.f32 %v6012_v13, %v5764_v37 }
 0x56f   :  { %1408 = vrot.lane.b32.xlu0 %v1292_v51, %s5188_s29  ;;  %v1392_v6 = vmin.f32 %v1292_v51, %v1390_v17  ;;  %v1295_v24 = vrot.slane %v1292_v51, 4 }
 0x571   :  { %v1396_v9 = vmin.f32 %v1392_v6, %v1394_v45 }
 0x573   :  { %v1398_v26 = vrot.slane %v1396_v9, 4 }
 0x575   :  { %v1400_v1 = vadd.f32 %v1398_v26, %v1386_v15 }
 0x577   :  { %v1500_v19 = vmin.f32 %v1400_v1, %v1498_v28  ;;  %v1403_v26 = vrot.slane %v1400_v1, 4 }
 0x579   :  { %v1504_v8 = vmin.f32 %v1500_v19, %v1502_v23 }
 0x57b   :  { %v1506_v6 = vrot.slane %v1504_v8, 4 }
 0x57d   :  { %v1508_v5 = vadd.f32 %v1506_v6, %v1494_v53 }
 0x57f   :  { %v1511_v23 = vrot.slane %v1508_v5, 4 }
 0x580   :  { %v792_v63 = vpop.permute.xlu0 %791 }
 0x581   :  { %v794_v43 = vadd.f32 %v792_v63, %v789_v2 }
 0x58d   :  { %2193 = vadd.xlane.f32.xlu1 %v2192_v33 }
 0x58e   :  { %2190 = vadd.xlane.f32.xlu0 %v2189_v21  ;;  %v977_v55 = vpop.permute.xlu0 %976 }
 0x590   :  { %v868_v61 = vpop.permute.xlu1 %867 }
 0x591   :  { %v870_v41 = vmin.f32 %v794_v43, %v868_v61 }
 0x593   :  { %v871_v10 = vmin.f32 %v870_v41, %v792_v63  ;;  %v969_v63 = vmul.f32 %v5997_v18, %v5799_v4 }
 0x595   :  { %v873_v40 = vrot.slane %v871_v10, 4  ;;  %v1077_v10 = vmul.f32 %v6012_v13, %v5799_v4 }
 0x597   :  { %v875_v45 = vadd.f32 %v873_v40, %v864_v44 }
 0x598   :  { %v1085_v2 = vpop.permute.xlu0 %1084 }
 0x599   :  { %v881_v48 = vrot.slane %v875_v45, 4 }
 0x59a   :  { %v973_v17 = vpop.permute.xlu1 %972 }
 0x59b   :  { %v975_v9 = vmin.f32 %v875_v45, %v973_v17 }
 0x59d   :  { %v979_v62 = vmin.f32 %v975_v9, %v977_v55 }
 0x59e   :  { %1296 = vrot.lane.b32.xlu1 %v1295_v24, %s5188_s29 }
 0x59f   :  { %v981_v28 = vrot.slane %v979_v62, 4 }
 0x5a1   :  { %v983_v51 = vadd.f32 %v981_v28, %v969_v63 }
 0x5a2   :  { %1404 = vrot.lane.b32.xlu1 %v1403_v26, %s5188_s29 }
 0x5a3   :  { %v986_v33 = vrot.slane %v983_v51, 4 }
 0x5a4   :  { %1516 = vrot.lane.b32.xlu0 %v1400_v1, %s5188_s29 }
 0x5a6   :  { %1512 = vrot.lane.b32.xlu1 %v1511_v23, %s5188_s29  ;;  %v1293_v23 = vmul.f32 %v6012_v13, %v5768_v38 }
 0x5a8   :  { %800 = vrot.lane.b32.xlu0 %v794_v43, %s5188_s29 }
 0x5aa   :  { %882 = vrot.lane.b32.xlu1 %v881_v48, %s5188_s29 }
 0x5ac   :  { %991 = vrot.lane.b32.xlu0 %v875_v45, %s5188_s29  ;;  %v1185_v45 = vmul.f32 %v5997_v18, %v5768_v38 }
 0x5ae   :  { %987 = vrot.lane.b32.xlu1 %v986_v33, %s5188_s29 }
 0x5b0   :  { %1099 = vrot.lane.b32.xlu0 %v983_v51, %s5188_s29 }
 0x5d1   :  { %v1193_v61 = vpop.permute.xlu1 %1192 }
 0x5d3   :  { %v1081_v21 = vpop.permute.xlu0 %1080 }
 0x5d4   :  { %v1083_v15 = vmin.f32 %v983_v51, %v1081_v21 }
 0x5d6   :  { %v1087_v1 = vmin.f32 %v1083_v15, %v1085_v2 }
 0x5d8   :  { %v1089_v41 = vrot.slane %v1087_v1, 4  ;;  %v1401_v1 = vmul.f32 %v5997_v18, %v5782_v56  ;;  %v798_v18 = vmul.f32 %v6001_v54, %v5764_v37 }
 0x5d9   :  { %v1301_v5 = vpop.permute.xlu0 %1300 }
 0x5da   :  { %v1091_v43 = vadd.f32 %v1089_v41, %v1077_v10 }
 0x5db   :  { %v1189_v19 = vpop.permute.xlu1 %1188 }
 0x5dc   :  { %v1191_v40 = vmin.f32 %v1091_v43, %v1189_v19  ;;  %1207 = vrot.lane.b32.xlu0 %v1091_v43, %s5188_s29  ;;  %v1094_v8 = vrot.slane %v1091_v43, 4 }
 0x5de   :  { %v1195_v44 = vmin.f32 %v1191_v40, %v1193_v61  ;;  %1095 = vrot.lane.b32.xlu1 %v1094_v8, %s5188_s29  ;;  %v1509_v8 = vmul.f32 %v6012_v13, %v5782_v56 }
 0x5e0   :  { %v1197_v17 = vrot.slane %v1195_v44, 4 }
 0x5e1   :  { %v1409_v28 = vpop.permute.xlu0 %1408 }
 0x5e2   :  { %v1199_v6 = vadd.f32 %v1197_v17, %v1185_v45 }
 0x5e4   :  { %1315 = vrot.lane.b32.xlu0 %v1199_v6, %s5188_s29  ;;  %v1202_v9 = vrot.slane %v1199_v6, 4 }
 0x5e6   :  { %1203 = vrot.lane.b32.xlu1 %v1202_v9, %s5188_s29 }
 0x616   :  { %v6076_v24 = vpop.xlane.xlu1 %2193 }
 0x617   :  { %v6081_v33 = vpop.xlane.xlu0 %2190 }
 0x61a   :  { %v1297_v53 = vpop.permute.xlu1 %1296 }
 0x61b   :  { %v1299_v55 = vmin.f32 %v1199_v6, %v1297_v53  ;;  %v1517_v10 = vpop.permute.xlu0 %1516 }
 0x61d   :  { %v1303_v62 = vmin.f32 %v1299_v55, %v1301_v5 }
 0x61e   :  { %v1405_v51 = vpop.permute.xlu1 %1404 }
 0x61f   :  { %v1305_v26 = vrot.slane %v1303_v62, 4  ;;  %v801_v45 = vpop.permute.xlu0 %800 }
 0x620   :  { %v803_v53 = vadd.f32 %v801_v45, %v798_v18 }
 0x621   :  { %v1307_v63 = vadd.f32 %v1305_v26, %v1293_v23  ;;  %v879_v26 = vmul.f32 %v6014_v36, %v5764_v37 }
 0x622   :  { %v1513_v41 = vpop.permute.xlu1 %1512 }
 0x623   :  { %v1407_v48 = vmin.f32 %v1307_v63, %v1405_v51  ;;  %1423 = vrot.lane.b32.xlu1 %v1307_v63, %s5188_s29  ;;  %v1310_v21 = vrot.slane %v1307_v63, 4  ;;  %v992_v63 = vpop.permute.xlu0 %991 }
 0x625   :  { %v1411_v2 = vmin.f32 %v1407_v48, %v1409_v28 }
 0x626   :  { %v883_v9 = vpop.permute.xlu1 %882 }
 0x627   :  { %v1413_v15 = vrot.slane %v1411_v2, 4  ;;  %1311 = vrot.lane.b32.xlu1 %v1310_v21, %s5188_s29  ;;  %v885_v55 = vmin.f32 %v803_v53, %v883_v9  ;;  %v6684_v2 = vsub.f32 %v5699_v57, %v5674_v7 }
 0x629   :  { %v1415_v61 = vadd.f32 %v1413_v15, %v1401_v1  ;;  %v886_v5 = vmin.f32 %v885_v55, %v801_v45  ;;  %v2151_v21 = vand.u32 2147483647, %v6684_v2  ;;  %v6685_v15 = vsub.f32 %v5674_v7, %v5699_v57 }
 0x62a   :  { %v988_v23 = vpop.permute.xlu1 %987 }
 0x62b   :  { %v1515_v43 = vmin.f32 %v1415_v61, %v1513_v41  ;;  %1531 = vrot.lane.b32.xlu1 %v1415_v61, %s5188_s29  ;;  %v1418_v40 = vrot.slane %v1415_v61, 4  ;;  %v888_v62 = vrot.slane %v886_v5, 4  ;;  %v2148_v1 = vand.u32 2147483647, %v6685_v15 }
 0x62c   :  { %v984_v61 = vmul.f32 %v6001_v54, %v5799_v4 }
 0x62d   :  { %v1519_v19 = vmin.f32 %v1515_v43, %v1517_v10  ;;  %v890_v13 = vadd.f32 %v888_v62, %v879_v26  ;;  %v2195_v43 = vsel %vm1952_vm8, %v2151_v21, 0.0 }
 0x62f   :  { %v1521_v44 = vrot.slane %v1519_v19, 4  ;;  %1419 = vrot.lane.b32.xlu1 %v1418_v40, %s5188_s29  ;;  %v990_v28 = vmin.f32 %v890_v13, %v988_v23  ;;  %v2186_v19 = vsel %vm1952_vm8, %v2148_v1, 0.0  ;;  %v896_v5 = vrot.slane %v890_v13, 4 }
 0x630   :  { %v1200_v23 = vmul.f32 %v6001_v54, %v5768_v38 }
 0x631   :  { %v1523_v17 = vadd.f32 %v1521_v44, %v1509_v8  ;;  %v994_v51 = vmin.f32 %v990_v28, %v992_v63  ;;  %v1100_v8 = vpop.permute.xlu0 %1099 }
 0x633   :  { %v1526_v6 = vrot.slane %v1523_v17, 4  ;;  %v996_v48 = vrot.slane %v994_v51, 4  ;;  %v1092_v17 = vmul.f32 %v6014_v36, %v5799_v4 }
 0x635   :  { %1527 = vrot.lane.b32.xlu0 %v1526_v6, %s5188_s29  ;;  %v998_v10 = vadd.f32 %v996_v48, %v984_v61  ;;  %v1308_v61 = vmul.f32 %v6014_v36, %v5768_v38 }
 0x637   :  { %v1001_v26 = vrot.slane %v998_v10, 4 }
 0x64e   :  { %v1208_v9 = vpop.permute.xlu0 %1207 }
 0x650   :  { %v1096_v41 = vpop.permute.xlu1 %1095 }
 0x651   :  { %v1098_v40 = vmin.f32 %v998_v10, %v1096_v41 }
 0x653   :  { %2196 = vadd.xlane.f32.xlu1 %v2195_v43  ;;  %v1102_v44 = vmin.f32 %v1098_v40, %v1100_v8 }
 0x654   :  { %2187 = vadd.xlane.f32.xlu0 %v2186_v19 }
 0x655   :  { %v1104_v45 = vrot.slane %v1102_v44, 4  ;;  %v1416_v44 = vmul.f32 %v6001_v54, %v5782_v56  ;;  %v2136_v54 = vsub.f32 %v5699_v57, %v5699_v57  ;;  %v894_v57 = vmul.f32 %v6005_v39, %v5764_v37 }
 0x656   :  { %v1316_v2 = vpop.permute.xlu0 %1315 }
 0x657   :  { %v1106_v7 = vadd.f32 %v1104_v45, %v1092_v17 }
 0x658   :  { %v1204_v18 = vpop.permute.xlu1 %1203 }
 0x659   :  { %v1206_v6 = vmin.f32 %v1106_v7, %v1204_v18 }
 0x65b   :  { %v1210_v55 = vmin.f32 %v1206_v6, %v1208_v9  ;;  %v1524_v9 = vmul.f32 %v6014_v36, %v5782_v56 }
 0x65d   :  { %v1212_v62 = vrot.slane %v1210_v55, 4 }
 0x65f   :  { %v1214_v28 = vadd.f32 %v1212_v62, %v1200_v23 }
 0x664   :  { %809 = vrot.lane.b32.xlu1 %v803_v53, %s5188_s29  ;;  %v1109_v53 = vrot.slane %v1106_v7, 4 }
 0x668   :  { %1006 = vrot.lane.b32.xlu1 %v890_v13, %s5188_s29  ;;  %v1217_v13 = vrot.slane %v1214_v28, 4 }
 0x66a   :  { %897 = vrot.lane.b32.xlu0 %v896_v5, %s5188_s29 }
 0x66c   :  { %1114 = vrot.lane.b32.xlu1 %v998_v10, %s5188_s29 }
 0x66e   :  { %1002 = vrot.lane.b32.xlu0 %v1001_v26, %s5188_s29  ;;  %v2152_v26 = vand.u32 2147483647, %v2136_v54 }
 0x670   :  { %1222 = vrot.lane.b32.xlu1 %v1106_v7, %s5188_s29  ;;  %v2198_v23 = vsel %vm1952_vm8, %v2152_v26, 0.0  ;;  %vm2299_vm8 = vcmask 35840  }
 0x672   :  { %1110 = vrot.lane.b32.xlu0 %v1109_v53, %s5188_s29 }
 0x674   :  { %1330 = vrot.lane.b32.xlu1 %v1214_v28, %s5188_s29 }
 0x676   :  { %1218 = vrot.lane.b32.xlu0 %v1217_v13, %s5188_s29  ;;  %v807_v13 = vmul.f32 %v5991_v27, %v5764_v37 }
 0x695   :  { %v1424_v63 = vpop.permute.xlu1 %1423 }
 0x699   :  { %v1312_v51 = vpop.permute.xlu1 %1311 }
 0x69a   :  { %v1314_v48 = vmin.f32 %v1214_v28, %v1312_v51 }
 0x69c   :  { %v1318_v21 = vmin.f32 %v1314_v48, %v1316_v2 }
 0x69d   :  { %v1532_v15 = vpop.permute.xlu1 %1531 }
 0x69e   :  { %v1320_v1 = vrot.slane %v1318_v21, 4 }
 0x6a0   :  { %v1322_v41 = vadd.f32 %v1320_v1, %v1308_v61 }
 0x6a1   :  { %v1420_v10 = vpop.permute.xlu1 %1419 }
 0x6a2   :  { %v1422_v43 = vmin.f32 %v1322_v41, %v1420_v10  ;;  %1438 = vrot.lane.b32.xlu1 %v1322_v41, %s5188_s29  ;;  %v1325_v19 = vrot.slane %v1322_v41, 4 }
 0x6a4   :  { %v1426_v40 = vmin.f32 %v1422_v43, %v1424_v63  ;;  %1326 = vrot.lane.b32.xlu0 %v1325_v19, %s5188_s29 }
 0x6a6   :  { %v1428_v8 = vrot.slane %v1426_v40, 4  ;;  %v999_v40 = vmul.f32 %v5991_v27, %v5799_v4 }
 0x6a7   :  { %v1528_v17 = vpop.permute.xlu0 %1527 }
 0x6a8   :  { %v1430_v45 = vadd.f32 %v1428_v8, %v1416_v44 }
 0x6aa   :  { %v1530_v7 = vmin.f32 %v1430_v45, %v1528_v17  ;;  %1546 = vrot.lane.b32.xlu1 %v1430_v45, %s5188_s29  ;;  %v1433_v18 = vrot.slane %v1430_v45, 4 }
 0x6ac   :  { %v1534_v6 = vmin.f32 %v1530_v7, %v1532_v15  ;;  %1434 = vrot.lane.b32.xlu0 %v1433_v18, %s5188_s29 }
 0x6ae   :  { %v1536_v55 = vrot.slane %v1534_v6, 4 }
 0x6b0   :  { %v1538_v5 = vadd.f32 %v1536_v55, %v1524_v9  ;;  %v1107_v9 = vmul.f32 %v6005_v39, %v5799_v4 }
 0x6b2   :  { %v1541_v62 = vrot.slane %v1538_v5, 4 }
 0x6b4   :  { %1542 = vrot.lane.b32.xlu0 %v1541_v62, %s5188_s29 }
 0x6d3   :  { %2199 = vadd.xlane.f32.xlu0 %v2198_v23 }
 0x6dc   :  { %v6132_v28 = vpop.xlane.xlu1 %2196 }
 0x6dd   :  { %v6134_v53 = vpop.xlane.xlu0 %2187 }
 0x6e0   :  { %v810_v36 = vpop.permute.xlu1 %809 }
 0x6e1   :  { %v812_v63 = vadd.f32 %v810_v36, %v807_v13  ;;  %v898_v51 = vpop.permute.xlu0 %897  ;;  %v1215_v13 = vmul.f32 %v5991_v27, %v5768_v38 }
 0x6e3   :  { %v900_v48 = vmin.f32 %v812_v63, %v898_v51  ;;  %818 = vrot.lane.b32.xlu1 %v812_v63, %s5188_s29 }
 0x6e4   :  { %v1007_v10 = vpop.permute.xlu1 %1006 }
 0x6e5   :  { %v901_v2 = vmin.f32 %v900_v48, %v810_v36  ;;  %v1003_v1 = vpop.permute.xlu0 %1002 }
 0x6e7   :  { %v903_v21 = vrot.slane %v901_v2, 4 }
 0x6e8   :  { %v1115_v7 = vpop.permute.xlu1 %1114 }
 0x6e9   :  { %v905_v15 = vadd.f32 %v903_v21, %v894_v57  ;;  %v1111_v44 = vpop.permute.xlu0 %1110 }
 0x6eb   :  { %v1005_v61 = vmin.f32 %v905_v15, %v1003_v1  ;;  %1021 = vrot.lane.b32.xlu1 %v905_v15, %s5188_s29  ;;  %v911_v41 = vrot.slane %v905_v15, 4  ;;  %v1323_v1 = vmul.f32 %v6005_v39, %v5768_v38 }
 0x6ec   :  { %v1223_v26 = vpop.permute.xlu1 %1222 }
 0x6ed   :  { %v1009_v43 = vmin.f32 %v1005_v61, %v1007_v10  ;;  %912 = vrot.lane.b32.xlu0 %v911_v41, %s5188_s29  ;;  %v1219_v5 = vpop.permute.xlu0 %1218 }
 0x6ef   :  { %v1011_v19 = vrot.slane %v1009_v43, 4 }
 0x6f0   :  { %v1331_v21 = vpop.permute.xlu1 %1330 }
 0x6f1   :  { %v1013_v8 = vadd.f32 %v1011_v19, %v999_v40 }
 0x6f3   :  { %v1113_v45 = vmin.f32 %v1013_v8, %v1111_v44  ;;  %1129 = vrot.lane.b32.xlu1 %v1013_v8, %s5188_s29  ;;  %v1016_v17 = vrot.slane %v1013_v8, 4  ;;  %v1431_v44 = vmul.f32 %v5991_v27, %v5782_v56  ;;  %v816_v27 = vmul.f32 %v5995_v34, %v5764_v37 }
 0x6f5   :  { %v1117_v18 = vmin.f32 %v1113_v45, %v1115_v7  ;;  %1017 = vrot.lane.b32.xlu0 %v1016_v17, %s5188_s29 }
 0x6f7   :  { %v1119_v6 = vrot.slane %v1117_v18, 4 }
 0x6f9   :  { %v1121_v55 = vadd.f32 %v1119_v6, %v1107_v9 }
 0x6fb   :  { %v1221_v62 = vmin.f32 %v1121_v55, %v1219_v5  ;;  %1237 = vrot.lane.b32.xlu1 %v1121_v55, %s5188_s29  ;;  %v1124_v54 = vrot.slane %v1121_v55, 4  ;;  %v1539_v55 = vmul.f32 %v6005_v39, %v5782_v56  ;;  %v909_v39 = vmul.f32 %v6008_v42, %v5764_v37 }
 0x6fd   :  { %v1225_v23 = vmin.f32 %v1221_v62, %v1223_v26  ;;  %1125 = vrot.lane.b32.xlu0 %v1124_v54, %s5188_s29 }
 0x6ff   :  { %v1227_v36 = vrot.slane %v1225_v23, 4 }
 0x701   :  { %v1229_v63 = vadd.f32 %v1227_v36, %v1215_v13 }
 0x703   :  { %1345 = vrot.lane.b32.xlu1 %v1229_v63, %s5188_s29  ;;  %v1232_v51 = vrot.slane %v1229_v63, 4 }
 0x705   :  { %1233 = vrot.lane.b32.xlu0 %v1232_v51, %s5188_s29 }
 0x714   :  { %v1439_v19 = vpop.permute.xlu1 %1438 }
 0x716   :  { %v1327_v48 = vpop.permute.xlu0 %1326 }
 0x717   :  { %v1329_v2 = vmin.f32 %v1229_v63, %v1327_v48 }
 0x719   :  { %v1333_v57 = vmin.f32 %v1329_v2, %v1331_v21 }
 0x71b   :  { %v1335_v15 = vrot.slane %v1333_v57, 4 }
 0x71c   :  { %v1547_v6 = vpop.permute.xlu1 %1546 }
 0x71d   :  { %v1337_v61 = vadd.f32 %v1335_v15, %v1323_v1 }
 0x71e   :  { %v1435_v41 = vpop.permute.xlu0 %1434 }
 0x71f   :  { %v1437_v10 = vmin.f32 %v1337_v61, %v1435_v41  ;;  %1453 = vrot.lane.b32.xlu1 %v1337_v61, %s5188_s29  ;;  %v1340_v43 = vrot.slane %v1337_v61, 4 }
 0x721   :  { %v1441_v40 = vmin.f32 %v1437_v10, %v1439_v19  ;;  %1341 = vrot.lane.b32.xlu0 %v1340_v43, %s5188_s29  ;;  %v1014_v10 = vmul.f32 %v5995_v34, %v5799_v4 }
 0x723   :  { %v1443_v8 = vrot.slane %v1441_v40, 4 }
 0x725   :  { %v1445_v45 = vadd.f32 %v1443_v8, %v1431_v44 }
 0x726   :  { %v1543_v17 = vpop.permute.xlu0 %1542 }
 0x727   :  { %v1545_v7 = vmin.f32 %v1445_v45, %v1543_v17  ;;  %1561 = vrot.lane.b32.xlu1 %v1445_v45, %s5188_s29  ;;  %v1448_v18 = vrot.slane %v1445_v45, 4 }
 0x729   :  { %v1549_v9 = vmin.f32 %v1545_v7, %v1547_v6  ;;  %1449 = vrot.lane.b32.xlu0 %v1448_v18, %s5188_s29  ;;  %v1122_v7 = vmul.f32 %v6008_v42, %v5799_v4 }
 0x72b   :  { %v1551_v5 = vrot.slane %v1549_v9, 4 }
 0x72d   :  { %v1553_v62 = vadd.f32 %v1551_v5, %v1539_v55 }
 0x72f   :  { %v1556_v54 = vrot.slane %v1553_v62, 4 }
 0x731   :  { %1557 = vrot.lane.b32.xlu0 %v1556_v54, %s5188_s29  ;;  %v1230_v54 = vmul.f32 %v5995_v34, %v5768_v38 }
 0x755   :  { %v819_v26 = vpop.permute.xlu1 %818 }
 0x756   :  { %v821_v23 = vadd.f32 %v819_v26, %v816_v27 }
 0x758   :  { %827 = vrot.lane.b32.xlu0 %v821_v23, %s5188_s29 }
 0x75c   :  { %v6169_v13 = vpop.xlane.xlu0 %2199 }
 0x75d   :  { %v1022_v15 = vpop.permute.xlu1 %1021 }
 0x760   :  { %v913_v36 = vpop.permute.xlu0 %912 }
 0x761   :  { %v915_v63 = vmin.f32 %v821_v23, %v913_v36  ;;  %v6686_v36 = vlaneseq }
 0x763   :  { %v916_v51 = vmin.f32 %v915_v63, %v819_v26  ;;  %v6192_v63 = vand.u32 127, %v6686_v36 }
 0x765   :  { %v918_v48 = vrot.slane %v916_v51, 4  ;;  %v1130_v8 = vpop.permute.xlu1 %1129 }
 0x767   :  { %v1018_v2 = vpop.permute.xlu0 %1017  ;;  %v920_v21 = vadd.f32 %v918_v48, %v909_v39 }
 0x769   :  { %v1020_v57 = vmin.f32 %v920_v21, %v1018_v2  ;;  %1036 = vrot.lane.b32.xlu0 %v920_v21, %s5188_s29  ;;  %v926_v61 = vrot.slane %v920_v21, 4  ;;  %v6196_v21 = vsub.s32 %v6192_v63, %v5756_v30 }
 0x76b   :  { %v1024_v1 = vmin.f32 %v1020_v57, %v1022_v15  ;;  %v2226_v15 = vrot.slane %v5743_v32, %v6196_v21 }
 0x76d   :  { %v1026_v41 = vrot.slane %v1024_v1, 4  ;;  %927 = vrot.lane.b32.xlu0 %v926_v61, %s5188_s29  ;;  %v1238_v5 = vpop.permute.xlu1 %1237  ;;  %v2222_v1 = vrot.slane %v5741_v25, %v6196_v21 }
 0x76f   :  { %v1126_v43 = vpop.permute.xlu0 %1125  ;;  %v1028_v19 = vadd.f32 %v1026_v41, %v1014_v10  ;;  %v2230_v41 = vrot.slane %v5758_v50, %v6196_v21 }
 0x771   :  { %v1128_v40 = vmin.f32 %v1028_v19, %v1126_v43  ;;  %1144 = vrot.lane.b32.xlu0 %v1028_v19, %s5188_s29  ;;  %v1031_v45 = vrot.slane %v1028_v19, 4  ;;  %v2234_v43 = vrot.slane %v5989_v29, %v6196_v21 }
 0x773   :  { %v1132_v44 = vmin.f32 %v1128_v40, %v1130_v8  ;;  %v2283_v40 = vsel %vm267_vm2, %v2226_v15, %v2222_v1 }
 0x774   :  { %v2284_v32 = vsel %vm270_vm3, %v2230_v41, %v2283_v40 }
 0x775   :  { %v1134_v17 = vrot.slane %v1132_v44, 4  ;;  %1032 = vrot.lane.b32.xlu0 %v1031_v45, %s5188_s29  ;;  %v1346_v39 = vpop.permute.xlu1 %1345  ;;  %v2285_v25 = vsel %vm273_vm4, %v2234_v43, %v2284_v32 }
 0x776   :  { %v2300_v50 = vsel %vm2299_vm8, %v2285_v25, 0.0 }
 0x777   :  { %v1234_v18 = vpop.permute.xlu0 %1233  ;;  %v1136_v6 = vadd.f32 %v1134_v17, %v1122_v7  ;;  %v1446_v17 = vmul.f32 %v5995_v34, %v5782_v56  ;;  %v825_v34 = vmul.f32 %v5999_v47, %v5764_v37 }
 0x779   :  { %v1236_v9 = vmin.f32 %v1136_v6, %v1234_v18  ;;  %1252 = vrot.lane.b32.xlu1 %v1136_v6, %s5188_s29  ;;  %v1139_v55 = vrot.slane %v1136_v6, 4 }
 0x77b   :  { %v1240_v62 = vmin.f32 %v1236_v9, %v1238_v5  ;;  %1140 = vrot.lane.b32.xlu0 %v1139_v55, %s5188_s29  ;;  %v1554_v5 = vmul.f32 %v6008_v42, %v5782_v56 }
 0x77d   :  { %v1242_v27 = vrot.slane %v1240_v62, 4  ;;  %831 = vrot.lane.b32.xlu1 %v5925_v49, %s5191_s7 }
 0x77f   :  { %v1244_v26 = vadd.f32 %v1242_v27, %v1230_v54 }
 0x781   :  { %936 = vrot.lane.b32.xlu1 %v5932_v16, %s5191_s7  ;;  %1360 = vrot.lane.b32.xlu0 %v1244_v26, %s5188_s29  ;;  %v1247_v23 = vrot.slane %v1244_v26, 4  ;;  %v1338_v16 = vmul.f32 %v6008_v42, %v5768_v38 }
 0x785   :  { %1248 = vrot.lane.b32.xlu0 %v1247_v23, %s5188_s29 }
 0x791   :  { %v1454_v8 = vpop.permute.xlu1 %1453 }
 0x793   :  { %v1342_v51 = vpop.permute.xlu0 %1341 }
 0x794   :  { %v1344_v48 = vmin.f32 %v1244_v26, %v1342_v51 }
 0x796   :  { %v1348_v2 = vmin.f32 %v1344_v48, %v1346_v39 }
 0x798   :  { %v1350_v49 = vrot.slane %v1348_v2, 4 }
 0x799   :  { %v1562_v6 = vpop.permute.xlu1 %1561 }
 0x79a   :  { %v1352_v57 = vadd.f32 %v1350_v49, %v1338_v16  ;;  %v924_v49 = vmul.f32 %v6018_v14, %v5764_v37 }
 0x79b   :  { %v1450_v61 = vpop.permute.xlu0 %1449 }
 0x79c   :  { %v1452_v10 = vmin.f32 %v1352_v57, %v1450_v61  ;;  %1468 = vrot.lane.b32.xlu0 %v1352_v57, %s5188_s29  ;;  %v1355_v19 = vrot.slane %v1352_v57, 4 }
 0x79e   :  { %v1456_v44 = vmin.f32 %v1452_v10, %v1454_v8  ;;  %v1029_v10 = vmul.f32 %v5999_v47, %v5799_v4 }
 0x7a0   :  { %1356 = vrot.lane.b32.xlu0 %v1355_v19, %s5188_s29  ;;  %v1458_v45 = vrot.slane %v1456_v44, 4 }
 0x7a2   :  { %v1460_v29 = vadd.f32 %v1458_v45, %v1446_v17  ;;  %v1137_v45 = vmul.f32 %v6018_v14, %v5799_v4 }
 0x7a3   :  { %v1558_v7 = vpop.permute.xlu0 %1557 }
 0x7a4   :  { %v1560_v18 = vmin.f32 %v1460_v29, %v1558_v7  ;;  %v1463_v54 = vrot.slane %v1460_v29, 4 }
 0x7a5   :  { %2301 = vadd.xlane.f32.xlu1 %v2300_v50 }
 0x7a6   :  { %v1564_v9 = vmin.f32 %v1560_v18, %v1562_v6 }
 0x7a8   :  { %v1566_v55 = vrot.slane %v1564_v9, 4  ;;  %v1245_v9 = vmul.f32 %v5999_v47, %v5768_v38 }
 0x7aa   :  { %v1568_v62 = vadd.f32 %v1566_v55, %v1554_v5 }
 0x7ac   :  { %v1571_v27 = vrot.slane %v1568_v62, 4 }
 0x7b6   :  { %1576 = vrot.lane.b32.xlu1 %v1460_v29, %s5188_s29 }
 0x7ba   :  { %1464 = vrot.lane.b32.xlu1 %v1463_v54, %s5188_s29  ;;  %v2242_v54 = vrot.slane %v5753_v58, %v6196_v21  ;;  %v2258_v58 = vrot.slane %v5987_v22, %v6196_v21 }
 0x7be   :  { %1769 = vxpose.xlu0.b32.start.end [1/1] (short) (narrow) %v5745_v35, 8  ;;  %1572 = vrot.lane.b32.xlu1 %v1571_v27, %s5188_s29  ;;  %v2246_v27 = vrot.slane %v5918_v59, %v6196_v21  ;;  %v2266_v59 = vrot.slane %v6134_v53, %v6196_v21 }
 0x7ca   :  { %v828_v26 = vpop.permute.xlu0 %827 }
 0x7cb   :  { %v830_v23 = vadd.f32 %v828_v26, %v825_v34  ;;  %v2238_v34 = vrot.slane %v5751_v31, %v6196_v21 }
 0x7cd   :  { %836 = vrot.lane.b32.xlu1 %v830_v23, %s5188_s29 }
 0x7db   :  { %v1037_v36 = vpop.permute.xlu0 %1036 }
 0x7df   :  { %v928_v42 = vpop.permute.xlu0 %927 }
 0x7e0   :  { %v930_v51 = vmin.f32 %v830_v23, %v928_v42  ;;  %v2254_v23 = vrot.slane %v5923_v12, %v6196_v21  ;;  %v2262_v42 = vrot.slane %v6026_v60, %v6196_v21 }
 0x7e2   :  { %v931_v48 = vmin.f32 %v930_v51, %v828_v26  ;;  %v2250_v26 = vrot.slane %v6032_v3, %v6196_v21  ;;  %v2289_v3 = vsel %vm267_vm2, %v2258_v58, %v2254_v23 }
 0x7e3   :  { %v1145_v39 = vpop.permute.xlu0 %1144  ;;  %v2290_v12 = vsel %vm270_vm3, %v2262_v42, %v2289_v3 }
 0x7e4   :  { %v933_v2 = vrot.slane %v931_v48, 4 }
 0x7e6   :  { %v935_v16 = vadd.f32 %v933_v2, %v924_v49  ;;  %v2291_v2 = vsel %vm273_vm4, %v2266_v59, %v2290_v12 }
 0x7e7   :  { %v1033_v57 = vpop.permute.xlu0 %1032  ;;  %v2306_v60 = vsel %vm2299_vm8, %v2291_v2, 0.0 }
 0x7e8   :  { %v1035_v15 = vmin.f32 %v935_v16, %v1033_v57  ;;  %1051 = vrot.lane.b32.xlu1 %v935_v16, %s5188_s29  ;;  %v941_v61 = vrot.slane %v935_v16, 4 }
 0x7ea   :  { %v1039_v1 = vmin.f32 %v1035_v15, %v1037_v36  ;;  %v2286_v36 = vsel %vm267_vm2, %v2242_v54, %v2238_v34 }
 0x7eb   :  { %v1253_v7 = vpop.permute.xlu1 %1252  ;;  %v2287_v51 = vsel %vm270_vm3, %v2246_v27, %v2286_v36  ;;  %v1569_v36 = vmul.f32 %v6018_v14, %v5782_v56 }
 0x7ec   :  { %v1041_v41 = vrot.slane %v1039_v1, 4  ;;  %942 = vrot.lane.b32.xlu1 %v941_v61, %s5188_s29  ;;  %v2288_v31 = vsel %vm273_vm4, %v2250_v26, %v2287_v51  ;;  %v1353_v61 = vmul.f32 %v6018_v14, %v5768_v38  ;;  %v2470_v14 = vmul.f32 %v5737_v20, %v5737_v20 }
 0x7ed   :  { %v1141_v19 = vpop.permute.xlu0 %1140 }
 0x7ee   :  { %v1043_v43 = vadd.f32 %v1041_v41, %v1029_v10 }
 0x7ef   :  { %v6265_v22 = vpop.permute.xlu1 %831 }
 0x7f0   :  { %v1143_v40 = vmin.f32 %v1043_v43, %v1141_v19  ;;  %1159 = vrot.lane.b32.xlu1 %v1043_v43, %s5188_s29  ;;  %v1046_v44 = vrot.slane %v1043_v43, 4  ;;  %v834_v12 = vmul.f32 %v6265_v22, %v5764_v37 }
 0x7f2   :  { %v1147_v8 = vmin.f32 %v1143_v40, %v1145_v39  ;;  %v2303_v39 = vsel %vm2299_vm8, %v2288_v31, 0.0 }
 0x7f3   :  { %v1361_v32 = vpop.permute.xlu0 %1360  ;;  %v6267_v16 = vpop.permute.xlu1 %936 }
 0x7f4   :  { %v1149_v25 = vrot.slane %v1147_v8, 4  ;;  %1047 = vrot.lane.b32.xlu1 %v1046_v44, %s5188_s29 }
 0x7f6   :  { %v1151_v50 = vadd.f32 %v1149_v25, %v1137_v45 }
 0x7f7   :  { %v1249_v17 = vpop.permute.xlu0 %1248 }
 0x7f8   :  { %v1251_v29 = vmin.f32 %v1151_v50, %v1249_v17  ;;  %1267 = vrot.lane.b32.xlu1 %v1151_v50, %s5188_s29  ;;  %v1154_v6 = vrot.slane %v1151_v50, 4 }
 0x7fa   :  { %v1255_v18 = vmin.f32 %v1251_v29, %v1253_v7  ;;  %v1806_v7 = vmul.f32 2.0, %v5747_v46 }
 0x7fc   :  { %v1257_v55 = vrot.slane %v1255_v18, 4  ;;  %1155 = vrot.lane.b32.xlu1 %v1154_v6, %s5188_s29 }
 0x7fe   :  { %v1259_v5 = vadd.f32 %v1257_v55, %v1245_v9  ;;  %v2270_v9 = vrot.slane %v6081_v33, %v6196_v21  ;;  %v2278_v55 = vrot.slane %v6132_v28, %v6196_v21 }
 0x800   :  { %1375 = vrot.lane.b32.xlu1 %v1259_v5, %s5188_s29  ;;  %v1262_v62 = vrot.slane %v1259_v5, 4 }
 0x802   :  { %1263 = vrot.lane.b32.xlu0 %v1262_v62, %s5188_s29 }
 0x80e   :  { %v1469_v48 = vpop.permute.xlu0 %1468 }
 0x812   :  { %v1357_v49 = vpop.permute.xlu0 %1356 }
 0x813   :  { %v1359_v53 = vmin.f32 %v1259_v5, %v1357_v49  ;;  %v2282_v5 = vrot.slane %v6169_v13, %v6196_v21 }
 0x815   :  { %v1363_v57 = vmin.f32 %v1359_v53, %v1361_v32  ;;  %v1461_v32 = vmul.f32 %v5999_v47, %v5782_v56  ;;  %v2274_v47 = vrot.slane %v6076_v24, %v6196_v21  ;;  %v2471_v53 = vsel %vm332_vm5, %v2470_v14, 0.0 }
 0x817   :  { %v1365_v1 = vrot.slane %v1363_v57, 4 }
 0x819   :  { %v1367_v10 = vadd.f32 %v1365_v1, %v1353_v61  ;;  %v939_v61 = vmul.f32 %v6267_v16, %v5764_v37 }
 0x81b   :  { %v1370_v40 = vrot.slane %v1367_v10, 4 }
 0x821   :  { %2304 = vadd.xlane.f32.xlu0 %v2303_v39 }
 0x824   :  { %2307 = vadd.xlane.f32.xlu1 %v2306_v60 }
 0x82e   :  { %v6269_v15 = vpop.xlane.xlu1 %2301 }
 0x832   :  { %v1577_v41 = vpop.permute.xlu1 %1576 }
 0x835   :  { %1483 = vrot.lane.b32.xlu1 %v1367_v10, %s5188_s29 }
 0x836   :  { %v1465_v43 = vpop.permute.xlu1 %1464 }
 0x837   :  { %v1467_v19 = vmin.f32 %v1367_v10, %v1465_v43 }
 0x839   :  { %v1471_v8 = vmin.f32 %v1467_v19, %v1469_v48  ;;  %1371 = vrot.lane.b32.xlu1 %v1370_v40, %s5188_s29 }
 0x83a   :  { %v1785_v50 = vpop.trf.xlu0  ;;  %v1573_v27 = vpop.permute.xlu1 %1572 }
 0x83b   :  { %v1473_v44 = vrot.slane %v1471_v8, 4  ;;  %v1804_v17 = vrot.slane %v1785_v50, %v5761_v0 }
 0x83d   :  { %v1475_v25 = vadd.f32 %v1473_v44, %v1461_v32  ;;  %v1805_v29 = vadd.f32 %v1804_v17, %v5745_v35  ;;  %v2292_v35 = vsel %vm267_vm2, %v2274_v47, %v2270_v9  ;;  %v1044_v44 = vmul.f32 %v6265_v22, %v5799_v4 }
 0x83e   :  { %v2293_v46 = vsel %vm270_vm3, %v2278_v55, %v2292_v35  ;;  %v1152_v17 = vmul.f32 %v6267_v16, %v5799_v4  ;;  %v1260_v35 = vmul.f32 %v6265_v22, %v5768_v38  ;;  %vm6687_vm3 = vcmask 1046534  }
 0x83f   :  { %1591 = vrot.lane.b32.xlu0 %v1475_v25, %s5188_s29  ;;  %v1478_v45 = vrot.slane %v1475_v25, 4  ;;  %v1807_v18 = vsub.f32 %v1805_v29, %v1806_v7  ;;  %v2294_v62 = vsel %vm273_vm4, %v2282_v5, %v2293_v46  ;;  %v1575_v34 = vmin.f32 %v1475_v25, %v1573_v27  ;;  %v837_v3 = vpop.permute.xlu1 %836 }
 0x840   :  { %v2309_v24 = vsel %vm2299_vm8, %v2294_v62, 0.0  ;;  %v839_v2 = vadd.f32 %v837_v3, %v834_v12  ;;  %vm6688_vm4 = vcmask 1047559  }
 0x841   :  { %1479 = vrot.lane.b32.xlu1 %v1478_v45, %s5188_s29  ;;  %v6282_v6 = vmax.f32 %v1807_v18, 0.0  ;;  %v1579_v26 = vmin.f32 %v1575_v34, %v1577_v41 }
 0x843   :  { %4659 = vrsqrt.f32 %v6282_v6  ;;  %vm1811_vm0 = vcmp.eq.f32.partialorder %v6282_v6, inf  ;;  %v1814_v13 = vand.u32 2147483648, %v6282_v6  ;;  %v1581_v21 = vrot.slane %v1579_v26, 4 }
 0x844   :  { %vm1813_vm2 = vcmp.eq.f32.partialorder %v6282_v6, 0.0  ;;  %vm2518_vm5 = vcmp.le.f32.partialorder %v6282_v6, 1e-12 }
 0x845   :  { %v1583_v42 = vadd.f32 %v1581_v21, %v1569_v36 }
 0x847   :  { %v1586_v59 = vrot.slane %v1583_v42, 4 }
 0x850   :  { %v4660_v54 = vpop.eup %4659 }
 0x851   :  { %v1810_v33 = vmul.f32 %v4660_v54, %v6282_v6 }
 0x853   :  { %v1812_v28 = vsel %vm1811_vm0, %v6282_v6, %v1810_v33 }
 0x854   :  { %v1815_v23 = vsel %vm1813_vm2, %v1814_v13, %v1812_v28 }
 0x855   :  { %v1816_v58 = vmul.f32 0.125, %v1815_v23  ;;  %v1476_v23 = vmul.f32 %v6265_v22, %v5782_v56 }
 0x857   :  { %v2522_v51 = vmul.f32 0.4, %v1816_v58 }
 0x859   :  { %v2524_v31 = vrot.slane %v2522_v51, 4  ;;  %v2537_v51 = vadd.s32 4294967268, %v6192_v63 }
 0x85a   :  { %v1052_v48 = vpop.permute.xlu1 %1051 }
 0x85e   :  { %v943_v39 = vpop.permute.xlu1 %942 }
 0x85f   :  { %v945_v60 = vmin.f32 %v839_v2, %v943_v39  ;;  %v1584_v39 = vmul.f32 %v6267_v16, %v5782_v56  ;;  %v2540_v2 = vsub.s32 %v2537_v51, %v5756_v30 }
 0x861   :  { %v946_v49 = vmin.f32 %v945_v60, %v837_v3  ;;  %v2529_v60 = vmul.f32 0.2, %v6269_v15 }
 0x862   :  { %v1160_v57 = vpop.permute.xlu1 %1159 }
 0x863   :  { %v948_v1 = vrot.slane %v946_v49, 4 }
 0x865   :  { %2310 = vadd.xlane.f32.xlu1 %v2309_v24  ;;  %v950_v41 = vadd.f32 %v948_v1, %v939_v61  ;;  %v1368_v24 = vmul.f32 %v6267_v16, %v5768_v38  ;;  %v2541_v1 = vrot.slane %v2529_v60, %v2540_v2 }
 0x866   :  { %v1048_v10 = vpop.permute.xlu1 %1047 }
 0x867   :  { %v1050_v43 = vmin.f32 %v950_v41, %v1048_v10 }
 0x869   :  { %v1054_v19 = vmin.f32 %v1050_v43, %v1052_v48 }
 0x86a   :  { %v1268_v40 = vpop.permute.xlu1 %1267 }
 0x86b   :  { %v1056_v8 = vrot.slane %v1054_v19, 4 }
 0x86d   :  { %v1058_v32 = vadd.f32 %v1056_v8, %v1044_v44 }
 0x86e   :  { %v1156_v20 = vpop.permute.xlu1 %1155 }
 0x86f   :  { %v1158_v25 = vmin.f32 %v1058_v32, %v1156_v20 }
 0x871   :  { %v1162_v45 = vmin.f32 %v1158_v25, %v1160_v57  ;;  %v2511_v25 = vmul.f32 2.0, %v5749_v52 }
 0x872   :  { %v1376_v29 = vpop.permute.xlu1 %1375 }
 0x873   :  { %v1164_v50 = vrot.slane %v1162_v45, 4 }
 0x874   :  { %v1264_v37 = vpop.permute.xlu0 %1263 }
 0x875   :  { %v1166_v7 = vadd.f32 %v1164_v50, %v1152_v17 }
 0x876   :  { %1587 = vrot.lane.b32.xlu1 %v1586_v59, %s5188_s29 }
 0x877   :  { %v1266_v47 = vmin.f32 %v1166_v7, %v1264_v37 }
 0x879   :  { %v1270_v9 = vmin.f32 %v1266_v47, %v1268_v40 }
 0x87a   :  { %2525 = vrot.lane.b32.xlu1 %v2524_v31, %s5191_s7 }
 0x87b   :  { %v1272_v5 = vrot.slane %v1270_v9, 4 }
 0x87d   :  { %v1274_v62 = vadd.f32 %v1272_v5, %v1260_v35 }
 0x89e   :  { %2472 = vadd.xlane.f32.xlu1 %v2471_v53 }
 0x8aa   :  { %v2305_v36 = vpop.xlane.xlu0 %2304 }
 0x8ab   :  { %v2530_v48 = vmul.f32 0.2, %v2305_v36 }
 0x8ad   :  { %v2308_v18 = vpop.xlane.xlu1 %2307  ;;  %v2545_v49 = vrot.slane %v2530_v48, %v2540_v2 }
 0x8ae   :  { %v2531_v12 = vmul.f32 0.2, %v2308_v18 }
 0x8af   :  { %v2554_v10 = vsel %vm278_vm14, %v2545_v49, %v2541_v1  ;;  %vm2516_vm14 = vcmp.eq.s32.totalorder %v5756_v30, %v6192_v63 }
 0x8b0   :  { %v2549_v53 = vrot.slane %v2531_v12, %v2540_v2 }
 0x8b1   :  { %v1484_v55 = vpop.permute.xlu1 %1483  ;;  %v1592_v31 = vpop.permute.xlu0 %1591 }
 0x8b2   :  { %v2555_v19 = vsel %vm6687_vm3, %v2549_v53, %v2554_v10  ;;  %vm4504_vm3 = vcmp.eq.s32.totalorder %v6192_v63, 2 }
 0x8b5   :  { %v1372_v46 = vpop.permute.xlu1 %1371 }
 0x8b6   :  { %v1374_v54 = vmin.f32 %v1274_v62, %v1372_v46 }
 0x8b8   :  { %v1378_v27 = vmin.f32 %v1374_v54, %v1376_v29 }
 0x8b9   :  { %v1480_v33 = vpop.permute.xlu1 %1479 }
 0x8ba   :  { %v1380_v34 = vrot.slane %v1378_v27, 4 }
 0x8bc   :  { %v1382_v4 = vadd.f32 %v1380_v34, %v1368_v24 }
 0x8be   :  { %v1482_v26 = vmin.f32 %v1382_v4, %v1480_v33 }
 0x8c0   :  { %v1486_v28 = vmin.f32 %v1482_v26, %v1484_v55 }
 0x8c2   :  { %v1488_v13 = vrot.slane %v1486_v28, 4 }
 0x8c4   :  { %v1490_v42 = vadd.f32 %v1488_v13, %v1476_v23 }
 0x8ee   :  { %v2311_v21 = vpop.xlane.xlu1 %2310 }
 0x8ef   :  { %v2532_v14 = vmul.f32 0.2, %v2311_v21 }
 0x8f1   :  { %v2553_v61 = vrot.slane %v2532_v14, %v2540_v2 }
 0x8f2   :  { %v1588_v58 = vpop.permute.xlu1 %1587 }
 0x8f3   :  { %v1590_v59 = vmin.f32 %v1490_v42, %v1588_v58  ;;  %v2556_v56 = vsel %vm6688_vm4, %v2553_v61, %v2555_v19  ;;  %vm4507_vm4 = vcmp.eq.s32.totalorder %v6192_v63, 3 }
 0x8f5   :  { %v1594_v3 = vmin.f32 %v1590_v59, %v1592_v31 }
 0x8f6   :  { %v2526_v43 = vpop.permute.xlu1 %2525 }
 0x8f7   :  { %v1596_v38 = vrot.slane %v1594_v3, 4 }
 0x8f9   :  { %v1598_v22 = vadd.f32 %v1596_v38, %v1584_v39 }
 0x8fb   :  { %v1599_v57 = vand.u32 2147483647, %v1598_v22 }
 0x8fd   :  { %v2521_v41 = vmul.f32 0.4, %v1599_v57 }
 0x8ff   :  { %v2528_v40 = vadd.f32 %v2526_v43, %v2521_v41 }
 0x901   :  { %v2558_v16 = vadd.f32 %v2556_v56, %v2528_v40 }
 0x903   :  { %v2560_v8 = vrot.slane %v2558_v16, 4 }
 0x905   :  { %2561 = vrot.lane.b32.xlu0 %v2560_v8, %s5187_s28 }
 0x927   :  { %v2473_v15 = vpop.xlane.xlu1 %2472 }
 0x928   :  { %2474 = vxpose.xlu0.b32.start.end [1/1] (short) (narrow) %v2473_v15, 8 }
 0x977   :  { %v2562_v44 = vpop.permute.xlu0 %2561 }
 0x9a4   :  { %v2490_v32 = vpop.trf.xlu0 }
 0x9a5   :  { %v2509_v20 = vrot.slane %v2490_v32, %v5761_v0 }
 0x9a7   :  { %v2510_v45 = vadd.f32 %v2509_v20, %v2473_v15 }
 0x9a9   :  { %v2512_v50 = vsub.f32 %v2510_v45, %v2511_v25 }
 0x9ab   :  { %v2513_v17 = vmax.f32 %v2512_v50, 0.0 }
 0x9ad   :  { %vm2517_vm10 = vcmp.le.f32.partialorder %v2513_v17, 1e-12 }
 0x9ae   :  { %vm2519_vm11 = vmand %vm2517_vm10, %vm2518_vm5 }
 0x9af   :  { %vm2520_vm12 = vmor %vm2516_vm14, %vm2519_vm11 }
 0x9b0   :  { %v6337_v29 = vsel %vm2520_vm12, 0.0, %v2562_v44 }
 0x9b1   :  { %v6340_v7 = vmul.f32 -10.0, %v6337_v29 }
 0x9b3   :  { %v2568_v52 = vsel %vm2567_vm15, %v6340_v7, -inf }
 0x9b4   :  { %2569 = vmax.xlane.f32.xlu1 %v2568_v52 }
 0xa3d   :  { %v2570_v0 = vpop.xlane.xlu1 %2569 }
 0xa3e   :  { %v2571_v37 = vsub.f32 %v6340_v7, %v2570_v0 }
 0xa40   :  { %v2572_v18 = vmul.f32 1.442695, %v2571_v37 }
 0xa42   :  { %4661 = vpow2.f32 %v2572_v18 }
 0xa4f   :  { %v4662_v30 = vpop.eup %4661 }
 0xa50   :  { %v2574_v6 = vsel %vm2567_vm15, %v4662_v30, 0.0 }
 0xa51   :  { %2575 = vadd.xlane.f32.xlu1 %v2574_v6 }
 0xada   :  { %v2576_v47 = vpop.xlane.xlu1 %2575 }
 0xadb   :  { %4663 = vlog2.f32 %v2576_v47 }
 0xae8   :  { %v4664_v9 = vpop.eup %4663 }
 0xae9   :  { %v2578_v55 = vmul.f32 0.6931472, %v4664_v9 }
 0xaeb   :  { %v2579_v5 = vadd.f32 %v2578_v55, %v2570_v0 }
 0xaed   :  { %v2580_v35 = vsub.f32 -1.3862944, %v2579_v5 }
 0xaef   :  { %v2581_v46 = vmul.f32 0.1, %v2580_v35 }
 0xaf1   :  { %v2582_v62 = vadd.f32 %v2581_v46, %v6340_v7 }
 0xaf3   :  { %v2583_v54 = vsel %vm2567_vm15, %v2582_v62, -inf }
 0xaf4   :  { %v2584_v27 = vrot.slane %v2583_v54, 4 }
 0xaf6   :  { %v2585_v34 = vmax.f32 %v2583_v54, %v2584_v27 }
 0xaf8   :  { %v2586_v24 = vrot.slane %v2585_v34, 2 }
 0xafa   :  { %v2587_v4 = vmax.f32 %v2585_v34, %v2586_v24 }
 0xafc   :  { %v2588_v33 = vrot.slane %v2587_v4, 1 }
 0xafe   :  { %v2589_v26 = vmax.f32 %v2587_v4, %v2588_v33 }
 0xb00   :  { %v2590_v28 = vsub.f32 %v2582_v62, %v2589_v26 }
 0xb02   :  { %v2591_v13 = vmul.f32 1.442695, %v2590_v28 }
 0xb04   :  { %4665 = vpow2.f32 %v2591_v13 }
 0xb11   :  { %v4666_v21 = vpop.eup %4665 }
 0xb12   :  { %v2593_v23 = vsel %vm2567_vm15, %v4666_v21, 0.0 }
 0xb13   :  { %v2594_v36 = vrot.slane %v2593_v23, 4 }
 0xb15   :  { %v2595_v42 = vadd.f32 %v2594_v36, %v2593_v23 }
 0xb17   :  { %v2596_v58 = vrot.slane %v2595_v42, 2 }
 0xb19   :  { %v2597_v59 = vadd.f32 %v2596_v58, %v2595_v42 }
 0xb1b   :  { %v2598_v51 = vrot.slane %v2597_v59, 1 }
 0xb1d   :  { %v2599_v31 = vadd.f32 %v2598_v51, %v2597_v59 }
 0xb1f   :  { %4667 = vlog2.f32 %v2599_v31 }
 0xb2c   :  { %v4668_v3 = vpop.eup %4667 }
 0xb2d   :  { %v2601_v48 = vmul.f32 0.6931472, %v4668_v3 }
 0xb2f   :  { %v2602_v12 = vadd.f32 %v2601_v48, %v2589_v26 }
 0xb31   :  { %v2603_v38 = vsub.f32 -1.3862944, %v2602_v12 }
 0xb33   :  { %v2604_v39 = vmul.f32 0.1, %v2603_v38 }
 0xb35   :  { %v2605_v2 = vadd.f32 %v2604_v39, %v6340_v7 }
 0xb37   :  { %v2606_v60 = vsel %vm2567_vm15, %v2605_v2, -inf }
 0xb38   :  { %2607 = vmax.xlane.f32.xlu0 %v2606_v60 }
 0xbc1   :  { %v2608_v14 = vpop.xlane.xlu0 %2607 }
 0xbc2   :  { %v2609_v22 = vsub.f32 %v2605_v2, %v2608_v14 }
 0xbc4   :  { %v2610_v49 = vmul.f32 1.442695, %v2609_v22 }
 0xbc6   :  { %4669 = vpow2.f32 %v2610_v49 }
 0xbd3   :  { %v4670_v53 = vpop.eup %4669 }
 0xbd4   :  { %v2612_v57 = vsel %vm2567_vm15, %v4670_v53, 0.0 }
 0xbd5   :  { %2613 = vadd.xlane.f32.xlu1 %v2612_v57 }
 0xc5e   :  { %v2614_v1 = vpop.xlane.xlu1 %2613 }
 0xc5f   :  { %4671 = vlog2.f32 %v2614_v1 }
 0xc6c   :  { %v4672_v61 = vpop.eup %4671 }
 0xc6d   :  { %v2616_v41 = vmul.f32 0.6931472, %v4672_v61 }
 0xc6f   :  { %v2617_v10 = vadd.f32 %v2616_v41, %v2608_v14 }
 0xc71   :  { %v2618_v43 = vsub.f32 -1.3862944, %v2617_v10 }
 0xc73   :  { %v2619_v19 = vmul.f32 0.1, %v2618_v43 }
 0xc75   :  { %v2620_v40 = vadd.f32 %v2619_v19, %v6340_v7 }
 0xc77   :  { %v2621_v56 = vsel %vm2567_vm15, %v2620_v40, -inf }
 0xc78   :  { %v2622_v16 = vrot.slane %v2621_v56, 4 }
 0xc7a   :  { %v2623_v8 = vmax.f32 %v2621_v56, %v2622_v16 }
 0xc7c   :  { %v2624_v15 = vrot.slane %v2623_v8, 2 }
 0xc7e   :  { %v2625_v44 = vmax.f32 %v2623_v8, %v2624_v15 }
 0xc80   :  { %v2626_v32 = vrot.slane %v2625_v44, 1 }
 0xc82   :  { %v2627_v20 = vmax.f32 %v2625_v44, %v2626_v32 }
 0xc84   :  { %v2628_v25 = vsub.f32 %v2620_v40, %v2627_v20 }
 0xc86   :  { %v2629_v45 = vmul.f32 1.442695, %v2628_v25 }
 0xc88   :  { %4673 = vpow2.f32 %v2629_v45 }
 0xc95   :  { %v4674_v50 = vpop.eup %4673 }
 0xc96   :  { %v2631_v17 = vsel %vm2567_vm15, %v4674_v50, 0.0 }
 0xc97   :  { %v2632_v52 = vrot.slane %v2631_v17, 4 }
 0xc99   :  { %v2633_v0 = vadd.f32 %v2632_v52, %v2631_v17 }
 0xc9b   :  { %v2634_v37 = vrot.slane %v2633_v0, 2 }
 0xc9d   :  { %v2635_v18 = vadd.f32 %v2634_v37, %v2633_v0 }
 0xc9f   :  { %v2636_v30 = vrot.slane %v2635_v18, 1 }
 0xca1   :  { %v2637_v6 = vadd.f32 %v2636_v30, %v2635_v18 }
 0xca3   :  { %4675 = vlog2.f32 %v2637_v6 }
 0xcb0   :  { %v4676_v47 = vpop.eup %4675 }
 0xcb1   :  { %v2639_v9 = vmul.f32 0.6931472, %v4676_v47 }
 0xcb3   :  { %v2640_v55 = vadd.f32 %v2639_v9, %v2627_v20 }
 0xcb5   :  { %v2641_v5 = vsub.f32 -1.3862944, %v2640_v55 }
 0xcb7   :  { %v2642_v35 = vmul.f32 0.1, %v2641_v5 }
 0xcb9   :  { %v2643_v46 = vadd.f32 %v2642_v35, %v6340_v7 }
 0xcbb   :  { %v2644_v62 = vsel %vm2567_vm15, %v2643_v46, -inf }
 0xcbc   :  { %2645 = vmax.xlane.f32.xlu1 %v2644_v62 }
 0xd45   :  { %v2646_v54 = vpop.xlane.xlu1 %2645 }
 0xd46   :  { %v2647_v27 = vsub.f32 %v2643_v46, %v2646_v54 }
 0xd48   :  { %v2648_v34 = vmul.f32 1.442695, %v2647_v27 }
 0xd4a   :  { %4677 = vpow2.f32 %v2648_v34 }
 0xd57   :  { %v4678_v24 = vpop.eup %4677 }
 0xd58   :  { %v2650_v4 = vsel %vm2567_vm15, %v4678_v24, 0.0 }
 0xd59   :  { %2651 = vadd.xlane.f32.xlu1 %v2650_v4 }
 0xde2   :  { %v2652_v33 = vpop.xlane.xlu1 %2651 }
 0xde3   :  { %4679 = vlog2.f32 %v2652_v33 }
 0xdf0   :  { %v4680_v26 = vpop.eup %4679 }
 0xdf1   :  { %v2654_v28 = vmul.f32 0.6931472, %v4680_v26 }
 0xdf3   :  { %v2655_v13 = vadd.f32 %v2654_v28, %v2646_v54 }
 0xdf5   :  { %v2656_v21 = vsub.f32 -1.3862944, %v2655_v13 }
 0xdf7   :  { %v2657_v23 = vmul.f32 0.1, %v2656_v21 }
 0xdf9   :  { %v2658_v36 = vadd.f32 %v2657_v23, %v6340_v7 }
 0xdfb   :  { %v2659_v42 = vsel %vm2567_vm15, %v2658_v36, -inf }
 0xdfc   :  { %v2660_v58 = vrot.slane %v2659_v42, 4 }
 0xdfe   :  { %v2661_v59 = vmax.f32 %v2659_v42, %v2660_v58 }
 0xe00   :  { %v2662_v51 = vrot.slane %v2661_v59, 2 }
 0xe02   :  { %v2663_v31 = vmax.f32 %v2661_v59, %v2662_v51 }
 0xe04   :  { %v2664_v3 = vrot.slane %v2663_v31, 1 }
 0xe06   :  { %v2665_v48 = vmax.f32 %v2663_v31, %v2664_v3 }
 0xe08   :  { %v2666_v12 = vsub.f32 %v2658_v36, %v2665_v48 }
 0xe0a   :  { %v2667_v38 = vmul.f32 1.442695, %v2666_v12 }
 0xe0c   :  { %4681 = vpow2.f32 %v2667_v38 }
 0xe19   :  { %v4682_v39 = vpop.eup %4681 }
 0xe1a   :  { %v2669_v2 = vsel %vm2567_vm15, %v4682_v39, 0.0 }
 0xe1b   :  { %v2670_v60 = vrot.slane %v2669_v2, 4 }
 0xe1d   :  { %v2671_v14 = vadd.f32 %v2670_v60, %v2669_v2 }
 0xe1f   :  { %v2672_v22 = vrot.slane %v2671_v14, 2 }
 0xe21   :  { %v2673_v49 = vadd.f32 %v2672_v22, %v2671_v14 }
 0xe23   :  { %v2674_v53 = vrot.slane %v2673_v49, 1 }
 0xe25   :  { %v2675_v57 = vadd.f32 %v2674_v53, %v2673_v49 }
 0xe27   :  { %4683 = vlog2.f32 %v2675_v57 }
 0xe34   :  { %v4684_v1 = vpop.eup %4683 }
 0xe35   :  { %v2677_v61 = vmul.f32 0.6931472, %v4684_v1 }
 0xe37   :  { %v2678_v41 = vadd.f32 %v2677_v61, %v2665_v48 }
 0xe39   :  { %v2679_v10 = vsub.f32 -1.3862944, %v2678_v41 }
 0xe3b   :  { %v2680_v43 = vmul.f32 0.1, %v2679_v10 }
 0xe3d   :  { %v2681_v19 = vadd.f32 %v2680_v43, %v6340_v7 }
 0xe3f   :  { %v2682_v40 = vsel %vm2567_vm15, %v2681_v19, -inf }
 0xe40   :  { %2683 = vmax.xlane.f32.xlu1 %v2682_v40 }
 0xec9   :  { %v2684_v56 = vpop.xlane.xlu1 %2683 }
 0xeca   :  { %v2685_v16 = vsub.f32 %v2681_v19, %v2684_v56 }
 0xecc   :  { %v2686_v8 = vmul.f32 1.442695, %v2685_v16 }
 0xece   :  { %4685 = vpow2.f32 %v2686_v8 }
 0xedb   :  { %v4686_v15 = vpop.eup %4685 }
 0xedc   :  { %v2688_v44 = vsel %vm2567_vm15, %v4686_v15, 0.0 }
 0xedd   :  { %2689 = vadd.xlane.f32.xlu1 %v2688_v44 }
 0xf66   :  { %v2690_v32 = vpop.xlane.xlu1 %2689 }
 0xf67   :  { %4687 = vlog2.f32 %v2690_v32 }
 0xf74   :  { %v4688_v20 = vpop.eup %4687 }
 0xf75   :  { %v2692_v25 = vmul.f32 0.6931472, %v4688_v20 }
 0xf77   :  { %v2693_v45 = vadd.f32 %v2692_v25, %v2684_v56 }
 0xf79   :  { %v2694_v50 = vsub.f32 -1.3862944, %v2693_v45 }
 0xf7b   :  { %v2695_v17 = vmul.f32 0.1, %v2694_v50 }
 0xf7d   :  { %v2696_v52 = vadd.f32 %v2695_v17, %v6340_v7 }
 0xf7f   :  { %v2697_v0 = vsel %vm2567_vm15, %v2696_v52, -inf }
 0xf80   :  { %v2698_v37 = vrot.slane %v2697_v0, 4 }
 0xf82   :  { %v2699_v18 = vmax.f32 %v2697_v0, %v2698_v37 }
 0xf84   :  { %v2700_v30 = vrot.slane %v2699_v18, 2 }
 0xf86   :  { %v2701_v6 = vmax.f32 %v2699_v18, %v2700_v30 }
 0xf88   :  { %v2702_v47 = vrot.slane %v2701_v6, 1 }
 0xf8a   :  { %v2703_v9 = vmax.f32 %v2701_v6, %v2702_v47 }
 0xf8c   :  { %v2704_v55 = vsub.f32 %v2696_v52, %v2703_v9 }
 0xf8e   :  { %v2705_v5 = vmul.f32 1.442695, %v2704_v55 }
 0xf90   :  { %4689 = vpow2.f32 %v2705_v5 }
 0xf9d   :  { %v4690_v35 = vpop.eup %4689 }
 0xf9e   :  { %v2707_v46 = vsel %vm2567_vm15, %v4690_v35, 0.0 }
 0xf9f   :  { %v2708_v62 = vrot.slane %v2707_v46, 4 }
 0xfa1   :  { %v2709_v54 = vadd.f32 %v2708_v62, %v2707_v46 }
 0xfa3   :  { %v2710_v27 = vrot.slane %v2709_v54, 2 }
 0xfa5   :  { %v2711_v34 = vadd.f32 %v2710_v27, %v2709_v54 }
 0xfa7   :  { %v2712_v24 = vrot.slane %v2711_v34, 1 }
 0xfa9   :  { %v2713_v4 = vadd.f32 %v2712_v24, %v2711_v34 }
 0xfab   :  { %4691 = vlog2.f32 %v2713_v4 }
 0xfb8   :  { %v4692_v33 = vpop.eup %4691 }
 0xfb9   :  { %v2715_v26 = vmul.f32 0.6931472, %v4692_v33 }
 0xfbb   :  { %v2716_v28 = vadd.f32 %v2715_v26, %v2703_v9 }
 0xfbd   :  { %v2717_v13 = vsub.f32 -1.3862944, %v2716_v28 }
 0xfbf   :  { %v2718_v21 = vmul.f32 0.1, %v2717_v13 }
 0xfc1   :  { %v2719_v23 = vadd.f32 %v2718_v21, %v6340_v7 }
 0xfc3   :  { %v2720_v36 = vsel %vm2567_vm15, %v2719_v23, -inf }
 0xfc4   :  { %2721 = vmax.xlane.f32.xlu1 %v2720_v36 }
0x104d   :  { %v2722_v42 = vpop.xlane.xlu1 %2721 }
0x104e   :  { %v2723_v58 = vsub.f32 %v2719_v23, %v2722_v42 }
0x1050   :  { %v2724_v59 = vmul.f32 1.442695, %v2723_v58 }
0x1052   :  { %4693 = vpow2.f32 %v2724_v59 }
0x105f   :  { %v4694_v51 = vpop.eup %4693 }
0x1060   :  { %v2726_v31 = vsel %vm2567_vm15, %v4694_v51, 0.0 }
0x1061   :  { %2727 = vadd.xlane.f32.xlu1 %v2726_v31 }
0x10ea   :  { %v2728_v3 = vpop.xlane.xlu1 %2727 }
0x10eb   :  { %4695 = vlog2.f32 %v2728_v3 }
0x10f8   :  { %v4696_v48 = vpop.eup %4695 }
0x10f9   :  { %v2730_v12 = vmul.f32 0.6931472, %v4696_v48 }
0x10fb   :  { %v2731_v38 = vadd.f32 %v2730_v12, %v2722_v42 }
0x10fd   :  { %v2732_v39 = vsub.f32 -1.3862944, %v2731_v38 }
0x10ff   :  { %v2733_v2 = vmul.f32 0.1, %v2732_v39 }
0x1101   :  { %v2734_v60 = vadd.f32 %v2733_v2, %v6340_v7 }
0x1103   :  { %v2735_v14 = vsel %vm2567_vm15, %v2734_v60, -inf }
0x1104   :  { %v2736_v22 = vrot.slane %v2735_v14, 4 }
0x1106   :  { %v2737_v49 = vmax.f32 %v2735_v14, %v2736_v22 }
0x1108   :  { %v2738_v53 = vrot.slane %v2737_v49, 2 }
0x110a   :  { %v2739_v57 = vmax.f32 %v2737_v49, %v2738_v53 }
0x110c   :  { %v2740_v1 = vrot.slane %v2739_v57, 1 }
0x110e   :  { %v2741_v61 = vmax.f32 %v2739_v57, %v2740_v1 }
0x1110   :  { %v2742_v41 = vsub.f32 %v2734_v60, %v2741_v61 }
0x1112   :  { %v2743_v10 = vmul.f32 1.442695, %v2742_v41 }
0x1114   :  { %4697 = vpow2.f32 %v2743_v10 }
0x1121   :  { %v4698_v43 = vpop.eup %4697 }
0x1122   :  { %v2745_v19 = vsel %vm2567_vm15, %v4698_v43, 0.0 }
0x1123   :  { %v2746_v40 = vrot.slane %v2745_v19, 4 }
0x1125   :  { %v2747_v56 = vadd.f32 %v2746_v40, %v2745_v19 }
0x1127   :  { %v2748_v16 = vrot.slane %v2747_v56, 2 }
0x1129   :  { %v2749_v8 = vadd.f32 %v2748_v16, %v2747_v56 }
0x112b   :  { %v2750_v15 = vrot.slane %v2749_v8, 1 }
0x112d   :  { %v2751_v44 = vadd.f32 %v2750_v15, %v2749_v8 }
0x112f   :  { %4699 = vlog2.f32 %v2751_v44 }
0x113c   :  { %v4700_v32 = vpop.eup %4699 }
0x113d   :  { %v2753_v20 = vmul.f32 0.6931472, %v4700_v32 }
0x113f   :  { %v2754_v25 = vadd.f32 %v2753_v20, %v2741_v61 }
0x1141   :  { %v2755_v45 = vsub.f32 -1.3862944, %v2754_v25 }
0x1143   :  { %v2756_v50 = vmul.f32 0.1, %v2755_v45 }
0x1145   :  { %v2757_v17 = vadd.f32 %v2756_v50, %v6340_v7 }
0x1147   :  { %v2758_v52 = vsel %vm2567_vm15, %v2757_v17, -inf }
0x1148   :  { %2759 = vmax.xlane.f32.xlu1 %v2758_v52 }
0x11d1   :  { %v2760_v0 = vpop.xlane.xlu1 %2759 }
0x11d2   :  { %v2761_v37 = vsub.f32 %v2757_v17, %v2760_v0 }
0x11d4   :  { %v2762_v18 = vmul.f32 1.442695, %v2761_v37 }
0x11d6   :  { %4701 = vpow2.f32 %v2762_v18 }
0x11e3   :  { %v4702_v30 = vpop.eup %4701 }
0x11e4   :  { %v2764_v6 = vsel %vm2567_vm15, %v4702_v30, 0.0 }
0x11e5   :  { %2765 = vadd.xlane.f32.xlu1 %v2764_v6 }
0x126e   :  { %v2766_v47 = vpop.xlane.xlu1 %2765 }
0x126f   :  { %4703 = vlog2.f32 %v2766_v47 }
0x127c   :  { %v4704_v9 = vpop.eup %4703 }
0x127d   :  { %v2768_v55 = vmul.f32 0.6931472, %v4704_v9 }
0x127f   :  { %v2769_v5 = vadd.f32 %v2768_v55, %v2760_v0 }
0x1281   :  { %v2770_v35 = vsub.f32 -1.3862944, %v2769_v5 }
0x1283   :  { %v2771_v46 = vmul.f32 0.1, %v2770_v35 }
0x1285   :  { %v2772_v62 = vadd.f32 %v2771_v46, %v6340_v7 }
0x1287   :  { %v2773_v54 = vsel %vm2567_vm15, %v2772_v62, -inf }
0x1288   :  { %v2774_v27 = vrot.slane %v2773_v54, 4 }
0x128a   :  { %v2775_v34 = vmax.f32 %v2773_v54, %v2774_v27 }
0x128c   :  { %v2776_v24 = vrot.slane %v2775_v34, 2 }
0x128e   :  { %v2777_v4 = vmax.f32 %v2775_v34, %v2776_v24 }
0x1290   :  { %v2778_v33 = vrot.slane %v2777_v4, 1 }
0x1292   :  { %v2779_v26 = vmax.f32 %v2777_v4, %v2778_v33 }
0x1294   :  { %v2780_v28 = vsub.f32 %v2772_v62, %v2779_v26 }
0x1296   :  { %v2781_v13 = vmul.f32 1.442695, %v2780_v28 }
0x1298   :  { %4705 = vpow2.f32 %v2781_v13 }
0x12a5   :  { %v4706_v21 = vpop.eup %4705 }
0x12a6   :  { %v2783_v23 = vsel %vm2567_vm15, %v4706_v21, 0.0 }
0x12a7   :  { %v2784_v36 = vrot.slane %v2783_v23, 4 }
0x12a9   :  { %v2785_v42 = vadd.f32 %v2784_v36, %v2783_v23 }
0x12ab   :  { %v2786_v58 = vrot.slane %v2785_v42, 2 }
0x12ad   :  { %v2787_v59 = vadd.f32 %v2786_v58, %v2785_v42 }
0x12af   :  { %v2788_v51 = vrot.slane %v2787_v59, 1 }
0x12b1   :  { %v2789_v31 = vadd.f32 %v2788_v51, %v2787_v59 }
0x12b3   :  { %4707 = vlog2.f32 %v2789_v31 }
0x12c0   :  { %v4708_v3 = vpop.eup %4707 }
0x12c1   :  { %v2791_v48 = vmul.f32 0.6931472, %v4708_v3 }
0x12c3   :  { %v2792_v12 = vadd.f32 %v2791_v48, %v2779_v26 }
0x12c5   :  { %v2793_v38 = vsub.f32 -1.3862944, %v2792_v12 }
0x12c7   :  { %v2794_v39 = vmul.f32 0.1, %v2793_v38 }
0x12c9   :  { %v2795_v2 = vadd.f32 %v2794_v39, %v6340_v7 }
0x12cb   :  { %v2796_v60 = vsel %vm2567_vm15, %v2795_v2, -inf }
0x12cc   :  { %2797 = vmax.xlane.f32.xlu1 %v2796_v60 }
0x1355   :  { %v2798_v14 = vpop.xlane.xlu1 %2797 }
0x1356   :  { %v2799_v22 = vsub.f32 %v2795_v2, %v2798_v14 }
0x1358   :  { %v2800_v49 = vmul.f32 1.442695, %v2799_v22 }
0x135a   :  { %4709 = vpow2.f32 %v2800_v49 }
0x1367   :  { %v4710_v53 = vpop.eup %4709 }
0x1368   :  { %v2802_v57 = vsel %vm2567_vm15, %v4710_v53, 0.0 }
0x1369   :  { %2803 = vadd.xlane.f32.xlu1 %v2802_v57 }
0x13f2   :  { %v2804_v1 = vpop.xlane.xlu1 %2803 }
0x13f3   :  { %4711 = vlog2.f32 %v2804_v1 }
0x1400   :  { %v4712_v61 = vpop.eup %4711 }
0x1401   :  { %v2806_v41 = vmul.f32 0.6931472, %v4712_v61 }
0x1403   :  { %v2807_v10 = vadd.f32 %v2806_v41, %v2798_v14 }
0x1405   :  { %v2808_v43 = vsub.f32 -1.3862944, %v2807_v10 }
0x1407   :  { %v2809_v19 = vmul.f32 0.1, %v2808_v43 }
0x1409   :  { %v2810_v40 = vadd.f32 %v2809_v19, %v6340_v7 }
0x140b   :  { %v2811_v56 = vsel %vm2567_vm15, %v2810_v40, -inf }
0x140c   :  { %v2812_v16 = vrot.slane %v2811_v56, 4 }
0x140e   :  { %v2813_v8 = vmax.f32 %v2811_v56, %v2812_v16 }
0x1410   :  { %v2814_v15 = vrot.slane %v2813_v8, 2 }
0x1412   :  { %v2815_v44 = vmax.f32 %v2813_v8, %v2814_v15 }
0x1414   :  { %v2816_v32 = vrot.slane %v2815_v44, 1 }
0x1416   :  { %v2817_v20 = vmax.f32 %v2815_v44, %v2816_v32 }
0x1418   :  { %v2818_v25 = vsub.f32 %v2810_v40, %v2817_v20 }
0x141a   :  { %v2819_v45 = vmul.f32 1.442695, %v2818_v25 }
0x141c   :  { %4713 = vpow2.f32 %v2819_v45 }
0x1429   :  { %v4714_v50 = vpop.eup %4713 }
0x142a   :  { %v2821_v17 = vsel %vm2567_vm15, %v4714_v50, 0.0 }
0x142b   :  { %v2822_v52 = vrot.slane %v2821_v17, 4 }
0x142d   :  { %v2823_v0 = vadd.f32 %v2822_v52, %v2821_v17 }
0x142f   :  { %v2824_v37 = vrot.slane %v2823_v0, 2 }
0x1431   :  { %v2825_v18 = vadd.f32 %v2824_v37, %v2823_v0 }
0x1433   :  { %v2826_v30 = vrot.slane %v2825_v18, 1 }
0x1435   :  { %v2827_v6 = vadd.f32 %v2826_v30, %v2825_v18 }
0x1437   :  { %4715 = vlog2.f32 %v2827_v6 }
0x1444   :  { %v4716_v47 = vpop.eup %4715 }
0x1445   :  { %v2829_v9 = vmul.f32 0.6931472, %v4716_v47 }
0x1447   :  { %v2830_v55 = vadd.f32 %v2829_v9, %v2817_v20 }
0x1449   :  { %v2831_v5 = vsub.f32 -1.3862944, %v2830_v55 }
0x144b   :  { %v2832_v35 = vmul.f32 0.1, %v2831_v5 }
0x144d   :  { %v2833_v46 = vadd.f32 %v2832_v35, %v6340_v7 }
0x144f   :  { %v2834_v62 = vsel %vm2567_vm15, %v2833_v46, -inf }
0x1450   :  { %2835 = vmax.xlane.f32.xlu0 %v2834_v62 }
0x14d9   :  { %v2836_v54 = vpop.xlane.xlu0 %2835 }
0x14da   :  { %v2837_v27 = vsub.f32 %v2833_v46, %v2836_v54 }
0x14dc   :  { %v2838_v34 = vmul.f32 1.442695, %v2837_v27 }
0x14de   :  { %4717 = vpow2.f32 %v2838_v34 }
0x14eb   :  { %v4718_v24 = vpop.eup %4717 }
0x14ec   :  { %v2840_v4 = vsel %vm2567_vm15, %v4718_v24, 0.0 }
0x14ed   :  { %2841 = vadd.xlane.f32.xlu1 %v2840_v4 }
0x1576   :  { %v2842_v33 = vpop.xlane.xlu1 %2841 }
0x1577   :  { %4719 = vlog2.f32 %v2842_v33 }
0x1584   :  { %v4720_v26 = vpop.eup %4719 }
0x1585   :  { %v2844_v28 = vmul.f32 0.6931472, %v4720_v26 }
0x1587   :  { %v2845_v13 = vadd.f32 %v2844_v28, %v2836_v54 }
0x1589   :  { %v2846_v21 = vsub.f32 -1.3862944, %v2845_v13 }
0x158b   :  { %v2847_v23 = vmul.f32 0.1, %v2846_v21 }
0x158d   :  { %v2848_v36 = vadd.f32 %v2847_v23, %v6340_v7 }
0x158f   :  { %v2849_v42 = vsel %vm2567_vm15, %v2848_v36, -inf }
0x1590   :  { %v2850_v58 = vrot.slane %v2849_v42, 4 }
0x1592   :  { %v2851_v59 = vmax.f32 %v2849_v42, %v2850_v58 }
0x1594   :  { %v2852_v51 = vrot.slane %v2851_v59, 2 }
0x1596   :  { %v2853_v31 = vmax.f32 %v2851_v59, %v2852_v51 }
0x1598   :  { %v2854_v3 = vrot.slane %v2853_v31, 1 }
0x159a   :  { %v2855_v48 = vmax.f32 %v2853_v31, %v2854_v3 }
0x159c   :  { %v2856_v12 = vsub.f32 %v2848_v36, %v2855_v48 }
0x159e   :  { %v2857_v38 = vmul.f32 1.442695, %v2856_v12 }
0x15a0   :  { %4721 = vpow2.f32 %v2857_v38 }
0x15ad   :  { %v4722_v39 = vpop.eup %4721 }
0x15ae   :  { %v2859_v2 = vsel %vm2567_vm15, %v4722_v39, 0.0 }
0x15af   :  { %v2860_v60 = vrot.slane %v2859_v2, 4 }
0x15b1   :  { %v2861_v14 = vadd.f32 %v2860_v60, %v2859_v2 }
0x15b3   :  { %v2862_v22 = vrot.slane %v2861_v14, 2 }
0x15b5   :  { %v2863_v49 = vadd.f32 %v2862_v22, %v2861_v14 }
0x15b7   :  { %v2864_v53 = vrot.slane %v2863_v49, 1 }
0x15b9   :  { %v2865_v57 = vadd.f32 %v2864_v53, %v2863_v49 }
0x15bb   :  { %4723 = vlog2.f32 %v2865_v57 }
0x15c8   :  { %v4724_v1 = vpop.eup %4723 }
0x15c9   :  { %v2867_v61 = vmul.f32 0.6931472, %v4724_v1 }
0x15cb   :  { %v2868_v41 = vadd.f32 %v2867_v61, %v2855_v48 }
0x15cd   :  { %v2869_v10 = vsub.f32 -1.3862944, %v2868_v41 }
0x15cf   :  { %v2870_v43 = vmul.f32 0.1, %v2869_v10 }
0x15d1   :  { %v2871_v19 = vadd.f32 %v2870_v43, %v6340_v7 }
0x15d3   :  { %v2872_v40 = vsel %vm2567_vm15, %v2871_v19, -inf }
0x15d4   :  { %2873 = vmax.xlane.f32.xlu0 %v2872_v40 }
0x165d   :  { %v2874_v56 = vpop.xlane.xlu0 %2873 }
0x165e   :  { %v2875_v16 = vsub.f32 %v2871_v19, %v2874_v56 }
0x1660   :  { %v2876_v8 = vmul.f32 1.442695, %v2875_v16 }
0x1662   :  { %4725 = vpow2.f32 %v2876_v8 }
0x166f   :  { %v4726_v15 = vpop.eup %4725 }
0x1670   :  { %v2878_v44 = vsel %vm2567_vm15, %v4726_v15, 0.0 }
0x1671   :  { %2879 = vadd.xlane.f32.xlu1 %v2878_v44 }
0x16fa   :  { %v2880_v32 = vpop.xlane.xlu1 %2879 }
0x16fb   :  { %4727 = vlog2.f32 %v2880_v32 }
0x1708   :  { %v4728_v20 = vpop.eup %4727 }
0x1709   :  { %v2882_v25 = vmul.f32 0.6931472, %v4728_v20 }
0x170b   :  { %v2883_v45 = vadd.f32 %v2882_v25, %v2874_v56 }
0x170d   :  { %v2884_v50 = vsub.f32 -1.3862944, %v2883_v45 }
0x170f   :  { %v2885_v17 = vmul.f32 0.1, %v2884_v50 }
0x1711   :  { %v2886_v52 = vadd.f32 %v2885_v17, %v6340_v7 }
0x1713   :  { %v2887_v0 = vsel %vm2567_vm15, %v2886_v52, -inf }
0x1714   :  { %v2888_v37 = vrot.slane %v2887_v0, 4 }
0x1716   :  { %v2889_v18 = vmax.f32 %v2887_v0, %v2888_v37 }
0x1718   :  { %v2890_v30 = vrot.slane %v2889_v18, 2 }
0x171a   :  { %v2891_v6 = vmax.f32 %v2889_v18, %v2890_v30 }
0x171c   :  { %v2892_v47 = vrot.slane %v2891_v6, 1 }
0x171e   :  { %v2893_v9 = vmax.f32 %v2891_v6, %v2892_v47 }
0x1720   :  { %v2894_v55 = vsub.f32 %v2886_v52, %v2893_v9 }
0x1722   :  { %v2895_v5 = vmul.f32 1.442695, %v2894_v55 }
0x1724   :  { %4729 = vpow2.f32 %v2895_v5 }
0x1731   :  { %v4730_v35 = vpop.eup %4729 }
0x1732   :  { %v2897_v46 = vsel %vm2567_vm15, %v4730_v35, 0.0 }
0x1733   :  { %v2898_v62 = vrot.slane %v2897_v46, 4 }
0x1735   :  { %v2899_v54 = vadd.f32 %v2898_v62, %v2897_v46 }
0x1737   :  { %v2900_v27 = vrot.slane %v2899_v54, 2 }
0x1739   :  { %v2901_v34 = vadd.f32 %v2900_v27, %v2899_v54 }
0x173b   :  { %v2902_v24 = vrot.slane %v2901_v34, 1 }
0x173d   :  { %v2903_v4 = vadd.f32 %v2902_v24, %v2901_v34 }
0x173f   :  { %4731 = vlog2.f32 %v2903_v4 }
0x174c   :  { %v4732_v33 = vpop.eup %4731 }
0x174d   :  { %v2905_v26 = vmul.f32 0.6931472, %v4732_v33 }
0x174f   :  { %v2906_v28 = vadd.f32 %v2905_v26, %v2893_v9 }
0x1751   :  { %v2907_v13 = vsub.f32 -1.3862944, %v2906_v28 }
0x1753   :  { %v2908_v21 = vmul.f32 0.1, %v2907_v13 }
0x1755   :  { %v2909_v23 = vadd.f32 %v2908_v21, %v6340_v7 }
0x1757   :  { %v2910_v36 = vsel %vm2567_vm15, %v2909_v23, -inf }
0x1758   :  { %2911 = vmax.xlane.f32.xlu0 %v2910_v36 }
0x17e1   :  { %v2912_v42 = vpop.xlane.xlu0 %2911 }
0x17e2   :  { %v2913_v58 = vsub.f32 %v2909_v23, %v2912_v42 }
0x17e4   :  { %v2914_v59 = vmul.f32 1.442695, %v2913_v58 }
0x17e6   :  { %4733 = vpow2.f32 %v2914_v59 }
0x17f3   :  { %v4734_v51 = vpop.eup %4733 }
0x17f4   :  { %v2916_v31 = vsel %vm2567_vm15, %v4734_v51, 0.0 }
0x17f5   :  { %2917 = vadd.xlane.f32.xlu1 %v2916_v31 }
0x187e   :  { %v2918_v3 = vpop.xlane.xlu1 %2917 }
0x187f   :  { %4735 = vlog2.f32 %v2918_v3 }
0x188c   :  { %v4736_v48 = vpop.eup %4735 }
0x188d   :  { %v2920_v12 = vmul.f32 0.6931472, %v4736_v48 }
0x188f   :  { %v2921_v38 = vadd.f32 %v2920_v12, %v2912_v42 }
0x1891   :  { %v2922_v39 = vsub.f32 -1.3862944, %v2921_v38 }
0x1893   :  { %v2923_v2 = vmul.f32 0.1, %v2922_v39 }
0x1895   :  { %v2924_v60 = vadd.f32 %v2923_v2, %v6340_v7 }
0x1897   :  { %v2925_v14 = vsel %vm2567_vm15, %v2924_v60, -inf }
0x1898   :  { %v2926_v22 = vrot.slane %v2925_v14, 4 }
0x189a   :  { %v2927_v49 = vmax.f32 %v2925_v14, %v2926_v22 }
0x189c   :  { %v2928_v53 = vrot.slane %v2927_v49, 2 }
0x189e   :  { %v2929_v57 = vmax.f32 %v2927_v49, %v2928_v53 }
0x18a0   :  { %v2930_v1 = vrot.slane %v2929_v57, 1 }
0x18a2   :  { %v2931_v61 = vmax.f32 %v2929_v57, %v2930_v1 }
0x18a4   :  { %v2932_v41 = vsub.f32 %v2924_v60, %v2931_v61 }
0x18a6   :  { %v2933_v10 = vmul.f32 1.442695, %v2932_v41 }
0x18a8   :  { %4737 = vpow2.f32 %v2933_v10 }
0x18b5   :  { %v4738_v43 = vpop.eup %4737 }
0x18b6   :  { %v2935_v19 = vsel %vm2567_vm15, %v4738_v43, 0.0 }
0x18b7   :  { %v2936_v40 = vrot.slane %v2935_v19, 4 }
0x18b9   :  { %v2937_v56 = vadd.f32 %v2936_v40, %v2935_v19 }
0x18bb   :  { %v2938_v16 = vrot.slane %v2937_v56, 2 }
0x18bd   :  { %v2939_v8 = vadd.f32 %v2938_v16, %v2937_v56 }
0x18bf   :  { %v2940_v15 = vrot.slane %v2939_v8, 1 }
0x18c1   :  { %v2941_v44 = vadd.f32 %v2940_v15, %v2939_v8 }
0x18c3   :  { %4739 = vlog2.f32 %v2941_v44 }
0x18d0   :  { %v4740_v32 = vpop.eup %4739 }
0x18d1   :  { %v2943_v20 = vmul.f32 0.6931472, %v4740_v32 }
0x18d3   :  { %v2944_v25 = vadd.f32 %v2943_v20, %v2931_v61 }
0x18d5   :  { %v2945_v45 = vsub.f32 -1.3862944, %v2944_v25 }
0x18d7   :  { %v2946_v50 = vmul.f32 0.1, %v2945_v45 }
0x18d9   :  { %v2947_v17 = vadd.f32 %v2946_v50, %v6340_v7 }
0x18db   :  { %v2948_v52 = vsel %vm2567_vm15, %v2947_v17, -inf }
0x18dc   :  { %2949 = vmax.xlane.f32.xlu0 %v2948_v52 }
0x1965   :  { %v2950_v0 = vpop.xlane.xlu0 %2949 }
0x1966   :  { %v2951_v37 = vsub.f32 %v2947_v17, %v2950_v0 }
0x1968   :  { %v2952_v18 = vmul.f32 1.442695, %v2951_v37 }
0x196a   :  { %4741 = vpow2.f32 %v2952_v18 }
0x1977   :  { %v4742_v30 = vpop.eup %4741 }
0x1978   :  { %v2954_v6 = vsel %vm2567_vm15, %v4742_v30, 0.0 }
0x1979   :  { %2955 = vadd.xlane.f32.xlu1 %v2954_v6 }
0x1a02   :  { %v2956_v47 = vpop.xlane.xlu1 %2955 }
0x1a03   :  { %4743 = vlog2.f32 %v2956_v47 }
0x1a10   :  { %v4744_v9 = vpop.eup %4743 }
0x1a11   :  { %v2958_v55 = vmul.f32 0.6931472, %v4744_v9 }
0x1a13   :  { %v2959_v5 = vadd.f32 %v2958_v55, %v2950_v0 }
0x1a15   :  { %v2960_v35 = vsub.f32 -1.3862944, %v2959_v5 }
0x1a17   :  { %v2961_v46 = vmul.f32 0.1, %v2960_v35 }
0x1a19   :  { %v2962_v62 = vadd.f32 %v2961_v46, %v6340_v7 }
0x1a1b   :  { %v2963_v54 = vsel %vm2567_vm15, %v2962_v62, -inf }
0x1a1c   :  { %v2964_v27 = vrot.slane %v2963_v54, 4 }
0x1a1e   :  { %v2965_v34 = vmax.f32 %v2963_v54, %v2964_v27 }
0x1a20   :  { %v2966_v24 = vrot.slane %v2965_v34, 2 }
0x1a22   :  { %v2967_v4 = vmax.f32 %v2965_v34, %v2966_v24 }
0x1a24   :  { %v2968_v33 = vrot.slane %v2967_v4, 1 }
0x1a26   :  { %v2969_v26 = vmax.f32 %v2967_v4, %v2968_v33 }
0x1a28   :  { %v2970_v28 = vsub.f32 %v2962_v62, %v2969_v26 }
0x1a2a   :  { %v2971_v13 = vmul.f32 1.442695, %v2970_v28 }
0x1a2c   :  { %4745 = vpow2.f32 %v2971_v13 }
0x1a39   :  { %v4746_v21 = vpop.eup %4745 }
0x1a3a   :  { %v2973_v23 = vsel %vm2567_vm15, %v4746_v21, 0.0 }
0x1a3b   :  { %v2974_v36 = vrot.slane %v2973_v23, 4 }
0x1a3d   :  { %v2975_v42 = vadd.f32 %v2974_v36, %v2973_v23 }
0x1a3f   :  { %v2976_v58 = vrot.slane %v2975_v42, 2 }
0x1a41   :  { %v2977_v59 = vadd.f32 %v2976_v58, %v2975_v42 }
0x1a43   :  { %v2978_v51 = vrot.slane %v2977_v59, 1 }
0x1a45   :  { %v2979_v31 = vadd.f32 %v2978_v51, %v2977_v59 }
0x1a47   :  { %4747 = vlog2.f32 %v2979_v31 }
0x1a54   :  { %v4748_v3 = vpop.eup %4747 }
0x1a55   :  { %v2981_v48 = vmul.f32 0.6931472, %v4748_v3 }
0x1a57   :  { %v2982_v12 = vadd.f32 %v2981_v48, %v2969_v26 }
0x1a59   :  { %v2983_v38 = vsub.f32 -1.3862944, %v2982_v12 }
0x1a5b   :  { %v2984_v39 = vmul.f32 0.1, %v2983_v38 }
0x1a5d   :  { %v2985_v2 = vadd.f32 %v2984_v39, %v6340_v7 }
0x1a5f   :  { %v2986_v60 = vsel %vm2567_vm15, %v2985_v2, -inf }
0x1a60   :  { %2987 = vmax.xlane.f32.xlu0 %v2986_v60 }
0x1ae9   :  { %v2988_v14 = vpop.xlane.xlu0 %2987 }
0x1aea   :  { %v2989_v22 = vsub.f32 %v2985_v2, %v2988_v14 }
0x1aec   :  { %v2990_v49 = vmul.f32 1.442695, %v2989_v22 }
0x1aee   :  { %4749 = vpow2.f32 %v2990_v49 }
0x1afb   :  { %v4750_v53 = vpop.eup %4749 }
0x1afc   :  { %v2992_v57 = vsel %vm2567_vm15, %v4750_v53, 0.0 }
0x1afd   :  { %2993 = vadd.xlane.f32.xlu1 %v2992_v57 }
0x1b86   :  { %v2994_v1 = vpop.xlane.xlu1 %2993 }
0x1b87   :  { %4751 = vlog2.f32 %v2994_v1 }
0x1b94   :  { %v4752_v61 = vpop.eup %4751 }
0x1b95   :  { %v2996_v41 = vmul.f32 0.6931472, %v4752_v61 }
0x1b97   :  { %v2997_v10 = vadd.f32 %v2996_v41, %v2988_v14 }
0x1b99   :  { %v2998_v43 = vsub.f32 -1.3862944, %v2997_v10 }
0x1b9b   :  { %v2999_v19 = vmul.f32 0.1, %v2998_v43 }
0x1b9d   :  { %v3000_v40 = vadd.f32 %v2999_v19, %v6340_v7 }
0x1b9f   :  { %v3001_v56 = vsel %vm2567_vm15, %v3000_v40, -inf }
0x1ba0   :  { %v3002_v16 = vrot.slane %v3001_v56, 4 }
0x1ba2   :  { %v3003_v8 = vmax.f32 %v3001_v56, %v3002_v16 }
0x1ba4   :  { %v3004_v15 = vrot.slane %v3003_v8, 2 }
0x1ba6   :  { %v3005_v44 = vmax.f32 %v3003_v8, %v3004_v15 }
0x1ba8   :  { %v3006_v32 = vrot.slane %v3005_v44, 1 }
0x1baa   :  { %v3007_v20 = vmax.f32 %v3005_v44, %v3006_v32 }
0x1bac   :  { %v3008_v25 = vsub.f32 %v3000_v40, %v3007_v20 }
0x1bae   :  { %v3009_v45 = vmul.f32 1.442695, %v3008_v25 }
0x1bb0   :  { %4753 = vpow2.f32 %v3009_v45 }
0x1bbd   :  { %v4754_v50 = vpop.eup %4753 }
0x1bbe   :  { %v3011_v17 = vsel %vm2567_vm15, %v4754_v50, 0.0 }
0x1bbf   :  { %v3012_v52 = vrot.slane %v3011_v17, 4 }
0x1bc1   :  { %v3013_v0 = vadd.f32 %v3012_v52, %v3011_v17 }
0x1bc3   :  { %v3014_v37 = vrot.slane %v3013_v0, 2 }
0x1bc5   :  { %v3015_v18 = vadd.f32 %v3014_v37, %v3013_v0 }
0x1bc7   :  { %v3016_v30 = vrot.slane %v3015_v18, 1 }
0x1bc9   :  { %v3017_v6 = vadd.f32 %v3016_v30, %v3015_v18 }
0x1bcb   :  { %4755 = vlog2.f32 %v3017_v6 }
0x1bd8   :  { %v4756_v47 = vpop.eup %4755 }
0x1bd9   :  { %v3019_v9 = vmul.f32 0.6931472, %v4756_v47 }
0x1bdb   :  { %v3020_v55 = vadd.f32 %v3019_v9, %v3007_v20 }
0x1bdd   :  { %v3021_v5 = vsub.f32 -1.3862944, %v3020_v55 }
0x1bdf   :  { %v3022_v35 = vmul.f32 0.1, %v3021_v5 }
0x1be1   :  { %v3023_v46 = vadd.f32 %v3022_v35, %v6340_v7 }
0x1be3   :  { %v3024_v62 = vsel %vm2567_vm15, %v3023_v46, -inf }
0x1be4   :  { %3025 = vmax.xlane.f32.xlu0 %v3024_v62 }
0x1c6d   :  { %v3026_v54 = vpop.xlane.xlu0 %3025 }
0x1c6e   :  { %v3027_v27 = vsub.f32 %v3023_v46, %v3026_v54 }
0x1c70   :  { %v3028_v34 = vmul.f32 1.442695, %v3027_v27 }
0x1c72   :  { %4757 = vpow2.f32 %v3028_v34 }
0x1c7f   :  { %v4758_v24 = vpop.eup %4757 }
0x1c80   :  { %v3030_v4 = vsel %vm2567_vm15, %v4758_v24, 0.0 }
0x1c81   :  { %3031 = vadd.xlane.f32.xlu1 %v3030_v4 }
0x1d0a   :  { %v3032_v33 = vpop.xlane.xlu1 %3031 }
0x1d0b   :  { %4759 = vlog2.f32 %v3032_v33 }
0x1d18   :  { %v4760_v26 = vpop.eup %4759 }
0x1d19   :  { %v3034_v28 = vmul.f32 0.6931472, %v4760_v26 }
0x1d1b   :  { %v3035_v13 = vadd.f32 %v3034_v28, %v3026_v54 }
0x1d1d   :  { %v3036_v21 = vsub.f32 -1.3862944, %v3035_v13 }
0x1d1f   :  { %v3037_v23 = vmul.f32 0.1, %v3036_v21 }
0x1d21   :  { %v3038_v36 = vadd.f32 %v3037_v23, %v6340_v7 }
0x1d23   :  { %v3039_v42 = vsel %vm2567_vm15, %v3038_v36, -inf }
0x1d24   :  { %v3040_v58 = vrot.slane %v3039_v42, 4 }
0x1d26   :  { %v3041_v59 = vmax.f32 %v3039_v42, %v3040_v58 }
0x1d28   :  { %v3042_v51 = vrot.slane %v3041_v59, 2 }
0x1d2a   :  { %v3043_v31 = vmax.f32 %v3041_v59, %v3042_v51 }
0x1d2c   :  { %v3044_v3 = vrot.slane %v3043_v31, 1 }
0x1d2e   :  { %v3045_v48 = vmax.f32 %v3043_v31, %v3044_v3 }
0x1d30   :  { %v3046_v12 = vsub.f32 %v3038_v36, %v3045_v48 }
0x1d32   :  { %v3047_v38 = vmul.f32 1.442695, %v3046_v12 }
0x1d34   :  { %4761 = vpow2.f32 %v3047_v38 }
0x1d41   :  { %v4762_v39 = vpop.eup %4761 }
0x1d42   :  { %v3049_v2 = vsel %vm2567_vm15, %v4762_v39, 0.0 }
0x1d43   :  { %v3050_v60 = vrot.slane %v3049_v2, 4 }
0x1d45   :  { %v3051_v14 = vadd.f32 %v3050_v60, %v3049_v2 }
0x1d47   :  { %v3052_v22 = vrot.slane %v3051_v14, 2 }
0x1d49   :  { %v3053_v49 = vadd.f32 %v3052_v22, %v3051_v14 }
0x1d4b   :  { %v3054_v53 = vrot.slane %v3053_v49, 1 }
0x1d4d   :  { %v3055_v57 = vadd.f32 %v3054_v53, %v3053_v49 }
0x1d4f   :  { %4763 = vlog2.f32 %v3055_v57 }
0x1d5c   :  { %v4764_v1 = vpop.eup %4763 }
0x1d5d   :  { %v3057_v61 = vmul.f32 0.6931472, %v4764_v1 }
0x1d5f   :  { %v3058_v41 = vadd.f32 %v3057_v61, %v3045_v48 }
0x1d61   :  { %v3059_v10 = vsub.f32 -1.3862944, %v3058_v41 }
0x1d63   :  { %v3060_v43 = vmul.f32 0.1, %v3059_v10 }
0x1d65   :  { %v3061_v19 = vadd.f32 %v3060_v43, %v6340_v7 }
0x1d67   :  { %v3062_v40 = vsel %vm2567_vm15, %v3061_v19, -inf }
0x1d68   :  { %3063 = vmax.xlane.f32.xlu0 %v3062_v40 }
0x1df1   :  { %v3064_v56 = vpop.xlane.xlu0 %3063 }
0x1df2   :  { %v3065_v16 = vsub.f32 %v3061_v19, %v3064_v56 }
0x1df4   :  { %v3066_v8 = vmul.f32 1.442695, %v3065_v16 }
0x1df6   :  { %4765 = vpow2.f32 %v3066_v8 }
0x1e03   :  { %v4766_v15 = vpop.eup %4765 }
0x1e04   :  { %v3068_v44 = vsel %vm2567_vm15, %v4766_v15, 0.0 }
0x1e05   :  { %3069 = vadd.xlane.f32.xlu1 %v3068_v44 }
0x1e8e   :  { %v3070_v32 = vpop.xlane.xlu1 %3069 }
0x1e8f   :  { %4767 = vlog2.f32 %v3070_v32 }
0x1e9c   :  { %v4768_v20 = vpop.eup %4767 }
0x1e9d   :  { %v3072_v25 = vmul.f32 0.6931472, %v4768_v20 }
0x1e9f   :  { %v3073_v45 = vadd.f32 %v3072_v25, %v3064_v56 }
0x1ea1   :  { %v3074_v50 = vsub.f32 -1.3862944, %v3073_v45 }
0x1ea3   :  { %v3075_v17 = vmul.f32 0.1, %v3074_v50 }
0x1ea5   :  { %v3076_v52 = vadd.f32 %v3075_v17, %v6340_v7 }
0x1ea7   :  { %v3077_v0 = vsel %vm2567_vm15, %v3076_v52, -inf }
0x1ea8   :  { %v3078_v37 = vrot.slane %v3077_v0, 4 }
0x1eaa   :  { %v3079_v18 = vmax.f32 %v3077_v0, %v3078_v37 }
0x1eac   :  { %v3080_v30 = vrot.slane %v3079_v18, 2 }
0x1eae   :  { %v3081_v6 = vmax.f32 %v3079_v18, %v3080_v30 }
0x1eb0   :  { %v3082_v47 = vrot.slane %v3081_v6, 1 }
0x1eb2   :  { %v3083_v9 = vmax.f32 %v3081_v6, %v3082_v47 }
0x1eb4   :  { %v3084_v55 = vsub.f32 %v3076_v52, %v3083_v9 }
0x1eb6   :  { %v3085_v5 = vmul.f32 1.442695, %v3084_v55 }
0x1eb8   :  { %4769 = vpow2.f32 %v3085_v5 }
0x1ec5   :  { %v4770_v35 = vpop.eup %4769 }
0x1ec6   :  { %v3087_v46 = vsel %vm2567_vm15, %v4770_v35, 0.0 }
0x1ec7   :  { %v3088_v62 = vrot.slane %v3087_v46, 4 }
0x1ec9   :  { %v3089_v54 = vadd.f32 %v3088_v62, %v3087_v46 }
0x1ecb   :  { %v3090_v27 = vrot.slane %v3089_v54, 2 }
0x1ecd   :  { %v3091_v34 = vadd.f32 %v3090_v27, %v3089_v54 }
0x1ecf   :  { %v3092_v24 = vrot.slane %v3091_v34, 1 }
0x1ed1   :  { %v3093_v4 = vadd.f32 %v3092_v24, %v3091_v34 }
0x1ed3   :  { %4771 = vlog2.f32 %v3093_v4 }
0x1ee0   :  { %v4772_v33 = vpop.eup %4771 }
0x1ee1   :  { %v3095_v26 = vmul.f32 0.6931472, %v4772_v33 }
0x1ee3   :  { %v3096_v28 = vadd.f32 %v3095_v26, %v3083_v9 }
0x1ee5   :  { %v3097_v13 = vsub.f32 -1.3862944, %v3096_v28 }
0x1ee7   :  { %v3098_v21 = vmul.f32 0.1, %v3097_v13 }
0x1ee9   :  { %v3099_v23 = vadd.f32 %v3098_v21, %v6340_v7 }
0x1eeb   :  { %v3100_v36 = vsel %vm2567_vm15, %v3099_v23, -inf }
0x1eec   :  { %3101 = vmax.xlane.f32.xlu0 %v3100_v36 }
0x1f75   :  { %v3102_v42 = vpop.xlane.xlu0 %3101 }
0x1f76   :  { %v3103_v58 = vsub.f32 %v3099_v23, %v3102_v42 }
0x1f78   :  { %v3104_v59 = vmul.f32 1.442695, %v3103_v58 }
0x1f7a   :  { %4773 = vpow2.f32 %v3104_v59 }
0x1f87   :  { %v4774_v51 = vpop.eup %4773 }
0x1f88   :  { %v3106_v31 = vsel %vm2567_vm15, %v4774_v51, 0.0 }
0x1f89   :  { %3107 = vadd.xlane.f32.xlu1 %v3106_v31 }
0x2012   :  { %v3108_v3 = vpop.xlane.xlu1 %3107 }
0x2013   :  { %4775 = vlog2.f32 %v3108_v3 }
0x2020   :  { %v4776_v48 = vpop.eup %4775 }
0x2021   :  { %v3110_v12 = vmul.f32 0.6931472, %v4776_v48 }
0x2023   :  { %v3111_v38 = vadd.f32 %v3110_v12, %v3102_v42 }
0x2025   :  { %v3112_v39 = vsub.f32 -1.3862944, %v3111_v38 }
0x2027   :  { %v3113_v2 = vmul.f32 0.1, %v3112_v39 }
0x2029   :  { %v3114_v60 = vadd.f32 %v3113_v2, %v6340_v7 }
0x202b   :  { %v3115_v14 = vsel %vm2567_vm15, %v3114_v60, -inf }
0x202c   :  { %v3116_v22 = vrot.slane %v3115_v14, 4 }
0x202e   :  { %v3117_v49 = vmax.f32 %v3115_v14, %v3116_v22 }
0x2030   :  { %v3118_v53 = vrot.slane %v3117_v49, 2 }
0x2032   :  { %v3119_v57 = vmax.f32 %v3117_v49, %v3118_v53 }
0x2034   :  { %v3120_v1 = vrot.slane %v3119_v57, 1 }
0x2036   :  { %v3121_v61 = vmax.f32 %v3119_v57, %v3120_v1 }
0x2038   :  { %v3122_v41 = vsub.f32 %v3114_v60, %v3121_v61 }
0x203a   :  { %v3123_v10 = vmul.f32 1.442695, %v3122_v41 }
0x203c   :  { %4777 = vpow2.f32 %v3123_v10 }
0x2049   :  { %v4778_v43 = vpop.eup %4777 }
0x204a   :  { %v3125_v19 = vsel %vm2567_vm15, %v4778_v43, 0.0 }
0x204b   :  { %v3126_v40 = vrot.slane %v3125_v19, 4 }
0x204d   :  { %v3127_v56 = vadd.f32 %v3126_v40, %v3125_v19 }
0x204f   :  { %v3128_v16 = vrot.slane %v3127_v56, 2 }
0x2051   :  { %v3129_v8 = vadd.f32 %v3128_v16, %v3127_v56 }
0x2053   :  { %v3130_v15 = vrot.slane %v3129_v8, 1 }
0x2055   :  { %v3131_v44 = vadd.f32 %v3130_v15, %v3129_v8 }
0x2057   :  { %4779 = vlog2.f32 %v3131_v44 }
0x2064   :  { %v4780_v32 = vpop.eup %4779 }
0x2065   :  { %v3133_v20 = vmul.f32 0.6931472, %v4780_v32 }
0x2067   :  { %v3134_v25 = vadd.f32 %v3133_v20, %v3121_v61 }
0x2069   :  { %v3135_v45 = vsub.f32 -1.3862944, %v3134_v25 }
0x206b   :  { %v3136_v50 = vmul.f32 0.1, %v3135_v45 }
0x206d   :  { %v3137_v17 = vadd.f32 %v3136_v50, %v6340_v7 }
0x206f   :  { %v3138_v52 = vsel %vm2567_vm15, %v3137_v17, -inf }
0x2070   :  { %3139 = vmax.xlane.f32.xlu0 %v3138_v52 }
0x20f9   :  { %v3140_v0 = vpop.xlane.xlu0 %3139 }
0x20fa   :  { %v3141_v37 = vsub.f32 %v3137_v17, %v3140_v0 }
0x20fc   :  { %v3142_v18 = vmul.f32 1.442695, %v3141_v37 }
0x20fe   :  { %4781 = vpow2.f32 %v3142_v18 }
0x210b   :  { %v4782_v30 = vpop.eup %4781 }
0x210c   :  { %v3144_v6 = vsel %vm2567_vm15, %v4782_v30, 0.0 }
0x210d   :  { %3145 = vadd.xlane.f32.xlu1 %v3144_v6 }
0x2196   :  { %v3146_v47 = vpop.xlane.xlu1 %3145 }
0x2197   :  { %4783 = vlog2.f32 %v3146_v47 }
0x21a4   :  { %v4784_v9 = vpop.eup %4783 }
0x21a5   :  { %v3148_v55 = vmul.f32 0.6931472, %v4784_v9 }
0x21a7   :  { %v3149_v5 = vadd.f32 %v3148_v55, %v3140_v0 }
0x21a9   :  { %v3150_v35 = vsub.f32 -1.3862944, %v3149_v5 }
0x21ab   :  { %v3151_v46 = vmul.f32 0.1, %v3150_v35 }
0x21ad   :  { %v3152_v62 = vadd.f32 %v3151_v46, %v6340_v7 }
0x21af   :  { %v3153_v54 = vsel %vm2567_vm15, %v3152_v62, -inf }
0x21b0   :  { %v3154_v27 = vrot.slane %v3153_v54, 4 }
0x21b2   :  { %v3155_v34 = vmax.f32 %v3153_v54, %v3154_v27 }
0x21b4   :  { %v3156_v24 = vrot.slane %v3155_v34, 2 }
0x21b6   :  { %v3157_v4 = vmax.f32 %v3155_v34, %v3156_v24 }
0x21b8   :  { %v3158_v33 = vrot.slane %v3157_v4, 1 }
0x21ba   :  { %v3159_v26 = vmax.f32 %v3157_v4, %v3158_v33 }
0x21bc   :  { %v3160_v28 = vsub.f32 %v3152_v62, %v3159_v26 }
0x21be   :  { %v3161_v13 = vmul.f32 1.442695, %v3160_v28 }
0x21c0   :  { %4785 = vpow2.f32 %v3161_v13 }
0x21cd   :  { %v4786_v21 = vpop.eup %4785 }
0x21ce   :  { %v3163_v23 = vsel %vm2567_vm15, %v4786_v21, 0.0 }
0x21cf   :  { %v3164_v36 = vrot.slane %v3163_v23, 4 }
0x21d1   :  { %v3165_v42 = vadd.f32 %v3164_v36, %v3163_v23 }
0x21d3   :  { %v3166_v58 = vrot.slane %v3165_v42, 2 }
0x21d5   :  { %v3167_v59 = vadd.f32 %v3166_v58, %v3165_v42 }
0x21d7   :  { %v3168_v51 = vrot.slane %v3167_v59, 1 }
0x21d9   :  { %v3169_v31 = vadd.f32 %v3168_v51, %v3167_v59 }
0x21db   :  { %4787 = vlog2.f32 %v3169_v31 }
0x21e8   :  { %v4788_v3 = vpop.eup %4787 }
0x21e9   :  { %v3171_v48 = vmul.f32 0.6931472, %v4788_v3 }
0x21eb   :  { %v3172_v12 = vadd.f32 %v3171_v48, %v3159_v26 }
0x21ed   :  { %v3173_v38 = vsub.f32 -1.3862944, %v3172_v12 }
0x21ef   :  { %v3174_v39 = vmul.f32 0.1, %v3173_v38 }
0x21f1   :  { %v3175_v2 = vadd.f32 %v3174_v39, %v6340_v7 }
0x21f3   :  { %v3176_v60 = vsel %vm2567_vm15, %v3175_v2, -inf }
0x21f4   :  { %3177 = vmax.xlane.f32.xlu0 %v3176_v60 }
0x227d   :  { %v3178_v14 = vpop.xlane.xlu0 %3177 }
0x227e   :  { %v3179_v22 = vsub.f32 %v3175_v2, %v3178_v14 }
0x2280   :  { %v3180_v49 = vmul.f32 1.442695, %v3179_v22 }
0x2282   :  { %4789 = vpow2.f32 %v3180_v49 }
0x228f   :  { %v4790_v53 = vpop.eup %4789 }
0x2290   :  { %v3182_v57 = vsel %vm2567_vm15, %v4790_v53, 0.0 }
0x2291   :  { %3183 = vadd.xlane.f32.xlu1 %v3182_v57 }
0x231a   :  { %v3184_v1 = vpop.xlane.xlu1 %3183 }
0x231b   :  { %4791 = vlog2.f32 %v3184_v1 }
0x2328   :  { %v4792_v61 = vpop.eup %4791 }
0x2329   :  { %v3186_v41 = vmul.f32 0.6931472, %v4792_v61 }
0x232b   :  { %v3187_v10 = vadd.f32 %v3186_v41, %v3178_v14 }
0x232d   :  { %v3188_v43 = vsub.f32 -1.3862944, %v3187_v10 }
0x232f   :  { %v3189_v19 = vmul.f32 0.1, %v3188_v43 }
0x2331   :  { %v3190_v40 = vadd.f32 %v3189_v19, %v6340_v7 }
0x2333   :  { %v3191_v56 = vsel %vm2567_vm15, %v3190_v40, -inf }
0x2334   :  { %v3192_v16 = vrot.slane %v3191_v56, 4 }
0x2336   :  { %v3193_v8 = vmax.f32 %v3191_v56, %v3192_v16 }
0x2338   :  { %v3194_v15 = vrot.slane %v3193_v8, 2 }
0x233a   :  { %v3195_v44 = vmax.f32 %v3193_v8, %v3194_v15 }
0x233c   :  { %v3196_v32 = vrot.slane %v3195_v44, 1 }
0x233e   :  { %v3197_v20 = vmax.f32 %v3195_v44, %v3196_v32 }
0x2340   :  { %v3198_v25 = vsub.f32 %v3190_v40, %v3197_v20 }
0x2342   :  { %v3199_v45 = vmul.f32 1.442695, %v3198_v25 }
0x2344   :  { %4793 = vpow2.f32 %v3199_v45 }
0x2351   :  { %v4794_v50 = vpop.eup %4793 }
0x2352   :  { %v3201_v17 = vsel %vm2567_vm15, %v4794_v50, 0.0 }
0x2353   :  { %v3202_v52 = vrot.slane %v3201_v17, 4 }
0x2355   :  { %v3203_v0 = vadd.f32 %v3202_v52, %v3201_v17 }
0x2357   :  { %v3204_v37 = vrot.slane %v3203_v0, 2 }
0x2359   :  { %v3205_v18 = vadd.f32 %v3204_v37, %v3203_v0 }
0x235b   :  { %v3206_v30 = vrot.slane %v3205_v18, 1 }
0x235d   :  { %v3207_v6 = vadd.f32 %v3206_v30, %v3205_v18 }
0x235f   :  { %4795 = vlog2.f32 %v3207_v6 }
0x236c   :  { %v4796_v47 = vpop.eup %4795 }
0x236d   :  { %v3209_v9 = vmul.f32 0.6931472, %v4796_v47 }
0x236f   :  { %v3210_v55 = vadd.f32 %v3209_v9, %v3197_v20 }
0x2371   :  { %v3211_v5 = vsub.f32 -1.3862944, %v3210_v55 }
0x2373   :  { %v3212_v35 = vmul.f32 0.1, %v3211_v5 }
0x2375   :  { %v3213_v46 = vadd.f32 %v3212_v35, %v6340_v7 }
0x2377   :  { %v3214_v62 = vsel %vm2567_vm15, %v3213_v46, -inf }
0x2378   :  { %3215 = vmax.xlane.f32.xlu0 %v3214_v62 }
0x2401   :  { %v3216_v54 = vpop.xlane.xlu0 %3215 }
0x2402   :  { %v3217_v27 = vsub.f32 %v3213_v46, %v3216_v54 }
0x2404   :  { %v3218_v34 = vmul.f32 1.442695, %v3217_v27 }
0x2406   :  { %4797 = vpow2.f32 %v3218_v34 }
0x2413   :  { %v4798_v24 = vpop.eup %4797 }
0x2414   :  { %v3220_v4 = vsel %vm2567_vm15, %v4798_v24, 0.0 }
0x2415   :  { %3221 = vadd.xlane.f32.xlu1 %v3220_v4 }
0x249e   :  { %v3222_v33 = vpop.xlane.xlu1 %3221 }
0x249f   :  { %4799 = vlog2.f32 %v3222_v33 }
0x24ac   :  { %v4800_v26 = vpop.eup %4799 }
0x24ad   :  { %v3224_v28 = vmul.f32 0.6931472, %v4800_v26 }
0x24af   :  { %v3225_v13 = vadd.f32 %v3224_v28, %v3216_v54 }
0x24b1   :  { %v3226_v21 = vsub.f32 -1.3862944, %v3225_v13 }
0x24b3   :  { %v3227_v23 = vmul.f32 0.1, %v3226_v21 }
0x24b5   :  { %v3228_v36 = vadd.f32 %v3227_v23, %v6340_v7 }
0x24b7   :  { %v3229_v42 = vsel %vm2567_vm15, %v3228_v36, -inf }
0x24b8   :  { %v3230_v58 = vrot.slane %v3229_v42, 4 }
0x24ba   :  { %v3231_v59 = vmax.f32 %v3229_v42, %v3230_v58 }
0x24bc   :  { %v3232_v51 = vrot.slane %v3231_v59, 2 }
0x24be   :  { %v3233_v31 = vmax.f32 %v3231_v59, %v3232_v51 }
0x24c0   :  { %v3234_v3 = vrot.slane %v3233_v31, 1 }
0x24c2   :  { %v3235_v48 = vmax.f32 %v3233_v31, %v3234_v3 }
0x24c4   :  { %v3236_v12 = vsub.f32 %v3228_v36, %v3235_v48 }
0x24c6   :  { %v3237_v38 = vmul.f32 1.442695, %v3236_v12 }
0x24c8   :  { %4801 = vpow2.f32 %v3237_v38 }
0x24d5   :  { %v4802_v39 = vpop.eup %4801 }
0x24d6   :  { %v3239_v2 = vsel %vm2567_vm15, %v4802_v39, 0.0 }
0x24d7   :  { %v3240_v60 = vrot.slane %v3239_v2, 4 }
0x24d9   :  { %v3241_v14 = vadd.f32 %v3240_v60, %v3239_v2 }
0x24db   :  { %v3242_v22 = vrot.slane %v3241_v14, 2 }
0x24dd   :  { %v3243_v49 = vadd.f32 %v3242_v22, %v3241_v14 }
0x24df   :  { %v3244_v53 = vrot.slane %v3243_v49, 1 }
0x24e1   :  { %v3245_v57 = vadd.f32 %v3244_v53, %v3243_v49 }
0x24e3   :  { %4803 = vlog2.f32 %v3245_v57 }
0x24f0   :  { %v4804_v1 = vpop.eup %4803 }
0x24f1   :  { %v3247_v61 = vmul.f32 0.6931472, %v4804_v1 }
0x24f3   :  { %v3248_v41 = vadd.f32 %v3247_v61, %v3235_v48 }
0x24f5   :  { %v3249_v10 = vsub.f32 -1.3862944, %v3248_v41 }
0x24f7   :  { %v3250_v43 = vmul.f32 0.1, %v3249_v10 }
0x24f9   :  { %v3251_v19 = vadd.f32 %v3250_v43, %v6340_v7 }
0x24fb   :  { %v3252_v40 = vsel %vm2567_vm15, %v3251_v19, -inf }
0x24fc   :  { %3253 = vmax.xlane.f32.xlu0 %v3252_v40 }
0x2585   :  { %v3254_v56 = vpop.xlane.xlu0 %3253 }
0x2586   :  { %v3255_v16 = vsub.f32 %v3251_v19, %v3254_v56 }
0x2588   :  { %v3256_v8 = vmul.f32 1.442695, %v3255_v16 }
0x258a   :  { %4805 = vpow2.f32 %v3256_v8 }
0x2597   :  { %v4806_v15 = vpop.eup %4805 }
0x2598   :  { %v3258_v44 = vsel %vm2567_vm15, %v4806_v15, 0.0 }
0x2599   :  { %3259 = vadd.xlane.f32.xlu1 %v3258_v44 }
0x2622   :  { %v3260_v32 = vpop.xlane.xlu1 %3259 }
0x2623   :  { %4807 = vlog2.f32 %v3260_v32 }
0x2630   :  { %v4808_v20 = vpop.eup %4807 }
0x2631   :  { %v3262_v25 = vmul.f32 0.6931472, %v4808_v20 }
0x2633   :  { %v3263_v45 = vadd.f32 %v3262_v25, %v3254_v56 }
0x2635   :  { %v3264_v50 = vsub.f32 -1.3862944, %v3263_v45 }
0x2637   :  { %v3265_v17 = vmul.f32 0.1, %v3264_v50 }
0x2639   :  { %v3266_v52 = vadd.f32 %v3265_v17, %v6340_v7 }
0x263b   :  { %v3267_v0 = vsel %vm2567_vm15, %v3266_v52, -inf }
0x263c   :  { %v3268_v37 = vrot.slane %v3267_v0, 4 }
0x263e   :  { %v3269_v18 = vmax.f32 %v3267_v0, %v3268_v37 }
0x2640   :  { %v3270_v30 = vrot.slane %v3269_v18, 2 }
0x2642   :  { %v3271_v6 = vmax.f32 %v3269_v18, %v3270_v30 }
0x2644   :  { %v3272_v47 = vrot.slane %v3271_v6, 1 }
0x2646   :  { %v3273_v9 = vmax.f32 %v3271_v6, %v3272_v47 }
0x2648   :  { %v3274_v55 = vsub.f32 %v3266_v52, %v3273_v9 }
0x264a   :  { %v3275_v5 = vmul.f32 1.442695, %v3274_v55 }
0x264c   :  { %4809 = vpow2.f32 %v3275_v5 }
0x2659   :  { %v4810_v35 = vpop.eup %4809 }
0x265a   :  { %v3277_v46 = vsel %vm2567_vm15, %v4810_v35, 0.0 }
0x265b   :  { %v3278_v62 = vrot.slane %v3277_v46, 4 }
0x265d   :  { %v3279_v54 = vadd.f32 %v3278_v62, %v3277_v46 }
0x265f   :  { %v3280_v27 = vrot.slane %v3279_v54, 2 }
0x2661   :  { %v3281_v34 = vadd.f32 %v3280_v27, %v3279_v54 }
0x2663   :  { %v3282_v24 = vrot.slane %v3281_v34, 1 }
0x2665   :  { %v3283_v4 = vadd.f32 %v3282_v24, %v3281_v34 }
0x2667   :  { %4811 = vlog2.f32 %v3283_v4 }
0x2674   :  { %v4812_v33 = vpop.eup %4811 }
0x2675   :  { %v3285_v26 = vmul.f32 0.6931472, %v4812_v33 }
0x2677   :  { %v3286_v28 = vadd.f32 %v3285_v26, %v3273_v9 }
0x2679   :  { %v3287_v13 = vsub.f32 -1.3862944, %v3286_v28 }
0x267b   :  { %v3288_v21 = vmul.f32 0.1, %v3287_v13 }
0x267d   :  { %v3289_v23 = vadd.f32 %v3288_v21, %v6340_v7 }
0x267f   :  { %v3290_v36 = vsel %vm2567_vm15, %v3289_v23, -inf }
0x2680   :  { %3291 = vmax.xlane.f32.xlu0 %v3290_v36 }
0x2709   :  { %v3292_v42 = vpop.xlane.xlu0 %3291 }
0x270a   :  { %v3293_v58 = vsub.f32 %v3289_v23, %v3292_v42 }
0x270c   :  { %v3294_v59 = vmul.f32 1.442695, %v3293_v58 }
0x270e   :  { %4813 = vpow2.f32 %v3294_v59 }
0x271b   :  { %v4814_v51 = vpop.eup %4813 }
0x271c   :  { %v3296_v31 = vsel %vm2567_vm15, %v4814_v51, 0.0 }
0x271d   :  { %3297 = vadd.xlane.f32.xlu1 %v3296_v31 }
0x27a6   :  { %v3298_v3 = vpop.xlane.xlu1 %3297 }
0x27a7   :  { %4815 = vlog2.f32 %v3298_v3 }
0x27b4   :  { %v4816_v48 = vpop.eup %4815 }
0x27b5   :  { %v3300_v12 = vmul.f32 0.6931472, %v4816_v48 }
0x27b7   :  { %v3301_v38 = vadd.f32 %v3300_v12, %v3292_v42 }
0x27b9   :  { %v3302_v39 = vsub.f32 -1.3862944, %v3301_v38 }
0x27bb   :  { %v3303_v2 = vmul.f32 0.1, %v3302_v39 }
0x27bd   :  { %v3304_v60 = vadd.f32 %v3303_v2, %v6340_v7 }
0x27bf   :  { %v3305_v14 = vsel %vm2567_vm15, %v3304_v60, -inf }
0x27c0   :  { %v3306_v22 = vrot.slane %v3305_v14, 4 }
0x27c2   :  { %v3307_v49 = vmax.f32 %v3305_v14, %v3306_v22 }
0x27c4   :  { %v3308_v53 = vrot.slane %v3307_v49, 2 }
0x27c6   :  { %v3309_v57 = vmax.f32 %v3307_v49, %v3308_v53 }
0x27c8   :  { %v3310_v1 = vrot.slane %v3309_v57, 1 }
0x27ca   :  { %v3311_v61 = vmax.f32 %v3309_v57, %v3310_v1 }
0x27cc   :  { %v3312_v41 = vsub.f32 %v3304_v60, %v3311_v61 }
0x27ce   :  { %v3313_v10 = vmul.f32 1.442695, %v3312_v41 }
0x27d0   :  { %4817 = vpow2.f32 %v3313_v10 }
0x27dd   :  { %v4818_v43 = vpop.eup %4817 }
0x27de   :  { %v3315_v19 = vsel %vm2567_vm15, %v4818_v43, 0.0 }
0x27df   :  { %v3316_v40 = vrot.slane %v3315_v19, 4 }
0x27e1   :  { %v3317_v56 = vadd.f32 %v3316_v40, %v3315_v19 }
0x27e3   :  { %v3318_v16 = vrot.slane %v3317_v56, 2 }
0x27e5   :  { %v3319_v8 = vadd.f32 %v3318_v16, %v3317_v56 }
0x27e7   :  { %v3320_v15 = vrot.slane %v3319_v8, 1 }
0x27e9   :  { %v3321_v44 = vadd.f32 %v3320_v15, %v3319_v8 }
0x27eb   :  { %4819 = vlog2.f32 %v3321_v44 }
0x27f8   :  { %v4820_v32 = vpop.eup %4819 }
0x27f9   :  { %v3323_v20 = vmul.f32 0.6931472, %v4820_v32 }
0x27fb   :  { %v3324_v25 = vadd.f32 %v3323_v20, %v3311_v61 }
0x27fd   :  { %v3325_v45 = vsub.f32 -1.3862944, %v3324_v25 }
0x27ff   :  { %v3326_v50 = vmul.f32 0.1, %v3325_v45 }
0x2801   :  { %v3327_v17 = vadd.f32 %v3326_v50, %v6340_v7 }
0x2803   :  { %v3328_v52 = vsel %vm2567_vm15, %v3327_v17, -inf }
0x2804   :  { %3329 = vmax.xlane.f32.xlu0 %v3328_v52 }
0x288d   :  { %v3330_v0 = vpop.xlane.xlu0 %3329 }
0x288e   :  { %v3331_v37 = vsub.f32 %v3327_v17, %v3330_v0 }
0x2890   :  { %v3332_v18 = vmul.f32 1.442695, %v3331_v37 }
0x2892   :  { %4821 = vpow2.f32 %v3332_v18 }
0x289f   :  { %v4822_v30 = vpop.eup %4821 }
0x28a0   :  { %v3334_v6 = vsel %vm2567_vm15, %v4822_v30, 0.0 }
0x28a1   :  { %3335 = vadd.xlane.f32.xlu1 %v3334_v6 }
0x292a   :  { %v3336_v47 = vpop.xlane.xlu1 %3335 }
0x292b   :  { %4823 = vlog2.f32 %v3336_v47 }
0x2938   :  { %v4824_v9 = vpop.eup %4823 }
0x2939   :  { %v3338_v55 = vmul.f32 0.6931472, %v4824_v9 }
0x293b   :  { %v3339_v5 = vadd.f32 %v3338_v55, %v3330_v0 }
0x293d   :  { %v3340_v35 = vsub.f32 -1.3862944, %v3339_v5 }
0x293f   :  { %v3341_v46 = vmul.f32 0.1, %v3340_v35 }
0x2941   :  { %v3342_v62 = vadd.f32 %v3341_v46, %v6340_v7 }
0x2943   :  { %v3343_v54 = vsel %vm2567_vm15, %v3342_v62, -inf }
0x2944   :  { %v3344_v27 = vrot.slane %v3343_v54, 4 }
0x2946   :  { %v3345_v34 = vmax.f32 %v3343_v54, %v3344_v27 }
0x2948   :  { %v3346_v24 = vrot.slane %v3345_v34, 2 }
0x294a   :  { %v3347_v4 = vmax.f32 %v3345_v34, %v3346_v24 }
0x294c   :  { %v3348_v33 = vrot.slane %v3347_v4, 1 }
0x294e   :  { %v3349_v26 = vmax.f32 %v3347_v4, %v3348_v33 }
0x2950   :  { %v3350_v28 = vsub.f32 %v3342_v62, %v3349_v26 }
0x2952   :  { %v3351_v13 = vmul.f32 1.442695, %v3350_v28 }
0x2954   :  { %4825 = vpow2.f32 %v3351_v13 }
0x2961   :  { %v4826_v21 = vpop.eup %4825 }
0x2962   :  { %v3353_v23 = vsel %vm2567_vm15, %v4826_v21, 0.0 }
0x2963   :  { %v3354_v36 = vrot.slane %v3353_v23, 4 }
0x2965   :  { %v3355_v42 = vadd.f32 %v3354_v36, %v3353_v23 }
0x2967   :  { %v3356_v58 = vrot.slane %v3355_v42, 2 }
0x2969   :  { %v3357_v59 = vadd.f32 %v3356_v58, %v3355_v42 }
0x296b   :  { %v3358_v51 = vrot.slane %v3357_v59, 1 }
0x296d   :  { %v3359_v31 = vadd.f32 %v3358_v51, %v3357_v59 }
0x296f   :  { %4827 = vlog2.f32 %v3359_v31 }
0x297c   :  { %v4828_v3 = vpop.eup %4827 }
0x297d   :  { %v3361_v48 = vmul.f32 0.6931472, %v4828_v3 }
0x297f   :  { %v3362_v12 = vadd.f32 %v3361_v48, %v3349_v26 }
0x2981   :  { %v3363_v38 = vsub.f32 -1.3862944, %v3362_v12 }
0x2983   :  { %v3364_v39 = vmul.f32 0.1, %v3363_v38 }
0x2985   :  { %v3365_v2 = vadd.f32 %v3364_v39, %v6340_v7 }
0x2987   :  { %v3366_v60 = vsel %vm2567_vm15, %v3365_v2, -inf }
0x2988   :  { %3367 = vmax.xlane.f32.xlu0 %v3366_v60 }
0x2a11   :  { %v3368_v14 = vpop.xlane.xlu0 %3367 }
0x2a12   :  { %v3369_v22 = vsub.f32 %v3365_v2, %v3368_v14 }
0x2a14   :  { %v3370_v49 = vmul.f32 1.442695, %v3369_v22 }
0x2a16   :  { %4829 = vpow2.f32 %v3370_v49 }
0x2a23   :  { %v4830_v53 = vpop.eup %4829 }
0x2a24   :  { %v3372_v57 = vsel %vm2567_vm15, %v4830_v53, 0.0 }
0x2a25   :  { %3373 = vadd.xlane.f32.xlu1 %v3372_v57 }
0x2aae   :  { %v3374_v1 = vpop.xlane.xlu1 %3373 }
0x2aaf   :  { %4831 = vlog2.f32 %v3374_v1 }
0x2abc   :  { %v4832_v61 = vpop.eup %4831 }
0x2abd   :  { %v3376_v41 = vmul.f32 0.6931472, %v4832_v61 }
0x2abf   :  { %v3377_v10 = vadd.f32 %v3376_v41, %v3368_v14 }
0x2ac1   :  { %v3378_v43 = vsub.f32 -1.3862944, %v3377_v10 }
0x2ac3   :  { %v3379_v19 = vmul.f32 0.1, %v3378_v43 }
0x2ac5   :  { %v3380_v40 = vadd.f32 %v3379_v19, %v6340_v7 }
0x2ac7   :  { %v3381_v56 = vsel %vm2567_vm15, %v3380_v40, -inf }
0x2ac8   :  { %v3382_v16 = vrot.slane %v3381_v56, 4 }
0x2aca   :  { %v3383_v8 = vmax.f32 %v3381_v56, %v3382_v16 }
0x2acc   :  { %v3384_v15 = vrot.slane %v3383_v8, 2 }
0x2ace   :  { %v3385_v44 = vmax.f32 %v3383_v8, %v3384_v15 }
0x2ad0   :  { %v3386_v32 = vrot.slane %v3385_v44, 1 }
0x2ad2   :  { %v3387_v20 = vmax.f32 %v3385_v44, %v3386_v32 }
0x2ad4   :  { %v3388_v25 = vsub.f32 %v3380_v40, %v3387_v20 }
0x2ad6   :  { %v3389_v45 = vmul.f32 1.442695, %v3388_v25 }
0x2ad8   :  { %4833 = vpow2.f32 %v3389_v45 }
0x2ae5   :  { %v4834_v50 = vpop.eup %4833 }
0x2ae6   :  { %v3391_v17 = vsel %vm2567_vm15, %v4834_v50, 0.0 }
0x2ae7   :  { %v3392_v52 = vrot.slane %v3391_v17, 4 }
0x2ae9   :  { %v3393_v0 = vadd.f32 %v3392_v52, %v3391_v17 }
0x2aeb   :  { %v3394_v37 = vrot.slane %v3393_v0, 2 }
0x2aed   :  { %v3395_v18 = vadd.f32 %v3394_v37, %v3393_v0 }
0x2aef   :  { %v3396_v30 = vrot.slane %v3395_v18, 1 }
0x2af1   :  { %v3397_v6 = vadd.f32 %v3396_v30, %v3395_v18 }
0x2af3   :  { %4835 = vlog2.f32 %v3397_v6 }
0x2b00   :  { %v4836_v47 = vpop.eup %4835 }
0x2b01   :  { %v3399_v9 = vmul.f32 0.6931472, %v4836_v47 }
0x2b03   :  { %v3400_v55 = vadd.f32 %v3399_v9, %v3387_v20 }
0x2b05   :  { %v3401_v5 = vsub.f32 -1.3862944, %v3400_v55 }
0x2b07   :  { %v3402_v35 = vmul.f32 0.1, %v3401_v5 }
0x2b09   :  { %v3403_v46 = vadd.f32 %v3402_v35, %v6340_v7 }
0x2b0b   :  { %v3404_v62 = vsel %vm2567_vm15, %v3403_v46, -inf }
0x2b0c   :  { %3405 = vmax.xlane.f32.xlu0 %v3404_v62 }
0x2b95   :  { %v3406_v54 = vpop.xlane.xlu0 %3405 }
0x2b96   :  { %v3407_v27 = vsub.f32 %v3403_v46, %v3406_v54 }
0x2b98   :  { %v3408_v34 = vmul.f32 1.442695, %v3407_v27 }
0x2b9a   :  { %4837 = vpow2.f32 %v3408_v34 }
0x2ba7   :  { %v4838_v24 = vpop.eup %4837 }
0x2ba8   :  { %v3410_v4 = vsel %vm2567_vm15, %v4838_v24, 0.0 }
0x2ba9   :  { %3411 = vadd.xlane.f32.xlu1 %v3410_v4 }
0x2c32   :  { %v3412_v33 = vpop.xlane.xlu1 %3411 }
0x2c33   :  { %4839 = vlog2.f32 %v3412_v33 }
0x2c40   :  { %v4840_v26 = vpop.eup %4839 }
0x2c41   :  { %v3414_v28 = vmul.f32 0.6931472, %v4840_v26 }
0x2c43   :  { %v3415_v13 = vadd.f32 %v3414_v28, %v3406_v54 }
0x2c45   :  { %v3416_v21 = vsub.f32 -1.3862944, %v3415_v13 }
0x2c47   :  { %v3417_v23 = vmul.f32 0.1, %v3416_v21 }
0x2c49   :  { %v3418_v36 = vadd.f32 %v3417_v23, %v6340_v7 }
0x2c4b   :  { %v3419_v42 = vsel %vm2567_vm15, %v3418_v36, -inf }
0x2c4c   :  { %v3420_v58 = vrot.slane %v3419_v42, 4 }
0x2c4e   :  { %v3421_v59 = vmax.f32 %v3419_v42, %v3420_v58 }
0x2c50   :  { %v3422_v51 = vrot.slane %v3421_v59, 2 }
0x2c52   :  { %v3423_v31 = vmax.f32 %v3421_v59, %v3422_v51 }
0x2c54   :  { %v3424_v3 = vrot.slane %v3423_v31, 1 }
0x2c56   :  { %v3425_v48 = vmax.f32 %v3423_v31, %v3424_v3 }
0x2c58   :  { %v3426_v12 = vsub.f32 %v3418_v36, %v3425_v48 }
0x2c5a   :  { %v3427_v38 = vmul.f32 1.442695, %v3426_v12 }
0x2c5c   :  { %4841 = vpow2.f32 %v3427_v38 }
0x2c69   :  { %v4842_v39 = vpop.eup %4841 }
0x2c6a   :  { %v3429_v2 = vsel %vm2567_vm15, %v4842_v39, 0.0 }
0x2c6b   :  { %v3430_v60 = vrot.slane %v3429_v2, 4 }
0x2c6d   :  { %v3431_v14 = vadd.f32 %v3430_v60, %v3429_v2 }
0x2c6f   :  { %v3432_v22 = vrot.slane %v3431_v14, 2 }
0x2c71   :  { %v3433_v49 = vadd.f32 %v3432_v22, %v3431_v14 }
0x2c73   :  { %v3434_v53 = vrot.slane %v3433_v49, 1 }
0x2c75   :  { %v3435_v57 = vadd.f32 %v3434_v53, %v3433_v49 }
0x2c77   :  { %4843 = vlog2.f32 %v3435_v57 }
0x2c84   :  { %v4844_v1 = vpop.eup %4843 }
0x2c85   :  { %v3437_v61 = vmul.f32 0.6931472, %v4844_v1 }
0x2c87   :  { %v3438_v41 = vadd.f32 %v3437_v61, %v3425_v48 }
0x2c89   :  { %v3439_v10 = vsub.f32 -1.3862944, %v3438_v41 }
0x2c8b   :  { %v3440_v43 = vmul.f32 0.1, %v3439_v10 }
0x2c8d   :  { %v3441_v19 = vadd.f32 %v3440_v43, %v6340_v7 }
0x2c8f   :  { %v3442_v40 = vsel %vm2567_vm15, %v3441_v19, -inf }
0x2c90   :  { %3443 = vmax.xlane.f32.xlu0 %v3442_v40 }
0x2d19   :  { %v3444_v56 = vpop.xlane.xlu0 %3443 }
0x2d1a   :  { %v3445_v16 = vsub.f32 %v3441_v19, %v3444_v56 }
0x2d1c   :  { %v3446_v8 = vmul.f32 1.442695, %v3445_v16 }
0x2d1e   :  { %4845 = vpow2.f32 %v3446_v8 }
0x2d2b   :  { %v4846_v15 = vpop.eup %4845 }
0x2d2c   :  { %v3448_v44 = vsel %vm2567_vm15, %v4846_v15, 0.0 }
0x2d2d   :  { %3449 = vadd.xlane.f32.xlu1 %v3448_v44 }
0x2db6   :  { %v3450_v32 = vpop.xlane.xlu1 %3449 }
0x2db7   :  { %4847 = vlog2.f32 %v3450_v32 }
0x2dc4   :  { %v4848_v20 = vpop.eup %4847 }
0x2dc5   :  { %v3452_v25 = vmul.f32 0.6931472, %v4848_v20 }
0x2dc7   :  { %v3453_v45 = vadd.f32 %v3452_v25, %v3444_v56 }
0x2dc9   :  { %v3454_v50 = vsub.f32 -1.3862944, %v3453_v45 }
0x2dcb   :  { %v3455_v17 = vmul.f32 0.1, %v3454_v50 }
0x2dcd   :  { %v3456_v52 = vadd.f32 %v3455_v17, %v6340_v7 }
0x2dcf   :  { %v3457_v0 = vsel %vm2567_vm15, %v3456_v52, -inf }
0x2dd0   :  { %v3458_v37 = vrot.slane %v3457_v0, 4 }
0x2dd2   :  { %v3459_v18 = vmax.f32 %v3457_v0, %v3458_v37 }
0x2dd4   :  { %v3460_v30 = vrot.slane %v3459_v18, 2 }
0x2dd6   :  { %v3461_v6 = vmax.f32 %v3459_v18, %v3460_v30 }
0x2dd8   :  { %v3462_v47 = vrot.slane %v3461_v6, 1 }
0x2dda   :  { %v3463_v9 = vmax.f32 %v3461_v6, %v3462_v47 }
0x2ddc   :  { %v3464_v55 = vsub.f32 %v3456_v52, %v3463_v9 }
0x2dde   :  { %v3465_v5 = vmul.f32 1.442695, %v3464_v55 }
0x2de0   :  { %4849 = vpow2.f32 %v3465_v5 }
0x2ded   :  { %v4850_v35 = vpop.eup %4849 }
0x2dee   :  { %v3467_v46 = vsel %vm2567_vm15, %v4850_v35, 0.0 }
0x2def   :  { %v3468_v62 = vrot.slane %v3467_v46, 4 }
0x2df1   :  { %v3469_v54 = vadd.f32 %v3468_v62, %v3467_v46 }
0x2df3   :  { %v3470_v27 = vrot.slane %v3469_v54, 2 }
0x2df5   :  { %v3471_v34 = vadd.f32 %v3470_v27, %v3469_v54 }
0x2df7   :  { %v3472_v24 = vrot.slane %v3471_v34, 1 }
0x2df9   :  { %v3473_v4 = vadd.f32 %v3472_v24, %v3471_v34 }
0x2dfb   :  { %4851 = vlog2.f32 %v3473_v4 }
0x2e08   :  { %v4852_v33 = vpop.eup %4851 }
0x2e09   :  { %v3475_v26 = vmul.f32 0.6931472, %v4852_v33 }
0x2e0b   :  { %v3476_v28 = vadd.f32 %v3475_v26, %v3463_v9 }
0x2e0d   :  { %v3477_v13 = vsub.f32 -1.3862944, %v3476_v28 }
0x2e0f   :  { %v3478_v21 = vmul.f32 0.1, %v3477_v13 }
0x2e11   :  { %v3479_v23 = vadd.f32 %v3478_v21, %v6340_v7 }
0x2e13   :  { %v3480_v36 = vsel %vm2567_vm15, %v3479_v23, -inf }
0x2e14   :  { %3481 = vmax.xlane.f32.xlu0 %v3480_v36 }
0x2e9d   :  { %v3482_v42 = vpop.xlane.xlu0 %3481 }
0x2e9e   :  { %v3483_v58 = vsub.f32 %v3479_v23, %v3482_v42 }
0x2ea0   :  { %v3484_v59 = vmul.f32 1.442695, %v3483_v58 }
0x2ea2   :  { %4853 = vpow2.f32 %v3484_v59 }
0x2eaf   :  { %v4854_v51 = vpop.eup %4853 }
0x2eb0   :  { %v3486_v31 = vsel %vm2567_vm15, %v4854_v51, 0.0 }
0x2eb1   :  { %3487 = vadd.xlane.f32.xlu1 %v3486_v31 }
0x2f3a   :  { %v3488_v3 = vpop.xlane.xlu1 %3487 }
0x2f3b   :  { %4855 = vlog2.f32 %v3488_v3 }
0x2f48   :  { %v4856_v48 = vpop.eup %4855 }
0x2f49   :  { %v3490_v12 = vmul.f32 0.6931472, %v4856_v48 }
0x2f4b   :  { %v3491_v38 = vadd.f32 %v3490_v12, %v3482_v42 }
0x2f4d   :  { %v3492_v39 = vsub.f32 -1.3862944, %v3491_v38 }
0x2f4f   :  { %v3493_v2 = vmul.f32 0.1, %v3492_v39 }
0x2f51   :  { %v3494_v60 = vadd.f32 %v3493_v2, %v6340_v7 }
0x2f53   :  { %v3495_v14 = vsel %vm2567_vm15, %v3494_v60, -inf }
0x2f54   :  { %v3496_v22 = vrot.slane %v3495_v14, 4 }
0x2f56   :  { %v3497_v49 = vmax.f32 %v3495_v14, %v3496_v22 }
0x2f58   :  { %v3498_v53 = vrot.slane %v3497_v49, 2 }
0x2f5a   :  { %v3499_v57 = vmax.f32 %v3497_v49, %v3498_v53 }
0x2f5c   :  { %v3500_v1 = vrot.slane %v3499_v57, 1 }
0x2f5e   :  { %v3501_v61 = vmax.f32 %v3499_v57, %v3500_v1 }
0x2f60   :  { %v3502_v41 = vsub.f32 %v3494_v60, %v3501_v61 }
0x2f62   :  { %v3503_v10 = vmul.f32 1.442695, %v3502_v41 }
0x2f64   :  { %4857 = vpow2.f32 %v3503_v10 }
0x2f71   :  { %v4858_v43 = vpop.eup %4857 }
0x2f72   :  { %v3505_v19 = vsel %vm2567_vm15, %v4858_v43, 0.0 }
0x2f73   :  { %v3506_v40 = vrot.slane %v3505_v19, 4 }
0x2f75   :  { %v3507_v56 = vadd.f32 %v3506_v40, %v3505_v19 }
0x2f77   :  { %v3508_v16 = vrot.slane %v3507_v56, 2 }
0x2f79   :  { %v3509_v8 = vadd.f32 %v3508_v16, %v3507_v56 }
0x2f7b   :  { %v3510_v15 = vrot.slane %v3509_v8, 1 }
0x2f7d   :  { %v3511_v44 = vadd.f32 %v3510_v15, %v3509_v8 }
0x2f7f   :  { %4859 = vlog2.f32 %v3511_v44 }
0x2f8c   :  { %v4860_v32 = vpop.eup %4859 }
0x2f8d   :  { %v3513_v20 = vmul.f32 0.6931472, %v4860_v32 }
0x2f8f   :  { %v3514_v25 = vadd.f32 %v3513_v20, %v3501_v61 }
0x2f91   :  { %v3515_v45 = vsub.f32 -1.3862944, %v3514_v25 }
0x2f93   :  { %v3516_v50 = vmul.f32 0.1, %v3515_v45 }
0x2f95   :  { %v3517_v17 = vadd.f32 %v3516_v50, %v6340_v7 }
0x2f97   :  { %v3518_v52 = vsel %vm2567_vm15, %v3517_v17, -inf }
0x2f98   :  { %3519 = vmax.xlane.f32.xlu0 %v3518_v52 }
0x3021   :  { %v3520_v0 = vpop.xlane.xlu0 %3519 }
0x3022   :  { %v3521_v37 = vsub.f32 %v3517_v17, %v3520_v0 }
0x3024   :  { %v3522_v18 = vmul.f32 1.442695, %v3521_v37 }
0x3026   :  { %4861 = vpow2.f32 %v3522_v18 }
0x3033   :  { %v4862_v30 = vpop.eup %4861 }
0x3034   :  { %v3524_v6 = vsel %vm2567_vm15, %v4862_v30, 0.0 }
0x3035   :  { %3525 = vadd.xlane.f32.xlu1 %v3524_v6 }
0x30be   :  { %v3526_v47 = vpop.xlane.xlu1 %3525 }
0x30bf   :  { %4863 = vlog2.f32 %v3526_v47 }
0x30cc   :  { %v4864_v9 = vpop.eup %4863 }
0x30cd   :  { %v3528_v55 = vmul.f32 0.6931472, %v4864_v9 }
0x30cf   :  { %v3529_v5 = vadd.f32 %v3528_v55, %v3520_v0 }
0x30d1   :  { %v3530_v35 = vsub.f32 -1.3862944, %v3529_v5 }
0x30d3   :  { %v3531_v46 = vmul.f32 0.1, %v3530_v35 }
0x30d5   :  { %v3532_v62 = vadd.f32 %v3531_v46, %v6340_v7 }
0x30d7   :  { %v3533_v54 = vsel %vm2567_vm15, %v3532_v62, -inf }
0x30d8   :  { %v3534_v27 = vrot.slane %v3533_v54, 4 }
0x30da   :  { %v3535_v34 = vmax.f32 %v3533_v54, %v3534_v27 }
0x30dc   :  { %v3536_v24 = vrot.slane %v3535_v34, 2 }
0x30de   :  { %v3537_v4 = vmax.f32 %v3535_v34, %v3536_v24 }
0x30e0   :  { %v3538_v33 = vrot.slane %v3537_v4, 1 }
0x30e2   :  { %v3539_v26 = vmax.f32 %v3537_v4, %v3538_v33 }
0x30e4   :  { %v3540_v28 = vsub.f32 %v3532_v62, %v3539_v26 }
0x30e6   :  { %v3541_v13 = vmul.f32 1.442695, %v3540_v28 }
0x30e8   :  { %4865 = vpow2.f32 %v3541_v13 }
0x30f5   :  { %v4866_v21 = vpop.eup %4865 }
0x30f6   :  { %v3543_v23 = vsel %vm2567_vm15, %v4866_v21, 0.0 }
0x30f7   :  { %v3544_v36 = vrot.slane %v3543_v23, 4 }
0x30f9   :  { %v3545_v42 = vadd.f32 %v3544_v36, %v3543_v23 }
0x30fb   :  { %v3546_v58 = vrot.slane %v3545_v42, 2 }
0x30fd   :  { %v3547_v59 = vadd.f32 %v3546_v58, %v3545_v42 }
0x30ff   :  { %v3548_v51 = vrot.slane %v3547_v59, 1 }
0x3101   :  { %v3549_v31 = vadd.f32 %v3548_v51, %v3547_v59 }
0x3103   :  { %4867 = vlog2.f32 %v3549_v31 }
0x3110   :  { %v4868_v3 = vpop.eup %4867 }
0x3111   :  { %v3551_v48 = vmul.f32 0.6931472, %v4868_v3 }
0x3113   :  { %v3552_v12 = vadd.f32 %v3551_v48, %v3539_v26 }
0x3115   :  { %v3553_v38 = vsub.f32 -1.3862944, %v3552_v12 }
0x3117   :  { %v3554_v39 = vmul.f32 0.1, %v3553_v38 }
0x3119   :  { %v3555_v2 = vadd.f32 %v3554_v39, %v6340_v7 }
0x311b   :  { %v3556_v60 = vsel %vm2567_vm15, %v3555_v2, -inf }
0x311c   :  { %3557 = vmax.xlane.f32.xlu0 %v3556_v60 }
0x31a5   :  { %v3558_v14 = vpop.xlane.xlu0 %3557 }
0x31a6   :  { %v3559_v22 = vsub.f32 %v3555_v2, %v3558_v14 }
0x31a8   :  { %v3560_v49 = vmul.f32 1.442695, %v3559_v22 }
0x31aa   :  { %4869 = vpow2.f32 %v3560_v49 }
0x31b7   :  { %v4870_v53 = vpop.eup %4869 }
0x31b8   :  { %v3562_v57 = vsel %vm2567_vm15, %v4870_v53, 0.0 }
0x31b9   :  { %3563 = vadd.xlane.f32.xlu1 %v3562_v57 }
0x3242   :  { %v3564_v1 = vpop.xlane.xlu1 %3563 }
0x3243   :  { %4871 = vlog2.f32 %v3564_v1 }
0x3250   :  { %v4872_v61 = vpop.eup %4871 }
0x3251   :  { %v3566_v41 = vmul.f32 0.6931472, %v4872_v61 }
0x3253   :  { %v3567_v10 = vadd.f32 %v3566_v41, %v3558_v14 }
0x3255   :  { %v3568_v43 = vsub.f32 -1.3862944, %v3567_v10 }
0x3257   :  { %v3569_v19 = vmul.f32 0.1, %v3568_v43 }
0x3259   :  { %v3570_v40 = vadd.f32 %v3569_v19, %v6340_v7 }
0x325b   :  { %v3571_v56 = vsel %vm2567_vm15, %v3570_v40, -inf }
0x325c   :  { %v3572_v16 = vrot.slane %v3571_v56, 4 }
0x325e   :  { %v3573_v8 = vmax.f32 %v3571_v56, %v3572_v16 }
0x3260   :  { %v3574_v15 = vrot.slane %v3573_v8, 2 }
0x3262   :  { %v3575_v44 = vmax.f32 %v3573_v8, %v3574_v15 }
0x3264   :  { %v3576_v32 = vrot.slane %v3575_v44, 1 }
0x3266   :  { %v3577_v20 = vmax.f32 %v3575_v44, %v3576_v32 }
0x3268   :  { %v3578_v25 = vsub.f32 %v3570_v40, %v3577_v20 }
0x326a   :  { %v3579_v45 = vmul.f32 1.442695, %v3578_v25 }
0x326c   :  { %4873 = vpow2.f32 %v3579_v45 }
0x3279   :  { %v4874_v50 = vpop.eup %4873 }
0x327a   :  { %v3581_v17 = vsel %vm2567_vm15, %v4874_v50, 0.0 }
0x327b   :  { %v3582_v52 = vrot.slane %v3581_v17, 4 }
0x327d   :  { %v3583_v0 = vadd.f32 %v3582_v52, %v3581_v17 }
0x327f   :  { %v3584_v37 = vrot.slane %v3583_v0, 2 }
0x3281   :  { %v3585_v18 = vadd.f32 %v3584_v37, %v3583_v0 }
0x3283   :  { %v3586_v30 = vrot.slane %v3585_v18, 1 }
0x3285   :  { %v3587_v6 = vadd.f32 %v3586_v30, %v3585_v18 }
0x3287   :  { %4875 = vlog2.f32 %v3587_v6 }
0x3294   :  { %v4876_v47 = vpop.eup %4875 }
0x3295   :  { %v3589_v9 = vmul.f32 0.6931472, %v4876_v47 }
0x3297   :  { %v3590_v55 = vadd.f32 %v3589_v9, %v3577_v20 }
0x3299   :  { %v3591_v5 = vsub.f32 -1.3862944, %v3590_v55 }
0x329b   :  { %v3592_v35 = vmul.f32 0.1, %v3591_v5 }
0x329d   :  { %v3593_v46 = vadd.f32 %v3592_v35, %v6340_v7 }
0x329f   :  { %v3594_v62 = vsel %vm2567_vm15, %v3593_v46, -inf }
0x32a0   :  { %3595 = vmax.xlane.f32.xlu0 %v3594_v62 }
0x3329   :  { %v3596_v54 = vpop.xlane.xlu0 %3595 }
0x332a   :  { %v3597_v27 = vsub.f32 %v3593_v46, %v3596_v54 }
0x332c   :  { %v3598_v34 = vmul.f32 1.442695, %v3597_v27 }
0x332e   :  { %4877 = vpow2.f32 %v3598_v34 }
0x333b   :  { %v4878_v24 = vpop.eup %4877 }
0x333c   :  { %v3600_v4 = vsel %vm2567_vm15, %v4878_v24, 0.0 }
0x333d   :  { %3601 = vadd.xlane.f32.xlu1 %v3600_v4 }
0x33c6   :  { %v3602_v33 = vpop.xlane.xlu1 %3601 }
0x33c7   :  { %4879 = vlog2.f32 %v3602_v33 }
0x33d4   :  { %v4880_v26 = vpop.eup %4879 }
0x33d5   :  { %v3604_v28 = vmul.f32 0.6931472, %v4880_v26 }
0x33d7   :  { %v3605_v13 = vadd.f32 %v3604_v28, %v3596_v54 }
0x33d9   :  { %v3606_v21 = vsub.f32 -1.3862944, %v3605_v13 }
0x33db   :  { %v3607_v23 = vmul.f32 0.1, %v3606_v21 }
0x33dd   :  { %v3608_v36 = vadd.f32 %v3607_v23, %v6340_v7 }
0x33df   :  { %v3609_v42 = vsel %vm2567_vm15, %v3608_v36, -inf }
0x33e0   :  { %v3610_v58 = vrot.slane %v3609_v42, 4 }
0x33e2   :  { %v3611_v59 = vmax.f32 %v3609_v42, %v3610_v58 }
0x33e4   :  { %v3612_v51 = vrot.slane %v3611_v59, 2 }
0x33e6   :  { %v3613_v31 = vmax.f32 %v3611_v59, %v3612_v51 }
0x33e8   :  { %v3614_v3 = vrot.slane %v3613_v31, 1 }
0x33ea   :  { %v3615_v48 = vmax.f32 %v3613_v31, %v3614_v3 }
0x33ec   :  { %v3616_v12 = vsub.f32 %v3608_v36, %v3615_v48 }
0x33ee   :  { %v3617_v38 = vmul.f32 1.442695, %v3616_v12 }
0x33f0   :  { %4881 = vpow2.f32 %v3617_v38 }
0x33fd   :  { %v4882_v39 = vpop.eup %4881 }
0x33fe   :  { %v3619_v2 = vsel %vm2567_vm15, %v4882_v39, 0.0 }
0x33ff   :  { %v3620_v60 = vrot.slane %v3619_v2, 4 }
0x3401   :  { %v3621_v14 = vadd.f32 %v3620_v60, %v3619_v2 }
0x3403   :  { %v3622_v22 = vrot.slane %v3621_v14, 2 }
0x3405   :  { %v3623_v49 = vadd.f32 %v3622_v22, %v3621_v14 }
0x3407   :  { %v3624_v53 = vrot.slane %v3623_v49, 1 }
0x3409   :  { %v3625_v57 = vadd.f32 %v3624_v53, %v3623_v49 }
0x340b   :  { %4883 = vlog2.f32 %v3625_v57 }
0x3418   :  { %v4884_v1 = vpop.eup %4883 }
0x3419   :  { %v3627_v61 = vmul.f32 0.6931472, %v4884_v1 }
0x341b   :  { %v3628_v41 = vadd.f32 %v3627_v61, %v3615_v48 }
0x341d   :  { %v3629_v10 = vsub.f32 -1.3862944, %v3628_v41 }
0x341f   :  { %v3630_v43 = vmul.f32 0.1, %v3629_v10 }
0x3421   :  { %v3631_v19 = vadd.f32 %v3630_v43, %v6340_v7 }
0x3423   :  { %v3632_v40 = vsel %vm2567_vm15, %v3631_v19, -inf }
0x3424   :  { %3633 = vmax.xlane.f32.xlu0 %v3632_v40 }
0x34ad   :  { %v3634_v56 = vpop.xlane.xlu0 %3633 }
0x34ae   :  { %v3635_v16 = vsub.f32 %v3631_v19, %v3634_v56 }
0x34b0   :  { %v3636_v8 = vmul.f32 1.442695, %v3635_v16 }
0x34b2   :  { %4885 = vpow2.f32 %v3636_v8 }
0x34bf   :  { %v4886_v15 = vpop.eup %4885 }
0x34c0   :  { %v3638_v44 = vsel %vm2567_vm15, %v4886_v15, 0.0 }
0x34c1   :  { %3639 = vadd.xlane.f32.xlu1 %v3638_v44 }
0x354a   :  { %v3640_v32 = vpop.xlane.xlu1 %3639 }
0x354b   :  { %4887 = vlog2.f32 %v3640_v32 }
0x3558   :  { %v4888_v20 = vpop.eup %4887 }
0x3559   :  { %v3642_v25 = vmul.f32 0.6931472, %v4888_v20 }
0x355b   :  { %v3643_v45 = vadd.f32 %v3642_v25, %v3634_v56 }
0x355d   :  { %v3644_v50 = vsub.f32 -1.3862944, %v3643_v45 }
0x355f   :  { %v3645_v17 = vmul.f32 0.1, %v3644_v50 }
0x3561   :  { %v3646_v52 = vadd.f32 %v3645_v17, %v6340_v7 }
0x3563   :  { %v3647_v0 = vsel %vm2567_vm15, %v3646_v52, -inf }
0x3564   :  { %v3648_v37 = vrot.slane %v3647_v0, 4 }
0x3566   :  { %v3649_v18 = vmax.f32 %v3647_v0, %v3648_v37 }
0x3568   :  { %v3650_v30 = vrot.slane %v3649_v18, 2 }
0x356a   :  { %v3651_v6 = vmax.f32 %v3649_v18, %v3650_v30 }
0x356c   :  { %v3652_v47 = vrot.slane %v3651_v6, 1 }
0x356e   :  { %v3653_v9 = vmax.f32 %v3651_v6, %v3652_v47 }
0x3570   :  { %v3654_v55 = vsub.f32 %v3646_v52, %v3653_v9 }
0x3572   :  { %v3655_v5 = vmul.f32 1.442695, %v3654_v55 }
0x3574   :  { %4889 = vpow2.f32 %v3655_v5 }
0x3581   :  { %v4890_v35 = vpop.eup %4889 }
0x3582   :  { %v3657_v46 = vsel %vm2567_vm15, %v4890_v35, 0.0 }
0x3583   :  { %v3658_v62 = vrot.slane %v3657_v46, 4 }
0x3585   :  { %v3659_v54 = vadd.f32 %v3658_v62, %v3657_v46 }
0x3587   :  { %v3660_v27 = vrot.slane %v3659_v54, 2 }
0x3589   :  { %v3661_v34 = vadd.f32 %v3660_v27, %v3659_v54 }
0x358b   :  { %v3662_v24 = vrot.slane %v3661_v34, 1 }
0x358d   :  { %v3663_v4 = vadd.f32 %v3662_v24, %v3661_v34 }
0x358f   :  { %4891 = vlog2.f32 %v3663_v4 }
0x359c   :  { %v4892_v33 = vpop.eup %4891 }
0x359d   :  { %v3665_v26 = vmul.f32 0.6931472, %v4892_v33 }
0x359f   :  { %v3666_v28 = vadd.f32 %v3665_v26, %v3653_v9 }
0x35a1   :  { %v3667_v13 = vsub.f32 -1.3862944, %v3666_v28 }
0x35a3   :  { %v3668_v21 = vmul.f32 0.1, %v3667_v13 }
0x35a5   :  { %v3669_v23 = vadd.f32 %v3668_v21, %v6340_v7 }
0x35a7   :  { %v3670_v36 = vsel %vm2567_vm15, %v3669_v23, -inf }
0x35a8   :  { %3671 = vmax.xlane.f32.xlu0 %v3670_v36 }
0x3631   :  { %v3672_v42 = vpop.xlane.xlu0 %3671 }
0x3632   :  { %v3673_v58 = vsub.f32 %v3669_v23, %v3672_v42 }
0x3634   :  { %v3674_v59 = vmul.f32 1.442695, %v3673_v58 }
0x3636   :  { %4893 = vpow2.f32 %v3674_v59 }
0x3643   :  { %v4894_v51 = vpop.eup %4893 }
0x3644   :  { %v3676_v31 = vsel %vm2567_vm15, %v4894_v51, 0.0 }
0x3645   :  { %3677 = vadd.xlane.f32.xlu1 %v3676_v31 }
0x36ce   :  { %v3678_v3 = vpop.xlane.xlu1 %3677 }
0x36cf   :  { %4895 = vlog2.f32 %v3678_v3 }
0x36dc   :  { %v4896_v48 = vpop.eup %4895 }
0x36dd   :  { %v3680_v12 = vmul.f32 0.6931472, %v4896_v48 }
0x36df   :  { %v3681_v38 = vadd.f32 %v3680_v12, %v3672_v42 }
0x36e1   :  { %v3682_v39 = vsub.f32 -1.3862944, %v3681_v38 }
0x36e3   :  { %v3683_v2 = vmul.f32 0.1, %v3682_v39 }
0x36e5   :  { %v3684_v60 = vadd.f32 %v3683_v2, %v6340_v7 }
0x36e7   :  { %v3685_v14 = vsel %vm2567_vm15, %v3684_v60, -inf }
0x36e8   :  { %v3686_v22 = vrot.slane %v3685_v14, 4 }
0x36ea   :  { %v3687_v49 = vmax.f32 %v3685_v14, %v3686_v22 }
0x36ec   :  { %v3688_v53 = vrot.slane %v3687_v49, 2 }
0x36ee   :  { %v3689_v57 = vmax.f32 %v3687_v49, %v3688_v53 }
0x36f0   :  { %v3690_v1 = vrot.slane %v3689_v57, 1 }
0x36f2   :  { %v3691_v61 = vmax.f32 %v3689_v57, %v3690_v1 }
0x36f4   :  { %v3692_v41 = vsub.f32 %v3684_v60, %v3691_v61 }
0x36f6   :  { %v3693_v10 = vmul.f32 1.442695, %v3692_v41 }
0x36f8   :  { %4897 = vpow2.f32 %v3693_v10 }
0x3705   :  { %v4898_v43 = vpop.eup %4897 }
0x3706   :  { %v3695_v19 = vsel %vm2567_vm15, %v4898_v43, 0.0 }
0x3707   :  { %v3696_v40 = vrot.slane %v3695_v19, 4 }
0x3709   :  { %v3697_v56 = vadd.f32 %v3696_v40, %v3695_v19 }
0x370b   :  { %v3698_v16 = vrot.slane %v3697_v56, 2 }
0x370d   :  { %v3699_v8 = vadd.f32 %v3698_v16, %v3697_v56 }
0x370f   :  { %v3700_v15 = vrot.slane %v3699_v8, 1 }
0x3711   :  { %v3701_v44 = vadd.f32 %v3700_v15, %v3699_v8 }
0x3713   :  { %4899 = vlog2.f32 %v3701_v44 }
0x3720   :  { %v4900_v32 = vpop.eup %4899 }
0x3721   :  { %v3703_v20 = vmul.f32 0.6931472, %v4900_v32 }
0x3723   :  { %v3704_v25 = vadd.f32 %v3703_v20, %v3691_v61 }
0x3725   :  { %v3705_v45 = vsub.f32 -1.3862944, %v3704_v25 }
0x3727   :  { %v3706_v50 = vmul.f32 0.1, %v3705_v45 }
0x3729   :  { %v3707_v17 = vadd.f32 %v3706_v50, %v6340_v7 }
0x372b   :  { %v3708_v52 = vsel %vm2567_vm15, %v3707_v17, -inf }
0x372c   :  { %3709 = vmax.xlane.f32.xlu0 %v3708_v52 }
0x37b5   :  { %v3710_v0 = vpop.xlane.xlu0 %3709 }
0x37b6   :  { %v3711_v37 = vsub.f32 %v3707_v17, %v3710_v0 }
0x37b8   :  { %v3712_v18 = vmul.f32 1.442695, %v3711_v37 }
0x37ba   :  { %4901 = vpow2.f32 %v3712_v18 }
0x37c7   :  { %v4902_v30 = vpop.eup %4901 }
0x37c8   :  { %v3714_v6 = vsel %vm2567_vm15, %v4902_v30, 0.0 }
0x37c9   :  { %3715 = vadd.xlane.f32.xlu1 %v3714_v6 }
0x3852   :  { %v3716_v47 = vpop.xlane.xlu1 %3715 }
0x3853   :  { %4903 = vlog2.f32 %v3716_v47 }
0x3860   :  { %v4904_v9 = vpop.eup %4903 }
0x3861   :  { %v3718_v55 = vmul.f32 0.6931472, %v4904_v9 }
0x3863   :  { %v3719_v5 = vadd.f32 %v3718_v55, %v3710_v0 }
0x3865   :  { %v3720_v35 = vsub.f32 -1.3862944, %v3719_v5 }
0x3867   :  { %v3721_v46 = vmul.f32 0.1, %v3720_v35 }
0x3869   :  { %v3722_v62 = vadd.f32 %v3721_v46, %v6340_v7 }
0x386b   :  { %v3723_v54 = vsel %vm2567_vm15, %v3722_v62, -inf }
0x386c   :  { %v3724_v27 = vrot.slane %v3723_v54, 4 }
0x386e   :  { %v3725_v34 = vmax.f32 %v3723_v54, %v3724_v27 }
0x3870   :  { %v3726_v24 = vrot.slane %v3725_v34, 2 }
0x3872   :  { %v3727_v4 = vmax.f32 %v3725_v34, %v3726_v24 }
0x3874   :  { %v3728_v33 = vrot.slane %v3727_v4, 1 }
0x3876   :  { %v3729_v26 = vmax.f32 %v3727_v4, %v3728_v33 }
0x3878   :  { %v3730_v28 = vsub.f32 %v3722_v62, %v3729_v26 }
0x387a   :  { %v3731_v13 = vmul.f32 1.442695, %v3730_v28 }
0x387c   :  { %4905 = vpow2.f32 %v3731_v13 }
0x3889   :  { %v4906_v21 = vpop.eup %4905 }
0x388a   :  { %v3733_v23 = vsel %vm2567_vm15, %v4906_v21, 0.0 }
0x388b   :  { %v3734_v36 = vrot.slane %v3733_v23, 4 }
0x388d   :  { %v3735_v42 = vadd.f32 %v3734_v36, %v3733_v23 }
0x388f   :  { %v3736_v58 = vrot.slane %v3735_v42, 2 }
0x3891   :  { %v3737_v59 = vadd.f32 %v3736_v58, %v3735_v42 }
0x3893   :  { %v3738_v51 = vrot.slane %v3737_v59, 1 }
0x3895   :  { %v3739_v31 = vadd.f32 %v3738_v51, %v3737_v59 }
0x3897   :  { %4907 = vlog2.f32 %v3739_v31 }
0x38a4   :  { %v4908_v3 = vpop.eup %4907 }
0x38a5   :  { %v3741_v48 = vmul.f32 0.6931472, %v4908_v3 }
0x38a7   :  { %v3742_v12 = vadd.f32 %v3741_v48, %v3729_v26 }
0x38a9   :  { %v3743_v38 = vsub.f32 -1.3862944, %v3742_v12 }
0x38ab   :  { %v3744_v39 = vmul.f32 0.1, %v3743_v38 }
0x38ad   :  { %v3745_v2 = vadd.f32 %v3744_v39, %v6340_v7 }
0x38af   :  { %v3746_v60 = vsel %vm2567_vm15, %v3745_v2, -inf }
0x38b0   :  { %3747 = vmax.xlane.f32.xlu0 %v3746_v60 }
0x3939   :  { %v3748_v14 = vpop.xlane.xlu0 %3747 }
0x393a   :  { %v3749_v22 = vsub.f32 %v3745_v2, %v3748_v14 }
0x393c   :  { %v3750_v49 = vmul.f32 1.442695, %v3749_v22 }
0x393e   :  { %4909 = vpow2.f32 %v3750_v49 }
0x394b   :  { %v4910_v53 = vpop.eup %4909 }
0x394c   :  { %v3752_v57 = vsel %vm2567_vm15, %v4910_v53, 0.0 }
0x394d   :  { %3753 = vadd.xlane.f32.xlu1 %v3752_v57 }
0x39d6   :  { %v3754_v1 = vpop.xlane.xlu1 %3753 }
0x39d7   :  { %4911 = vlog2.f32 %v3754_v1 }
0x39e4   :  { %v4912_v61 = vpop.eup %4911 }
0x39e5   :  { %v3756_v41 = vmul.f32 0.6931472, %v4912_v61 }
0x39e7   :  { %v3757_v10 = vadd.f32 %v3756_v41, %v3748_v14 }
0x39e9   :  { %v3758_v43 = vsub.f32 -1.3862944, %v3757_v10 }
0x39eb   :  { %v3759_v19 = vmul.f32 0.1, %v3758_v43 }
0x39ed   :  { %v3760_v40 = vadd.f32 %v3759_v19, %v6340_v7 }
0x39ef   :  { %v3761_v56 = vsel %vm2567_vm15, %v3760_v40, -inf }
0x39f0   :  { %v3762_v16 = vrot.slane %v3761_v56, 4 }
0x39f2   :  { %v3763_v8 = vmax.f32 %v3761_v56, %v3762_v16 }
0x39f4   :  { %v3764_v15 = vrot.slane %v3763_v8, 2 }
0x39f6   :  { %v3765_v44 = vmax.f32 %v3763_v8, %v3764_v15 }
0x39f8   :  { %v3766_v32 = vrot.slane %v3765_v44, 1 }
0x39fa   :  { %v3767_v20 = vmax.f32 %v3765_v44, %v3766_v32 }
0x39fc   :  { %v3768_v25 = vsub.f32 %v3760_v40, %v3767_v20 }
0x39fe   :  { %v3769_v45 = vmul.f32 1.442695, %v3768_v25 }
0x3a00   :  { %4913 = vpow2.f32 %v3769_v45 }
0x3a0d   :  { %v4914_v50 = vpop.eup %4913 }
0x3a0e   :  { %v3771_v17 = vsel %vm2567_vm15, %v4914_v50, 0.0 }
0x3a0f   :  { %v3772_v52 = vrot.slane %v3771_v17, 4 }
0x3a11   :  { %v3773_v0 = vadd.f32 %v3772_v52, %v3771_v17 }
0x3a13   :  { %v3774_v37 = vrot.slane %v3773_v0, 2 }
0x3a15   :  { %v3775_v18 = vadd.f32 %v3774_v37, %v3773_v0 }
0x3a17   :  { %v3776_v30 = vrot.slane %v3775_v18, 1 }
0x3a19   :  { %v3777_v6 = vadd.f32 %v3776_v30, %v3775_v18 }
0x3a1b   :  { %4915 = vlog2.f32 %v3777_v6 }
0x3a28   :  { %v4916_v47 = vpop.eup %4915 }
0x3a29   :  { %v3779_v9 = vmul.f32 0.6931472, %v4916_v47 }
0x3a2b   :  { %v3780_v55 = vadd.f32 %v3779_v9, %v3767_v20 }
0x3a2d   :  { %v3781_v5 = vsub.f32 -1.3862944, %v3780_v55 }
0x3a2f   :  { %v3782_v35 = vmul.f32 0.1, %v3781_v5 }
0x3a31   :  { %v3783_v46 = vadd.f32 %v3782_v35, %v6340_v7 }
0x3a33   :  { %v3784_v62 = vsel %vm2567_vm15, %v3783_v46, -inf }
0x3a34   :  { %3785 = vmax.xlane.f32.xlu0 %v3784_v62 }
0x3abd   :  { %v3786_v54 = vpop.xlane.xlu0 %3785 }
0x3abe   :  { %v3787_v27 = vsub.f32 %v3783_v46, %v3786_v54 }
0x3ac0   :  { %v3788_v34 = vmul.f32 1.442695, %v3787_v27 }
0x3ac2   :  { %4917 = vpow2.f32 %v3788_v34 }
0x3acf   :  { %v4918_v24 = vpop.eup %4917 }
0x3ad0   :  { %v3790_v4 = vsel %vm2567_vm15, %v4918_v24, 0.0 }
0x3ad1   :  { %3791 = vadd.xlane.f32.xlu1 %v3790_v4 }
0x3b5a   :  { %v3792_v33 = vpop.xlane.xlu1 %3791 }
0x3b5b   :  { %4919 = vlog2.f32 %v3792_v33 }
0x3b68   :  { %v4920_v26 = vpop.eup %4919 }
0x3b69   :  { %v3794_v28 = vmul.f32 0.6931472, %v4920_v26 }
0x3b6b   :  { %v3795_v13 = vadd.f32 %v3794_v28, %v3786_v54 }
0x3b6d   :  { %v3796_v21 = vsub.f32 -1.3862944, %v3795_v13 }
0x3b6f   :  { %v3797_v23 = vmul.f32 0.1, %v3796_v21 }
0x3b71   :  { %v3798_v36 = vadd.f32 %v3797_v23, %v6340_v7 }
0x3b73   :  { %v3799_v42 = vsel %vm2567_vm15, %v3798_v36, -inf }
0x3b74   :  { %v3800_v58 = vrot.slane %v3799_v42, 4 }
0x3b76   :  { %v3801_v59 = vmax.f32 %v3799_v42, %v3800_v58 }
0x3b78   :  { %v3802_v51 = vrot.slane %v3801_v59, 2 }
0x3b7a   :  { %v3803_v31 = vmax.f32 %v3801_v59, %v3802_v51 }
0x3b7c   :  { %v3804_v3 = vrot.slane %v3803_v31, 1 }
0x3b7e   :  { %v3805_v48 = vmax.f32 %v3803_v31, %v3804_v3 }
0x3b80   :  { %v3806_v12 = vsub.f32 %v3798_v36, %v3805_v48 }
0x3b82   :  { %v3807_v38 = vmul.f32 1.442695, %v3806_v12 }
0x3b84   :  { %4921 = vpow2.f32 %v3807_v38 }
0x3b91   :  { %v4922_v39 = vpop.eup %4921 }
0x3b92   :  { %v3809_v2 = vsel %vm2567_vm15, %v4922_v39, 0.0 }
0x3b93   :  { %v3810_v60 = vrot.slane %v3809_v2, 4 }
0x3b95   :  { %v3811_v14 = vadd.f32 %v3810_v60, %v3809_v2 }
0x3b97   :  { %v3812_v22 = vrot.slane %v3811_v14, 2 }
0x3b99   :  { %v3813_v49 = vadd.f32 %v3812_v22, %v3811_v14 }
0x3b9b   :  { %v3814_v53 = vrot.slane %v3813_v49, 1 }
0x3b9d   :  { %v3815_v57 = vadd.f32 %v3814_v53, %v3813_v49 }
0x3b9f   :  { %4923 = vlog2.f32 %v3815_v57 }
0x3bac   :  { %v4924_v1 = vpop.eup %4923 }
0x3bad   :  { %v3817_v61 = vmul.f32 0.6931472, %v4924_v1 }
0x3baf   :  { %v3818_v41 = vadd.f32 %v3817_v61, %v3805_v48 }
0x3bb1   :  { %v3819_v10 = vsub.f32 -1.3862944, %v3818_v41 }
0x3bb3   :  { %v3820_v43 = vmul.f32 0.1, %v3819_v10 }
0x3bb5   :  { %v3821_v19 = vadd.f32 %v3820_v43, %v6340_v7 }
0x3bb7   :  { %v3822_v40 = vsel %vm2567_vm15, %v3821_v19, -inf }
0x3bb8   :  { %3823 = vmax.xlane.f32.xlu0 %v3822_v40 }
0x3c41   :  { %v3824_v56 = vpop.xlane.xlu0 %3823 }
0x3c42   :  { %v3825_v16 = vsub.f32 %v3821_v19, %v3824_v56 }
0x3c44   :  { %v3826_v8 = vmul.f32 1.442695, %v3825_v16 }
0x3c46   :  { %4925 = vpow2.f32 %v3826_v8 }
0x3c53   :  { %v4926_v15 = vpop.eup %4925 }
0x3c54   :  { %v3828_v44 = vsel %vm2567_vm15, %v4926_v15, 0.0 }
0x3c55   :  { %3829 = vadd.xlane.f32.xlu1 %v3828_v44 }
0x3cde   :  { %v3830_v32 = vpop.xlane.xlu1 %3829 }
0x3cdf   :  { %4927 = vlog2.f32 %v3830_v32 }
0x3cec   :  { %v4928_v20 = vpop.eup %4927 }
0x3ced   :  { %v3832_v25 = vmul.f32 0.6931472, %v4928_v20 }
0x3cef   :  { %v3833_v45 = vadd.f32 %v3832_v25, %v3824_v56 }
0x3cf1   :  { %v3834_v50 = vsub.f32 -1.3862944, %v3833_v45 }
0x3cf3   :  { %v3835_v17 = vmul.f32 0.1, %v3834_v50 }
0x3cf5   :  { %v3836_v52 = vadd.f32 %v3835_v17, %v6340_v7 }
0x3cf7   :  { %v3837_v0 = vsel %vm2567_vm15, %v3836_v52, -inf }
0x3cf8   :  { %v3838_v37 = vrot.slane %v3837_v0, 4 }
0x3cfa   :  { %v3839_v18 = vmax.f32 %v3837_v0, %v3838_v37 }
0x3cfc   :  { %v3840_v30 = vrot.slane %v3839_v18, 2 }
0x3cfe   :  { %v3841_v6 = vmax.f32 %v3839_v18, %v3840_v30 }
0x3d00   :  { %v3842_v47 = vrot.slane %v3841_v6, 1 }
0x3d02   :  { %v3843_v9 = vmax.f32 %v3841_v6, %v3842_v47 }
0x3d04   :  { %v3844_v55 = vsub.f32 %v3836_v52, %v3843_v9 }
0x3d06   :  { %v3845_v5 = vmul.f32 1.442695, %v3844_v55 }
0x3d08   :  { %4929 = vpow2.f32 %v3845_v5 }
0x3d15   :  { %v4930_v35 = vpop.eup %4929 }
0x3d16   :  { %v3847_v46 = vsel %vm2567_vm15, %v4930_v35, 0.0 }
0x3d17   :  { %v3848_v62 = vrot.slane %v3847_v46, 4 }
0x3d19   :  { %v3849_v54 = vadd.f32 %v3848_v62, %v3847_v46 }
0x3d1b   :  { %v3850_v27 = vrot.slane %v3849_v54, 2 }
0x3d1d   :  { %v3851_v34 = vadd.f32 %v3850_v27, %v3849_v54 }
0x3d1f   :  { %v3852_v24 = vrot.slane %v3851_v34, 1 }
0x3d21   :  { %v3853_v4 = vadd.f32 %v3852_v24, %v3851_v34 }
0x3d23   :  { %4931 = vlog2.f32 %v3853_v4 }
0x3d30   :  { %v4932_v33 = vpop.eup %4931 }
0x3d31   :  { %v3855_v26 = vmul.f32 0.6931472, %v4932_v33 }
0x3d33   :  { %v3856_v28 = vadd.f32 %v3855_v26, %v3843_v9 }
0x3d35   :  { %v3857_v13 = vsub.f32 -1.3862944, %v3856_v28 }
0x3d37   :  { %v3858_v21 = vmul.f32 0.1, %v3857_v13 }
0x3d39   :  { %v3859_v23 = vadd.f32 %v3858_v21, %v6340_v7 }
0x3d3b   :  { %v3860_v36 = vsel %vm2567_vm15, %v3859_v23, -inf }
0x3d3c   :  { %3861 = vmax.xlane.f32.xlu0 %v3860_v36 }
0x3dc5   :  { %v3862_v42 = vpop.xlane.xlu0 %3861 }
0x3dc6   :  { %v3863_v58 = vsub.f32 %v3859_v23, %v3862_v42 }
0x3dc8   :  { %v3864_v59 = vmul.f32 1.442695, %v3863_v58 }
0x3dca   :  { %4933 = vpow2.f32 %v3864_v59 }
0x3dd7   :  { %v4934_v51 = vpop.eup %4933 }
0x3dd8   :  { %v3866_v31 = vsel %vm2567_vm15, %v4934_v51, 0.0 }
0x3dd9   :  { %3867 = vadd.xlane.f32.xlu1 %v3866_v31 }
0x3e62   :  { %v3868_v3 = vpop.xlane.xlu1 %3867 }
0x3e63   :  { %4935 = vlog2.f32 %v3868_v3 }
0x3e70   :  { %v4936_v48 = vpop.eup %4935 }
0x3e71   :  { %v3870_v12 = vmul.f32 0.6931472, %v4936_v48 }
0x3e73   :  { %v3871_v38 = vadd.f32 %v3870_v12, %v3862_v42 }
0x3e75   :  { %v3872_v39 = vsub.f32 -1.3862944, %v3871_v38 }
0x3e77   :  { %v3873_v2 = vmul.f32 0.1, %v3872_v39 }
0x3e79   :  { %v3874_v60 = vadd.f32 %v3873_v2, %v6340_v7 }
0x3e7b   :  { %v3875_v14 = vsel %vm2567_vm15, %v3874_v60, -inf }
0x3e7c   :  { %v3876_v22 = vrot.slane %v3875_v14, 4 }
0x3e7e   :  { %v3877_v49 = vmax.f32 %v3875_v14, %v3876_v22 }
0x3e80   :  { %v3878_v53 = vrot.slane %v3877_v49, 2 }
0x3e82   :  { %v3879_v57 = vmax.f32 %v3877_v49, %v3878_v53 }
0x3e84   :  { %v3880_v1 = vrot.slane %v3879_v57, 1 }
0x3e86   :  { %v3881_v61 = vmax.f32 %v3879_v57, %v3880_v1 }
0x3e88   :  { %v3882_v41 = vsub.f32 %v3874_v60, %v3881_v61 }
0x3e8a   :  { %v3883_v10 = vmul.f32 1.442695, %v3882_v41 }
0x3e8c   :  { %4937 = vpow2.f32 %v3883_v10 }
0x3e99   :  { %v4938_v43 = vpop.eup %4937 }
0x3e9a   :  { %v3885_v19 = vsel %vm2567_vm15, %v4938_v43, 0.0 }
0x3e9b   :  { %v3886_v40 = vrot.slane %v3885_v19, 4 }
0x3e9d   :  { %v3887_v56 = vadd.f32 %v3886_v40, %v3885_v19 }
0x3e9f   :  { %v3888_v16 = vrot.slane %v3887_v56, 2 }
0x3ea1   :  { %v3889_v8 = vadd.f32 %v3888_v16, %v3887_v56 }
0x3ea3   :  { %v3890_v15 = vrot.slane %v3889_v8, 1 }
0x3ea5   :  { %v3891_v44 = vadd.f32 %v3890_v15, %v3889_v8 }
0x3ea7   :  { %4939 = vlog2.f32 %v3891_v44 }
0x3eb4   :  { %v4940_v32 = vpop.eup %4939 }
0x3eb5   :  { %v3893_v20 = vmul.f32 0.6931472, %v4940_v32 }
0x3eb7   :  { %v3894_v25 = vadd.f32 %v3893_v20, %v3881_v61 }
0x3eb9   :  { %v3895_v45 = vsub.f32 -1.3862944, %v3894_v25 }
0x3ebb   :  { %v3896_v50 = vmul.f32 0.1, %v3895_v45 }
0x3ebd   :  { %v3897_v17 = vadd.f32 %v3896_v50, %v6340_v7 }
0x3ebf   :  { %v3898_v52 = vsel %vm2567_vm15, %v3897_v17, -inf }
0x3ec0   :  { %3899 = vmax.xlane.f32.xlu0 %v3898_v52 }
0x3f49   :  { %v3900_v0 = vpop.xlane.xlu0 %3899 }
0x3f4a   :  { %v3901_v37 = vsub.f32 %v3897_v17, %v3900_v0 }
0x3f4c   :  { %v3902_v18 = vmul.f32 1.442695, %v3901_v37 }
0x3f4e   :  { %4941 = vpow2.f32 %v3902_v18 }
0x3f5b   :  { %v4942_v30 = vpop.eup %4941 }
0x3f5c   :  { %v3904_v6 = vsel %vm2567_vm15, %v4942_v30, 0.0 }
0x3f5d   :  { %3905 = vadd.xlane.f32.xlu1 %v3904_v6 }
0x3fe6   :  { %v3906_v47 = vpop.xlane.xlu1 %3905 }
0x3fe7   :  { %4943 = vlog2.f32 %v3906_v47 }
0x3ff4   :  { %v4944_v9 = vpop.eup %4943 }
0x3ff5   :  { %v3908_v55 = vmul.f32 0.6931472, %v4944_v9 }
0x3ff7   :  { %v3909_v5 = vadd.f32 %v3908_v55, %v3900_v0 }
0x3ff9   :  { %v3910_v35 = vsub.f32 -1.3862944, %v3909_v5 }
0x3ffb   :  { %v3911_v46 = vmul.f32 0.1, %v3910_v35 }
0x3ffd   :  { %v3912_v62 = vadd.f32 %v3911_v46, %v6340_v7 }
0x3fff   :  { %v3913_v54 = vsel %vm2567_vm15, %v3912_v62, -inf }
0x4000   :  { %v3914_v27 = vrot.slane %v3913_v54, 4 }
0x4002   :  { %v3915_v34 = vmax.f32 %v3913_v54, %v3914_v27 }
0x4004   :  { %v3916_v24 = vrot.slane %v3915_v34, 2 }
0x4006   :  { %v3917_v4 = vmax.f32 %v3915_v34, %v3916_v24 }
0x4008   :  { %v3918_v33 = vrot.slane %v3917_v4, 1 }
0x400a   :  { %v3919_v26 = vmax.f32 %v3917_v4, %v3918_v33 }
0x400c   :  { %v3920_v28 = vsub.f32 %v3912_v62, %v3919_v26 }
0x400e   :  { %v3921_v13 = vmul.f32 1.442695, %v3920_v28 }
0x4010   :  { %4945 = vpow2.f32 %v3921_v13 }
0x401d   :  { %v4946_v21 = vpop.eup %4945 }
0x401e   :  { %v3923_v23 = vsel %vm2567_vm15, %v4946_v21, 0.0 }
0x401f   :  { %v3924_v36 = vrot.slane %v3923_v23, 4 }
0x4021   :  { %v3925_v42 = vadd.f32 %v3924_v36, %v3923_v23 }
0x4023   :  { %v3926_v58 = vrot.slane %v3925_v42, 2 }
0x4025   :  { %v3927_v59 = vadd.f32 %v3926_v58, %v3925_v42 }
0x4027   :  { %v3928_v51 = vrot.slane %v3927_v59, 1 }
0x4029   :  { %v3929_v31 = vadd.f32 %v3928_v51, %v3927_v59 }
0x402b   :  { %4947 = vlog2.f32 %v3929_v31 }
0x4038   :  { %v4948_v3 = vpop.eup %4947 }
0x4039   :  { %v3931_v48 = vmul.f32 0.6931472, %v4948_v3 }
0x403b   :  { %v3932_v12 = vadd.f32 %v3931_v48, %v3919_v26 }
0x403d   :  { %v3933_v38 = vsub.f32 -1.3862944, %v3932_v12 }
0x403f   :  { %v3934_v39 = vmul.f32 0.1, %v3933_v38 }
0x4041   :  { %v3935_v2 = vadd.f32 %v3934_v39, %v6340_v7 }
0x4043   :  { %v3936_v60 = vsel %vm2567_vm15, %v3935_v2, -inf }
0x4044   :  { %3937 = vmax.xlane.f32.xlu0 %v3936_v60 }
0x40cd   :  { %v3938_v14 = vpop.xlane.xlu0 %3937 }
0x40ce   :  { %v3939_v22 = vsub.f32 %v3935_v2, %v3938_v14 }
0x40d0   :  { %v3940_v49 = vmul.f32 1.442695, %v3939_v22 }
0x40d2   :  { %4949 = vpow2.f32 %v3940_v49 }
0x40df   :  { %v4950_v53 = vpop.eup %4949 }
0x40e0   :  { %v3942_v57 = vsel %vm2567_vm15, %v4950_v53, 0.0 }
0x40e1   :  { %3943 = vadd.xlane.f32.xlu1 %v3942_v57 }
0x416a   :  { %v3944_v1 = vpop.xlane.xlu1 %3943 }
0x416b   :  { %4951 = vlog2.f32 %v3944_v1 }
0x4178   :  { %v4952_v61 = vpop.eup %4951 }
0x4179   :  { %v3946_v41 = vmul.f32 0.6931472, %v4952_v61 }
0x417b   :  { %v3947_v10 = vadd.f32 %v3946_v41, %v3938_v14 }
0x417d   :  { %v3948_v43 = vsub.f32 -1.3862944, %v3947_v10 }
0x417f   :  { %v3949_v19 = vmul.f32 0.1, %v3948_v43 }
0x4181   :  { %v3950_v40 = vadd.f32 %v3949_v19, %v6340_v7 }
0x4183   :  { %v3951_v56 = vsel %vm2567_vm15, %v3950_v40, -inf }
0x4184   :  { %v3952_v16 = vrot.slane %v3951_v56, 4 }
0x4186   :  { %v3953_v8 = vmax.f32 %v3951_v56, %v3952_v16 }
0x4188   :  { %v3954_v15 = vrot.slane %v3953_v8, 2 }
0x418a   :  { %v3955_v44 = vmax.f32 %v3953_v8, %v3954_v15 }
0x418c   :  { %v3956_v32 = vrot.slane %v3955_v44, 1 }
0x418e   :  { %v3957_v20 = vmax.f32 %v3955_v44, %v3956_v32 }
0x4190   :  { %v3958_v25 = vsub.f32 %v3950_v40, %v3957_v20 }
0x4192   :  { %v3959_v45 = vmul.f32 1.442695, %v3958_v25 }
0x4194   :  { %4953 = vpow2.f32 %v3959_v45 }
0x41a1   :  { %v4954_v50 = vpop.eup %4953 }
0x41a2   :  { %v3961_v17 = vsel %vm2567_vm15, %v4954_v50, 0.0 }
0x41a3   :  { %v3962_v52 = vrot.slane %v3961_v17, 4 }
0x41a5   :  { %v3963_v0 = vadd.f32 %v3962_v52, %v3961_v17 }
0x41a7   :  { %v3964_v37 = vrot.slane %v3963_v0, 2 }
0x41a9   :  { %v3965_v18 = vadd.f32 %v3964_v37, %v3963_v0 }
0x41ab   :  { %v3966_v30 = vrot.slane %v3965_v18, 1 }
0x41ad   :  { %v3967_v6 = vadd.f32 %v3966_v30, %v3965_v18 }
0x41af   :  { %4955 = vlog2.f32 %v3967_v6 }
0x41bc   :  { %v4956_v47 = vpop.eup %4955 }
0x41bd   :  { %v3969_v9 = vmul.f32 0.6931472, %v4956_v47 }
0x41bf   :  { %v3970_v55 = vadd.f32 %v3969_v9, %v3957_v20 }
0x41c1   :  { %v3971_v5 = vsub.f32 -1.3862944, %v3970_v55 }
0x41c3   :  { %v3972_v35 = vmul.f32 0.1, %v3971_v5 }
0x41c5   :  { %v3973_v46 = vadd.f32 %v3972_v35, %v6340_v7 }
0x41c7   :  { %v3974_v62 = vsel %vm2567_vm15, %v3973_v46, -inf }
0x41c8   :  { %3975 = vmax.xlane.f32.xlu0 %v3974_v62 }
0x4251   :  { %v3976_v54 = vpop.xlane.xlu0 %3975 }
0x4252   :  { %v3977_v27 = vsub.f32 %v3973_v46, %v3976_v54 }
0x4254   :  { %v3978_v34 = vmul.f32 1.442695, %v3977_v27 }
0x4256   :  { %4957 = vpow2.f32 %v3978_v34 }
0x4263   :  { %v4958_v24 = vpop.eup %4957 }
0x4264   :  { %v3980_v4 = vsel %vm2567_vm15, %v4958_v24, 0.0 }
0x4265   :  { %3981 = vadd.xlane.f32.xlu1 %v3980_v4 }
0x42ee   :  { %v3982_v33 = vpop.xlane.xlu1 %3981 }
0x42ef   :  { %4959 = vlog2.f32 %v3982_v33 }
0x42fc   :  { %v4960_v26 = vpop.eup %4959 }
0x42fd   :  { %v3984_v28 = vmul.f32 0.6931472, %v4960_v26 }
0x42ff   :  { %v3985_v13 = vadd.f32 %v3984_v28, %v3976_v54 }
0x4301   :  { %v3986_v21 = vsub.f32 -1.3862944, %v3985_v13 }
0x4303   :  { %v3987_v23 = vmul.f32 0.1, %v3986_v21 }
0x4305   :  { %v3988_v36 = vadd.f32 %v3987_v23, %v6340_v7 }
0x4307   :  { %v3989_v42 = vsel %vm2567_vm15, %v3988_v36, -inf }
0x4308   :  { %v3990_v58 = vrot.slane %v3989_v42, 4 }
0x430a   :  { %v3991_v59 = vmax.f32 %v3989_v42, %v3990_v58 }
0x430c   :  { %v3992_v51 = vrot.slane %v3991_v59, 2 }
0x430e   :  { %v3993_v31 = vmax.f32 %v3991_v59, %v3992_v51 }
0x4310   :  { %v3994_v3 = vrot.slane %v3993_v31, 1 }
0x4312   :  { %v3995_v48 = vmax.f32 %v3993_v31, %v3994_v3 }
0x4314   :  { %v3996_v12 = vsub.f32 %v3988_v36, %v3995_v48 }
0x4316   :  { %v3997_v38 = vmul.f32 1.442695, %v3996_v12 }
0x4318   :  { %4961 = vpow2.f32 %v3997_v38 }
0x4325   :  { %v4962_v39 = vpop.eup %4961 }
0x4326   :  { %v3999_v2 = vsel %vm2567_vm15, %v4962_v39, 0.0 }
0x4327   :  { %v4000_v60 = vrot.slane %v3999_v2, 4 }
0x4329   :  { %v4001_v14 = vadd.f32 %v4000_v60, %v3999_v2 }
0x432b   :  { %v4002_v22 = vrot.slane %v4001_v14, 2 }
0x432d   :  { %v4003_v49 = vadd.f32 %v4002_v22, %v4001_v14 }
0x432f   :  { %v4004_v53 = vrot.slane %v4003_v49, 1 }
0x4331   :  { %v4005_v57 = vadd.f32 %v4004_v53, %v4003_v49 }
0x4333   :  { %4963 = vlog2.f32 %v4005_v57 }
0x4340   :  { %v4964_v1 = vpop.eup %4963 }
0x4341   :  { %v4007_v61 = vmul.f32 0.6931472, %v4964_v1 }
0x4343   :  { %v4008_v41 = vadd.f32 %v4007_v61, %v3995_v48 }
0x4345   :  { %v4009_v10 = vsub.f32 -1.3862944, %v4008_v41 }
0x4347   :  { %v4010_v43 = vmul.f32 0.1, %v4009_v10 }
0x4349   :  { %v4011_v19 = vadd.f32 %v4010_v43, %v6340_v7 }
0x434b   :  { %v4012_v40 = vsel %vm2567_vm15, %v4011_v19, -inf }
0x434c   :  { %4013 = vmax.xlane.f32.xlu0 %v4012_v40 }
0x43d5   :  { %v4014_v56 = vpop.xlane.xlu0 %4013 }
0x43d6   :  { %v4015_v16 = vsub.f32 %v4011_v19, %v4014_v56 }
0x43d8   :  { %v4016_v8 = vmul.f32 1.442695, %v4015_v16 }
0x43da   :  { %4965 = vpow2.f32 %v4016_v8 }
0x43e7   :  { %v4966_v15 = vpop.eup %4965 }
0x43e8   :  { %v4018_v44 = vsel %vm2567_vm15, %v4966_v15, 0.0 }
0x43e9   :  { %4019 = vadd.xlane.f32.xlu1 %v4018_v44 }
0x4472   :  { %v4020_v32 = vpop.xlane.xlu1 %4019 }
0x4473   :  { %4967 = vlog2.f32 %v4020_v32 }
0x4480   :  { %v4968_v20 = vpop.eup %4967 }
0x4481   :  { %v4022_v25 = vmul.f32 0.6931472, %v4968_v20 }
0x4483   :  { %v4023_v45 = vadd.f32 %v4022_v25, %v4014_v56 }
0x4485   :  { %v4024_v50 = vsub.f32 -1.3862944, %v4023_v45 }
0x4487   :  { %v4025_v17 = vmul.f32 0.1, %v4024_v50 }
0x4489   :  { %v4026_v52 = vadd.f32 %v4025_v17, %v6340_v7 }
0x448b   :  { %v4027_v0 = vsel %vm2567_vm15, %v4026_v52, -inf }
0x448c   :  { %v4028_v37 = vrot.slane %v4027_v0, 4 }
0x448e   :  { %v4029_v18 = vmax.f32 %v4027_v0, %v4028_v37 }
0x4490   :  { %v4030_v30 = vrot.slane %v4029_v18, 2 }
0x4492   :  { %v4031_v6 = vmax.f32 %v4029_v18, %v4030_v30 }
0x4494   :  { %v4032_v47 = vrot.slane %v4031_v6, 1 }
0x4496   :  { %v4033_v9 = vmax.f32 %v4031_v6, %v4032_v47 }
0x4498   :  { %v4034_v55 = vsub.f32 %v4026_v52, %v4033_v9 }
0x449a   :  { %v4035_v5 = vmul.f32 1.442695, %v4034_v55 }
0x449c   :  { %4969 = vpow2.f32 %v4035_v5 }
0x44a9   :  { %v4970_v35 = vpop.eup %4969 }
0x44aa   :  { %v4037_v46 = vsel %vm2567_vm15, %v4970_v35, 0.0 }
0x44ab   :  { %v4038_v62 = vrot.slane %v4037_v46, 4 }
0x44ad   :  { %v4039_v54 = vadd.f32 %v4038_v62, %v4037_v46 }
0x44af   :  { %v4040_v27 = vrot.slane %v4039_v54, 2 }
0x44b1   :  { %v4041_v34 = vadd.f32 %v4040_v27, %v4039_v54 }
0x44b3   :  { %v4042_v24 = vrot.slane %v4041_v34, 1 }
0x44b5   :  { %v4043_v4 = vadd.f32 %v4042_v24, %v4041_v34 }
0x44b7   :  { %4971 = vlog2.f32 %v4043_v4 }
0x44c4   :  { %v4972_v33 = vpop.eup %4971 }
0x44c5   :  { %v4045_v26 = vmul.f32 0.6931472, %v4972_v33 }
0x44c7   :  { %v4046_v28 = vadd.f32 %v4045_v26, %v4033_v9 }
0x44c9   :  { %v4047_v13 = vsub.f32 -1.3862944, %v4046_v28 }
0x44cb   :  { %v4048_v21 = vmul.f32 0.1, %v4047_v13 }
0x44cd   :  { %v4049_v23 = vadd.f32 %v4048_v21, %v6340_v7 }
0x44cf   :  { %v4050_v36 = vsel %vm2567_vm15, %v4049_v23, -inf }
0x44d0   :  { %4051 = vmax.xlane.f32.xlu0 %v4050_v36 }
0x4559   :  { %v4052_v42 = vpop.xlane.xlu0 %4051 }
0x455a   :  { %v4053_v58 = vsub.f32 %v4049_v23, %v4052_v42 }
0x455c   :  { %v4054_v59 = vmul.f32 1.442695, %v4053_v58 }
0x455e   :  { %4973 = vpow2.f32 %v4054_v59 }
0x456b   :  { %v4974_v51 = vpop.eup %4973 }
0x456c   :  { %v4056_v31 = vsel %vm2567_vm15, %v4974_v51, 0.0 }
0x456d   :  { %4057 = vadd.xlane.f32.xlu1 %v4056_v31 }
0x45f6   :  { %v4058_v3 = vpop.xlane.xlu1 %4057 }
0x45f7   :  { %4975 = vlog2.f32 %v4058_v3 }
0x4604   :  { %v4976_v48 = vpop.eup %4975 }
0x4605   :  { %v4060_v12 = vmul.f32 0.6931472, %v4976_v48 }
0x4607   :  { %v4061_v38 = vadd.f32 %v4060_v12, %v4052_v42 }
0x4609   :  { %v4062_v39 = vsub.f32 -1.3862944, %v4061_v38 }
0x460b   :  { %v4063_v2 = vmul.f32 0.1, %v4062_v39 }
0x460d   :  { %v4064_v60 = vadd.f32 %v4063_v2, %v6340_v7 }
0x460f   :  { %v4065_v14 = vsel %vm2567_vm15, %v4064_v60, -inf }
0x4610   :  { %v4066_v22 = vrot.slane %v4065_v14, 4 }
0x4612   :  { %v4067_v49 = vmax.f32 %v4065_v14, %v4066_v22 }
0x4614   :  { %v4068_v53 = vrot.slane %v4067_v49, 2 }
0x4616   :  { %v4069_v57 = vmax.f32 %v4067_v49, %v4068_v53 }
0x4618   :  { %v4070_v1 = vrot.slane %v4069_v57, 1 }
0x461a   :  { %v4071_v61 = vmax.f32 %v4069_v57, %v4070_v1 }
0x461c   :  { %v4072_v41 = vsub.f32 %v4064_v60, %v4071_v61 }
0x461e   :  { %v4073_v10 = vmul.f32 1.442695, %v4072_v41 }
0x4620   :  { %4977 = vpow2.f32 %v4073_v10 }
0x462d   :  { %v4978_v43 = vpop.eup %4977 }
0x462e   :  { %v4075_v19 = vsel %vm2567_vm15, %v4978_v43, 0.0 }
0x462f   :  { %v4076_v40 = vrot.slane %v4075_v19, 4 }
0x4631   :  { %v4077_v56 = vadd.f32 %v4076_v40, %v4075_v19 }
0x4633   :  { %v4078_v16 = vrot.slane %v4077_v56, 2 }
0x4635   :  { %v4079_v8 = vadd.f32 %v4078_v16, %v4077_v56 }
0x4637   :  { %v4080_v15 = vrot.slane %v4079_v8, 1 }
0x4639   :  { %v4081_v44 = vadd.f32 %v4080_v15, %v4079_v8 }
0x463b   :  { %4979 = vlog2.f32 %v4081_v44 }
0x4648   :  { %v4980_v32 = vpop.eup %4979 }
0x4649   :  { %v4083_v20 = vmul.f32 0.6931472, %v4980_v32 }
0x464b   :  { %v4084_v25 = vadd.f32 %v4083_v20, %v4071_v61 }
0x464d   :  { %v4085_v45 = vsub.f32 -1.3862944, %v4084_v25 }
0x464f   :  { %v4086_v50 = vmul.f32 0.1, %v4085_v45 }
0x4651   :  { %v4087_v17 = vadd.f32 %v4086_v50, %v6340_v7 }
0x4653   :  { %v4088_v52 = vsel %vm2567_vm15, %v4087_v17, -inf }
0x4654   :  { %4089 = vmax.xlane.f32.xlu0 %v4088_v52 }
0x46dd   :  { %v4090_v0 = vpop.xlane.xlu0 %4089 }
0x46de   :  { %v4091_v37 = vsub.f32 %v4087_v17, %v4090_v0 }
0x46e0   :  { %v4092_v18 = vmul.f32 1.442695, %v4091_v37 }
0x46e2   :  { %4981 = vpow2.f32 %v4092_v18 }
0x46ef   :  { %v4982_v30 = vpop.eup %4981 }
0x46f0   :  { %v4094_v6 = vsel %vm2567_vm15, %v4982_v30, 0.0 }
0x46f1   :  { %4095 = vadd.xlane.f32.xlu1 %v4094_v6 }
0x477a   :  { %v4096_v47 = vpop.xlane.xlu1 %4095 }
0x477b   :  { %4983 = vlog2.f32 %v4096_v47 }
0x4788   :  { %v4984_v9 = vpop.eup %4983 }
0x4789   :  { %v4098_v55 = vmul.f32 0.6931472, %v4984_v9 }
0x478b   :  { %v4099_v5 = vadd.f32 %v4098_v55, %v4090_v0 }
0x478d   :  { %v4100_v35 = vsub.f32 -1.3862944, %v4099_v5 }
0x478f   :  { %v4101_v46 = vmul.f32 0.1, %v4100_v35 }
0x4791   :  { %v4102_v62 = vadd.f32 %v4101_v46, %v6340_v7 }
0x4793   :  { %v4103_v54 = vsel %vm2567_vm15, %v4102_v62, -inf }
0x4794   :  { %v4104_v27 = vrot.slane %v4103_v54, 4 }
0x4796   :  { %v4105_v34 = vmax.f32 %v4103_v54, %v4104_v27 }
0x4798   :  { %v4106_v24 = vrot.slane %v4105_v34, 2 }
0x479a   :  { %v4107_v4 = vmax.f32 %v4105_v34, %v4106_v24 }
0x479c   :  { %v4108_v33 = vrot.slane %v4107_v4, 1 }
0x479e   :  { %v4109_v26 = vmax.f32 %v4107_v4, %v4108_v33 }
0x47a0   :  { %v4110_v28 = vsub.f32 %v4102_v62, %v4109_v26 }
0x47a2   :  { %v4111_v13 = vmul.f32 1.442695, %v4110_v28 }
0x47a4   :  { %4985 = vpow2.f32 %v4111_v13 }
0x47b1   :  { %v4986_v21 = vpop.eup %4985 }
0x47b2   :  { %v4113_v23 = vsel %vm2567_vm15, %v4986_v21, 0.0 }
0x47b3   :  { %v4114_v36 = vrot.slane %v4113_v23, 4 }
0x47b5   :  { %v4115_v42 = vadd.f32 %v4114_v36, %v4113_v23 }
0x47b7   :  { %v4116_v58 = vrot.slane %v4115_v42, 2 }
0x47b9   :  { %v4117_v59 = vadd.f32 %v4116_v58, %v4115_v42 }
0x47bb   :  { %v4118_v51 = vrot.slane %v4117_v59, 1 }
0x47bd   :  { %v4119_v31 = vadd.f32 %v4118_v51, %v4117_v59 }
0x47bf   :  { %4987 = vlog2.f32 %v4119_v31 }
0x47cc   :  { %v4988_v3 = vpop.eup %4987 }
0x47cd   :  { %v4121_v48 = vmul.f32 0.6931472, %v4988_v3 }
0x47cf   :  { %v4122_v12 = vadd.f32 %v4121_v48, %v4109_v26 }
0x47d1   :  { %v4123_v38 = vsub.f32 -1.3862944, %v4122_v12 }
0x47d3   :  { %v4124_v39 = vmul.f32 0.1, %v4123_v38 }
0x47d5   :  { %v4125_v2 = vadd.f32 %v4124_v39, %v6340_v7 }
0x47d7   :  { %v4126_v60 = vsel %vm2567_vm15, %v4125_v2, -inf }
0x47d8   :  { %4127 = vmax.xlane.f32.xlu0 %v4126_v60 }
0x4861   :  { %v4128_v14 = vpop.xlane.xlu0 %4127 }
0x4862   :  { %v4129_v22 = vsub.f32 %v4125_v2, %v4128_v14 }
0x4864   :  { %v4130_v49 = vmul.f32 1.442695, %v4129_v22 }
0x4866   :  { %4989 = vpow2.f32 %v4130_v49 }
0x4873   :  { %v4990_v53 = vpop.eup %4989 }
0x4874   :  { %v4132_v57 = vsel %vm2567_vm15, %v4990_v53, 0.0 }
0x4875   :  { %4133 = vadd.xlane.f32.xlu1 %v4132_v57 }
0x48fe   :  { %v4134_v1 = vpop.xlane.xlu1 %4133 }
0x48ff   :  { %4991 = vlog2.f32 %v4134_v1 }
0x490c   :  { %v4992_v61 = vpop.eup %4991 }
0x490d   :  { %v4136_v41 = vmul.f32 0.6931472, %v4992_v61 }
0x490f   :  { %v4137_v10 = vadd.f32 %v4136_v41, %v4128_v14 }
0x4911   :  { %v4138_v43 = vsub.f32 -1.3862944, %v4137_v10 }
0x4913   :  { %v4139_v19 = vmul.f32 0.1, %v4138_v43 }
0x4915   :  { %v4140_v40 = vadd.f32 %v4139_v19, %v6340_v7 }
0x4917   :  { %v4141_v56 = vsel %vm2567_vm15, %v4140_v40, -inf }
0x4918   :  { %v4142_v16 = vrot.slane %v4141_v56, 4 }
0x491a   :  { %v4143_v8 = vmax.f32 %v4141_v56, %v4142_v16 }
0x491c   :  { %v4144_v15 = vrot.slane %v4143_v8, 2 }
0x491e   :  { %v4145_v44 = vmax.f32 %v4143_v8, %v4144_v15 }
0x4920   :  { %v4146_v32 = vrot.slane %v4145_v44, 1 }
0x4922   :  { %v4147_v20 = vmax.f32 %v4145_v44, %v4146_v32 }
0x4924   :  { %v4148_v25 = vsub.f32 %v4140_v40, %v4147_v20 }
0x4926   :  { %v4149_v45 = vmul.f32 1.442695, %v4148_v25 }
0x4928   :  { %4993 = vpow2.f32 %v4149_v45 }
0x4935   :  { %v4994_v50 = vpop.eup %4993 }
0x4936   :  { %v4151_v17 = vsel %vm2567_vm15, %v4994_v50, 0.0 }
0x4937   :  { %v4152_v52 = vrot.slane %v4151_v17, 4 }
0x4939   :  { %v4153_v0 = vadd.f32 %v4152_v52, %v4151_v17 }
0x493b   :  { %v4154_v37 = vrot.slane %v4153_v0, 2 }
0x493d   :  { %v4155_v18 = vadd.f32 %v4154_v37, %v4153_v0 }
0x493f   :  { %v4156_v30 = vrot.slane %v4155_v18, 1 }
0x4941   :  { %v4157_v6 = vadd.f32 %v4156_v30, %v4155_v18 }
0x4943   :  { %4995 = vlog2.f32 %v4157_v6 }
0x4950   :  { %v4996_v47 = vpop.eup %4995 }
0x4951   :  { %v4159_v9 = vmul.f32 0.6931472, %v4996_v47 }
0x4953   :  { %v4160_v55 = vadd.f32 %v4159_v9, %v4147_v20 }
0x4955   :  { %v4161_v5 = vsub.f32 -1.3862944, %v4160_v55 }
0x4957   :  { %v4162_v35 = vmul.f32 0.1, %v4161_v5 }
0x4959   :  { %v4163_v46 = vadd.f32 %v4162_v35, %v6340_v7 }
0x495b   :  { %v4164_v62 = vsel %vm2567_vm15, %v4163_v46, -inf }
0x495c   :  { %4165 = vmax.xlane.f32.xlu0 %v4164_v62 }
0x49e5   :  { %v4166_v54 = vpop.xlane.xlu0 %4165 }
0x49e6   :  { %v4167_v27 = vsub.f32 %v4163_v46, %v4166_v54 }
0x49e8   :  { %v4168_v34 = vmul.f32 1.442695, %v4167_v27 }
0x49ea   :  { %4997 = vpow2.f32 %v4168_v34 }
0x49f7   :  { %v4998_v24 = vpop.eup %4997 }
0x49f8   :  { %v4170_v4 = vsel %vm2567_vm15, %v4998_v24, 0.0 }
0x49f9   :  { %4171 = vadd.xlane.f32.xlu1 %v4170_v4 }
0x4a82   :  { %v4172_v33 = vpop.xlane.xlu1 %4171 }
0x4a83   :  { %4999 = vlog2.f32 %v4172_v33 }
0x4a90   :  { %v5000_v26 = vpop.eup %4999 }
0x4a91   :  { %v4174_v28 = vmul.f32 0.6931472, %v5000_v26 }
0x4a93   :  { %v4175_v13 = vadd.f32 %v4174_v28, %v4166_v54 }
0x4a95   :  { %v4176_v21 = vsub.f32 -1.3862944, %v4175_v13 }
0x4a97   :  { %v4177_v23 = vmul.f32 0.1, %v4176_v21 }
0x4a99   :  { %v4178_v36 = vadd.f32 %v4177_v23, %v6340_v7 }
0x4a9b   :  { %v4179_v42 = vsel %vm2567_vm15, %v4178_v36, -inf }
0x4a9c   :  { %v4180_v58 = vrot.slane %v4179_v42, 4 }
0x4a9e   :  { %v4181_v59 = vmax.f32 %v4179_v42, %v4180_v58 }
0x4aa0   :  { %v4182_v51 = vrot.slane %v4181_v59, 2 }
0x4aa2   :  { %v4183_v31 = vmax.f32 %v4181_v59, %v4182_v51 }
0x4aa4   :  { %v4184_v3 = vrot.slane %v4183_v31, 1 }
0x4aa6   :  { %v4185_v48 = vmax.f32 %v4183_v31, %v4184_v3 }
0x4aa8   :  { %v4186_v12 = vsub.f32 %v4178_v36, %v4185_v48 }
0x4aaa   :  { %v4187_v38 = vmul.f32 1.442695, %v4186_v12 }
0x4aac   :  { %5001 = vpow2.f32 %v4187_v38 }
0x4ab9   :  { %v5002_v39 = vpop.eup %5001 }
0x4aba   :  { %v4189_v2 = vsel %vm2567_vm15, %v5002_v39, 0.0 }
0x4abb   :  { %v4190_v60 = vrot.slane %v4189_v2, 4 }
0x4abd   :  { %v4191_v14 = vadd.f32 %v4190_v60, %v4189_v2 }
0x4abf   :  { %v4192_v22 = vrot.slane %v4191_v14, 2 }
0x4ac1   :  { %v4193_v49 = vadd.f32 %v4192_v22, %v4191_v14 }
0x4ac3   :  { %v4194_v53 = vrot.slane %v4193_v49, 1 }
0x4ac5   :  { %v4195_v57 = vadd.f32 %v4194_v53, %v4193_v49 }
0x4ac7   :  { %5003 = vlog2.f32 %v4195_v57 }
0x4ad4   :  { %v5004_v1 = vpop.eup %5003 }
0x4ad5   :  { %v4197_v61 = vmul.f32 0.6931472, %v5004_v1 }
0x4ad7   :  { %v4198_v41 = vadd.f32 %v4197_v61, %v4185_v48 }
0x4ad9   :  { %v4199_v10 = vsub.f32 -1.3862944, %v4198_v41 }
0x4adb   :  { %v4200_v43 = vmul.f32 0.1, %v4199_v10 }
0x4add   :  { %v4201_v19 = vadd.f32 %v4200_v43, %v6340_v7 }
0x4adf   :  { %v4202_v40 = vsel %vm2567_vm15, %v4201_v19, -inf }
0x4ae0   :  { %4203 = vmax.xlane.f32.xlu0 %v4202_v40 }
0x4b69   :  { %v4204_v56 = vpop.xlane.xlu0 %4203 }
0x4b6a   :  { %v4205_v16 = vsub.f32 %v4201_v19, %v4204_v56 }
0x4b6c   :  { %v4206_v8 = vmul.f32 1.442695, %v4205_v16 }
0x4b6e   :  { %5005 = vpow2.f32 %v4206_v8 }
0x4b7b   :  { %v5006_v15 = vpop.eup %5005 }
0x4b7c   :  { %v4208_v44 = vsel %vm2567_vm15, %v5006_v15, 0.0 }
0x4b7d   :  { %4209 = vadd.xlane.f32.xlu1 %v4208_v44 }
0x4c06   :  { %v4210_v32 = vpop.xlane.xlu1 %4209 }
0x4c07   :  { %5007 = vlog2.f32 %v4210_v32 }
0x4c14   :  { %v5008_v20 = vpop.eup %5007 }
0x4c15   :  { %v4212_v25 = vmul.f32 0.6931472, %v5008_v20 }
0x4c17   :  { %v4213_v45 = vadd.f32 %v4212_v25, %v4204_v56 }
0x4c19   :  { %v4214_v50 = vsub.f32 -1.3862944, %v4213_v45 }
0x4c1b   :  { %v4215_v17 = vmul.f32 0.1, %v4214_v50 }
0x4c1d   :  { %v4216_v52 = vadd.f32 %v4215_v17, %v6340_v7 }
0x4c1f   :  { %v4217_v0 = vsel %vm2567_vm15, %v4216_v52, -inf }
0x4c20   :  { %v4218_v37 = vrot.slane %v4217_v0, 4 }
0x4c22   :  { %v4219_v18 = vmax.f32 %v4217_v0, %v4218_v37 }
0x4c24   :  { %v4220_v30 = vrot.slane %v4219_v18, 2 }
0x4c26   :  { %v4221_v6 = vmax.f32 %v4219_v18, %v4220_v30 }
0x4c28   :  { %v4222_v47 = vrot.slane %v4221_v6, 1 }
0x4c2a   :  { %v4223_v9 = vmax.f32 %v4221_v6, %v4222_v47 }
0x4c2c   :  { %v4224_v55 = vsub.f32 %v4216_v52, %v4223_v9 }
0x4c2e   :  { %v4225_v5 = vmul.f32 1.442695, %v4224_v55 }
0x4c30   :  { %5009 = vpow2.f32 %v4225_v5 }
0x4c3d   :  { %v5010_v35 = vpop.eup %5009 }
0x4c3e   :  { %v4227_v46 = vsel %vm2567_vm15, %v5010_v35, 0.0 }
0x4c3f   :  { %v4228_v62 = vrot.slane %v4227_v46, 4 }
0x4c41   :  { %v4229_v54 = vadd.f32 %v4228_v62, %v4227_v46 }
0x4c43   :  { %v4230_v27 = vrot.slane %v4229_v54, 2 }
0x4c45   :  { %v4231_v34 = vadd.f32 %v4230_v27, %v4229_v54 }
0x4c47   :  { %v4232_v24 = vrot.slane %v4231_v34, 1 }
0x4c49   :  { %v4233_v4 = vadd.f32 %v4232_v24, %v4231_v34 }
0x4c4b   :  { %5011 = vlog2.f32 %v4233_v4 }
0x4c58   :  { %v5012_v33 = vpop.eup %5011 }
0x4c59   :  { %v4235_v26 = vmul.f32 0.6931472, %v5012_v33 }
0x4c5b   :  { %v4236_v28 = vadd.f32 %v4235_v26, %v4223_v9 }
0x4c5d   :  { %v4237_v13 = vsub.f32 -1.3862944, %v4236_v28 }
0x4c5f   :  { %v4238_v21 = vmul.f32 0.1, %v4237_v13 }
0x4c61   :  { %v4239_v23 = vadd.f32 %v4238_v21, %v6340_v7 }
0x4c63   :  { %v4240_v36 = vsel %vm2567_vm15, %v4239_v23, -inf }
0x4c64   :  { %4241 = vmax.xlane.f32.xlu0 %v4240_v36 }
0x4ced   :  { %v4242_v42 = vpop.xlane.xlu0 %4241 }
0x4cee   :  { %v4243_v58 = vsub.f32 %v4239_v23, %v4242_v42 }
0x4cf0   :  { %v4244_v59 = vmul.f32 1.442695, %v4243_v58 }
0x4cf2   :  { %5013 = vpow2.f32 %v4244_v59 }
0x4cff   :  { %v5014_v51 = vpop.eup %5013 }
0x4d00   :  { %v4246_v31 = vsel %vm2567_vm15, %v5014_v51, 0.0 }
0x4d01   :  { %4247 = vadd.xlane.f32.xlu1 %v4246_v31 }
0x4d8a   :  { %v4248_v3 = vpop.xlane.xlu1 %4247 }
0x4d8b   :  { %5015 = vlog2.f32 %v4248_v3 }
0x4d98   :  { %v5016_v48 = vpop.eup %5015 }
0x4d99   :  { %v4250_v12 = vmul.f32 0.6931472, %v5016_v48 }
0x4d9b   :  { %v4251_v38 = vadd.f32 %v4250_v12, %v4242_v42 }
0x4d9d   :  { %v4252_v39 = vsub.f32 -1.3862944, %v4251_v38 }
0x4d9f   :  { %v4253_v2 = vmul.f32 0.1, %v4252_v39 }
0x4da1   :  { %v4254_v60 = vadd.f32 %v4253_v2, %v6340_v7 }
0x4da3   :  { %v4255_v14 = vsel %vm2567_vm15, %v4254_v60, -inf }
0x4da4   :  { %v4256_v22 = vrot.slane %v4255_v14, 4 }
0x4da6   :  { %v4257_v49 = vmax.f32 %v4255_v14, %v4256_v22 }
0x4da8   :  { %v4258_v53 = vrot.slane %v4257_v49, 2 }
0x4daa   :  { %v4259_v57 = vmax.f32 %v4257_v49, %v4258_v53 }
0x4dac   :  { %v4260_v1 = vrot.slane %v4259_v57, 1 }
0x4dae   :  { %v4261_v61 = vmax.f32 %v4259_v57, %v4260_v1 }
0x4db0   :  { %v4262_v41 = vsub.f32 %v4254_v60, %v4261_v61 }
0x4db2   :  { %v4263_v10 = vmul.f32 1.442695, %v4262_v41 }
0x4db4   :  { %5017 = vpow2.f32 %v4263_v10 }
0x4dc1   :  { %v5018_v43 = vpop.eup %5017 }
0x4dc2   :  { %v4265_v19 = vsel %vm2567_vm15, %v5018_v43, 0.0 }
0x4dc3   :  { %v4266_v40 = vrot.slane %v4265_v19, 4 }
0x4dc5   :  { %v4267_v56 = vadd.f32 %v4266_v40, %v4265_v19 }
0x4dc7   :  { %v4268_v16 = vrot.slane %v4267_v56, 2 }
0x4dc9   :  { %v4269_v8 = vadd.f32 %v4268_v16, %v4267_v56 }
0x4dcb   :  { %v4270_v15 = vrot.slane %v4269_v8, 1 }
0x4dcd   :  { %v4271_v44 = vadd.f32 %v4270_v15, %v4269_v8 }
0x4dcf   :  { %5019 = vlog2.f32 %v4271_v44 }
0x4ddc   :  { %v5020_v32 = vpop.eup %5019 }
0x4ddd   :  { %v4273_v20 = vmul.f32 0.6931472, %v5020_v32 }
0x4ddf   :  { %v4274_v25 = vadd.f32 %v4273_v20, %v4261_v61 }
0x4de1   :  { %v4275_v45 = vsub.f32 -1.3862944, %v4274_v25 }
0x4de3   :  { %v4276_v50 = vmul.f32 0.1, %v4275_v45 }
0x4de5   :  { %v4277_v17 = vadd.f32 %v4276_v50, %v6340_v7 }
0x4de7   :  { %v4278_v52 = vsel %vm2567_vm15, %v4277_v17, -inf }
0x4de8   :  { %4279 = vmax.xlane.f32.xlu0 %v4278_v52 }
0x4e71   :  { %v4280_v0 = vpop.xlane.xlu0 %4279 }
0x4e72   :  { %v4281_v37 = vsub.f32 %v4277_v17, %v4280_v0 }
0x4e74   :  { %v4282_v18 = vmul.f32 1.442695, %v4281_v37 }
0x4e76   :  { %5021 = vpow2.f32 %v4282_v18 }
0x4e83   :  { %v5022_v30 = vpop.eup %5021 }
0x4e84   :  { %v4284_v6 = vsel %vm2567_vm15, %v5022_v30, 0.0 }
0x4e85   :  { %4285 = vadd.xlane.f32.xlu1 %v4284_v6 }
0x4f0e   :  { %v4286_v47 = vpop.xlane.xlu1 %4285 }
0x4f0f   :  { %5023 = vlog2.f32 %v4286_v47 }
0x4f1c   :  { %v5024_v9 = vpop.eup %5023 }
0x4f1d   :  { %v4288_v55 = vmul.f32 0.6931472, %v5024_v9 }
0x4f1f   :  { %v4289_v5 = vadd.f32 %v4288_v55, %v4280_v0 }
0x4f21   :  { %v4290_v35 = vsub.f32 -1.3862944, %v4289_v5 }
0x4f23   :  { %v4291_v46 = vmul.f32 0.1, %v4290_v35 }
0x4f25   :  { %v4292_v62 = vadd.f32 %v4291_v46, %v6340_v7 }
0x4f27   :  { %v4293_v54 = vsel %vm2567_vm15, %v4292_v62, -inf }
0x4f28   :  { %v4294_v27 = vrot.slane %v4293_v54, 4 }
0x4f2a   :  { %v4295_v34 = vmax.f32 %v4293_v54, %v4294_v27 }
0x4f2c   :  { %v4296_v24 = vrot.slane %v4295_v34, 2 }
0x4f2e   :  { %v4297_v4 = vmax.f32 %v4295_v34, %v4296_v24 }
0x4f30   :  { %v4298_v33 = vrot.slane %v4297_v4, 1 }
0x4f32   :  { %v4299_v26 = vmax.f32 %v4297_v4, %v4298_v33 }
0x4f34   :  { %v4300_v28 = vsub.f32 %v4292_v62, %v4299_v26 }
0x4f36   :  { %v4301_v13 = vmul.f32 1.442695, %v4300_v28 }
0x4f38   :  { %5025 = vpow2.f32 %v4301_v13 }
0x4f45   :  { %v5026_v21 = vpop.eup %5025 }
0x4f46   :  { %v4303_v23 = vsel %vm2567_vm15, %v5026_v21, 0.0 }
0x4f47   :  { %v4304_v36 = vrot.slane %v4303_v23, 4 }
0x4f49   :  { %v4305_v42 = vadd.f32 %v4304_v36, %v4303_v23 }
0x4f4b   :  { %v4306_v58 = vrot.slane %v4305_v42, 2 }
0x4f4d   :  { %v4307_v59 = vadd.f32 %v4306_v58, %v4305_v42 }
0x4f4f   :  { %v4308_v51 = vrot.slane %v4307_v59, 1 }
0x4f51   :  { %v4309_v31 = vadd.f32 %v4308_v51, %v4307_v59 }
0x4f53   :  { %5027 = vlog2.f32 %v4309_v31 }
0x4f60   :  { %v5028_v3 = vpop.eup %5027 }
0x4f61   :  { %v4311_v48 = vmul.f32 0.6931472, %v5028_v3 }
0x4f63   :  { %v4312_v12 = vadd.f32 %v4311_v48, %v4299_v26 }
0x4f65   :  { %v4313_v38 = vsub.f32 -1.3862944, %v4312_v12 }
0x4f67   :  { %v4314_v39 = vmul.f32 0.1, %v4313_v38 }
0x4f69   :  { %v4315_v2 = vadd.f32 %v4314_v39, %v6340_v7 }
0x4f6b   :  { %v4316_v60 = vsel %vm2567_vm15, %v4315_v2, -inf }
0x4f6c   :  { %4317 = vmax.xlane.f32.xlu0 %v4316_v60 }
0x4ff5   :  { %v4318_v14 = vpop.xlane.xlu0 %4317 }
0x4ff6   :  { %v4319_v22 = vsub.f32 %v4315_v2, %v4318_v14 }
0x4ff8   :  { %v4320_v49 = vmul.f32 1.442695, %v4319_v22 }
0x4ffa   :  { %5029 = vpow2.f32 %v4320_v49 }
0x5007   :  { %v5030_v53 = vpop.eup %5029 }
0x5008   :  { %v4322_v57 = vsel %vm2567_vm15, %v5030_v53, 0.0 }
0x5009   :  { %4323 = vadd.xlane.f32.xlu1 %v4322_v57 }
0x5092   :  { %v4324_v1 = vpop.xlane.xlu1 %4323 }
0x5093   :  { %5031 = vlog2.f32 %v4324_v1 }
0x50a0   :  { %v5032_v61 = vpop.eup %5031 }
0x50a1   :  { %v4326_v41 = vmul.f32 0.6931472, %v5032_v61 }
0x50a3   :  { %v4327_v10 = vadd.f32 %v4326_v41, %v4318_v14 }
0x50a5   :  { %v4328_v43 = vsub.f32 -1.3862944, %v4327_v10 }
0x50a7   :  { %v4329_v19 = vmul.f32 0.1, %v4328_v43 }
0x50a9   :  { %v4330_v40 = vadd.f32 %v4329_v19, %v6340_v7 }
0x50ab   :  { %v4331_v56 = vsel %vm2567_vm15, %v4330_v40, -inf }
0x50ac   :  { %v4332_v16 = vrot.slane %v4331_v56, 4 }
0x50ae   :  { %v4333_v8 = vmax.f32 %v4331_v56, %v4332_v16 }
0x50b0   :  { %v4334_v15 = vrot.slane %v4333_v8, 2 }
0x50b2   :  { %v4335_v44 = vmax.f32 %v4333_v8, %v4334_v15 }
0x50b4   :  { %v4336_v32 = vrot.slane %v4335_v44, 1 }
0x50b6   :  { %v4337_v20 = vmax.f32 %v4335_v44, %v4336_v32 }
0x50b8   :  { %v4338_v25 = vsub.f32 %v4330_v40, %v4337_v20 }
0x50ba   :  { %v4339_v45 = vmul.f32 1.442695, %v4338_v25 }
0x50bc   :  { %5033 = vpow2.f32 %v4339_v45 }
0x50c9   :  { %v5034_v50 = vpop.eup %5033 }
0x50ca   :  { %v4341_v17 = vsel %vm2567_vm15, %v5034_v50, 0.0 }
0x50cb   :  { %v4342_v52 = vrot.slane %v4341_v17, 4 }
0x50cd   :  { %v4343_v0 = vadd.f32 %v4342_v52, %v4341_v17 }
0x50cf   :  { %v4344_v37 = vrot.slane %v4343_v0, 2 }
0x50d1   :  { %v4345_v18 = vadd.f32 %v4344_v37, %v4343_v0 }
0x50d3   :  { %v4346_v30 = vrot.slane %v4345_v18, 1 }
0x50d5   :  { %v4347_v6 = vadd.f32 %v4346_v30, %v4345_v18 }
0x50d7   :  { %5035 = vlog2.f32 %v4347_v6 }
0x50e4   :  { %v5036_v47 = vpop.eup %5035 }
0x50e5   :  { %v4349_v9 = vmul.f32 0.6931472, %v5036_v47 }
0x50e7   :  { %v4350_v55 = vadd.f32 %v4349_v9, %v4337_v20 }
0x50e9   :  { %v4351_v5 = vsub.f32 -1.3862944, %v4350_v55 }
0x50eb   :  { %v4352_v35 = vmul.f32 0.1, %v4351_v5 }
0x50ed   :  { %v4353_v46 = vadd.f32 %v4352_v35, %v6340_v7 }
0x50ef   :  { %v4354_v62 = vsel %vm2567_vm15, %v4353_v46, -inf }
0x50f0   :  { %4355 = vmax.xlane.f32.xlu0 %v4354_v62 }
0x5179   :  { %v4356_v54 = vpop.xlane.xlu0 %4355 }
0x517a   :  { %v4357_v27 = vsub.f32 %v4353_v46, %v4356_v54 }
0x517c   :  { %v4358_v34 = vmul.f32 1.442695, %v4357_v27 }
0x517e   :  { %5037 = vpow2.f32 %v4358_v34 }
0x518b   :  { %v5038_v24 = vpop.eup %5037 }
0x518c   :  { %v4360_v4 = vsel %vm2567_vm15, %v5038_v24, 0.0 }
0x518d   :  { %4361 = vadd.xlane.f32.xlu1 %v4360_v4 }
0x5216   :  { %v4362_v33 = vpop.xlane.xlu1 %4361 }
0x5217   :  { %5039 = vlog2.f32 %v4362_v33 }
0x5224   :  { %v5040_v26 = vpop.eup %5039 }
0x5225   :  { %v4364_v28 = vmul.f32 0.6931472, %v5040_v26 }
0x5227   :  { %v4365_v13 = vadd.f32 %v4364_v28, %v4356_v54 }
0x5229   :  { %v4366_v21 = vsub.f32 -1.3862944, %v4365_v13 }
0x522b   :  { %v4367_v23 = vmul.f32 0.1, %v4366_v21 }
0x522d   :  { %v4368_v36 = vadd.f32 %v4367_v23, %v6340_v7 }
0x522f   :  { %v4369_v42 = vsel %vm2567_vm15, %v4368_v36, -inf }
0x5230   :  { %v4370_v58 = vrot.slane %v4369_v42, 4 }
0x5232   :  { %v4371_v59 = vmax.f32 %v4369_v42, %v4370_v58  ;;  %v85_v42 = vld [vmem:[#allocation5] sm:$0xf]  ;;  %v94_v58 = vld [vmem:[#allocation6] sm:$0xf] }
0x5233   :  { %vm86_vm7 = vcmp.ne.f32.partialorder %v85_v42, %v85_v42  ;;  %vm95_vm13 = vcmp.ne.f32.partialorder %v94_v58, %v94_v58 }
0x5234   :  { %v4372_v51 = vrot.slane %v4371_v59, 2 }
0x5236   :  { %v4373_v31 = vmax.f32 %v4371_v59, %v4372_v51  ;;  %v87_v59 = vsel %vm86_vm7, 0.0, %v85_v42  ;;  %v96_v51 = vsel %vm95_vm13, 0.0, %v94_v58 }
0x5237   :  { %vm88_vm6 = vcmp.eq.f32.partialorder %v87_v59, inf  ;;  %vm97_vm8 = vcmp.eq.f32.partialorder %v96_v51, inf }
0x5238   :  { %v4374_v3 = vrot.slane %v4373_v31, 1 }
0x523a   :  { %v4375_v48 = vmax.f32 %v4373_v31, %v4374_v3  ;;  %v89_v31 = vsel %vm88_vm6, 1.0, %v87_v59  ;;  %v98_v3 = vsel %vm97_vm8, 1.0, %v96_v51 }
0x523b   :  { %vm90_vm0 = vcmp.eq.f32.partialorder %v89_v31, -inf  ;;  %vm99_vm2 = vcmp.eq.f32.partialorder %v98_v3, -inf }
0x523c   :  { %v4376_v12 = vsub.f32 %v4368_v36, %v4375_v48 }
0x523e   :  { %v4377_v38 = vmul.f32 1.442695, %v4376_v12  ;;  %v100_v12 = vsel %vm99_vm2, -1.0, %v98_v3 }
0x5240   :  { %5041 = vpow2.f32 %v4377_v38 }
0x524d   :  { %v5042_v39 = vpop.eup %5041 }
0x524e   :  { %v4379_v2 = vsel %vm2567_vm15, %v5042_v39, 0.0 }
0x524f   :  { %v4380_v60 = vrot.slane %v4379_v2, 4 }
0x5251   :  { %v4381_v14 = vadd.f32 %v4380_v60, %v4379_v2 }
0x5253   :  { %v4382_v22 = vrot.slane %v4381_v14, 2 }
0x5255   :  { %v4383_v49 = vadd.f32 %v4382_v22, %v4381_v14 }
0x5257   :  { %v4384_v53 = vrot.slane %v4383_v49, 1 }
0x5259   :  { %v4385_v57 = vadd.f32 %v4384_v53, %v4383_v49  ;;  %v183_v53 = vand.u32 2147483647, %v5370_v11 }
0x525b   :  { %5043 = vlog2.f32 %v4385_v57  ;;  %v6689_v57 = vld [vmem:[#allocation15_spill] sm:$0xff] }
0x5268   :  { %v5044_v1 = vpop.eup %5043 }
0x5269   :  { %v4387_v61 = vmul.f32 0.6931472, %v5044_v1  ;;  %v184_v1 = vand.u32 2147483647, %v6689_v57 }
0x526b   :  { %v4388_v41 = vadd.f32 %v4387_v61, %v4375_v48  ;;  %v91_v48 = vsel %vm90_vm0, -1.0, %v89_v31  ;;  %v6690_v61 = vld [vmem:[#allocation16_spill] sm:$0xff] }
0x526c   :  { %v4521_v38 = vclamps-f32 %v91_v48, 100.0 }
0x526d   :  { %v4389_v10 = vsub.f32 -1.3862944, %v4388_v41  ;;  %v185_v41 = vand.u32 2147483647, %v6690_v61 }
0x526e   :  { %v101_v39 = vsub.f32 %v4521_v38, %v100_v12 }
0x526f   :  { %v4390_v43 = vmul.f32 0.1, %v4389_v10  ;;  %v187_v10 = vsel %vm158_vm1, %v183_v53, 0.0 }
0x5270   :  { %v102_v2 = vmul.f32 %v101_v39, %v101_v39 }
0x5271   :  { %v4391_v19 = vadd.f32 %v4390_v43, %v6340_v7  ;;  %v188_v43 = vsel %vm158_vm1, %v184_v1, 0.0 }
0x5272   :  { %v104_v60 = vsel %vm103_vm9, %v102_v2, 0.0  ;;  %vm4501_vm9 = vcmp.eq.s32.totalorder %v6192_v63, 1 }
0x5273   :  { %v4392_v40 = vsel %vm2567_vm15, %v4391_v19, -inf }
0x5274   :  { %4393 = vmax.xlane.f32.xlu0 %v4392_v40  ;;  %v6691_v40 = vld [vmem:[#allocation17_spill] sm:$0xff] }
0x52fd   :  { %v4394_v56 = vpop.xlane.xlu0 %4393 }
0x52fe   :  { %v4395_v16 = vsub.f32 %v4391_v19, %v4394_v56  ;;  %v189_v19 = vadd.f32 %v188_v43, %v187_v10 }
0x5300   :  { %v4396_v8 = vmul.f32 1.442695, %v4395_v16  ;;  %v190_v16 = vsel %vm158_vm1, %v185_v41, 0.0 }
0x5302   :  { %5045 = vpow2.f32 %v4396_v8 }
0x530f   :  { %v5046_v15 = vpop.eup %5045 }
0x5310   :  { %v4398_v44 = vsel %vm2567_vm15, %v5046_v15, 0.0  ;;  %v191_v15 = vadd.f32 %v190_v16, %v189_v19 }
0x5311   :  { %4399 = vadd.xlane.f32.xlu1 %v4398_v44 }
0x539a   :  { %v4400_v32 = vpop.xlane.xlu1 %4399 }
0x539b   :  { %5047 = vlog2.f32 %v4400_v32 }
0x53a8   :  { %v5048_v20 = vpop.eup %5047 }
0x53a9   :  { %v4402_v25 = vmul.f32 0.6931472, %v5048_v20 }
0x53ab   :  { %v4403_v45 = vadd.f32 %v4402_v25, %v4394_v56  ;;  %v186_v56 = vand.u32 2147483647, %v6691_v40 }
0x53ad   :  { %v4404_v50 = vsub.f32 -1.3862944, %v4403_v45  ;;  %v192_v32 = vsel %vm158_vm1, %v186_v56, 0.0  ;;  %vm4498_vm1 = vcmp.eq.s32.totalorder %v6192_v63, 0 }
0x53ae   :  { %v193_v11 = vadd.f32 %v192_v32, %v191_v15 }
0x53af   :  { %v4405_v17 = vmul.f32 0.1, %v4404_v50 }
0x53b1   :  { %v4406_v52 = vadd.f32 %v4405_v17, %v6340_v7 }
0x53b3   :  { %v4407_v0 = vsel %vm2567_vm15, %v4406_v52, -inf }
0x53b4   :  { %v4408_v37 = vrot.slane %v4407_v0, 4 }
0x53b6   :  { %v4409_v18 = vmax.f32 %v4407_v0, %v4408_v37 }
0x53b8   :  { %v4410_v30 = vrot.slane %v4409_v18, 2 }
0x53ba   :  { %v4411_v6 = vmax.f32 %v4409_v18, %v4410_v30 }
0x53bc   :  { %v4412_v47 = vrot.slane %v4411_v6, 1 }
0x53be   :  { %v4413_v9 = vmax.f32 %v4411_v6, %v4412_v47 }
0x53c0   :  { %v4414_v55 = vsub.f32 %v4406_v52, %v4413_v9 }
0x53c2   :  { %v4415_v5 = vmul.f32 1.442695, %v4414_v55 }
0x53c4   :  { %5049 = vpow2.f32 %v4415_v5 }
0x53d1   :  { %v5050_v35 = vpop.eup %5049 }
0x53d2   :  { %v4417_v46 = vsel %vm2567_vm15, %v5050_v35, 0.0 }
0x53d3   :  { %v4418_v62 = vrot.slane %v4417_v46, 4 }
0x53d5   :  { %v4419_v54 = vadd.f32 %v4418_v62, %v4417_v46 }
0x53d7   :  { %v4420_v27 = vrot.slane %v4419_v54, 2 }
0x53d9   :  { %v4421_v34 = vadd.f32 %v4420_v27, %v4419_v54 }
0x53db   :  { %v4422_v24 = vrot.slane %v4421_v34, 1 }
0x53dd   :  { %v4423_v4 = vadd.f32 %v4422_v24, %v4421_v34 }
0x53df   :  { %5051 = vlog2.f32 %v4423_v4 }
0x53ec   :  { %v5052_v33 = vpop.eup %5051 }
0x53ed   :  { %v4425_v26 = vmul.f32 0.6931472, %v5052_v33 }
0x53ef   :  { %v4426_v28 = vadd.f32 %v4425_v26, %v4413_v9 }
0x53f1   :  { %v4427_v13 = vsub.f32 -1.3862944, %v4426_v28 }
0x53f3   :  { %v4428_v21 = vmul.f32 0.1, %v4427_v13 }
0x53f5   :  { %v4429_v23 = vadd.f32 %v4428_v21, %v6340_v7 }
0x53f7   :  { %v4430_v36 = vsel %vm2567_vm15, %v4429_v23, -inf }
0x53f8   :  { %4431 = vmax.xlane.f32.xlu0 %v4430_v36 }
0x53fc   :  { %105 = vadd.xlane.f32.xlu0 %v104_v60 }
0x5481   :  { %v4432_v14 = vpop.xlane.xlu0 %4431 }
0x5482   :  { %v4433_v22 = vsub.f32 %v4429_v23, %v4432_v14 }
0x5484   :  { %v4434_v49 = vmul.f32 1.442695, %v4433_v22 }
0x5485   :  { %v106_v20 = vpop.xlane.xlu0 %105 }
0x5486   :  { %5053 = vpow2.f32 %v4434_v49  ;;  %v107_v25 = vrot.slane %v106_v20, 4 }
0x5488   :  { %v108_v45 = vadd.f32 %v107_v25, %v106_v20 }
0x548a   :  { %v109_v50 = vrot.slane %v108_v45, 2 }
0x548c   :  { %v110_v17 = vadd.f32 %v109_v50, %v108_v45 }
0x548e   :  { %v111_v52 = vrot.slane %v110_v17, 1 }
0x5490   :  { %v112_v0 = vadd.f32 %v111_v52, %v110_v17 }
0x5492   :  { %4568 = vpush %v112_v0 }
0x5493   :  { %v5054_v8 = vpop.eup %5053 }
0x5494   :  { %v4436_v44 = vsel %vm2567_vm15, %v5054_v8, 0.0 }
0x5495   :  { %4437 = vadd.xlane.f32.xlu1 %v4436_v44 }
0x5499   :  { %194 = vadd.xlane.f32.xlu1 %v193_v11 }
0x54c3   :  { %s6655_s2 = spop %4568 }
0x54c4   :  { %s116_s9 = smul.f32 0.03125, %s6655_s2 }
0x551e   :  { %v4438_v37 = vpop.xlane.xlu1 %4437 }
0x551f   :  { %5055 = vlog2.f32 %v4438_v37 }
0x5522   :  { %v195_v18 = vpop.xlane.xlu1 %194 }
0x5523   :  { %v196_v30 = vrot.slane %v195_v18, 4 }
0x5525   :  { %v197_v6 = vadd.f32 %v196_v30, %v195_v18 }
0x5527   :  { %v198_v47 = vrot.slane %v197_v6, 2 }
0x5529   :  { %v199_v9 = vadd.f32 %v198_v47, %v197_v6 }
0x552b   :  { %v200_v55 = vrot.slane %v199_v9, 1 }
0x552c   :  { %v5056_v5 = vpop.eup %5055 }
0x552d   :  { %v4440_v35 = vmul.f32 0.6931472, %v5056_v5  ;;  %v201_v46 = vadd.f32 %v200_v55, %v199_v9 }
0x552f   :  { %v4441_v62 = vadd.f32 %v4440_v35, %v4432_v14  ;;  %4570 = vpush %v201_v46 }
0x5531   :  { %v4442_v54 = vsub.f32 -1.3862944, %v4441_v62 }
0x5533   :  { %v4443_v27 = vmul.f32 0.1, %v4442_v54 }
0x5535   :  { %v4444_v34 = vadd.f32 %v4443_v27, %v6340_v7 }
0x5537   :  { %v4445_v24 = vsel %vm2567_vm15, %v4444_v34, -inf }
0x5538   :  { %v4446_v4 = vrot.slane %v4445_v24, 4 }
0x553a   :  { %v4447_v33 = vmax.f32 %v4445_v24, %v4446_v4 }
0x553c   :  { %v4448_v26 = vrot.slane %v4447_v33, 2 }
0x553e   :  { %v4449_v28 = vmax.f32 %v4447_v33, %v4448_v26 }
0x5540   :  { %v4450_v13 = vrot.slane %v4449_v28, 1 }
0x5542   :  { %v4451_v21 = vmax.f32 %v4449_v28, %v4450_v13 }
0x5544   :  { %v4452_v23 = vsub.f32 %v4444_v34, %v4451_v21 }
0x5546   :  { %v4453_v36 = vmul.f32 1.442695, %v4452_v23 }
0x5548   :  { %5057 = vpow2.f32 %v4453_v36 }
0x5555   :  { %v5058_v42 = vpop.eup %5057 }
0x5556   :  { %v4455_v58 = vsel %vm2567_vm15, %v5058_v42, 0.0 }
0x5557   :  { %v4456_v59 = vrot.slane %v4455_v58, 4 }
0x5559   :  { %v4457_v51 = vadd.f32 %v4456_v59, %v4455_v58 }
0x555b   :  { %v4458_v31 = vrot.slane %v4457_v51, 2 }
0x555d   :  { %v4459_v3 = vadd.f32 %v4458_v31, %v4457_v51 }
0x555f   :  { %v4460_v48 = vrot.slane %v4459_v3, 1 }
0x5560   :  { %s4571_s0 = spop %4570 }
0x5561   :  { %v4461_v7 = vadd.f32 %v4460_v48, %v4459_v3  ;;  %s205_s8 = smul.f32 0.00390625, %s4571_s0 }
0x5563   :  { %5059 = vlog2.f32 %v4461_v7  ;;  %s4485_s11 = smax.f32 %s5192_s10, %s205_s8 }
0x5564   :  { %s4486_s1 = smin.f32 %s5193_s12, %s4485_s11 }
0x5565   :  { %v4492_v8 = vstv %s4486_s1 }
0x5570   :  { %v5060_v12 = vpop.eup %5059 }
0x5571   :  { %v4463_v38 = vmul.f32 0.6931472, %v5060_v12 }
0x5573   :  { %v4464_v39 = vadd.f32 %v4463_v38, %v4451_v21 }
0x5575   :  { %v4465_v2 = vsub.f32 -1.3862944, %v4464_v39 }
0x5577   :  { %v4466_v60 = vmul.f32 0.1, %v4465_v2 }
0x5579   :  { %v4467_v14 = vadd.f32 %v4466_v60, %v4443_v27 }
0x557b   :  { %v4468_v22 = vsub.f32 %v4467_v14, %v6337_v29 }
0x557d   :  { %v4469_v49 = vmul.f32 10.0, %v4468_v22 }
0x557f   :  { %v4470_v53 = vmul.f32 1.442695, %v4469_v49 }
0x5581   :  { %5061 = vpow2.f32 %v4470_v53 }
0x558e   :  { %v5062_v57 = vpop.eup %5061 }
0x558f   :  { %v4472_v1 = vmul.f32 %v5062_v57, %v6337_v29  ;;  %v4499_v29 = vstv %s116_s9 }
0x5590   :  { %v4500_v15 = vsel %vm4498_vm1, %v4499_v29, 0.0 }
0x5591   :  { %v4473_v61 = vsel %vm2567_vm15, %v4472_v1, 0.0 }
0x5592   :  { %4474 = vadd.xlane.f32.xlu0 %v4473_v61 }
0x561b   :  { %v4475_v41 = vpop.xlane.xlu0 %4474 }
0x561c   :  { %v4476_v10 = vrot.slane %v4475_v41, 4 }
0x561e   :  { %v4477_v43 = vadd.f32 %v4476_v10, %v4475_v41 }
0x5620   :  { %v4478_v19 = vrot.slane %v4477_v43, 2 }
0x5622   :  { %v4479_v40 = vadd.f32 %v4478_v19, %v4477_v43 }
0x5624   :  { %v4480_v56 = vrot.slane %v4479_v40, 1 }
0x5626   :  { %v4481_v16 = vadd.f32 %v4480_v56, %v4479_v40 }
0x5628   :  { %4572 = vpush %v4481_v16 }
0x5659   :  { %s4573_s13 = spop %4572 }
0x565a   :  { %s4483_s14 = smax.f32 %s5192_s10, %s4573_s13 }
0x565b   :  { %s4484_s3 = smin.f32 %s5193_s12, %s4483_s14 }
0x565c   :  { %v4487_v44 = vstv %s4484_s3 }
0x565d   :  { %5063 = vtanh.f32 %v4487_v44  ;;  %v4503_v32 = vsel %vm4501_vm9, %v4487_v44, %v4500_v15 }
0x565e   :  { %5065 = vtanh.f32 %v4492_v8  ;;  %v4506_v25 = vsel %vm4504_vm3, %v4492_v8, %v4503_v32 }
0x566a   :  { %v5064_v11 = vpop.eup %5063 }
0x566b   :  { %v5066_v20 = vpop.eup %5065  ;;  %4574 = vpush %v5064_v11 }
0x566c   :  { %4576 = vpush %v5066_v20 }
0x569c   :  { %s4575_s17 = spop %4574 }
0x569d   :  { %s4490_s18 = smul.f32 %s4575_s17, %s82_s4  ;;  %s4577_s19 = spop %4576 }
0x569e   :  { %s4495_s21 = smul.f32 %s4577_s19, %s4519_s15 }
0x569f   :  { %s4491_s20 = sadd.f32 %s4490_s18, %s116_s9 }
0x56a1   :  { %s4496_s22 = sadd.f32 %s4495_s21, %s4491_s20 }
0x56a3   :  { %s4497_s23 = smul.f32 %s4520_s16, %s4496_s22 }
0x56a5   :  { %v4508_v45 = vstv %s4497_s23 }
0x56a6   :  { %v4509_v50 = vsel %vm4507_vm4, %v4508_v45, %v4506_v25 }
0x56a7   :  { %4510 = vst [vmem:[%s6670_s5] sm:$0x1] %v4509_v50 }
0x56a8   :  { %4515 = vsyncpa [#allocation3], 1 }
0x56a9   :  { %4516 = vsyncpa [#allocation7], 1 }
0x56aa   :  { %4517 = vsyncpa [#allocation10], 1 }
0x56ab   :  { %4518 = vsyncpa [#allocation4], 1 }

</bundles_post_ra>
